<compile_context>
chip_gen: v5e
topology: v5e:2x2
jax: 0.10.0
libtpu: 0.0.40
codegen_flags: <defaults>
</compile_context>

<pallas_src>
import numpy as np
import jax
import jax.numpy as jnp
from jax.experimental import pallas as pl
from jax.experimental.pallas import tpu as pltpu

EPS = 1e-5


# ----------------------------------------------------------------------------
# host-side helpers: bilinear(align_corners=True) interpolation matrices with
# the F.pad zero rows folded in.  These are O(H^2) / O(W^2) -- small.
# ----------------------------------------------------------------------------
def _interp_matrix(n_in, n_out):
    """(n_out, n_in) M s.t. y = M @ x is 1-D linear interp, align_corners=True."""
    m = np.zeros((n_out, n_in), np.float32)
    if n_in == 1 or n_out == 1:
        m[:, 0] = 1.0
        return m
    scale = (n_in - 1) / (n_out - 1)
    for i in range(n_out):
        pos = i * scale
        i0 = min(int(np.floor(pos)), n_in - 2)
        frac = pos - i0
        m[i, i0] = 1.0 - frac
        m[i, i0 + 1] = frac
    return m


def _up_pad_matrix(n_in, n_target):
    """Upsample-by-2 (align_corners=True) then zero-pad to n_target, as a matrix."""
    n_up = 2 * n_in
    diff = n_target - n_up
    assert diff >= 0, "Up expects the skip tensor to be >= the upsampled tensor"
    pad_before = diff // 2
    m = np.zeros((n_target, n_in), np.float32)
    m[pad_before:pad_before + n_up, :] = _interp_matrix(n_in, n_up)
    return m


# ----------------------------------------------------------------------------
# in-kernel helpers
# ----------------------------------------------------------------------------
def _zero_halo(xpad_ref, H, W, C):
    """Zero only the 1-pixel conv-padding halo (4 thin stores, not a full pass)."""
    zrow = jnp.zeros((1, W + 2, C), xpad_ref.dtype)
    zcol = jnp.zeros((H + 2, 1, C), xpad_ref.dtype)
    xpad_ref[0:1, :, :] = zrow
    xpad_ref[H + 1:H + 2, :, :] = zrow
    xpad_ref[:, 0:1, :] = zcol
    xpad_ref[:, W + 1:W + 2, :] = zcol


def _conv3x3_acc(xpad_ref, w_ref, H, W, Ci, Co):
    """3x3 conv (padding already staged in xpad_ref, bf16) as 9 per-tap
    accumulating MXU matmuls into one f32 accumulator -- no im2col slab."""
    acc = jnp.zeros((H * W, Co), jnp.float32)
    for ky in range(3):
        for kx in range(3):
            t = ky * 3 + kx
            patch = xpad_ref[ky:ky + H, kx:kx + W, :].reshape(H * W, Ci)
            acc = acc + jnp.dot(patch, w_ref[t * Ci:(t + 1) * Ci, :],
                                preferred_element_type=jnp.float32)
    return acc


# ----------------------------------------------------------------------------
# phase 1: upsample + pad + (folded) concat + conv1, plus partial BN1 stats
# ----------------------------------------------------------------------------
def _conv1_kernel(x1_ref, x2_ref, uh_ref, uw_ref, w1_ref,
                  y1_ref, s1_ref, xpad_ref):
    H1, W1, C1 = x1_ref.shape
    H2, W2, C2 = x2_ref.shape
    Cin = C1 + C2
    Cmid = w1_ref.shape[-1]

    # bilinear upsample (align_corners=True) + F.pad of x1 via two small 2-D
    # matmuls with precomputed interpolation matrices (pad rows are zero rows).
    # Transposes keep the lane dim.  Default MXU precision (bf16 passes).
    x1 = x1_ref[...].astype(jnp.float32)
    th = jnp.dot(uh_ref[...], x1.reshape(H1, W1 * C1),
                 preferred_element_type=jnp.float32)              # (H2, W1*C1)
    thT = jnp.transpose(th.reshape(H2, W1, C1), (1, 0, 2))        # (W1, H2, C1)
    tw = jnp.dot(uw_ref[...], thT.reshape(W1, H2 * C1),
                 preferred_element_type=jnp.float32)              # (W2, H2*C1)
    x1u = jnp.transpose(tw.reshape(W2, H2, C1), (1, 0, 2))        # (H2, W2, C1)

    # stage the conv1 input in a bf16 scratch: zero only the halo, then write
    # the interior once.  torch.cat([x2, x1_up], dim=1) is folded into the
    # channel axis ([0:C2] = skip, [C2:Cin] = upsampled), matching the weight
    # slab's input-channel order.
    _zero_halo(xpad_ref, H2, W2, Cin)
    xpad_ref[1:1 + H2, 1:1 + W2, 0:C2] = x2_ref[...].astype(jnp.bfloat16)
    xpad_ref[1:1 + H2, 1:1 + W2, C2:Cin] = x1u.astype(jnp.bfloat16)

    acc = _conv3x3_acc(xpad_ref, w1_ref, H2, W2, Cin, Cmid)       # (H2*W2, Cmid) f32

    y1_ref[...] = acc.reshape(H2, W2, Cmid)                       # pre-BN conv1 out
    # per-sample partial BN statistics (combined across the grid outside).
    # (Could be a ones-row MXU matmul if the XLU reduce ever binds.)
    s1_ref[0:1, :] = jnp.sum(acc, axis=0, keepdims=True)
    s1_ref[1:2, :] = jnp.sum(acc * acc, axis=0, keepdims=True)


# ----------------------------------------------------------------------------
# phase 2: BN1 + ReLU (2-op form) + conv2, plus partial BN2 stats
# ----------------------------------------------------------------------------
def _conv2_kernel(y1_ref, sc_ref, sh_ref, w2_ref, y2_ref, s2_ref, hpad_ref):
    H2, W2, Cmid = y1_ref.shape
    Cout = w2_ref.shape[-1]

    # BN (training-mode batch stats, precomputed scale/shift) + ReLU.
    h1 = jnp.maximum(y1_ref[...] * sc_ref[...] + sh_ref[...], 0.0)

    _zero_halo(hpad_ref, H2, W2, Cmid)
    hpad_ref[1:1 + H2, 1:1 + W2, :] = h1.astype(jnp.bfloat16)

    acc = _conv3x3_acc(hpad_ref, w2_ref, H2, W2, Cmid, Cout)      # (H2*W2, Cout) f32

    y2_ref[...] = acc.reshape(H2, W2, Cout)                       # pre-BN conv2 out
    s2_ref[0:1, :] = jnp.sum(acc, axis=0, keepdims=True)
    s2_ref[1:2, :] = jnp.sum(acc * acc, axis=0, keepdims=True)


# ----------------------------------------------------------------------------
# phase 3: BN2 + ReLU, lane-dense store
# ----------------------------------------------------------------------------
def _bn_relu_kernel(y2_ref, sc_ref, sh_ref, o_ref):
    H2, W2, Cout = y2_ref.shape
    y = jnp.maximum(y2_ref[...] * sc_ref[...] + sh_ref[...], 0.0)
    o_ref[...] = y.reshape(H2, W2 * Cout)                         # lane-dense slab


# ----------------------------------------------------------------------------
# plain-JAX glue: combine per-sample partial moments into per-channel affine
# ----------------------------------------------------------------------------
def _bn_affine(partial_stats, gamma, beta, m):
    s = jnp.sum(partial_stats, axis=0)                 # (2, C): [sum, sum_sq]
    mean = s[0] / m
    var = jnp.maximum(s[1] / m - mean * mean, 0.0)     # clamp one-pass variance
    scale = gamma.reshape(-1) * jax.lax.rsqrt(var + EPS)
    shift = beta.reshape(-1) - mean * scale
    return scale.reshape(1, -1), shift.reshape(1, -1)


# ----------------------------------------------------------------------------
# wrappers
# ----------------------------------------------------------------------------
def up_forward_nhwc(x1, x2, params):
    """Core entry point. x1: (N,H1,W1,C1), x2: (N,H2,W2,C2), NHWC (f32 or bf16).
    Returns (N, H2, W2, Cout) f32."""
    w1s, g1, be1, w2s, g2, be2 = params
    N, H1, W1, C1 = x1.shape
    N2, H2, W2, C2 = x2.shape
    assert N == N2
    Cin = C1 + C2
    Cmid = w1s.shape[-1]
    Cout = w2s.shape[-1]
    assert w1s.shape[0] == 9 * Cin, "conv1 weight slab / input channel mismatch"
    assert w2s.shape[0] == 9 * Cmid

    uh = jnp.asarray(_up_pad_matrix(H1, H2))           # (H2, H1)
    uw = jnp.asarray(_up_pad_matrix(W1, W2))           # (W2, W1)

    cp = pltpu.CompilerParams(dimension_semantics=("parallel",),
                              vmem_limit_bytes=32 * 1024 * 1024)
    m_total = N * H2 * W2

    # ---- phase 1: upsample + pad + folded concat + conv1 + partial BN1 stats
    c1_flops = 2 * N * H2 * W2 * 9 * Cin * Cmid \
        + 2 * N * (H2 * H1 * W1 * C1 + W2 * W1 * H2 * C1)
    c1_bytes = (x1.size + x2.size) * 4 + int(w1s.size) * 2 \
        + (uh.size + uw.size) * 4 + N * H2 * W2 * Cmid * 4 + N * 2 * Cmid * 4
    y1, s1 = pl.pallas_call(
        _conv1_kernel,
        out_shape=(jax.ShapeDtypeStruct((N, H2, W2, Cmid), jnp.float32),
                   jax.ShapeDtypeStruct((N, 2, Cmid), jnp.float32)),
        grid=(N,),
        in_specs=[
            pl.BlockSpec((None, H1, W1, C1), lambda n: (n, 0, 0, 0)),
            pl.BlockSpec((None, H2, W2, C2), lambda n: (n, 0, 0, 0)),
            pl.BlockSpec((H2, H1), lambda n: (0, 0)),
            pl.BlockSpec((W2, W1), lambda n: (0, 0)),
            pl.BlockSpec((9 * Cin, Cmid), lambda n: (0, 0)),
        ],
        out_specs=(
            pl.BlockSpec((None, H2, W2, Cmid), lambda n: (n, 0, 0, 0)),
            pl.BlockSpec((None, 2, Cmid), lambda n: (n, 0, 0)),
        ),
        scratch_shapes=[pltpu.VMEM((H2 + 2, W2 + 2, Cin), jnp.bfloat16)],
        compiler_params=cp,
        cost_estimate=pl.CostEstimate(flops=int(c1_flops), transcendentals=0,
                                      bytes_accessed=int(c1_bytes)),
    )(x1, x2, uh, uw, w1s)

    scale1, shift1 = _bn_affine(s1, g1, be1, m_total)

    # ---- phase 2: BN1+ReLU + conv2 + partial BN2 stats
    c2_flops = 2 * N * H2 * W2 * 9 * Cmid * Cout
    c2_bytes = N * H2 * W2 * (Cmid + Cout) * 4 + int(w2s.size) * 2 + N * 2 * Cout * 4
    y2, s2 = pl.pallas_call(
        _conv2_kernel,
        out_shape=(jax.ShapeDtypeStruct((N, H2, W2, Cout), jnp.float32),
                   jax.ShapeDtypeStruct((N, 2, Cout), jnp.float32)),
        grid=(N,),
        in_specs=[
            pl.BlockSpec((None, H2, W2, Cmid), lambda n: (n, 0, 0, 0)),
            pl.BlockSpec((1, Cmid), lambda n: (0, 0)),
            pl.BlockSpec((1, Cmid), lambda n: (0, 0)),
            pl.BlockSpec((9 * Cmid, Cout), lambda n: (0, 0)),
        ],
        out_specs=(
            pl.BlockSpec((None, H2, W2, Cout), lambda n: (n, 0, 0, 0)),
            pl.BlockSpec((None, 2, Cout), lambda n: (n, 0, 0)),
        ),
        scratch_shapes=[pltpu.VMEM((H2 + 2, W2 + 2, Cmid), jnp.bfloat16)],
        compiler_params=cp,
        cost_estimate=pl.CostEstimate(flops=int(c2_flops), transcendentals=0,
                                      bytes_accessed=int(c2_bytes)),
    )(y1, scale1, shift1, w2s)

    scale2, shift2 = _bn_affine(s2, g2, be2, m_total)

    # ---- phase 3: BN2+ReLU, lane-dense (N, H2, W2*Cout) store
    out2d = pl.pallas_call(
        _bn_relu_kernel,
        out_shape=jax.ShapeDtypeStruct((N, H2, W2 * Cout), jnp.float32),
        grid=(N,),
        in_specs=[
            pl.BlockSpec((None, H2, W2, Cout), lambda n: (n, 0, 0, 0)),
            pl.BlockSpec((1, Cout), lambda n: (0, 0)),
            pl.BlockSpec((1, Cout), lambda n: (0, 0)),
        ],
        out_specs=pl.BlockSpec((None, H2, W2 * Cout), lambda n: (n, 0, 0)),
        compiler_params=cp,
    )(y2, scale2, shift2)

    return out2d.reshape(N, H2, W2, Cout)


def up_forward(x1_nchw, x2_nchw, params):
    """PyTorch-parity wrapper (NCHW in / NCHW out), matching Up.forward(x1, x2)."""
    x1 = jnp.transpose(x1_nchw, (0, 2, 3, 1)).astype(jnp.float32)
    x2 = jnp.transpose(x2_nchw, (0, 2, 3, 1)).astype(jnp.float32)
    y = up_forward_nhwc(x1, x2, params)
    return jnp.transpose(y, (0, 3, 1, 2))


def init_params(key, in_channels, out_channels):
    """Synthetic params for Up(in_channels, out_channels, bilinear=True):
    DoubleConv(in_channels, out_channels, mid=in_channels//2).
    Conv weights are bf16 im2col slabs (9*Cin, Cout), row = (ky*3+kx)*Cin + ci
    with ci ordered [x2 channels, x1 channels] (the torch.cat order).  Conv
    biases are omitted: they cancel exactly under training-mode BatchNorm."""
    mid = in_channels // 2
    k1, k2 = jax.random.split(key, 2)

    def conv_slab(k, ci, co):
        w = 0.1 * jax.random.normal(k, (co, ci, 3, 3), jnp.float32)   # torch layout
        slab = jnp.transpose(w, (2, 3, 1, 0)).reshape(9 * ci, co)
        return slab.astype(jnp.bfloat16)

    w1s = conv_slab(k1, in_channels, mid)
    g1 = jnp.ones((1, mid), jnp.float32)
    be1 = jnp.zeros((1, mid), jnp.float32)
    w2s = conv_slab(k2, mid, out_channels)
    g2 = jnp.ones((1, out_channels), jnp.float32)
    be2 = jnp.zeros((1, out_channels), jnp.float32)
    return (w1s, g1, be1, w2s, g2, be2)


# ----------------------------------------------------------------------------
# pure-numpy reference (float32) for correctness checking
# ----------------------------------------------------------------------------
def _reference_numpy(x1_nchw, x2_nchw, params):
    w1s, g1, be1, w2s, g2, be2 = params
    x1 = np.transpose(np.asarray(x1_nchw, np.float32), (0, 2, 3, 1))
    x2 = np.transpose(np.asarray(x2_nchw, np.float32), (0, 2, 3, 1))
    N, H1, W1, C1 = x1.shape
    _, H2, W2, C2 = x2.shape
    Cmid = w1s.shape[-1]
    Cout = w2s.shape[-1]

    uh = _up_pad_matrix(H1, H2)
    uw = _up_pad_matrix(W1, W2)
    x1u = np.einsum("hH,nHwc->nhwc", uh, x1)
    x1u = np.einsum("wW,nhWc->nhwc", uw, x1u)
    xcat = np.concatenate([x2, x1u], axis=-1)

    w1 = np.asarray(w1s.astype(jnp.float32)).reshape(3, 3, C1 + C2, Cmid)
    w2 = np.asarray(w2s.astype(jnp.float32)).reshape(3, 3, Cmid, Cout)

    def conv3x3(x, w):
        n, h, wdt, _ = x.shape
        co = w.shape[-1]
        xp = np.pad(x, ((0, 0), (1, 1), (1, 1), (0, 0)))
        out = np.zeros((n, h, wdt, co), np.float32)
        for ky in range(3):
            for kx in range(3):
                out += np.einsum("nhwc,cd->nhwd",
                                 xp[:, ky:ky + h, kx:kx + wdt, :], w[ky, kx])
        return out

    def bn_relu(x, g, b):
        mean = x.mean(axis=(0, 1, 2))
        var = x.var(axis=(0, 1, 2))
        y = (x - mean) / np.sqrt(var + EPS) * np.asarray(g).reshape(-1) \
            + np.asarray(b).reshape(-1)
        return np.maximum(y, 0.0)

    h = bn_relu(conv3x3(xcat, w1), g1, be1)
    y = bn_relu(conv3x3(h, w2), g2, be2)
    return np.transpose(y, (0, 3, 1, 2))


if __name__ == "__main__":
    key = jax.random.PRNGKey(0)
    k1, k2, kp = jax.random.split(key, 3)

    # Up(in_channels=8, out_channels=8, bilinear=True):
    #   x1 (deep feature): (N, 4, 8, 8)   -> upsampled to 16x16
    #   x2 (skip feature): (N, 4, 16, 16) -> folded concat gives 8 channels
    N, C1, H1, W1 = 2, 4, 8, 8
    C2, H2, W2 = 4, 16, 16
    in_channels = C1 + C2
    out_channels = 8

    x1 = jax.random.normal(k1, (N, C1, H1, W1), jnp.float32)   # NCHW like PyTorch
    x2 = jax.random.normal(k2, (N, C2, H2, W2), jnp.float32)
    params = init_params(kp, in_channels, out_channels)

    y = up_forward(x1, x2, params)
    y = jax.block_until_ready(y)

    assert y.shape == (N, out_channels, H2, W2), y.shape
    assert bool(jnp.all(jnp.isfinite(y)))
    assert bool(jnp.all(y >= 0.0))   # final ReLU

    # loose tolerance: conv / upsample matmuls run in bf16 on the MXU
    y_ref = _reference_numpy(x1, x2, params)
    err = float(np.max(np.abs(np.asarray(y) - y_ref)))
    assert np.isfinite(err) and err < 0.2, f"max abs err vs reference: {err}"

    print("KERNEL_OK")
</pallas_src>

<mosaic_0001>
module attributes {stable_mosaic.version = 11 : i64} {
  func.func @_conv1_kernel(%arg0: i32, %arg1: memref<1x8x8x4xf32, #tpu.memory_space<vmem>>, %arg2: memref<1x16x16x4xf32, #tpu.memory_space<vmem>>, %arg3: memref<16x8xf32, #tpu.memory_space<vmem>>, %arg4: memref<16x8xf32, #tpu.memory_space<vmem>>, %arg5: memref<72x4xbf16, #tpu.memory_space<vmem>>, %arg6: memref<1x16x16x4xf32, #tpu.memory_space<vmem>>, %arg7: memref<1x2x4xf32, #tpu.memory_space<vmem>>, %arg8: memref<18x18x8xbf16, #tpu.memory_space<vmem>>) attributes {dimension_semantics = [#tpu.dimension_semantics<parallel>], iteration_bounds = array<i64: 2>, scalar_prefetch = 0 : i64, scratch_operands = 1 : i64, tpu.core_type = #tpu.core_type<tc>, window_params = [{transform_indices = @transform_0, window_bounds = array<i64: 1, 8, 8, 4>}, {transform_indices = @transform_1, window_bounds = array<i64: 1, 16, 16, 4>}, {pipeline_mode = #tpu.pipeline_mode<synchronous>, transform_indices = @transform_2, window_bounds = array<i64: 16, 8>}, {pipeline_mode = #tpu.pipeline_mode<synchronous>, transform_indices = @transform_3, window_bounds = array<i64: 16, 8>}, {pipeline_mode = #tpu.pipeline_mode<synchronous>, transform_indices = @transform_4, window_bounds = array<i64: 72, 4>}, {transform_indices = @transform_5, window_bounds = array<i64: 1, 16, 16, 4>}, {transform_indices = @transform_6, window_bounds = array<i64: 1, 2, 4>}]} {
    %c0 = arith.constant 0 : index
    %c0_0 = arith.constant 0 : index
    %c0_1 = arith.constant 0 : index
    %c0_2 = arith.constant 0 : index
    %0 = vector.load %arg1[%c0, %c0_0, %c0_1, %c0_2] : memref<1x8x8x4xf32, #tpu.memory_space<vmem>>, vector<1x8x8x4xf32>
    %1 = vector.shape_cast %0 : vector<1x8x8x4xf32> to vector<8x8x4xf32>
    %c0_3 = arith.constant 0 : index
    %c0_4 = arith.constant 0 : index
    %2 = vector.load %arg3[%c0_3, %c0_4] : memref<16x8xf32, #tpu.memory_space<vmem>>, vector<16x8xf32>
    %3 = vector.shape_cast %1 : vector<8x8x4xf32> to vector<8x32xf32>
    %cst = arith.constant dense<0.000000e+00> : vector<16x32xf32>
    %4 = tpu.matmul %2, %3, %cst {dimension_numbers = #tpu.dot_dimension_numbers<[1], [0], [0], [1], [0, 0, 1, 1], [], []>} : vector<16x8xf32>, vector<8x32xf32>, vector<16x32xf32> -> vector<16x32xf32>
    %5 = vector.shape_cast %4 : vector<16x32xf32> to vector<16x8x4xf32>
    %6 = tpu.transpose %5, [1, 0, 2] : vector<16x8x4xf32> -> vector<8x16x4xf32>
    %c0_5 = arith.constant 0 : index
    %c0_6 = arith.constant 0 : index
    %7 = vector.load %arg4[%c0_5, %c0_6] : memref<16x8xf32, #tpu.memory_space<vmem>>, vector<16x8xf32>
    %8 = vector.shape_cast %6 : vector<8x16x4xf32> to vector<8x64xf32>
    %cst_7 = arith.constant dense<0.000000e+00> : vector<16x64xf32>
    %9 = tpu.matmul %7, %8, %cst_7 {dimension_numbers = #tpu.dot_dimension_numbers<[1], [0], [0], [1], [0, 0, 1, 1], [], []>} : vector<16x8xf32>, vector<8x64xf32>, vector<16x64xf32> -> vector<16x64xf32>
    %10 = vector.shape_cast %9 : vector<16x64xf32> to vector<16x16x4xf32>
    %11 = tpu.transpose %10, [1, 0, 2] : vector<16x16x4xf32> -> vector<16x16x4xf32>
    %cst_8 = arith.constant 0.000000e+00 : bf16
    %12 = vector.broadcast %cst_8 : bf16 to vector<1x18x8xbf16>
    %cst_9 = arith.constant 0.000000e+00 : bf16
    %13 = vector.broadcast %cst_9 : bf16 to vector<18x1x8xbf16>
    %c0_10 = arith.constant 0 : index
    %c0_11 = arith.constant 0 : index
    %c0_12 = arith.constant 0 : index
    %14 = vector.load %arg8[%c0_10, %c0_11, %c0_12] : memref<18x18x8xbf16, #tpu.memory_space<vmem>>, vector<1x18x8xbf16>
    tpu.vector_store %arg8[%c0_10, %c0_11, %c0_12], %12 {strides = array<i32>} : memref<18x18x8xbf16, #tpu.memory_space<vmem>>, vector<1x18x8xbf16>,
    %c17 = arith.constant 17 : index
    %c0_13 = arith.constant 0 : index
    %c0_14 = arith.constant 0 : index
    %15 = vector.load %arg8[%c17, %c0_13, %c0_14] : memref<18x18x8xbf16, #tpu.memory_space<vmem>>, vector<1x18x8xbf16>
    tpu.vector_store %arg8[%c17, %c0_13, %c0_14], %12 {strides = array<i32>} : memref<18x18x8xbf16, #tpu.memory_space<vmem>>, vector<1x18x8xbf16>,
    %c0_15 = arith.constant 0 : index
    %c0_16 = arith.constant 0 : index
    %c0_17 = arith.constant 0 : index
    %16 = vector.load %arg8[%c0_15, %c0_16, %c0_17] : memref<18x18x8xbf16, #tpu.memory_space<vmem>>, vector<18x1x8xbf16>
    tpu.vector_store %arg8[%c0_15, %c0_16, %c0_17], %13 {strides = array<i32>} : memref<18x18x8xbf16, #tpu.memory_space<vmem>>, vector<18x1x8xbf16>,
    %c0_18 = arith.constant 0 : index
    %c17_19 = arith.constant 17 : index
    %c0_20 = arith.constant 0 : index
    %17 = vector.load %arg8[%c0_18, %c17_19, %c0_20] : memref<18x18x8xbf16, #tpu.memory_space<vmem>>, vector<18x1x8xbf16>
    tpu.vector_store %arg8[%c0_18, %c17_19, %c0_20], %13 {strides = array<i32>} : memref<18x18x8xbf16, #tpu.memory_space<vmem>>, vector<18x1x8xbf16>,
    %c0_21 = arith.constant 0 : index
    %c0_22 = arith.constant 0 : index
    %c0_23 = arith.constant 0 : index
    %c0_24 = arith.constant 0 : index
    %18 = vector.load %arg2[%c0_21, %c0_22, %c0_23, %c0_24] : memref<1x16x16x4xf32, #tpu.memory_space<vmem>>, vector<1x16x16x4xf32>
    %19 = vector.shape_cast %18 : vector<1x16x16x4xf32> to vector<16x16x4xf32>
    %20 = arith.truncf %19 : vector<16x16x4xf32> to vector<16x16x4xbf16>
    %c1 = arith.constant 1 : index
    %c1_25 = arith.constant 1 : index
    %c0_26 = arith.constant 0 : index
    %21 = vector.load %arg8[%c1, %c1_25, %c0_26] : memref<18x18x8xbf16, #tpu.memory_space<vmem>>, vector<16x16x4xbf16>
    tpu.vector_store %arg8[%c1, %c1_25, %c0_26], %20 {strides = array<i32>} : memref<18x18x8xbf16, #tpu.memory_space<vmem>>, vector<16x16x4xbf16>,
    %22 = arith.truncf %11 : vector<16x16x4xf32> to vector<16x16x4xbf16>
    %c1_27 = arith.constant 1 : index
    %c1_28 = arith.constant 1 : index
    %c4 = arith.constant 4 : index
    %23 = vector.load %arg8[%c1_27, %c1_28, %c4] : memref<18x18x8xbf16, #tpu.memory_space<vmem>>, vector<16x16x4xbf16>
    tpu.vector_store %arg8[%c1_27, %c1_28, %c4], %22 {strides = array<i32>} : memref<18x18x8xbf16, #tpu.memory_space<vmem>>, vector<16x16x4xbf16>,
    %cst_29 = arith.constant 0.000000e+00 : f32
    %24 = vector.broadcast %cst_29 : f32 to vector<256x4xf32>
    %c0_30 = arith.constant 0 : index
    %c0_31 = arith.constant 0 : index
    %c0_32 = arith.constant 0 : index
    %25 = vector.load %arg8[%c0_30, %c0_31, %c0_32] : memref<18x18x8xbf16, #tpu.memory_space<vmem>>, vector<16x16x8xbf16>
    %26 = vector.shape_cast %25 : vector<16x16x8xbf16> to vector<256x8xbf16>
    %c0_33 = arith.constant 0 : index
    %c0_34 = arith.constant 0 : index
    %27 = vector.load %arg5[%c0_33, %c0_34] : memref<72x4xbf16, #tpu.memory_space<vmem>>, vector<8x4xbf16>
    %cst_35 = arith.constant dense<0.000000e+00> : vector<256x4xf32>
    %28 = tpu.matmul %26, %27, %cst_35 {dimension_numbers = #tpu.dot_dimension_numbers<[1], [0], [0], [1], [0, 0, 1, 1], [], []>} : vector<256x8xbf16>, vector<8x4xbf16>, vector<256x4xf32> -> vector<256x4xf32>
    %29 = arith.addf %24, %28 : vector<256x4xf32>
    %c0_36 = arith.constant 0 : index
    %c1_37 = arith.constant 1 : index
    %c0_38 = arith.constant 0 : index
    %30 = vector.load %arg8[%c0_36, %c1_37, %c0_38] : memref<18x18x8xbf16, #tpu.memory_space<vmem>>, vector<16x16x8xbf16>
    %31 = vector.shape_cast %30 : vector<16x16x8xbf16> to vector<256x8xbf16>
    %c8 = arith.constant 8 : index
    %c0_39 = arith.constant 0 : index
    %32 = vector.load %arg5[%c8, %c0_39] : memref<72x4xbf16, #tpu.memory_space<vmem>>, vector<8x4xbf16>
    %cst_40 = arith.constant dense<0.000000e+00> : vector<256x4xf32>
    %33 = tpu.matmul %31, %32, %cst_40 {dimension_numbers = #tpu.dot_dimension_numbers<[1], [0], [0], [1], [0, 0, 1, 1], [], []>} : vector<256x8xbf16>, vector<8x4xbf16>, vector<256x4xf32> -> vector<256x4xf32>
    %34 = arith.addf %29, %33 : vector<256x4xf32>
    %c0_41 = arith.constant 0 : index
    %c2 = arith.constant 2 : index
    %c0_42 = arith.constant 0 : index
    %35 = vector.load %arg8[%c0_41, %c2, %c0_42] : memref<18x18x8xbf16, #tpu.memory_space<vmem>>, vector<16x16x8xbf16>
    %36 = vector.shape_cast %35 : vector<16x16x8xbf16> to vector<256x8xbf16>
    %c16 = arith.constant 16 : index
    %c0_43 = arith.constant 0 : index
    %37 = vector.load %arg5[%c16, %c0_43] : memref<72x4xbf16, #tpu.memory_space<vmem>>, vector<8x4xbf16>
    %cst_44 = arith.constant dense<0.000000e+00> : vector<256x4xf32>
    %38 = tpu.matmul %36, %37, %cst_44 {dimension_numbers = #tpu.dot_dimension_numbers<[1], [0], [0], [1], [0, 0, 1, 1], [], []>} : vector<256x8xbf16>, vector<8x4xbf16>, vector<256x4xf32> -> vector<256x4xf32>
    %39 = arith.addf %34, %38 : vector<256x4xf32>
    %c1_45 = arith.constant 1 : index
    %c0_46 = arith.constant 0 : index
    %c0_47 = arith.constant 0 : index
    %40 = vector.load %arg8[%c1_45, %c0_46, %c0_47] : memref<18x18x8xbf16, #tpu.memory_space<vmem>>, vector<16x16x8xbf16>
    %41 = vector.shape_cast %40 : vector<16x16x8xbf16> to vector<256x8xbf16>
    %c24 = arith.constant 24 : index
    %c0_48 = arith.constant 0 : index
    %42 = vector.load %arg5[%c24, %c0_48] : memref<72x4xbf16, #tpu.memory_space<vmem>>, vector<8x4xbf16>
    %cst_49 = arith.constant dense<0.000000e+00> : vector<256x4xf32>
    %43 = tpu.matmul %41, %42, %cst_49 {dimension_numbers = #tpu.dot_dimension_numbers<[1], [0], [0], [1], [0, 0, 1, 1], [], []>} : vector<256x8xbf16>, vector<8x4xbf16>, vector<256x4xf32> -> vector<256x4xf32>
    %44 = arith.addf %39, %43 : vector<256x4xf32>
    %c1_50 = arith.constant 1 : index
    %c1_51 = arith.constant 1 : index
    %c0_52 = arith.constant 0 : index
    %45 = vector.load %arg8[%c1_50, %c1_51, %c0_52] : memref<18x18x8xbf16, #tpu.memory_space<vmem>>, vector<16x16x8xbf16>
    %46 = vector.shape_cast %45 : vector<16x16x8xbf16> to vector<256x8xbf16>
    %c32 = arith.constant 32 : index
    %c0_53 = arith.constant 0 : index
    %47 = vector.load %arg5[%c32, %c0_53] : memref<72x4xbf16, #tpu.memory_space<vmem>>, vector<8x4xbf16>
    %cst_54 = arith.constant dense<0.000000e+00> : vector<256x4xf32>
    %48 = tpu.matmul %46, %47, %cst_54 {dimension_numbers = #tpu.dot_dimension_numbers<[1], [0], [0], [1], [0, 0, 1, 1], [], []>} : vector<256x8xbf16>, vector<8x4xbf16>, vector<256x4xf32> -> vector<256x4xf32>
    %49 = arith.addf %44, %48 : vector<256x4xf32>
    %c1_55 = arith.constant 1 : index
    %c2_56 = arith.constant 2 : index
    %c0_57 = arith.constant 0 : index
    %50 = vector.load %arg8[%c1_55, %c2_56, %c0_57] : memref<18x18x8xbf16, #tpu.memory_space<vmem>>, vector<16x16x8xbf16>
    %51 = vector.shape_cast %50 : vector<16x16x8xbf16> to vector<256x8xbf16>
    %c40 = arith.constant 40 : index
    %c0_58 = arith.constant 0 : index
    %52 = vector.load %arg5[%c40, %c0_58] : memref<72x4xbf16, #tpu.memory_space<vmem>>, vector<8x4xbf16>
    %cst_59 = arith.constant dense<0.000000e+00> : vector<256x4xf32>
    %53 = tpu.matmul %51, %52, %cst_59 {dimension_numbers = #tpu.dot_dimension_numbers<[1], [0], [0], [1], [0, 0, 1, 1], [], []>} : vector<256x8xbf16>, vector<8x4xbf16>, vector<256x4xf32> -> vector<256x4xf32>
    %54 = arith.addf %49, %53 : vector<256x4xf32>
    %c2_60 = arith.constant 2 : index
    %c0_61 = arith.constant 0 : index
    %c0_62 = arith.constant 0 : index
    %55 = vector.load %arg8[%c2_60, %c0_61, %c0_62] : memref<18x18x8xbf16, #tpu.memory_space<vmem>>, vector<16x16x8xbf16>
    %56 = vector.shape_cast %55 : vector<16x16x8xbf16> to vector<256x8xbf16>
    %c48 = arith.constant 48 : index
    %c0_63 = arith.constant 0 : index
    %57 = vector.load %arg5[%c48, %c0_63] : memref<72x4xbf16, #tpu.memory_space<vmem>>, vector<8x4xbf16>
    %cst_64 = arith.constant dense<0.000000e+00> : vector<256x4xf32>
    %58 = tpu.matmul %56, %57, %cst_64 {dimension_numbers = #tpu.dot_dimension_numbers<[1], [0], [0], [1], [0, 0, 1, 1], [], []>} : vector<256x8xbf16>, vector<8x4xbf16>, vector<256x4xf32> -> vector<256x4xf32>
    %59 = arith.addf %54, %58 : vector<256x4xf32>
    %c2_65 = arith.constant 2 : index
    %c1_66 = arith.constant 1 : index
    %c0_67 = arith.constant 0 : index
    %60 = vector.load %arg8[%c2_65, %c1_66, %c0_67] : memref<18x18x8xbf16, #tpu.memory_space<vmem>>, vector<16x16x8xbf16>
    %61 = vector.shape_cast %60 : vector<16x16x8xbf16> to vector<256x8xbf16>
    %c56 = arith.constant 56 : index
    %c0_68 = arith.constant 0 : index
    %62 = vector.load %arg5[%c56, %c0_68] : memref<72x4xbf16, #tpu.memory_space<vmem>>, vector<8x4xbf16>
    %cst_69 = arith.constant dense<0.000000e+00> : vector<256x4xf32>
    %63 = tpu.matmul %61, %62, %cst_69 {dimension_numbers = #tpu.dot_dimension_numbers<[1], [0], [0], [1], [0, 0, 1, 1], [], []>} : vector<256x8xbf16>, vector<8x4xbf16>, vector<256x4xf32> -> vector<256x4xf32>
    %64 = arith.addf %59, %63 : vector<256x4xf32>
    %c2_70 = arith.constant 2 : index
    %c2_71 = arith.constant 2 : index
    %c0_72 = arith.constant 0 : index
    %65 = vector.load %arg8[%c2_70, %c2_71, %c0_72] : memref<18x18x8xbf16, #tpu.memory_space<vmem>>, vector<16x16x8xbf16>
    %66 = vector.shape_cast %65 : vector<16x16x8xbf16> to vector<256x8xbf16>
    %c64 = arith.constant 64 : index
    %c0_73 = arith.constant 0 : index
    %67 = vector.load %arg5[%c64, %c0_73] : memref<72x4xbf16, #tpu.memory_space<vmem>>, vector<8x4xbf16>
    %cst_74 = arith.constant dense<0.000000e+00> : vector<256x4xf32>
    %68 = tpu.matmul %66, %67, %cst_74 {dimension_numbers = #tpu.dot_dimension_numbers<[1], [0], [0], [1], [0, 0, 1, 1], [], []>} : vector<256x8xbf16>, vector<8x4xbf16>, vector<256x4xf32> -> vector<256x4xf32>
    %69 = arith.addf %64, %68 : vector<256x4xf32>
    %70 = vector.shape_cast %69 : vector<256x4xf32> to vector<16x16x4xf32>
    %c0_75 = arith.constant 0 : index
    %c0_76 = arith.constant 0 : index
    %c0_77 = arith.constant 0 : index
    %c0_78 = arith.constant 0 : index
    %71 = vector.load %arg6[%c0_75, %c0_76, %c0_77, %c0_78] : memref<1x16x16x4xf32, #tpu.memory_space<vmem>>, vector<1x16x16x4xf32>
    %72 = vector.shape_cast %71 : vector<1x16x16x4xf32> to vector<16x16x4xf32>
    %73 = vector.shape_cast %70 : vector<16x16x4xf32> to vector<1x16x16x4xf32>
    tpu.vector_store %arg6[%c0_75, %c0_76, %c0_77, %c0_78], %73 {strides = array<i32>} : memref<1x16x16x4xf32, #tpu.memory_space<vmem>>, vector<1x16x16x4xf32>,
    %cst_79 = arith.constant dense<0.000000e+00> : vector<4xf32>
    %74 = vector.multi_reduction <add>, %69, %cst_79 [0] : vector<256x4xf32> to vector<4xf32>
    %75 = vector.shape_cast %74 : vector<4xf32> to vector<1x4xf32>
    %c0_80 = arith.constant 0 : index
    %c0_81 = arith.constant 0 : index
    %c0_82 = arith.constant 0 : index
    %76 = vector.load %arg7[%c0_80, %c0_81, %c0_82] : memref<1x2x4xf32, #tpu.memory_space<vmem>>, vector<1x1x4xf32>
    %77 = vector.shape_cast %76 : vector<1x1x4xf32> to vector<1x4xf32>
    %78 = vector.shape_cast %75 : vector<1x4xf32> to vector<1x1x4xf32>
    tpu.vector_store %arg7[%c0_80, %c0_81, %c0_82], %78 {strides = array<i32>} : memref<1x2x4xf32, #tpu.memory_space<vmem>>, vector<1x1x4xf32>,
    %79 = arith.mulf %69, %69 : vector<256x4xf32>
    %cst_83 = arith.constant dense<0.000000e+00> : vector<4xf32>
    %80 = vector.multi_reduction <add>, %79, %cst_83 [0] : vector<256x4xf32> to vector<4xf32>
    %81 = vector.shape_cast %80 : vector<4xf32> to vector<1x4xf32>
    %c0_84 = arith.constant 0 : index
    %c1_85 = arith.constant 1 : index
    %c0_86 = arith.constant 0 : index
    %82 = vector.load %arg7[%c0_84, %c1_85, %c0_86] : memref<1x2x4xf32, #tpu.memory_space<vmem>>, vector<1x1x4xf32>
    %83 = vector.shape_cast %82 : vector<1x1x4xf32> to vector<1x4xf32>
    %84 = vector.shape_cast %81 : vector<1x4xf32> to vector<1x1x4xf32>
    tpu.vector_store %arg7[%c0_84, %c1_85, %c0_86], %84 {strides = array<i32>} : memref<1x2x4xf32, #tpu.memory_space<vmem>>, vector<1x1x4xf32>,
    return
  }
  func.func @transform_0(%arg0: i32) -> (i32, i32, i32, i32) {
    %c0_i32 = arith.constant 0 : i32
    %c0_i32_0 = arith.constant 0 : i32
    %c0_i32_1 = arith.constant 0 : i32
    %c0_i32_2 = arith.constant 0 : i32
    return %arg0, %c0_i32, %c0_i32_0, %c0_i32_1 : i32, i32, i32, i32
  }
  func.func @transform_1(%arg0: i32) -> (i32, i32, i32, i32) {
    %c0_i32 = arith.constant 0 : i32
    %c0_i32_0 = arith.constant 0 : i32
    %c0_i32_1 = arith.constant 0 : i32
    %c0_i32_2 = arith.constant 0 : i32
    return %arg0, %c0_i32, %c0_i32_0, %c0_i32_1 : i32, i32, i32, i32
  }
  func.func @transform_2(%arg0: i32) -> (i32, i32) {
    %c0_i32 = arith.constant 0 : i32
    %c0_i32_0 = arith.constant 0 : i32
    %c0_i32_1 = arith.constant 0 : i32
    return %c0_i32, %c0_i32_0 : i32, i32
  }
  func.func @transform_3(%arg0: i32) -> (i32, i32) {
    %c0_i32 = arith.constant 0 : i32
    %c0_i32_0 = arith.constant 0 : i32
    %c0_i32_1 = arith.constant 0 : i32
    return %c0_i32, %c0_i32_0 : i32, i32
  }
  func.func @transform_4(%arg0: i32) -> (i32, i32) {
    %c0_i32 = arith.constant 0 : i32
    %c0_i32_0 = arith.constant 0 : i32
    %c0_i32_1 = arith.constant 0 : i32
    return %c0_i32, %c0_i32_0 : i32, i32
  }
  func.func @transform_5(%arg0: i32) -> (i32, i32, i32, i32) {
    %c0_i32 = arith.constant 0 : i32
    %c0_i32_0 = arith.constant 0 : i32
    %c0_i32_1 = arith.constant 0 : i32
    %c0_i32_2 = arith.constant 0 : i32
    return %arg0, %c0_i32, %c0_i32_0, %c0_i32_1 : i32, i32, i32, i32
  }
  func.func @transform_6(%arg0: i32) -> (i32, i32, i32) {
    %c0_i32 = arith.constant 0 : i32
    %c0_i32_0 = arith.constant 0 : i32
    %c0_i32_1 = arith.constant 0 : i32
    return %arg0, %c0_i32, %c0_i32_0 : i32, i32, i32
  }
}

</mosaic_0001>

<bundles_post_ra>
// kernel: tpu_custom_call.1
= control target key start
LH: loop header
LB: loop body
LE: loop exit
PB: predicated region body
PF: predicated region fallthrough
CT: control target
= control target key end

     0   :  { %12 = vsyncpa [#allocation4], 0  ;;  %s11688_s0 = inlined_call_operand.vmem [shape: f32[2,8,8,4], index: 0, kind: input, shape index: {}]   ;;  %s11689_s1 = inlined_call_operand.vmem [shape: f32[2,16,16,4], index: 1, kind: input, shape index: {}]   ;;  %s11690_s2 = inlined_call_operand.vmem [shape: f32[16,8], index: 2, kind: input, shape index: {}]   ;;  %s11691_s3 = inlined_call_operand.vmem [shape: f32[16,8], index: 3, kind: input, shape index: {}]   ;;  %s11692_s4 = inlined_call_operand.vmem [shape: bf16[72,4], index: 4, kind: input, shape index: {}]   ;;  %s11693_s5 = inlined_call_operand.vmem [shape: f32[2,16,16,4], index: 5, kind: output, shape index: {0}]   ;;  %s11694_s6 = inlined_call_operand.hbm [shape: f32[2,2,4], index: 6, kind: output, shape index: {1}]  }
   0x1   :  { %14 = vsyncpa [#allocation4 + $0x1], 0  ;;  %s8525_s21 = smov 0   ;;  %s8527_s22 = smov 0  }
   0x2   :  { %s8529_s23 = smov 0   ;;  %s8531_s24 = smov 0  }
   0x3 LB: > { %s8546_s25 = sadd.s32 4294967295, %s8455_s24   ;;  %s7713_s26 = sadd.s32 4294967294, %s8455_s24   ;;  %s8455_s24 = sphi %s8531_s24, %s11744_s24   ;;  %s8451_s23 = sphi %s8529_s23, %s11743_s23   ;;  %s8447_s22 = sphi %s8527_s22, %s11742_s22   ;;  %s8443_s21 = sphi %s8525_s21, %s11741_s21  }
   0x4   : > { %s8550_s27 = sadd.s32 1, %s8455_s24   ;;  %s168_s28 = sadd.s32 1, %s8451_s23 }
   0x5   : > { %s165_s29 = ssub.s32 %s8455_s24, %s8550_s27  ;;  %p178_p0 = scmp.ne.s32.totalorder %s8451_s23, %s8447_s22 }
   0x6   : > { %p166_p1 = scmp.eq.s32.totalorder %s165_s29, 0  ;;  %p179_p2 = scmp.eq.s32.totalorder %s8546_s25, 1 }
   0x7   : > { %p184_p3 = scmp.ne.s32.totalorder %s8447_s22, %s8443_s21  ;;  %p185_p4 = scmp.eq.s32.totalorder %s7713_s26, 1 }
   0x8   : > { %s8561_s30 = scalar_select %p166_p1, %s8451_s23, %s168_s28  }
   0x9   : > { %p8563_p5 = por %p179_p2, %p178_p0  ;;  %p8567_p6 = por %p185_p4, %p184_p3 }
   0xa   : > { %p7716_p7 = scmp.ge.s32.totalorder %s8455_s24, 1  ;;  %p228_p8 = scmp.lt.s32.totalorder %s8455_s24, 3 }
   0xc   : > { %p229_p9 = pnand %p7716_p7, %p228_p8 }
   0xe   : > { %232 = sbr.rel (%p229_p9) target bundleno = 1941 (0x795), region = 40 }
  0x13   : > { %p268_p10 = scmp.lt.s32.totalorder %s8546_s25, 1  ;;  %v8457_v0 = vmov 1983009808   ;;  %v8458_v2 = vmov 1934713408   ;;  %vm295_vm0 = vcmask 1047556  }
  0x14   : > { %v300_v1 = vunpack.c.l.s4 %v8457_v0  ;;  %v348_v3 = vunpack.c.l.s4 %v8458_v2  ;;  %s8459_s14 = smov 12   ;;  %s11695_s15 = smov 4   ;;  %vm435_vm1 = vcmask 31744   ;;  %vm437_vm2 = vcmask 64512  }
  0x15   : > { %s8575_s9 = scalar_select %p268_p10, %s8546_s25, 1  ;;  %vm439_vm3 = vcmask 97280   ;;  %vm441_vm4 = vcmask 130048   ;;  %vm443_vm5 = vcmask 162816   ;;  %vm445_vm6 = vcmask 195584  }
  0x16   : > { %v8581_v12 = vunpack.c.0.s8 %v300_v1  ;;  %v8583_v19 = vunpack.c.0.s8 %v348_v3  ;;  %s8461_s16 = smov 20   ;;  %s8462_s17 = smov 16   ;;  %vm447_vm7 = vcmask 228352   ;;  %vm1263_vm8 = vcmask 261120  }
  0x17   : > { %s8116_s10 = sshll.u32 %s8575_s9, 6  ;;  %s8463_s18 = smov 8   ;;  %vm1265_vm9 = vcmask 293888   ;;  %vm1267_vm10 = vcmask 326656   ;;  %vm1269_vm11 = vcmask 359424   ;;  %vm1271_vm12 = vcmask 392192  }
  0x18   : > { %s272_s13 = scalar_lea.vmem %s11688_s0, %s8116_s10  ;;  %s8464_s19 = smov 24   ;;  %vm1273_vm13 = vcmask 424960   ;;  %vm1275_vm14 = vcmask 457728   ;;  %vm1277_vm15 = vcmask 490496  }
  0x19   : > { %v284_v4 = vld [vmem:[%s272_s13] sm:$0xff]  ;;  %v285_v5 = vld [vmem:[%s272_s13 + $0x8] sm:$0xff]  ;;  %v286_v6 = vld [vmem:[%s272_s13 + $0x10] sm:$0xff]  ;;  %s8465_s20 = smov 28   ;;  %s8466_s11 = smov 112  }
  0x1a   : > { %v287_v7 = vld [vmem:[%s272_s13 + $0x18] sm:$0xff]  ;;  %v288_v8 = vld [vmem:[%s272_s13 + $0x20] sm:$0xff]  ;;  %v289_v9 = vld [vmem:[%s272_s13 + $0x28] sm:$0xff]  ;;  %v294_v10 = vrot.slane %v286_v6, 4  ;;  %v297_v11 = vrot.slane %v284_v4, 4  ;;  %v309_v13 = vrot.slane %v285_v5, 4 }
  0x1b   : > { %v290_v14 = vld [vmem:[%s272_s13 + $0x30] sm:$0xff]  ;;  %v291_v15 = vld [vmem:[%s272_s13 + $0x38] sm:$0xff]  ;;  %v307_v16 = vrot.slane %v287_v7, 4  ;;  %v321_v17 = vrot.slane %v288_v8, 4  ;;  %v333_v18 = vrot.slane %v289_v9, 4  ;;  %s8467_s12 = smov 120  }
  0x1c   : > { %v296_v20 = vsel %vm295_vm0, %v294_v10, %v284_v4  ;;  %v319_v21 = vrot.slane %v290_v14, 4  ;;  %v331_v22 = vrot.slane %v291_v15, 4  ;;  %v298_v23 = vsel %vm295_vm0, %v286_v6, %v297_v11  ;;  %s8468_s13 = smov 124   ;;  %s11697_s26 = smov 108  }
  0x1d   : > { %v302_v24 = vperm.slane %v296_v20, %v8581_v12  ;;  %v308_v25 = vsel %vm295_vm0, %v307_v16, %v285_v5  ;;  %v306_v26 = vperm.slane %v298_v23, %v8581_v12  ;;  %v310_v27 = vsel %vm295_vm0, %v287_v7, %v309_v13  ;;  %s8470_s28 = smov 104   ;;  %s8471_s29 = smov 100  }
  0x1e   : > { %v314_v28 = vperm.slane %v308_v25, %v8581_v12  ;;  %v320_v29 = vsel %vm295_vm0, %v319_v21, %v288_v8  ;;  %v332_v30 = vsel %vm295_vm0, %v331_v22, %v289_v9  ;;  %v318_v31 = vperm.slane %v310_v27, %v8581_v12  ;;  %s8472_s10 = smov 116  }
  0x1f   : > { %v326_v32 = vperm.slane %v320_v29, %v8581_v12  ;;  %v338_v33 = vperm.slane %v332_v30, %v8581_v12  ;;  %v345_v34 = vrot.slane %v302_v24, 4  ;;  %v322_v35 = vsel %vm295_vm0, %v290_v14, %v321_v17  ;;  %v292_v29 = vld [vmem:[%s11690_s2] sm:$0xff] }
  0x20   : > { %v343_v36 = vrot.slane %v314_v28, 4  ;;  %v334_v37 = vsel %vm295_vm0, %v291_v15, %v333_v18  ;;  %v355_v38 = vrot.slane %v318_v31, 4  ;;  %v330_v45 = vperm.slane %v322_v35, %v8581_v12 }
  0x21   : > { %v367_v39 = vrot.slane %v338_v33, 4  ;;  %v346_v40 = vsel %vm295_vm0, %v314_v28, %v345_v34  ;;  %v369_v41 = vrot.slane %v326_v32, 4  ;;  %v342_v42 = vperm.slane %v334_v37, %v8581_v12 }
  0x22   : > { %v344_v43 = vsel %vm295_vm0, %v343_v36, %v302_v24  ;;  %v354_v44 = vperm.slane %v346_v40, %v8583_v19  ;;  %v356_v46 = vsel %vm295_vm0, %v355_v38, %v306_v26  ;;  %v381_v56 = vrot.slane %v330_v45, 4 }
  0x23   : > { %v350_v47 = vperm.slane %v344_v43, %v8583_v19  ;;  %v368_v48 = vsel %vm295_vm0, %v367_v39, %v326_v32  ;;  %v370_v49 = vsel %vm295_vm0, %v338_v33, %v369_v41  ;;  %v362_v50 = vperm.slane %v356_v46, %v8583_v19 }
  0x24   : > { %v374_v51 = vperm.slane %v368_v48, %v8583_v19  ;;  %v378_v52 = vperm.slane %v370_v49, %v8583_v19  ;;  %v397_v53 = vrot.slane %v354_v44, 4  ;;  %v379_v54 = vrot.slane %v342_v42, 4 }
  0x25   : > { %v393_v55 = vrot.slane %v350_v47, 4  ;;  %v401_v57 = vrot.slane %v362_v50, 4  ;;  %v357_v60 = vrot.slane %v306_v26, 4  ;;  %v382_v63 = vsel %vm295_vm0, %v342_v42, %v381_v56 }
  0x26   : > { %v398_v58 = vsel %vm295_vm0, %v378_v52, %v397_v53  ;;  %v380_v59 = vsel %vm295_vm0, %v379_v54, %v330_v45  ;;  %v395_v0 = vrot.slane %v378_v52, 4  ;;  %v390_v2 = vperm.slane %v382_v63, %v8583_v19 }
  0x27   : > { %v394_v61 = vsel %vm295_vm0, %v374_v51, %v393_v55  ;;  %416 = vrot.lane.b32.xlu1 %v398_v58, %s8459_s14  ;;  %v386_v62 = vperm.slane %v380_v59, %v8583_v19  ;;  %v358_v4 = vsel %vm295_vm0, %v318_v31, %v357_v60  ;;  %v391_v15 = vrot.slane %v374_v51, 4  ;;  %v293_v31 = vld [vmem:[%s11690_s2 + $0x8] sm:$0xff] }
  0x28   : > { %408 = vrot.lane.b32.xlu0 %v394_v61, %s11695_s15  ;;  %v403_v5 = vrot.slane %v390_v2, 4  ;;  %v396_v7 = vsel %vm295_vm0, %v395_v0, %v354_v44  ;;  %v366_v8 = vperm.slane %v358_v4, %v8583_v19 }
  0x29   : > { %v399_v1 = vrot.slane %v386_v62, 4  ;;  %v402_v3 = vsel %vm295_vm0, %v386_v62, %v401_v57  ;;  %v392_v17 = vsel %vm295_vm0, %v391_v15, %v350_v47 }
  0x2a   : > { %424 = vrot.lane.b32.xlu2 %v402_v3, %s8461_s16  ;;  %v404_v9 = vsel %vm295_vm0, %v403_v5, %v366_v8  ;;  %v405_v10 = vrot.slane %v366_v8, 4 }
  0x2b   : > { %v400_v6 = vsel %vm295_vm0, %v399_v1, %v362_v50 }
  0x2c   : > { %v406_v11 = vsel %vm295_vm0, %v390_v2, %v405_v10 }
  0x2f   : > { %420 = vrot.lane.b32.xlu1 %v400_v6, %s8462_s17 }
  0x30   : > { %412 = vrot.lane.b32.xlu0 %v396_v7, %s8463_s18 }
  0x32   : > { %428 = vrot.lane.b32.xlu2 %v404_v9, %s8464_s19 }
  0x38   : > { %432 = vrot.lane.b32.xlu0 %v406_v11, %s8465_s20 }
  0x84   : > { %v425_v16 = vpop.permute.xlu2 %424 }
  0x8c   : > { %v429_v25 = vpop.permute.xlu2 %428 }
  0x99   : > { %v417_v13 = vpop.permute.xlu1 %416 }
  0x9a   : > { %v409_v14 = vpop.permute.xlu0 %408 }
  0x9b   : > { %v436_v18 = vsel %vm435_vm1, %v392_v17, %v409_v14 }
  0xa1   : > { %v421_v21 = vpop.permute.xlu1 %420 }
  0xa2   : > { %v413_v20 = vpop.permute.xlu0 %412 }
  0xa3   : > { %v438_v22 = vsel %vm437_vm2, %v436_v18, %v413_v20 }
  0xa4   : > { %v440_v23 = vsel %vm439_vm3, %v438_v22, %v417_v13 }
  0xa5   : > { %v442_v24 = vsel %vm441_vm4, %v440_v23, %v421_v21 }
  0xa6   : > { %v444_v26 = vsel %vm443_vm5, %v442_v24, %v425_v16 }
  0xa7   : > { %v446_v27 = vsel %vm445_vm6, %v444_v26, %v429_v25 }
  0xaa   : > { %v433_v28 = vpop.permute.xlu0 %432 }
  0xab   : > { %v448_v30 = vsel %vm447_vm7, %v446_v27, %v433_v28 }
  0xac   : > { %470 = vmatpush.msra.mxu0 %v448_v30 }
  0xad   : > { %7724 = vmatmul.msk.f32.vlgmr.msra.gmra.mxu0 %vm437_vm2, %v292_v29 }
  0xb5   : > { %7725 = vmatmul.msk.f32.gmra.mxu0 %vm437_vm2, %v293_v31 }
 0x12a   : > { %v472_v32 = vpop.f32.mrf.mxu0 }
 0x12b   : > { %498 = vrot.lane.b32.xlu1 %v472_v32, %s8466_s11  ;;  %486 = vrot.lane.b32.xlu0 %v472_v32, %s8467_s12  ;;  %v524_v52 = vrot.slane %v472_v32, 4 }
 0x132   : > { %v475_v33 = vpop.f32.mrf.mxu0 }
 0x133   : > { %480 = vrot.lane.b32.xlu0 %v472_v32, %s8468_s13  ;;  %v8247_v34 = vpack.i.bf16 %v475_v33, %v472_v32  ;;  %v636_v2 = vrot.slane %v475_v33, 4 }
 0x135   : > { %8248 = vrot.lane.b32.xlu2 %v8247_v34, %s11697_s26  ;;  %8243 = vrot.lane.b32.xlu1 %v8247_v34, %s8470_s28  ;;  %s8488_s26 = smov 68  }
 0x13b   : > { %500 = vrot.lane.b32.xlu0 %v475_v33, %s8466_s11 }
 0x13d   : > { %8253 = vrot.lane.b32.xlu2 %v8247_v34, %s8471_s29  ;;  %8258 = vrot.lane.b32.xlu1 %v8247_v34, %s8472_s10 }
 0x145   : > { %488 = vrot.lane.b32.xlu2 %v475_v33, %s8467_s12  ;;  %482 = vrot.lane.b32.xlu1 %v475_v33, %s8468_s13 }
 0x18f   : > { %v8249_v35 = vpop.permute.xlu2 %8248 }
 0x190   : > { %v8250_v38 = vunpack.i.l.bf16 %v8249_v35  ;;  %v8251_v41 = vunpack.i.h.bf16 %v8249_v35 }
 0x192   : > { %v560_v44 = vrot.slane %v8250_v38, 4  ;;  %v672_v46 = vrot.slane %v8251_v41, 4 }
 0x197   : > { %v8254_v36 = vpop.permute.xlu2 %8253 }
 0x198   : > { %v8255_v37 = vunpack.i.l.bf16 %v8254_v36  ;;  %v8256_v39 = vunpack.i.h.bf16 %v8254_v36 }
 0x19a   : > { %v558_v43 = vrot.slane %v8255_v37, 4  ;;  %v670_v45 = vrot.slane %v8256_v39, 4  ;;  %v561_v47 = vsel %vm295_vm0, %v8255_v37, %v560_v44  ;;  %v673_v49 = vsel %vm295_vm0, %v8256_v39, %v672_v46 }
 0x19b   : > { %v569_v54 = vperm.slane %v561_v47, %v8581_v12  ;;  %v681_v57 = vperm.slane %v673_v49, %v8581_v12 }
 0x19c   : > { %v559_v48 = vsel %vm295_vm0, %v558_v43, %v8250_v38  ;;  %v671_v50 = vsel %vm295_vm0, %v670_v45, %v8251_v41 }
 0x19d   : > { %v487_v40 = vpop.permute.xlu0 %486  ;;  %v499_v42 = vpop.permute.xlu1 %498  ;;  %v565_v56 = vperm.slane %v559_v48, %v8581_v12  ;;  %v677_v60 = vperm.slane %v671_v50, %v8581_v12  ;;  %v606_v3 = vrot.slane %v569_v54, 4  ;;  %v718_v8 = vrot.slane %v681_v57, 4 }
 0x19e   : > { %v522_v51 = vrot.slane %v487_v40, 4  ;;  %v525_v58 = vsel %vm295_vm0, %v487_v40, %v524_v52  ;;  %v548_v61 = vrot.slane %v499_v42, 4 }
 0x19f   : > { %v489_v55 = vpop.permute.xlu2 %488  ;;  %v8670_v4 = vperm.slane %v525_v58, %v8581_v12  ;;  %v594_v7 = vrot.slane %v565_v56, 4  ;;  %v706_v11 = vrot.slane %v677_v60, 4 }
 0x1a0   : > { %v523_v0 = vsel %vm295_vm0, %v522_v51, %v472_v32  ;;  %v634_v1 = vrot.slane %v489_v55, 4  ;;  %v637_v9 = vsel %vm295_vm0, %v489_v55, %v636_v2 }
 0x1a1   : > { %v8676_v13 = vperm.slane %v523_v0, %v8581_v12  ;;  %v584_v22 = vrot.slane %v8670_v4, 4  ;;  %v8684_v23 = vperm.slane %v637_v9, %v8581_v12 }
 0x1a2   : > { %v635_v16 = vsel %vm295_vm0, %v634_v1, %v475_v33 }
 0x1a3   : > { %v572_v31 = vrot.slane %v8676_v13, 4  ;;  %v641_v32 = vperm.slane %v635_v16, %v8581_v12  ;;  %v696_v48 = vrot.slane %v8684_v23, 4 }
 0x1a5   : > { %v8661_v53 = vpop.permute.xlu0 %480  ;;  %v684_v47 = vrot.slane %v641_v32, 4 }
 0x1a6   : > { %v536_v49 = vrot.slane %v8661_v53, 4 }
 0x1a7   : > { %v8244_v59 = vpop.permute.xlu1 %8243 }
 0x1a8   : > { %v8246_v62 = vunpack.i.h.bf16 %v8244_v59  ;;  %v8245_v63 = vunpack.i.l.bf16 %v8244_v59 }
 0x1aa   : > { %v546_v5 = vrot.slane %v8245_v63, 4  ;;  %v549_v6 = vsel %vm295_vm0, %v8245_v63, %v548_v61  ;;  %v658_v14 = vrot.slane %v8246_v62, 4 }
 0x1ab   : > { %v557_v10 = vperm.slane %v549_v6, %v8581_v12 }
 0x1ac   : > { %v547_v15 = vsel %vm295_vm0, %v546_v5, %v499_v42 }
 0x1ad   : > { %v553_v17 = vperm.slane %v547_v15, %v8581_v12  ;;  %v607_v18 = vsel %vm295_vm0, %v606_v3, %v557_v10  ;;  %v608_v20 = vrot.slane %v557_v10, 4  ;;  %v501_v21 = vpop.permute.xlu0 %500 }
 0x1ae   : > { %v659_v24 = vsel %vm295_vm0, %v658_v14, %v501_v21  ;;  %v660_v25 = vrot.slane %v501_v21, 4  ;;  %v8693_v33 = vperm.slane %v607_v18, %v8583_v19 }
 0x1af   : > { %v595_v26 = vsel %vm295_vm0, %v594_v7, %v553_v17  ;;  %v596_v27 = vrot.slane %v553_v17, 4  ;;  %v609_v28 = vsel %vm295_vm0, %v569_v54, %v608_v20  ;;  %v665_v29 = vperm.slane %v659_v24, %v8581_v12  ;;  %v8259_v30 = vpop.permute.xlu1 %8258 }
 0x1b0   : > { %v661_v34 = vsel %vm295_vm0, %v8246_v62, %v660_v25  ;;  %v8700_v39 = vperm.slane %v595_v26, %v8583_v19  ;;  %v617_v41 = vperm.slane %v609_v28, %v8583_v19  ;;  %v8261_v46 = vunpack.i.h.bf16 %v8259_v30 }
 0x1b1   : > { %v597_v35 = vsel %vm295_vm0, %v565_v56, %v596_v27  ;;  %v669_v36 = vperm.slane %v661_v34, %v8581_v12  ;;  %v707_v37 = vsel %vm295_vm0, %v706_v11, %v665_v29  ;;  %v708_v38 = vrot.slane %v665_v29, 4 }
 0x1b2   : > { %v8703_v40 = vperm.slane %v597_v35, %v8583_v19  ;;  %v8707_v42 = vperm.slane %v707_v37, %v8583_v19  ;;  %v626_v51 = vrot.slane %v8693_v33, 4  ;;  %v8260_v55 = vunpack.i.l.bf16 %v8259_v30 }
 0x1b3   : > { %v709_v43 = vsel %vm295_vm0, %v677_v60, %v708_v38  ;;  %v719_v44 = vsel %vm295_vm0, %v718_v8, %v669_v36  ;;  %v720_v45 = vrot.slane %v669_v36, 4  ;;  %v618_v56 = vrot.slane %v8700_v39, 4 }
 0x1b4   : > { %v8714_v50 = vperm.slane %v709_v43, %v8583_v19  ;;  %v8719_v54 = vperm.slane %v719_v44, %v8583_v19  ;;  %v630_v58 = vrot.slane %v617_v41, 4  ;;  %v646_v60 = vrot.slane %v8261_v46, 4 }
 0x1b5   : > { %v721_v52 = vsel %vm295_vm0, %v681_v57, %v720_v45  ;;  %v622_v61 = vrot.slane %v8703_v40, 4  ;;  %v730_v62 = vrot.slane %v8707_v42, 4  ;;  %v534_v63 = vrot.slane %v8260_v55, 4 }
 0x1b6   : > { %v8723_v59 = vperm.slane %v721_v52, %v8583_v19  ;;  %v537_v0 = vsel %vm295_vm0, %v8260_v55, %v536_v49  ;;  %v734_v57 = vrot.slane %v8714_v50, 4  ;;  %v738_v6 = vrot.slane %v8719_v54, 4 }
 0x1b7   : > { %v483_v1 = vpop.permute.xlu1 %482  ;;  %v545_v2 = vperm.slane %v537_v0, %v8581_v12  ;;  %v535_v8 = vsel %vm295_vm0, %v534_v63, %v8661_v53 }
 0x1b8   : > { %v647_v3 = vsel %vm295_vm0, %v646_v60, %v483_v1  ;;  %v648_v5 = vrot.slane %v483_v1, 4  ;;  %v742_v7 = vrot.slane %v8723_v59, 4  ;;  %v541_v10 = vperm.slane %v535_v8, %v8581_v12 }
 0x1b9   : > { %v653_v9 = vperm.slane %v647_v3, %v8581_v12  ;;  %v582_v11 = vrot.slane %v545_v2, 4  ;;  %v585_v14 = vsel %vm295_vm0, %v545_v2, %v584_v22 }
 0x1ba   : > { %v649_v15 = vsel %vm295_vm0, %v8261_v46, %v648_v5  ;;  %v593_v16 = vperm.slane %v585_v14, %v8583_v19  ;;  %v570_v21 = vrot.slane %v541_v10, 4  ;;  %v573_v24 = vsel %vm295_vm0, %v541_v10, %v572_v31 }
 0x1bb   : > { %v657_v17 = vperm.slane %v649_v15, %v8581_v12  ;;  %v682_v18 = vrot.slane %v653_v9, 4  ;;  %v685_v20 = vsel %vm295_vm0, %v653_v9, %v684_v47  ;;  %v583_v53 = vsel %vm295_vm0, %v582_v11, %v8670_v4 }
 0x1bc   : > { %v8746_v25 = vperm.slane %v685_v20, %v8583_v19  ;;  %v581_v22 = vperm.slane %v573_v24, %v8583_v19  ;;  %v589_v26 = vperm.slane %v583_v53, %v8583_v19  ;;  %v631_v27 = vsel %vm295_vm0, %v630_v58, %v593_v16 }
 0x1bd   : > { %v632_v28 = vrot.slane %v593_v16, 4  ;;  %v571_v29 = vsel %vm295_vm0, %v570_v21, %v8676_v13  ;;  %v770_v30 = vrot.slane %v631_v27, 4  ;;  %v683_v34 = vsel %vm295_vm0, %v682_v18, %v641_v32 }
 0x1be   : > { %v694_v31 = vrot.slane %v657_v17, 4  ;;  %v577_v35 = vperm.slane %v571_v29, %v8583_v19  ;;  %v623_v4 = vsel %vm295_vm0, %v622_v61, %v581_v22  ;;  %v624_v36 = vrot.slane %v581_v22, 4 }
 0x1bf   : > { %v627_v37 = vsel %vm295_vm0, %v626_v51, %v589_v26  ;;  %v628_v38 = vrot.slane %v589_v26, 4  ;;  %v633_v43 = vsel %vm295_vm0, %v617_v41, %v632_v28  ;;  %v746_v44 = vrot.slane %v623_v4, 4 }
 0x1c0   : > { %v771_v45 = vsel %vm295_vm0, %v770_v30, %v627_v37  ;;  %v619_v46 = vsel %vm295_vm0, %v618_v56, %v577_v35  ;;  %v620_v13 = vrot.slane %v577_v35, 4  ;;  %v625_v32 = vsel %vm295_vm0, %v8703_v40, %v624_v36 }
 0x1c1   : > { %v772_v47 = vrot.slane %v627_v37, 4  ;;  %v629_v49 = vsel %vm295_vm0, %v8693_v33, %v628_v38  ;;  %v747_v52 = vsel %vm295_vm0, %v746_v44, %v619_v46  ;;  %v748_v55 = vrot.slane %v619_v46, 4 }
 0x1c2   : > { %v758_v51 = vrot.slane %v625_v32, 4  ;;  %v621_v41 = vsel %vm295_vm0, %v8700_v39, %v620_v13  ;;  %v8768_v58 = vperm.slane %v747_v52, %v8581_v12  ;;  %v8772_v60 = vperm.slane %v771_v45, %v8581_v12 }
 0x1c3   : > { %v773_v56 = vsel %vm295_vm0, %v631_v27, %v772_v47  ;;  %v749_v40 = vsel %vm295_vm0, %v623_v4, %v748_v55  ;;  %v760_v33 = vrot.slane %v621_v41, 4  ;;  %v782_v1 = vrot.slane %v633_v43, 4 }
 0x1c4   : > { %v759_v61 = vsel %vm295_vm0, %v758_v51, %v621_v41  ;;  %v8777_v63 = vperm.slane %v773_v56, %v8581_v12  ;;  %v8780_v0 = vperm.slane %v749_v40, %v8581_v12  ;;  %v784_v2 = vrot.slane %v629_v49, 4 }
 0x1c5   : > { %v8783_v39 = vperm.slane %v759_v61, %v8581_v12  ;;  %v761_v3 = vsel %vm295_vm0, %v625_v32, %v760_v33  ;;  %v796_v5 = vrot.slane %v8768_v58, 4  ;;  %v820_v8 = vrot.slane %v8772_v60, 4 }
 0x1c6   : > { %v832_v9 = vrot.slane %v8777_v63, 4  ;;  %v8790_v10 = vperm.slane %v761_v3, %v8581_v12  ;;  %v783_v11 = vsel %vm295_vm0, %v782_v1, %v629_v49  ;;  %v785_v14 = vsel %vm295_vm0, %v633_v43, %v784_v2 }
 0x1c7   : > { %v794_v15 = vrot.slane %v8783_v39, 4  ;;  %v8796_v16 = vperm.slane %v783_v11, %v8581_v12  ;;  %v8799_v18 = vperm.slane %v785_v14, %v8581_v12  ;;  %v808_v20 = vrot.slane %v8780_v0, 4 }
 0x1c8   : > { %v689_v21 = vperm.slane %v683_v34, %v8583_v19  ;;  %v806_v24 = vrot.slane %v8790_v10, 4  ;;  %v695_v53 = vsel %vm295_vm0, %v694_v31, %v8684_v23  ;;  %v697_v22 = vsel %vm295_vm0, %v657_v17, %v696_v48 }
 0x1c9   : > { %v735_v26 = vsel %vm295_vm0, %v734_v57, %v8746_v25  ;;  %v818_v27 = vrot.slane %v8796_v16, 4  ;;  %v830_v28 = vrot.slane %v8799_v18, 4  ;;  %v701_v29 = vperm.slane %v695_v53, %v8583_v19 }
 0x1ca   : > { %v705_v30 = vperm.slane %v697_v22, %v8583_v19  ;;  %v731_v34 = vsel %vm295_vm0, %v730_v62, %v689_v21  ;;  %v732_v23 = vrot.slane %v689_v21, 4  ;;  %v736_v48 = vrot.slane %v8746_v25, 4 }
 0x1cb   : > { %v858_v17 = vrot.slane %v735_v26, 4  ;;  %v739_v57 = vsel %vm295_vm0, %v738_v6, %v701_v29  ;;  %v740_v31 = vrot.slane %v701_v29, 4  ;;  %v860_v25 = vrot.slane %v731_v34, 4 }
 0x1cc   : > { %v743_v35 = vsel %vm295_vm0, %v742_v7, %v705_v30  ;;  %v744_v4 = vrot.slane %v705_v30, 4  ;;  %v733_v36 = vsel %vm295_vm0, %v8707_v42, %v732_v23  ;;  %v737_v62 = vsel %vm295_vm0, %v8714_v50, %v736_v48 }
 0x1cd   : > { %v859_v37 = vsel %vm295_vm0, %v858_v17, %v731_v34  ;;  %v741_v38 = vsel %vm295_vm0, %v8719_v54, %v740_v31  ;;  %v870_v7 = vrot.slane %v737_v62, 4  ;;  %v861_v44 = vsel %vm295_vm0, %v735_v26, %v860_v25 }
 0x1ce   : > { %v745_v6 = vsel %vm295_vm0, %v8723_v59, %v744_v4  ;;  %v8837_v43 = vperm.slane %v859_v37, %v8581_v12  ;;  %v872_v45 = vrot.slane %v733_v36, 4  ;;  %v882_v42 = vrot.slane %v743_v35, 4 }
 0x1cf   : > { %v884_v46 = vrot.slane %v739_v57, 4  ;;  %v8841_v50 = vperm.slane %v861_v44, %v8581_v12  ;;  %v871_v13 = vsel %vm295_vm0, %v870_v7, %v733_v36  ;;  %v894_v32 = vrot.slane %v745_v6, 4 }
 0x1d0   : > { %v896_v47 = vrot.slane %v741_v38, 4  ;;  %v873_v54 = vsel %vm295_vm0, %v737_v62, %v872_v45  ;;  %v8846_v59 = vperm.slane %v871_v13, %v8581_v12  ;;  %v883_v49 = vsel %vm295_vm0, %v882_v42, %v739_v57 }
 0x1d1   : > { %v885_v52 = vsel %vm295_vm0, %v743_v35, %v884_v46  ;;  %v8851_v55 = vperm.slane %v873_v54, %v8581_v12  ;;  %v8854_v51 = vperm.slane %v883_v49, %v8581_v12  ;;  %v895_v56 = vsel %vm295_vm0, %v894_v32, %v741_v38 }
 0x1d2   : > { %v8857_v41 = vperm.slane %v885_v52, %v8581_v12  ;;  %v897_v40 = vsel %vm295_vm0, %v745_v6, %v896_v47  ;;  %v8862_v61 = vperm.slane %v895_v56, %v8581_v12  ;;  %v906_v33 = vrot.slane %v8846_v59, 4 }
 0x1d3   : > { %v908_v1 = vrot.slane %v8837_v43, 4  ;;  %v8867_v2 = vperm.slane %v897_v40, %v8581_v12  ;;  %v918_v3 = vrot.slane %v8851_v55, 4  ;;  %v920_v11 = vrot.slane %v8841_v50, 4 }
 0x1d4   : > { %v932_v14 = vrot.slane %v8854_v51, 4  ;;  %v930_v53 = vrot.slane %v8862_v61, 4  ;;  %v944_v22 = vrot.slane %v8857_v41, 4  ;;  %v795_v26 = vsel %vm295_vm0, %v794_v15, %v8768_v58 }
 0x1d5   : > { %v8874_v21 = vsel %vm295_vm0, %v8846_v59, %v908_v1  ;;  %v8882_v29 = vsel %vm295_vm0, %v8851_v55, %v920_v11  ;;  %v942_v30 = vrot.slane %v8867_v2, 4  ;;  %v797_v34 = vsel %vm295_vm0, %v8783_v39, %v796_v5 }
 0x1d6   : > { %v801_v23 = vperm.slane %v795_v26, %v8583_v19  ;;  %v805_v48 = vperm.slane %v797_v34, %v8583_v19  ;;  %v807_v17 = vsel %vm295_vm0, %v806_v24, %v8780_v0  ;;  %v809_v15 = vsel %vm295_vm0, %v8790_v10, %v808_v20 }
 0x1d7   : > { %v819_v57 = vsel %vm295_vm0, %v818_v27, %v8772_v60  ;;  %v813_v31 = vperm.slane %v807_v17, %v8583_v19  ;;  %v817_v58 = vperm.slane %v809_v15, %v8583_v19  ;;  %v821_v39 = vsel %vm295_vm0, %v8796_v16, %v820_v8 }
 0x1d8   : > { %v825_v5 = vperm.slane %v819_v57, %v8583_v19  ;;  %v829_v35 = vperm.slane %v821_v39, %v8583_v19  ;;  %v831_v0 = vsel %vm295_vm0, %v830_v28, %v8777_v63  ;;  %v833_v10 = vsel %vm295_vm0, %v8799_v18, %v832_v9 }
 0x1d9   : > { %v844_v20 = vrot.slane %v801_v23, 4  ;;  %v837_v24 = vperm.slane %v831_v0, %v8583_v19  ;;  %v841_v60 = vperm.slane %v833_v10, %v8583_v19  ;;  %v848_v4 = vrot.slane %v805_v48, 4 }
 0x1da   : > { %v842_v27 = vrot.slane %v825_v5, 4  ;;  %v846_v16 = vrot.slane %v829_v35, 4  ;;  %v852_v36 = vrot.slane %v813_v31, 4  ;;  %v856_v62 = vrot.slane %v817_v58, 4 }
 0x1db   : > { %v845_v8 = vsel %vm295_vm0, %v825_v5, %v844_v20  ;;  %v849_v28 = vsel %vm295_vm0, %v829_v35, %v848_v4  ;;  %v850_v63 = vrot.slane %v837_v24, 4  ;;  %v854_v25 = vrot.slane %v841_v60, 4 }
 0x1dc   : > { %v843_v37 = vsel %vm295_vm0, %v842_v27, %v801_v23  ;;  %v847_v9 = vsel %vm295_vm0, %v846_v16, %v805_v48  ;;  %v853_v18 = vsel %vm295_vm0, %v837_v24, %v852_v36  ;;  %v857_v38 = vsel %vm295_vm0, %v841_v60, %v856_v62 }
 0x1dd   : > { %v974_v6 = vrot.slane %v843_v37, 4  ;;  %v851_v7 = vsel %vm295_vm0, %v850_v63, %v813_v31  ;;  %v855_v44 = vsel %vm295_vm0, %v854_v25, %v817_v58  ;;  %v972_v45 = vrot.slane %v847_v9, 4 }
 0x1de   : > { %v984_v42 = vrot.slane %v849_v28, 4  ;;  %v986_v46 = vrot.slane %v845_v8, 4  ;;  %v996_v13 = vrot.slane %v855_v44, 4  ;;  %v998_v32 = vrot.slane %v851_v7, 4 }
 0x1df   : > { %v1008_v47 = vrot.slane %v857_v38, 4  ;;  %v973_v54 = vsel %vm295_vm0, %v972_v45, %v843_v37  ;;  %v1010_v52 = vrot.slane %v853_v18, 4  ;;  %v975_v56 = vsel %vm295_vm0, %v847_v9, %v974_v6 }
 0x1e0   : > { %v985_v49 = vsel %vm295_vm0, %v984_v42, %v845_v8  ;;  %v979_v40 = vperm.slane %v973_v54, %v8581_v12  ;;  %v997_v11 = vsel %vm295_vm0, %v996_v13, %v851_v7  ;;  %v983_v48 = vperm.slane %v975_v56, %v8581_v12 }
 0x1e1   : > { %v991_v1 = vperm.slane %v985_v49, %v8581_v12  ;;  %v1009_v26 = vsel %vm295_vm0, %v1008_v47, %v853_v18  ;;  %v1003_v34 = vperm.slane %v997_v11, %v8581_v12  ;;  %v987_v17 = vsel %vm295_vm0, %v849_v28, %v986_v46 }
 0x1e2   : > { %v1015_v23 = vperm.slane %v1009_v26, %v8581_v12  ;;  %v1022_v15 = vrot.slane %v979_v40, 4  ;;  %v995_v57 = vperm.slane %v987_v17, %v8581_v12  ;;  %v999_v31 = vsel %vm295_vm0, %v855_v44, %v998_v32 }
 0x1e3   : > { %v1011_v58 = vsel %vm295_vm0, %v857_v38, %v1010_v52  ;;  %v1046_v39 = vrot.slane %v1003_v34, 4  ;;  %v1007_v5 = vperm.slane %v999_v31, %v8581_v12  ;;  %v1034_v0 = vrot.slane %v983_v48, 4 }
 0x1e4   : > { %v1019_v35 = vperm.slane %v1011_v58, %v8581_v12  ;;  %v1023_v10 = vsel %vm295_vm0, %v991_v1, %v1022_v15  ;;  %v1032_v20 = vrot.slane %v995_v57, 4  ;;  %v1020_v24 = vrot.slane %v991_v1, 4 }
 0x1e5   : > { %v1044_v60 = vrot.slane %v1015_v23, 4  ;;  %v1031_v27 = vperm.slane %v1023_v10, %v8583_v19  ;;  %v1047_v4 = vsel %vm295_vm0, %v1015_v23, %v1046_v39  ;;  %v1035_v8 = vsel %vm295_vm0, %v995_v57, %v1034_v0 }
 0x1e6   : > { %v1058_v16 = vrot.slane %v1007_v5, 4  ;;  %v1055_v36 = vperm.slane %v1047_v4, %v8583_v19  ;;  %v1043_v62 = vperm.slane %v1035_v8, %v8583_v19  ;;  %v1033_v37 = vsel %vm295_vm0, %v1032_v20, %v983_v48 }
 0x1e7   : > { %v1056_v28 = vrot.slane %v1019_v35, 4  ;;  %v1074_v63 = vrot.slane %v1031_v27, 4  ;;  %v8946_v9 = vperm.slane %v1033_v37, %v8583_v19  ;;  %v1021_v18 = vsel %vm295_vm0, %v1020_v24, %v979_v40 }
 0x1e8   : > { %v1059_v25 = vsel %vm295_vm0, %v1019_v35, %v1058_v16  ;;  %v1082_v6 = vrot.slane %v1043_v62, 4  ;;  %v1072_v7 = vrot.slane %v1055_v36, 4  ;;  %v8957_v13 = vperm.slane %v1021_v18, %v8583_v19 }
 0x1e9   : > { %v1067_v38 = vperm.slane %v1059_v25, %v8583_v19  ;;  %v1057_v44 = vsel %vm295_vm0, %v1056_v28, %v1007_v5  ;;  %v1075_v45 = vsel %vm295_vm0, %v1055_v36, %v1074_v63  ;;  %v1078_v46 = vrot.slane %v8946_v9, 4 }
 0x1ea   : > { %v8953_v42 = vperm.slane %v1057_v44, %v8583_v19  ;;  %1205 = vrot.lane.b32.xlu1 %v1075_v45, %s8459_s14  ;;  %v1073_v47 = vsel %vm295_vm0, %v1072_v7, %v1031_v27  ;;  %v1045_v49 = vsel %vm295_vm0, %v1044_v60, %v1003_v34  ;;  %v1070_v56 = vrot.slane %v8957_v13, 4  ;;  %s8473_s14 = smov 36  }
 0x1eb   : > { %v1083_v32 = vsel %vm295_vm0, %v1067_v38, %v1082_v6  ;;  %v1080_v54 = vrot.slane %v1067_v38, 4  ;;  %1201 = vrot.lane.b32.xlu0 %v1073_v47, %s8463_s18  ;;  %v8966_v52 = vperm.slane %v1045_v49, %v8583_v19  ;;  %v907_v40 = vsel %vm295_vm0, %v906_v33, %v8837_v43  ;;  %s8476_s18 = smov 48  }
 0x1ec   : > { %1221 = vrot.lane.b32.xlu2 %v1083_v32, %s8465_s20  ;;  %v1079_v1 = vsel %vm295_vm0, %v8953_v42, %v1078_v46  ;;  %v913_v11 = vperm.slane %v907_v40, %v8583_v19  ;;  %v917_v26 = vperm.slane %v8874_v21, %v8583_v19  ;;  %v919_v34 = vsel %vm295_vm0, %v918_v3, %v8841_v50  ;;  %s8478_s20 = smov 52  }
 0x1ed   : > { %v1081_v23 = vsel %vm295_vm0, %v1080_v54, %v1043_v62  ;;  %v1071_v59 = vsel %vm295_vm0, %v8966_v52, %v1070_v56  ;;  %v925_v43 = vperm.slane %v919_v34, %v8583_v19  ;;  %v929_v33 = vperm.slane %v8882_v29, %v8583_v19 }
 0x1ee   : > { %v931_v21 = vsel %vm295_vm0, %v930_v53, %v8854_v51  ;;  %v933_v50 = vsel %vm295_vm0, %v8862_v61, %v932_v14  ;;  %v943_v55 = vsel %vm295_vm0, %v942_v30, %v8857_v41  ;;  %v945_v3 = vsel %vm295_vm0, %v8867_v2, %v944_v22 }
 0x1ef   : > { %v937_v29 = vperm.slane %v931_v21, %v8583_v19  ;;  %v941_v48 = vperm.slane %v933_v50, %v8583_v19  ;;  %v949_v53 = vperm.slane %v943_v55, %v8583_v19  ;;  %v953_v51 = vperm.slane %v945_v3, %v8583_v19 }
 0x1f0   : > { %v956_v17 = vrot.slane %v913_v11, 4  ;;  %v960_v61 = vrot.slane %v917_v26, 4  ;;  %v964_v14 = vrot.slane %v925_v43, 4  ;;  %v968_v15 = vrot.slane %v929_v33, 4 }
 0x1f1   : > { %v954_v57 = vrot.slane %v937_v29, 4  ;;  %v958_v31 = vrot.slane %v941_v48, 4  ;;  %v962_v30 = vrot.slane %v949_v53, 4  ;;  %v966_v58 = vrot.slane %v953_v51, 4 }
 0x1f2   : > { %1217 = vrot.lane.b32.xlu1 %v1081_v23, %s8464_s19  ;;  %v957_v41 = vsel %vm295_vm0, %v937_v29, %v956_v17  ;;  %v961_v2 = vsel %vm295_vm0, %v941_v48, %v960_v61  ;;  %v965_v22 = vsel %vm295_vm0, %v949_v53, %v964_v14  ;;  %v969_v39 = vsel %vm295_vm0, %v953_v51, %v968_v15  ;;  %s8477_s19 = smov 44  }
 0x1f3   : > { %1213 = vrot.lane.b32.xlu0 %v1079_v1, %s8461_s16  ;;  %v955_v5 = vsel %vm295_vm0, %v954_v57, %v913_v11  ;;  %v959_v35 = vsel %vm295_vm0, %v958_v31, %v917_v26  ;;  %v963_v0 = vsel %vm295_vm0, %v962_v30, %v925_v43  ;;  %v1096_v10 = vrot.slane %v961_v2, 4  ;;  %s8474_s16 = smov 32  }
 0x1f4   : > { %1197 = vrot.lane.b32.xlu2 %v1071_v59, %s11695_s15  ;;  %v967_v20 = vsel %vm295_vm0, %v966_v58, %v929_v33  ;;  %v1084_v24 = vrot.slane %v959_v35, 4  ;;  %v1110_v60 = vrot.slane %v963_v0, 4  ;;  %v1120_v27 = vrot.slane %v969_v39, 4  ;;  %s8485_s15 = smov 92  }
 0x1f5   : > { %v1097_v4 = vsel %vm295_vm0, %v1096_v10, %v957_v41  ;;  %v1108_v8 = vrot.slane %v967_v20, 4  ;;  %v1122_v16 = vrot.slane %v965_v22, 4  ;;  %v1076_v36 = vrot.slane %v8953_v42, 4 }
 0x1f6   : > { %v1085_v62 = vsel %vm295_vm0, %v1084_v24, %v955_v5  ;;  %v1103_v37 = vperm.slane %v1097_v4, %v8581_v12  ;;  %v1121_v28 = vsel %vm295_vm0, %v1120_v27, %v965_v22  ;;  %v1086_v63 = vrot.slane %v955_v5, 4 }
 0x1f7   : > { %v1091_v25 = vperm.slane %v1085_v62, %v8581_v12  ;;  %v1109_v18 = vsel %vm295_vm0, %v1108_v8, %v963_v0  ;;  %v1127_v38 = vperm.slane %v1121_v28, %v8581_v12  ;;  %v1077_v44 = vsel %vm295_vm0, %v1076_v36, %v8946_v9 }
 0x1f8   : > { %v1115_v6 = vperm.slane %v1109_v18, %v8581_v12  ;;  %v1132_v7 = vrot.slane %v1103_v37, 4  ;;  %v1098_v45 = vrot.slane %v957_v41, 4  ;;  %v1087_v46 = vsel %vm295_vm0, %v959_v35, %v1086_v63 }
 0x1f9   : > { %v1156_v42 = vrot.slane %v1127_v38, 4  ;;  %v1111_v32 = vsel %vm295_vm0, %v967_v20, %v1110_v60  ;;  %v1123_v47 = vsel %vm295_vm0, %v969_v39, %v1122_v16  ;;  %v1134_v26 = vrot.slane %v1091_v25, 4 }
 0x1fa   : > { %v1133_v54 = vsel %vm295_vm0, %v1132_v7, %v1091_v25  ;;  %v1099_v49 = vsel %vm295_vm0, %v961_v2, %v1098_v45  ;;  %v1119_v56 = vperm.slane %v1111_v32, %v8581_v12  ;;  %v1131_v40 = vperm.slane %v1123_v47, %v8581_v12 }
 0x1fb   : > { %v1139_v1 = vperm.slane %v1133_v54, %v8583_v19  ;;  %v1157_v9 = vsel %vm295_vm0, %v1156_v42, %v1115_v6  ;;  %v1107_v11 = vperm.slane %v1099_v49, %v8581_v12  ;;  %v1095_v23 = vperm.slane %v1087_v46, %v8581_v12 }
 0x1fc   : > { %1209 = vrot.lane.b32.xlu2 %v1077_v44, %s8462_s17  ;;  %v1163_v34 = vperm.slane %v1157_v9, %v8583_v19  ;;  %v1168_v59 = vrot.slane %v1131_v40, 4  ;;  %v1158_v43 = vrot.slane %v1115_v6, 4  ;;  %v1135_v50 = vsel %vm295_vm0, %v1103_v37, %v1134_v26  ;;  %s8475_s17 = smov 40  }
 0x1fd   : > { %v1182_v33 = vrot.slane %v1139_v1, 4  ;;  %v1144_v21 = vrot.slane %v1107_v11, 4  ;;  %v1068_v55 = vrot.slane %v8966_v52, 4  ;;  %v1143_v15 = vperm.slane %v1135_v50, %v8583_v19  ;;  %v971_v50 = vld [vmem:[%s11691_s3 + $0x8] sm:$0xff] }
 0x1fe   : > { %v1180_v3 = vrot.slane %v1163_v34, 4  ;;  %v1169_v29 = vsel %vm295_vm0, %v1168_v59, %v1119_v56  ;;  %v1159_v48 = vsel %vm295_vm0, %v1127_v38, %v1158_v43  ;;  %v1146_v52 = vrot.slane %v1095_v23, 4 }
 0x1ff   : > { %v1183_v53 = vsel %vm295_vm0, %v1163_v34, %v1182_v33  ;;  %v1175_v51 = vperm.slane %v1169_v29, %v8583_v19  ;;  %v1167_v17 = vperm.slane %v1159_v48, %v8583_v19  ;;  %v1145_v14 = vsel %vm295_vm0, %v1144_v21, %v1095_v23  ;;  %v970_v33 = vld [vmem:[%s11691_s3] sm:$0xff] }
 0x200   : > { %1229 = vrot.lane.b32.xlu1 %v1183_v53, %s8473_s14  ;;  %v1181_v61 = vsel %vm295_vm0, %v1180_v3, %v1139_v1  ;;  %v1170_v31 = vrot.slane %v1119_v56, 4  ;;  %v1069_v30 = vsel %vm295_vm0, %v1068_v55, %v8957_v13  ;;  %v1151_v58 = vperm.slane %v1145_v14, %v8583_v19  ;;  %s8479_s14 = smov 60  }
 0x201   : > { %1225 = vrot.lane.b32.xlu0 %v1181_v61, %s8474_s16  ;;  %v1184_v57 = vrot.slane %v1167_v17, 4  ;;  %v1188_v41 = vrot.slane %v1175_v51, 4  ;;  %v1186_v22 = vrot.slane %v1143_v15, 4  ;;  %v1147_v39 = vsel %vm295_vm0, %v1107_v11, %v1146_v52  ;;  %s8480_s16 = smov 56  }
 0x202   : > { %v1171_v5 = vsel %vm295_vm0, %v1131_v40, %v1170_v31  ;;  %v1155_v0 = vperm.slane %v1147_v39, %v8583_v19  ;;  %v1190_v10 = vrot.slane %v1151_v58, 4 }
 0x203   : > { %v1185_v2 = vsel %vm295_vm0, %v1184_v57, %v1143_v15  ;;  %v1189_v35 = vsel %vm295_vm0, %v1188_v41, %v1151_v58  ;;  %v1187_v13 = vsel %vm295_vm0, %v1167_v17, %v1186_v22  ;;  %v1179_v20 = vperm.slane %v1171_v5, %v8583_v19 }
 0x204   : > { %1233 = vrot.lane.b32.xlu2 %v1185_v2, %s8475_s17  ;;  %v1194_v24 = vrot.slane %v1155_v0, 4  ;;  %v1191_v60 = vsel %vm295_vm0, %v1175_v51, %v1190_v10  ;;  %s8483_s17 = smov 80  }
 0x205   : > { %v1192_v27 = vrot.slane %v1179_v20, 4 }
 0x206   : > { %v1195_v4 = vsel %vm295_vm0, %v1179_v20, %v1194_v24 }
 0x207   : > { %v1193_v8 = vsel %vm295_vm0, %v1192_v27, %v1155_v0 }
 0x208   : > { %1241 = vrot.lane.b32.xlu1 %v1189_v35, %s8476_s18  ;;  %s8484_s18 = smov 88  }
 0x209   : > { %1237 = vrot.lane.b32.xlu0 %v1187_v13, %s8477_s19  ;;  %s8486_s19 = smov 72  }
 0x20c   : > { %1245 = vrot.lane.b32.xlu2 %v1191_v60, %s8478_s20  ;;  %s8487_s20 = smov 84  }
 0x210   : > { %1253 = vrot.lane.b32.xlu1 %v1195_v4, %s8479_s14  ;;  %s8481_s14 = smov 76  }
 0x211   : > { %1249 = vrot.lane.b32.xlu0 %v1193_v8, %s8480_s16  ;;  %s8482_s16 = smov 96  }
 0x246   : > { %v1222_v16 = vpop.permute.xlu2 %1221 }
 0x24e   : > { %v1198_v37 = vpop.permute.xlu2 %1197 }
 0x24f   : > { %v1256_v28 = vsel %vm435_vm1, %v1069_v30, %v1198_v37 }
 0x256   : > { %v1210_v6 = vpop.permute.xlu2 %1209 }
 0x25c   : > { %v1206_v36 = vpop.permute.xlu1 %1205 }
 0x25d   : > { %v1202_v62 = vpop.permute.xlu0 %1201 }
 0x25e   : > { %v1257_v63 = vsel %vm437_vm2, %v1256_v28, %v1202_v62  ;;  %v1234_v54 = vpop.permute.xlu2 %1233 }
 0x25f   : > { %v1258_v38 = vsel %vm439_vm3, %v1257_v63, %v1206_v36  ;;  %vm2306_vm3 = vsmask.f32 256 }
 0x260   : > { %v1259_v7 = vsel %vm441_vm4, %v1258_v38, %v1210_v6  ;;  %vm2482_vm4 = vsmask.f32 4368 }
 0x264   : > { %v1218_v25 = vpop.permute.xlu1 %1217 }
 0x265   : > { %v1214_v18 = vpop.permute.xlu0 %1213 }
 0x266   : > { %v1260_v44 = vsel %vm443_vm5, %v1259_v7, %v1214_v18  ;;  %v1246_v26 = vpop.permute.xlu2 %1245  ;;  %vm9832_vm5 = vmor %vm2306_vm3, %vm2482_vm4 }
 0x267   : > { %v1261_v45 = vsel %vm445_vm6, %v1260_v44, %v1218_v25  ;;  %vm2299_vm6 = vcmask 57344  }
 0x268   : > { %v1262_v32 = vsel %vm447_vm7, %v1261_v45, %v1222_v16  ;;  %vm9909_vm7 = vmand %vm2299_vm6, %vm2306_vm3 }
 0x272   : > { %v1230_v42 = vpop.permute.xlu1 %1229 }
 0x273   : > { %v1226_v46 = vpop.permute.xlu0 %1225 }
 0x274   : > { %v1264_v47 = vsel %vm1263_vm8, %v1262_v32, %v1226_v46  ;;  %vm2362_vm8 = vsmask.f32 7938 }
 0x275   : > { %v1266_v49 = vsel %vm1265_vm9, %v1264_v47, %v1230_v42  ;;  %vm2805_vm9 = vcmask 27648  }
 0x276   : > { %v1268_v1 = vsel %vm1267_vm10, %v1266_v49, %v1234_v54  ;;  %vm9940_vm10 = vmand %vm2805_vm9, %vm2362_vm8 }
 0x27a   : > { %v1242_v56 = vpop.permute.xlu1 %1241 }
 0x27b   : > { %v1238_v40 = vpop.permute.xlu0 %1237 }
 0x27c   : > { %v1270_v9 = vsel %vm1269_vm11, %v1268_v1, %v1238_v40  ;;  %vm3370_vm11 = vcmask 60448  }
 0x27d   : > { %v1272_v11 = vsel %vm1271_vm12, %v1270_v9, %v1242_v56  ;;  %vm10076_vm12 = vmand %vm3370_vm11, %vm2362_vm8 }
 0x27e   : > { %v1274_v34 = vsel %vm1273_vm13, %v1272_v11, %v1246_v26  ;;  %vm2812_vm13 = vcmask 24576  }
 0x282   : > { %v1254_v59 = vpop.permute.xlu1 %1253 }
 0x283   : > { %v1250_v23 = vpop.permute.xlu0 %1249 }
 0x284   : > { %v1276_v43 = vsel %vm1275_vm14, %v1274_v34, %v1250_v23  ;;  %vm10256_vm14 = vmand %vm2812_vm13, %vm2306_vm3 }
 0x285   : > { %v1278_v21 = vsel %vm1277_vm15, %v1276_v43, %v1254_v59  ;;  %vm3377_vm15 = vcmask 57376  }
 0x286   : > { %1300 = vmatpush.msra.mxu1 %v1278_v21  ;;  %vm10333_vm4 = vmand %vm3377_vm15, %vm2306_vm3  ;;  %vm2296_vm3 = vcmask 60416   ;;  %vm3536_vm15 = vsmask.f32 3328 }
 0x287   : > { %7726 = vmatmul.msk.f32.vlgmr.msra.gmra.mxu1 %vm437_vm2, %v970_v33 }
 0x28f   : > { %7727 = vmatmul.msk.f32.gmra.mxu1 %vm437_vm2, %v971_v50 }
 0x304   : > { %v9081_v55 = vpop.f32.mrf.mxu1 }
 0x305   : > { %v1402_v36 = vrot.slane %v9081_v55, 4 }
 0x30c   : > { %v9083_v3 = vpop.f32.mrf.mxu1 }
 0x30d   : > { %v8272_v29 = vpack.i.bf16 %v9083_v3, %v9081_v55  ;;  %v1626_v59 = vrot.slane %v9083_v3, 4 }
 0x30f   : > { %8273 = vrot.lane.b32.xlu1 %v8272_v29, %s8481_s14  ;;  %8268 = vrot.lane.b32.xlu0 %v8272_v29, %s8482_s16  ;;  %s11704_s14 = smov 108  }
 0x310   : > { %8263 = vrot.lane.b32.xlu2 %v8272_v29, %s8483_s17 }
 0x317   : > { %8288 = vrot.lane.b32.xlu1 %v8272_v29, %s8484_s18  ;;  %8283 = vrot.lane.b32.xlu0 %v8272_v29, %s8485_s15  ;;  %s11705_s15 = smov 4  }
 0x318   : > { %8278 = vrot.lane.b32.xlu2 %v8272_v29, %s8486_s19  ;;  %s8413_s19 = scalar_lea.hbm %s11694_s6, 4 }
 0x31f   : > { %8303 = vrot.lane.b32.xlu1 %v8272_v29, %s8487_s20  ;;  %8298 = vrot.lane.b32.xlu0 %v8272_v29, %s8472_s10 }
 0x320   : > { %8293 = vrot.lane.b32.xlu2 %v8272_v29, %s8488_s26 }
 0x327   : > { %8318 = vrot.lane.b32.xlu1 %v8272_v29, %s8471_s29  ;;  %8313 = vrot.lane.b32.xlu0 %v8272_v29, %s8467_s12 }
 0x328   : > { %8308 = vrot.lane.b32.xlu2 %v8272_v29, %s8468_s13 }
 0x32f   : > { %8333 = vrot.lane.b32.xlu1 %v8272_v29, %s8466_s11  ;;  %8328 = vrot.lane.b32.xlu0 %v8272_v29, %s8470_s28  ;;  %s8117_s11 = sshll.u32 %s8575_s9, 8  ;;  %s265_s9 = sand.u32 1, %s8447_s22  }
 0x330   : > { %8323 = vrot.lane.b32.xlu2 %v8272_v29, %s11704_s14  ;;  %s9872_s26 = scalar_lea.vmem %s11689_s1, %s8117_s11  ;;  %s11348_s20 = scalar_lea.vmem %s11693_s5, %s8117_s11 }
 0x331   : > { %s7717_s11 = sshll.u32 %s265_s9, 1  ;;  %s8113_s14 = sshll.u32 %s8546_s25, 1 }
 0x332   : > { %s7612_s13 = scalar_lea.hbm %s11694_s6, %s8113_s14  ;;  %s7599_s25 = scalar_lea.sflag [#allocation4], %s265_s9 }
 0x333   : > { %s7616_s29 = sshll.u32 %s7612_s13, 4  ;;  %s7617_s29 = int_to_ptr.hbm [resolvable:$true] %s7616_s29 }
 0x334   : > { %s8407_s10 = sshra.s32 %s7617_s29, 4  ;;  %s8408_s10 = int_to_ptr.hbm [resolvable:$true] %s8407_s10 }
 0x335   : > { %s8409_s16 = scalar_lea.hbm %s8408_s10, 2  ;;  %p8414_p0 = scmp.lt.s32.totalorder %s8408_s10, %s11694_s6 }
 0x336   : > { %p8410_p11 = scmp.ne.s32.totalorder %s8408_s10, %s8409_s16  ;;  %p8415_p1 = scmp.lt.s32.totalorder %s8413_s19, %s8409_s16 }
 0x338   : > { %p8411_p12 = pnand %p8410_p11, %p8563_p5  ;;  %p8416_p2 = por %p8415_p1, %p8414_p0 }
 0x33a   : > { %p8412_p13 = pneg %p8411_p12 }
 0x33c   : > { %p8417_p3 = pnand %p8416_p2, %p8412_p13 }
 0x36a   : > { %v8264_v48 = vpop.permute.xlu2 %8263 }
 0x36b   : > { %v8265_v51 = vunpack.i.l.bf16 %v8264_v48  ;;  %v8266_v14 = vunpack.i.h.bf16 %v8264_v48 }
 0x36d   : > { %v1538_v15 = vrot.slane %v8265_v51, 4  ;;  %v1762_v58 = vrot.slane %v8266_v14, 4 }
 0x372   : > { %v8279_v53 = vpop.permute.xlu2 %8278 }
 0x373   : > { %v8281_v17 = vunpack.i.h.bf16 %v8279_v53  ;;  %v8280_v61 = vunpack.i.l.bf16 %v8279_v53 }
 0x375   : > { %v1760_v52 = vrot.slane %v8281_v17, 4  ;;  %v1536_v57 = vrot.slane %v8280_v61, 4  ;;  %v1539_v30 = vsel %vm295_vm0, %v8280_v61, %v1538_v15  ;;  %v1763_v35 = vsel %vm295_vm0, %v8281_v17, %v1762_v58 }
 0x376   : > { %v1547_v5 = vperm.slane %v1539_v30, %v8581_v12  ;;  %v1771_v16 = vperm.slane %v1763_v35, %v8581_v12 }
 0x377   : > { %v1537_v41 = vsel %vm295_vm0, %v1536_v57, %v8265_v51  ;;  %v1761_v2 = vsel %vm295_vm0, %v1760_v52, %v8266_v14 }
 0x378   : > { %v1543_v0 = vperm.slane %v1537_v41, %v8581_v12  ;;  %v1767_v10 = vperm.slane %v1761_v2, %v8581_v12  ;;  %v1598_v8 = vrot.slane %v1547_v5, 4  ;;  %v1822_v11 = vrot.slane %v1771_v16, 4 }
 0x37a   : > { %v8294_v31 = vpop.permute.xlu2 %8293  ;;  %v1586_v25 = vrot.slane %v1543_v0, 4  ;;  %v1810_v18 = vrot.slane %v1767_v10, 4 }
 0x37b   : > { %v8296_v22 = vunpack.i.h.bf16 %v8294_v31  ;;  %v8295_v39 = vunpack.i.l.bf16 %v8294_v31 }
 0x37d   : > { %v1772_v20 = vrot.slane %v8296_v22, 4  ;;  %v1548_v24 = vrot.slane %v8295_v39, 4 }
 0x381   : > { %v8274_v13 = vpop.permute.xlu1 %8273  ;;  %v9101_v4 = vpop.permute.xlu0 %8268 }
 0x382   : > { %v8276_v60 = vunpack.i.h.bf16 %v8274_v13  ;;  %v8275_v27 = vunpack.i.l.bf16 %v8274_v13  ;;  %v9109_v7 = vpop.permute.xlu2 %8308  ;;  %v8271_v42 = vunpack.i.h.bf16 %v9101_v4  ;;  %v8270_v46 = vunpack.i.l.bf16 %v9101_v4 }
 0x383   : > { %v8311_v1 = vunpack.i.h.bf16 %v9109_v7  ;;  %v8310_v9 = vunpack.i.l.bf16 %v9109_v7 }
 0x384   : > { %v1774_v62 = vrot.slane %v8276_v60, 4  ;;  %v1549_v37 = vsel %vm295_vm0, %v1548_v24, %v8275_v27  ;;  %v1550_v28 = vrot.slane %v8275_v27, 4  ;;  %v1773_v63 = vsel %vm295_vm0, %v1772_v20, %v8276_v60 }
 0x385   : > { %v1555_v38 = vperm.slane %v1549_v37, %v8581_v12  ;;  %v1779_v6 = vperm.slane %v1773_v63, %v8581_v12  ;;  %v1738_v50 = vrot.slane %v8271_v42, 4  ;;  %v1514_v51 = vrot.slane %v8270_v46, 4 }
 0x386   : > { %v1551_v44 = vsel %vm295_vm0, %v8295_v39, %v1550_v28  ;;  %v1775_v45 = vsel %vm295_vm0, %v8296_v22, %v1774_v62  ;;  %v9138_v14 = vrot.slane %v8311_v1, 4  ;;  %v9142_v15 = vrot.slane %v8310_v9, 4 }
 0x387   : > { %v1559_v32 = vperm.slane %v1551_v44, %v8581_v12  ;;  %v1584_v47 = vrot.slane %v1555_v38, 4  ;;  %v1587_v54 = vsel %vm295_vm0, %v1555_v38, %v1586_v25  ;;  %v1783_v49 = vperm.slane %v1775_v45, %v8581_v12 }
 0x388   : > { %v1808_v56 = vrot.slane %v1779_v6, 4  ;;  %v1811_v40 = vsel %vm295_vm0, %v1779_v6, %v1810_v18  ;;  %v9124_v43 = vperm.slane %v1587_v54, %v8583_v19 }
 0x389   : > { %v1585_v26 = vsel %vm295_vm0, %v1584_v47, %v1543_v0  ;;  %v1596_v34 = vrot.slane %v1559_v32, 4  ;;  %v8289_v23 = vpop.permute.xlu1 %8288  ;;  %v1599_v33 = vsel %vm295_vm0, %v1559_v32, %v1598_v8  ;;  %v1820_v48 = vrot.slane %v1783_v49, 4  ;;  %v8284_v52 = vpop.permute.xlu0 %8283 }
 0x38a   : > { %v1809_v21 = vsel %vm295_vm0, %v1808_v56, %v1767_v10  ;;  %v1823_v53 = vsel %vm295_vm0, %v1783_v49, %v1822_v11  ;;  %v9131_v17 = vperm.slane %v1585_v26, %v8583_v19  ;;  %v9134_v61 = vperm.slane %v1811_v40, %v8583_v19  ;;  %v9172_v18 = vpop.permute.xlu2 %8323 }
 0x38b   : > { %v1597_v29 = vsel %vm295_vm0, %v1596_v34, %v1547_v5  ;;  %v9145_v57 = vperm.slane %v1599_v33, %v8583_v19  ;;  %v9148_v31 = vperm.slane %v1809_v21, %v8583_v19  ;;  %v1821_v30 = vsel %vm295_vm0, %v1820_v48, %v1771_v16 }
 0x38c   : > { %v8291_v58 = vunpack.i.h.bf16 %v8289_v23  ;;  %v9152_v41 = vperm.slane %v1597_v29, %v8583_v19  ;;  %v1612_v2 = vrot.slane %v9124_v43, 4  ;;  %v9156_v22 = vperm.slane %v1823_v53, %v8583_v19 }
 0x38d   : > { %v8290_v39 = vunpack.i.l.bf16 %v8289_v23  ;;  %v9159_v5 = vperm.slane %v1821_v30, %v8583_v19  ;;  %v8286_v10 = vunpack.i.h.bf16 %v8284_v52  ;;  %v8285_v60 = vunpack.i.l.bf16 %v8284_v52 }
 0x38e   : > { %v1736_v35 = vrot.slane %v8291_v58, 4  ;;  %v1739_v0 = vsel %vm295_vm0, %v8291_v58, %v1738_v50  ;;  %v1608_v27 = vrot.slane %v9131_v17, 4  ;;  %v1620_v4 = vrot.slane %v9145_v57, 4 }
 0x38f   : > { %v1512_v13 = vrot.slane %v8290_v39, 4  ;;  %v1515_v20 = vsel %vm295_vm0, %v8290_v39, %v1514_v51  ;;  %v1747_v24 = vperm.slane %v1739_v0, %v8581_v12  ;;  %v1832_v8 = vrot.slane %v9148_v31, 4 }
 0x390   : > { %v1737_v16 = vsel %vm295_vm0, %v1736_v35, %v8271_v42  ;;  %v1616_v37 = vrot.slane %v9152_v41, 4  ;;  %v1836_v28 = vrot.slane %v9134_v61, 4  ;;  %v1523_v25 = vperm.slane %v1515_v20, %v8581_v12 }
 0x391   : > { %v8304_v62 = vpop.permute.xlu1 %8303  ;;  %v1513_v63 = vsel %vm295_vm0, %v1512_v13, %v8270_v46  ;;  %v1844_v38 = vrot.slane %v9156_v22, 4  ;;  %v1743_v6 = vperm.slane %v1737_v16, %v8581_v12  ;;  %v1750_v44 = vrot.slane %v8286_v10, 4  ;;  %v8299_v0 = vpop.permute.xlu0 %8298 }
 0x392   : > { %v8306_v45 = vunpack.i.h.bf16 %v8304_v62  ;;  %v1840_v32 = vrot.slane %v9159_v5, 4  ;;  %v1798_v42 = vrot.slane %v1747_v24, 4  ;;  %v1526_v47 = vrot.slane %v8285_v60, 4 }
 0x393   : > { %v8305_v54 = vunpack.i.l.bf16 %v8304_v62  ;;  %v1519_v49 = vperm.slane %v1513_v63, %v8581_v12  ;;  %v8326_v56 = vunpack.i.h.bf16 %v9172_v18  ;;  %v1574_v11 = vrot.slane %v1523_v25, 4 }
 0x394   : > { %v1748_v46 = vrot.slane %v8306_v45, 4  ;;  %v1751_v40 = vsel %vm295_vm0, %v8306_v45, %v1750_v44  ;;  %v1786_v33 = vrot.slane %v1743_v6, 4  ;;  %v8325_v21 = vunpack.i.l.bf16 %v9172_v18 }
 0x395   : > { %v1524_v26 = vrot.slane %v8305_v54, 4  ;;  %v1527_v34 = vsel %vm295_vm0, %v8305_v54, %v1526_v47  ;;  %v1759_v23 = vperm.slane %v1751_v40, %v8581_v12  ;;  %v1562_v30 = vrot.slane %v1519_v49, 4 }
 0x396   : > { %v1535_v50 = vperm.slane %v1527_v34, %v8581_v12  ;;  %v1749_v29 = vsel %vm295_vm0, %v1748_v46, %v8286_v10  ;;  %v9198_v45 = vrot.slane %v8326_v56, 4  ;;  %v8301_v54 = vunpack.i.h.bf16 %v8299_v0 }
 0x397   : > { %v1525_v48 = vsel %vm295_vm0, %v1524_v26, %v8285_v60  ;;  %v1755_v53 = vperm.slane %v1749_v29, %v8581_v12  ;;  %v1796_v51 = vrot.slane %v1759_v23, 4  ;;  %v1799_v52 = vsel %vm295_vm0, %v1759_v23, %v1798_v42 }
 0x398   : > { %v1531_v58 = vperm.slane %v1525_v48, %v8581_v12  ;;  %v1572_v39 = vrot.slane %v1535_v50, 4  ;;  %v1575_v35 = vsel %vm295_vm0, %v1535_v50, %v1574_v11  ;;  %v1807_v23 = vperm.slane %v1799_v52, %v8583_v19 }
 0x399   : > { %v1583_v13 = vperm.slane %v1575_v35, %v8583_v19  ;;  %v1784_v20 = vrot.slane %v1755_v53, 4  ;;  %v1787_v16 = vsel %vm295_vm0, %v1755_v53, %v1786_v33  ;;  %v1797_v10 = vsel %vm295_vm0, %v1796_v51, %v1747_v24  ;;  %v8319_v35 = vpop.permute.xlu1 %8318 }
 0x39a   : > { %v1560_v60 = vrot.slane %v1531_v58, 4  ;;  %v1563_v62 = vsel %vm295_vm0, %v1531_v58, %v1562_v30  ;;  %v1573_v63 = vsel %vm295_vm0, %v1572_v39, %v1523_v25  ;;  %v1795_v44 = vperm.slane %v1787_v16, %v8583_v19 }
 0x39b   : > { %v1571_v42 = vperm.slane %v1563_v62, %v8583_v19  ;;  %v1579_v47 = vperm.slane %v1573_v63, %v8583_v19  ;;  %v1785_v24 = vsel %vm295_vm0, %v1784_v20, %v1743_v6  ;;  %v1803_v40 = vperm.slane %v1797_v10, %v8583_v19 }
 0x39c   : > { %v1561_v46 = vsel %vm295_vm0, %v1560_v60, %v1519_v49  ;;  %v9206_v11 = vsel %vm295_vm0, %v1836_v28, %v1795_v44  ;;  %v9210_v25 = vrot.slane %v8325_v21, 4  ;;  %v1622_v34 = vrot.slane %v1583_v13, 4 }
 0x39d   : > { %v9213_v26 = vperm.slane %v1561_v46, %v8583_v19  ;;  %v1614_v33 = vrot.slane %v1571_v42, 4  ;;  %v1618_v50 = vrot.slane %v1579_v47, 4  ;;  %v9217_v49 = vperm.slane %v1785_v24, %v8583_v19  ;;  %v8314_v24 = vpop.permute.xlu0 %8313 }
 0x39e   : > { %v1838_v6 = vrot.slane %v1795_v44, 4  ;;  %v1621_v28 = vsel %vm295_vm0, %v1620_v4, %v1583_v13  ;;  %v1841_v29 = vsel %vm295_vm0, %v1840_v32, %v1803_v40  ;;  %v1636_v48 = vrot.slane %v8301_v54, 4 }
 0x39f   : > { %v8300_v53 = vunpack.i.l.bf16 %v8299_v0  ;;  %v9226_v51 = vsel %vm295_vm0, %v1612_v2, %v1571_v42  ;;  %v1617_v52 = vsel %vm295_vm0, %v1616_v37, %v1579_v47  ;;  %v9235_v30 = vsel %vm295_vm0, %v1832_v8, %v9217_v49 }
 0x3a0   : > { %v9239_v4 = vsel %vm295_vm0, %v9134_v61, %v1838_v6  ;;  %v9245_v2 = vsel %vm295_vm0, %v1608_v27, %v9213_v26  ;;  %v1842_v32 = vrot.slane %v1803_v40, 4  ;;  %v1845_v37 = vsel %vm295_vm0, %v1844_v38, %v1807_v23 }
 0x3a1   : > { %v1846_v58 = vrot.slane %v1807_v23, 4  ;;  %v9252_v8 = vsel %vm295_vm0, %v9124_v43, %v1614_v33  ;;  %v9256_v61 = vsel %vm295_vm0, %v9152_v41, %v1618_v50  ;;  %v9260_v39 = vsel %vm295_vm0, %v9145_v57, %v1622_v34 }
 0x3a2   : > { %v1639_v27 = vsel %vm295_vm0, %v8301_v54, %v9138_v14  ;;  %v1610_v0 = vrot.slane %v9213_v26, 4  ;;  %v9268_v43 = vsel %vm295_vm0, %v9159_v5, %v1842_v32  ;;  %v2072_v13 = vrot.slane %v9226_v51, 4 }
 0x3a3   : > { %v9272_v41 = vsel %vm295_vm0, %v9156_v22, %v1846_v58  ;;  %v2096_v20 = vrot.slane %v1621_v28, 4  ;;  %v2098_v16 = vrot.slane %v1617_v52, 4  ;;  %v2084_v14 = vrot.slane %v9252_v8, 4 }
 0x3a4   : > { %v2110_v10 = vrot.slane %v9256_v61, 4  ;;  %v2208_v60 = vrot.slane %v1845_v37, 4  ;;  %v2210_v62 = vrot.slane %v1841_v29, 4  ;;  %v2108_v63 = vrot.slane %v9260_v39, 4 }
 0x3a5   : > { %v2222_v5 = vrot.slane %v9268_v43, 4  ;;  %v1412_v44 = vrot.slane %v8300_v53, 4  ;;  %v1415_v22 = vsel %vm295_vm0, %v8300_v53, %v9142_v15  ;;  %v1637_v46 = vsel %vm295_vm0, %v1636_v48, %v8311_v1 }
 0x3a6   : > { %v9283_v42 = vsel %vm295_vm0, %v2208_v60, %v1841_v29  ;;  %v9286_v47 = vsel %vm295_vm0, %v1845_v37, %v2210_v62  ;;  %v1423_v54 = vperm.slane %v1415_v22, %v8581_v12  ;;  %v9293_v40 = vsel %vm295_vm0, %v2096_v20, %v1617_v52 }
 0x3a7   : > { %v9296_v34 = vsel %vm295_vm0, %v1621_v28, %v2098_v16  ;;  %v9300_v15 = vsel %vm295_vm0, %v9272_v41, %v2222_v5  ;;  %v1413_v23 = vsel %vm295_vm0, %v1412_v44, %v8310_v9  ;;  %v9307_v33 = vsel %vm295_vm0, %v9260_v39, %v2110_v10  ;;  %v9316_v10 = vpop.permute.xlu1 %8333 }
 0x3a8   : > { %v1419_v50 = vperm.slane %v1413_v23, %v8581_v12  ;;  %v1643_v6 = vperm.slane %v1637_v46, %v8581_v12  ;;  %v8321_v29 = vunpack.i.h.bf16 %v8319_v35  ;;  %v8320_v48 = vunpack.i.l.bf16 %v8319_v35 }
 0x3a9   : > { %v8316_v53 = vunpack.i.h.bf16 %v8314_v24  ;;  %v1460_v32 = vrot.slane %v1423_v54, 4  ;;  %v1647_v7 = vperm.slane %v1639_v27, %v8581_v12  ;;  %v8315_v9 = vunpack.i.l.bf16 %v8314_v24 }
 0x3aa   : > { %v1448_v52 = vrot.slane %v1419_v50, 4  ;;  %v1672_v37 = vrot.slane %v1643_v6, 4  ;;  %v1660_v58 = vrot.slane %v8321_v29, 4  ;;  %v1436_v20 = vrot.slane %v8320_v48, 4 }
 0x3ab   : > { %v1439_v16 = vsel %vm295_vm0, %v8320_v48, %v9210_v25  ;;  %v1663_v35 = vsel %vm295_vm0, %v8321_v29, %v9198_v45  ;;  %v1624_v62 = vrot.slane %v8316_v53, 4  ;;  %v1400_v5 = vrot.slane %v8315_v9, 4 }
 0x3ac   : > { %v9319_v60 = vperm.slane %v1439_v16, %v8581_v12  ;;  %v1437_v27 = vsel %vm295_vm0, %v1436_v20, %v8325_v21  ;;  %v1661_v44 = vsel %vm295_vm0, %v1660_v58, %v8326_v56  ;;  %v9330_v25 = vperm.slane %v1663_v35, %v8581_v12 }
 0x3ad   : > { %v1403_v22 = vsel %vm295_vm0, %v8315_v9, %v1402_v36  ;;  %v1684_v46 = vrot.slane %v1647_v7, 4  ;;  %v9336_v45 = vperm.slane %v1437_v27, %v8581_v12  ;;  %v1625_v24 = vsel %vm295_vm0, %v1624_v62, %v9083_v3 }
 0x3ae   : > { %v8336_v21 = vunpack.i.h.bf16 %v9316_v10  ;;  %v1484_v18 = vrot.slane %v9319_v60, 4  ;;  %v1631_v56 = vperm.slane %v1625_v24, %v8581_v12  ;;  %v1401_v23 = vsel %vm295_vm0, %v1400_v5, %v9081_v55 }
 0x3af   : > { %v1411_v29 = vperm.slane %v1403_v22, %v8581_v12  ;;  %v9347_v36 = vperm.slane %v1661_v44, %v8581_v12  ;;  %v1708_v48 = vrot.slane %v9330_v25, 4  ;;  %v1407_v9 = vperm.slane %v1401_v23, %v8581_v12 }
 0x3b0   : > { %v1627_v58 = vsel %vm295_vm0, %v8316_v53, %v1626_v59  ;;  %v1674_v20 = vrot.slane %v1631_v56, 4  ;;  %v1673_v44 = vsel %vm295_vm0, %v1672_v37, %v1631_v56  ;;  %v9413_v57 = vperm.slane %v9293_v40, %v8581_v12 }
 0x3b1   : > { %v1461_v16 = vsel %vm295_vm0, %v1460_v32, %v1411_v29  ;;  %v1462_v35 = vrot.slane %v1411_v29, 4  ;;  %v1635_v62 = vperm.slane %v1627_v58, %v8581_v12  ;;  %v1449_v55 = vsel %vm295_vm0, %v1448_v52, %v1407_v9  ;;  %v8329_v29 = vpop.permute.xlu0 %8328 }
 0x3b2   : > { %v1450_v5 = vrot.slane %v1407_v9, 4  ;;  %v9358_v27 = vperm.slane %v1461_v16, %v8583_v19  ;;  %v9362_v22 = vperm.slane %v1449_v55, %v8583_v19  ;;  %v1675_v59 = vsel %vm295_vm0, %v1643_v6, %v1674_v20 }
 0x3b3   : > { %v1463_v3 = vsel %vm295_vm0, %v1423_v54, %v1462_v35  ;;  %v9367_v53 = vperm.slane %v1673_v44, %v8583_v19  ;;  %v1472_v32 = vrot.slane %v9336_v45, 4  ;;  %v9375_v23 = vperm.slane %v1675_v59, %v8583_v19 }
 0x3b4   : > { %v1451_v52 = vsel %vm295_vm0, %v1419_v50, %v1450_v5  ;;  %v9372_v24 = vperm.slane %v1463_v3, %v8583_v19  ;;  %v1696_v37 = vrot.slane %v9347_v36, 4  ;;  %v1685_v54 = vsel %vm295_vm0, %v1684_v46, %v1635_v62 }
 0x3b5   : > { %v9379_v56 = vperm.slane %v1451_v52, %v8583_v19  ;;  %v1686_v6 = vrot.slane %v1635_v62, 4  ;;  %v1498_v9 = vrot.slane %v9362_v22, 4  ;;  %v1506_v58 = vrot.slane %v9358_v27, 4 }
 0x3b6   : > { %v1510_v50 = vrot.slane %v9372_v24, 4  ;;  %v9386_v20 = vperm.slane %v1685_v54, %v8583_v19  ;;  %v1722_v35 = vrot.slane %v9367_v53, 4  ;;  %v1650_v55 = vrot.slane %v8336_v21, 4 }
 0x3b7   : > { %v1687_v16 = vsel %vm295_vm0, %v1647_v7, %v1686_v6  ;;  %v8335_v5 = vunpack.i.l.bf16 %v9316_v10  ;;  %v1726_v62 = vrot.slane %v9375_v23, 4  ;;  %v8331_v44 = vunpack.i.h.bf16 %v8329_v29 }
 0x3b8   : > { %v9392_v46 = vperm.slane %v1687_v16, %v8583_v19  ;;  %v8330_v3 = vunpack.i.l.bf16 %v8329_v29  ;;  %v1502_v59 = vrot.slane %v9379_v56, 4  ;;  %v1730_v52 = vrot.slane %v9386_v20, 4 }
 0x3b9   : > { %v1426_v54 = vrot.slane %v8335_v5, 4  ;;  %v2073_v7 = vsel %vm295_vm0, %v2072_v13, %v9245_v2  ;;  %v1648_v6 = vrot.slane %v8331_v44, 4  ;;  %v1651_v10 = vsel %vm295_vm0, %v8331_v44, %v1650_v55 }
 0x3ba   : > { %v1424_v28 = vrot.slane %v8330_v3, 4  ;;  %v9406_v16 = vsel %vm295_vm0, %v9131_v17, %v1610_v0  ;;  %v1734_v29 = vrot.slane %v9392_v46, 4  ;;  %v1659_v1 = vperm.slane %v1651_v10, %v8581_v12 }
 0x3bb   : > { %v1427_v38 = vsel %vm295_vm0, %v8330_v3, %v1426_v54  ;;  %v1649_v13 = vsel %vm295_vm0, %v1648_v6, %v8336_v21  ;;  %v9419_v44 = vperm.slane %v2073_v7, %v8581_v12  ;;  %v2085_v40 = vsel %vm295_vm0, %v2084_v14, %v9406_v16 }
 0x3bc   : > { %v1425_v55 = vsel %vm295_vm0, %v1424_v28, %v8335_v5  ;;  %v1435_v26 = vperm.slane %v1427_v38, %v8581_v12  ;;  %v1655_v17 = vperm.slane %v1649_v13, %v8581_v12  ;;  %v1709_v10 = vsel %vm295_vm0, %v1708_v48, %v1659_v1 }
 0x3bd   : > { %v1431_v0 = vperm.slane %v1425_v55, %v8581_v12  ;;  %v1710_v3 = vrot.slane %v1659_v1, 4  ;;  %v1715_v1 = vperm.slane %v1709_v10, %v8583_v19  ;;  %v2146_v39 = vrot.slane %v9413_v57, 4 }
 0x3be   : > { %v1485_v28 = vsel %vm295_vm0, %v1484_v18, %v1435_v26  ;;  %v1486_v38 = vrot.slane %v1435_v26, 4  ;;  %v1698_v5 = vrot.slane %v1655_v17, 4  ;;  %v1697_v14 = vsel %vm295_vm0, %v1696_v37, %v1655_v17 }
 0x3bf   : > { %v1473_v54 = vsel %vm295_vm0, %v1472_v32, %v1431_v0  ;;  %v1474_v7 = vrot.slane %v1431_v0, 4  ;;  %v1491_v6 = vperm.slane %v1485_v28, %v8583_v19  ;;  %v9443_v32 = vperm.slane %v2085_v40, %v8581_v12 }
 0x3c0   : > { %v1479_v48 = vperm.slane %v1473_v54, %v8583_v19  ;;  %v1487_v13 = vsel %vm295_vm0, %v9319_v60, %v1486_v38  ;;  %v1699_v54 = vsel %vm295_vm0, %v9347_v36, %v1698_v5  ;;  %v1711_v60 = vsel %vm295_vm0, %v9330_v25, %v1710_v3 }
 0x3c1   : > { %v1475_v18 = vsel %vm295_vm0, %v9336_v45, %v1474_v7  ;;  %v1495_v55 = vperm.slane %v1487_v13, %v8583_v19  ;;  %v1504_v26 = vrot.slane %v1491_v6, 4  ;;  %v1507_v17 = vsel %vm295_vm0, %v1491_v6, %v1506_v58 }
 0x3c2   : > { %v1483_v0 = vperm.slane %v1475_v18, %v8583_v19  ;;  %v1496_v28 = vrot.slane %v1479_v48, 4  ;;  %v1499_v37 = vsel %vm295_vm0, %v1479_v48, %v1498_v9  ;;  %v1703_v10 = vperm.slane %v1697_v14, %v8583_v19 }
 0x3c3   : > { %v1508_v45 = vrot.slane %v1495_v55, 4  ;;  %v1505_v40 = vsel %vm295_vm0, %v1504_v26, %v9358_v27  ;;  %v1511_v7 = vsel %vm295_vm0, %v1495_v55, %v1510_v50  ;;  %v1707_v13 = vperm.slane %v1699_v54, %v8583_v19 }
 0x3c4   : > { %v1500_v38 = vrot.slane %v1483_v0, 4  ;;  %v1497_v36 = vsel %vm295_vm0, %v1496_v28, %v9362_v22  ;;  %v1503_v25 = vsel %vm295_vm0, %v1483_v0, %v1502_v59  ;;  %v1719_v9 = vperm.slane %v1711_v60, %v8583_v19 }
 0x3c5   : > { %v1720_v3 = vrot.slane %v1703_v10, 4  ;;  %v1509_v58 = vsel %vm295_vm0, %v1508_v45, %v9372_v24  ;;  %v9464_v5 = vsel %vm295_vm0, %v1703_v10, %v1722_v35  ;;  %v1724_v6 = vrot.slane %v1707_v13, 4 }
 0x3c6   : > { %v1728_v27 = vrot.slane %v1715_v1, 4  ;;  %v1501_v50 = vsel %vm295_vm0, %v1500_v38, %v9379_v56  ;;  %v9473_v22 = vsel %vm295_vm0, %v1707_v13, %v1726_v62  ;;  %v1732_v59 = vrot.slane %v1719_v9, 4 }
 0x3c7   : > { %v9470_v48 = vsel %vm295_vm0, %v1720_v3, %v9367_v53  ;;  %v9477_v14 = vsel %vm295_vm0, %v1724_v6, %v9375_v23  ;;  %v9484_v35 = vsel %vm295_vm0, %v1715_v1, %v1730_v52  ;;  %v9487_v56 = vsel %vm295_vm0, %v1719_v9, %v1734_v29 }
 0x3c8   : > { %v9481_v24 = vsel %vm295_vm0, %v1728_v27, %v9386_v20  ;;  %v9491_v53 = vsel %vm295_vm0, %v1732_v59, %v9392_v46  ;;  %v1850_v62 = vrot.slane %v1497_v36, 4  ;;  %v1860_v18 = vrot.slane %v1503_v25, 4 }
 0x3c9   : > { %v1862_v55 = vrot.slane %v1499_v37, 4  ;;  %v1872_v26 = vrot.slane %v1509_v58, 4  ;;  %v1874_v23 = vrot.slane %v1505_v40, 4  ;;  %v1884_v0 = vrot.slane %v1511_v7, 4 }
 0x3ca   : > { %v1972_v28 = vrot.slane %v9473_v22, 4  ;;  %v1886_v20 = vrot.slane %v1507_v17, 4  ;;  %v1996_v29 = vrot.slane %v9487_v56, 4  ;;  %v1984_v46 = vrot.slane %v9491_v53, 4 }
 0x3cb   : > { %v1885_v1 = vsel %vm295_vm0, %v1884_v0, %v1507_v17  ;;  %v2109_v45 = vsel %vm295_vm0, %v2108_v63, %v9256_v61  ;;  %v2122_v3 = vrot.slane %v9419_v44, 4  ;;  %v1851_v61 = vsel %vm295_vm0, %v1501_v50, %v1850_v62 }
 0x3cc   : > { %v1891_v10 = vperm.slane %v1885_v1, %v8581_v12  ;;  %v9507_v38 = vsel %vm295_vm0, %v1972_v28, %v9464_v5  ;;  %v9511_v9 = vperm.slane %v2109_v45, %v8581_v12  ;;  %v1997_v17 = vsel %vm295_vm0, %v1996_v29, %v9484_v35 }
 0x3cd   : > { %v9519_v63 = vperm.slane %v1851_v61, %v8581_v12  ;;  %v1863_v6 = vsel %vm295_vm0, %v1503_v25, %v1862_v55  ;;  %v1875_v27 = vsel %vm295_vm0, %v1509_v58, %v1874_v23  ;;  %v1887_v59 = vsel %vm295_vm0, %v1511_v7, %v1886_v20 }
 0x3ce   : > { %v2123_v0 = vsel %vm295_vm0, %v9443_v32, %v2122_v3  ;;  %v2147_v28 = vsel %vm295_vm0, %v9511_v9, %v2146_v39  ;;  %v9529_v29 = vperm.slane %v1863_v6, %v8581_v12  ;;  %v9532_v62 = vperm.slane %v1875_v27, %v8581_v12 }
 0x3cf   : > { %v2131_v1 = vperm.slane %v2123_v0, %v8583_v19  ;;  %v2155_v25 = vperm.slane %v2147_v28, %v8583_v19  ;;  %v9537_v58 = vperm.slane %v1887_v59, %v8581_v12  ;;  %v1848_v7 = vrot.slane %v1501_v50, 4 }
 0x3d0   : > { %v1908_v55 = vrot.slane %v9529_v29, 4  ;;  %v1861_v23 = vsel %vm295_vm0, %v1860_v18, %v1499_v37  ;;  %v1873_v20 = vsel %vm295_vm0, %v1872_v26, %v1505_v40  ;;  %v1920_v45 = vrot.slane %v1891_v10, 4 }
 0x3d1   : > { %v2172_v3 = vrot.slane %v2155_v25, 4  ;;  %v1932_v39 = vrot.slane %v9537_v58, 4  ;;  %v1849_v61 = vsel %vm295_vm0, %v1848_v7, %v1497_v36  ;;  %v1867_v6 = vperm.slane %v1861_v23, %v8581_v12 }
 0x3d2   : > { %v1909_v27 = vsel %vm295_vm0, %v1908_v55, %v9519_v63  ;;  %v1855_v59 = vperm.slane %v1849_v61, %v8581_v12  ;;  %v1879_v50 = vperm.slane %v1873_v20, %v8581_v12  ;;  %v2174_v0 = vrot.slane %v2131_v1, 4 }
 0x3d3   : > { %v2173_v37 = vsel %vm295_vm0, %v2172_v3, %v2131_v1  ;;  %v1915_v40 = vperm.slane %v1909_v27, %v8583_v19  ;;  %v1933_v18 = vsel %vm295_vm0, %v1932_v39, %v9532_v62  ;;  %v1896_v26 = vrot.slane %v1867_v6, 4 }
 0x3d4   : > { %v2942_v28 = vpack.c.bf16 %v2173_v37, %v2173_v37  ;;  %v1939_v36 = vperm.slane %v1933_v18, %v8583_v19  ;;  %v1921_v7 = vsel %vm295_vm0, %v1920_v45, %v1879_v50  ;;  %v1898_v23 = vrot.slane %v1855_v59, 4 }
 0x3d5   : > { %v1954_v55 = vrot.slane %v1915_v40, 4  ;;  %v1897_v61 = vsel %vm295_vm0, %v1896_v26, %v1855_v59  ;;  %v1927_v20 = vperm.slane %v1921_v7, %v8583_v19  ;;  %v1922_v21 = vrot.slane %v1879_v50, 4 }
 0x3d6   : > { %v3125_v13 = vshrl.u32 %v2942_v28, 16  ;;  %v3128_v1 = vshll.u32 %v2942_v28, 16  ;;  %v1903_v3 = vperm.slane %v1897_v61, %v8583_v19  ;;  %v1899_v27 = vsel %vm295_vm0, %v1867_v6, %v1898_v23 }
 0x3d7   : > { %v1955_v39 = vsel %vm295_vm0, %v1939_v36, %v1954_v55  ;;  %v1944_v37 = vrot.slane %v1927_v20, 4  ;;  %v9561_v18 = vperm.slane %v1899_v27, %v8583_v19  ;;  %v1923_v45 = vsel %vm295_vm0, %v1891_v10, %v1922_v21 }
 0x3d8   : > { %v9564_v52 = vrot.slane %v3125_v13, 7  ;;  %v2932_v59 = vpack.c.bf16 %v1955_v39, %v1955_v39  ;;  %v9567_v26 = vperm.slane %v1923_v45, %v8583_v19  ;;  %v2175_v50 = vsel %vm295_vm0, %v2155_v25, %v2174_v0 }
 0x3d9   : > { %v1945_v28 = vsel %vm295_vm0, %v1944_v37, %v1903_v3  ;;  %v1950_v6 = vrot.slane %v9561_v18, 4  ;;  %v2944_v7 = vpack.c.bf16 %v2175_v50, %v2175_v50  ;;  %v1946_v23 = vrot.slane %v1903_v3, 4 }
 0x3da   : > { %v1985_v55 = vsel %vm295_vm0, %v1984_v46, %v9481_v24  ;;  %v3130_v21 = vor.u32 %v3128_v1, %v9564_v52  ;;  %v3040_v10 = vshrl.u32 %v2932_v59, 16  ;;  %v2922_v13 = vpack.c.bf16 %v1945_v28, %v1945_v28 }
 0x3db   : > { %v9578_v61 = vperm.slane %v1997_v17, %v8581_v12  ;;  %v1951_v25 = vsel %vm295_vm0, %v9567_v26, %v1950_v6  ;;  %v3142_v0 = vshrl.u32 %v2944_v7, 16  ;;  %v1947_v27 = vsel %vm295_vm0, %v1927_v20, %v1946_v23 }
 0x3dc   : > { %3286 = vrot.lane.b32.xlu2 %v3130_v21, %s11705_s15  ;;  %v9584_v3 = vrot.slane %v3040_v10, 7  ;;  %v3043_v39 = vshll.u32 %v2932_v59, 16  ;;  %v2955_v37 = vshrl.u32 %v2922_v13, 16  ;;  %v2928_v46 = vpack.c.bf16 %v1951_v25, %v1951_v25 }
 0x3dd   : > { %v9586_v45 = vrot.slane %v3142_v0, 7  ;;  %v2924_v1 = vpack.c.bf16 %v1947_v27, %v1947_v27  ;;  %v1952_v50 = vrot.slane %v1939_v36, 4  ;;  %v1910_v17 = vrot.slane %v9519_v63, 4 }
 0x3de   : > { %v9589_v28 = vrot.slane %v2955_v37, 7  ;;  %v2958_v60 = vshll.u32 %v2922_v13, 16  ;;  %v3006_v6 = vshrl.u32 %v2928_v46, 16  ;;  %v3145_v54 = vshll.u32 %v2944_v7, 16 }
 0x3df   : > { %v3045_v20 = vor.u32 %v3043_v39, %v9584_v3  ;;  %v3009_v23 = vshll.u32 %v2928_v46, 16  ;;  %v2972_v21 = vshrl.u32 %v2924_v1, 16  ;;  %v1953_v10 = vsel %vm295_vm0, %v1952_v50, %v1915_v40 }
 0x3e0   : > { %v2960_v59 = vor.u32 %v2958_v60, %v9589_v28  ;;  %v9594_v25 = vrot.slane %v3006_v6, 7  ;;  %v2930_v0 = vpack.c.bf16 %v1953_v10, %v1953_v10  ;;  %v1911_v36 = vsel %vm295_vm0, %v9529_v29, %v1910_v17 }
 0x3e1   : > { %v3147_v63 = vor.u32 %v3145_v54, %v9586_v45  ;;  %v2975_v27 = vshll.u32 %v2924_v1, 16  ;;  %v1934_v13 = vrot.slane %v9532_v62, 4  ;;  %v1960_v7 = vrot.slane %v9477_v14, 4 }
 0x3e2   : > { %3226 = vrot.lane.b32.xlu1 %v2960_v59, %s11705_s15  ;;  %v3011_v39 = vor.u32 %v3009_v23, %v9594_v25  ;;  %v9603_v40 = vrot.slane %v2972_v21, 7  ;;  %v3023_v60 = vshrl.u32 %v2930_v0, 16  ;;  %v9607_v37 = vperm.slane %v9507_v38, %v8581_v12 }
 0x3e3   : > { %v9610_v29 = vperm.slane %v1911_v36, %v8583_v19  ;;  %v1935_v54 = vsel %vm295_vm0, %v9537_v58, %v1934_v13  ;;  %v1961_v62 = vsel %vm295_vm0, %v1960_v7, %v9470_v48  ;;  %v9617_v46 = vperm.slane %v1985_v55, %v8581_v12 }
 0x3e4   : > { %3256 = vrot.lane.b32.xlu2 %v3045_v20, %s11705_s15  ;;  %3244 = vrot.lane.b32.xlu0 %v3011_v39, %s11705_s15  ;;  %v9621_v1 = vrot.slane %v3023_v60, 7  ;;  %v1943_v38 = vperm.slane %v1935_v54, %v8583_v19  ;;  %v9625_v50 = vperm.slane %v1961_v62, %v8581_v12  ;;  %v2008_v17 = vrot.slane %v9607_v37, 4 }
 0x3e5   : > { %v3026_v58 = vshll.u32 %v2930_v0, 16  ;;  %v2032_v6 = vrot.slane %v9578_v61, 4  ;;  %v11707_v23 = vrot.slane %v9470_v48, 4  ;;  %v11708_v20 = vrot.slane %v9481_v24, 4 }
 0x3e6   : > { %11706 = vst [vmem:[#allocation6_spill] sm:$0xff] %v9621_v1  ;;  %v2977_v10 = vor.u32 %v2975_v27, %v9603_v40  ;;  %v1956_v59 = vrot.slane %v1943_v38, 4  ;;  %v2009_v36 = vsel %vm295_vm0, %v2008_v17, %v9625_v50  ;;  %v11709_v0 = vrot.slane %v9464_v5, 4 }
 0x3e7   : > { %v1963_v55 = vsel %vm295_vm0, %v9477_v14, %v11707_v23  ;;  %v1987_v21 = vsel %vm295_vm0, %v9491_v53, %v11708_v20  ;;  %v3028_v48 = vor.u32 %v3026_v58, %v9621_v1  ;;  %v2015_v14 = vperm.slane %v2009_v36, %v8583_v19 }
 0x3e8   : > { %v1975_v13 = vsel %vm295_vm0, %v9473_v22, %v11709_v0  ;;  %v2033_v24 = vsel %vm295_vm0, %v2032_v6, %v9617_v46  ;;  %v9649_v53 = vperm.slane %v1963_v55, %v8581_v12  ;;  %v1957_v27 = vsel %vm295_vm0, %v1956_v59, %v9610_v29 }
 0x3e9   : > { %v2039_v7 = vperm.slane %v2033_v24, %v8583_v19  ;;  %v9655_v5 = vperm.slane %v1987_v21, %v8581_v12  ;;  %v11710_v22 = vrot.slane %v9484_v35, 4  ;;  %v2934_v60 = vpack.c.bf16 %v1957_v27, %v1957_v27 }
 0x3ea   : > { %v9662_v54 = vperm.slane %v1975_v13, %v8581_v12  ;;  %v2022_v62 = vrot.slane %v9649_v53, 4  ;;  %v11711_v17 = vrot.slane %v9245_v2, 4  ;;  %3232 = vrot.lane.b32.xlu1 %v2977_v10, %s11705_s15  ;;  %v1948_v59 = vrot.slane %v9567_v26, 4 }
 0x3eb   : > { %v1999_v39 = vsel %vm295_vm0, %v9487_v56, %v11710_v22  ;;  %v2056_v6 = vrot.slane %v2039_v7, 4  ;;  %v2046_v35 = vrot.slane %v9655_v5, 4  ;;  %v11712_v56 = vrot.slane %v9406_v16, 4 }
 0x3ec   : > { %v2075_v58 = vsel %vm295_vm0, %v9226_v51, %v11711_v17  ;;  %v9671_v23 = vperm.slane %v1999_v39, %v8581_v12  ;;  %v3057_v20 = vshrl.u32 %v2934_v60, 16  ;;  %v2023_v2 = vsel %vm295_vm0, %v9662_v54, %v2022_v62  ;;  %3292 = vrot.lane.b32.xlu2 %v3147_v63, %s11705_s15  ;;  %3250 = vrot.lane.b32.xlu0 %v3028_v48, %s11705_s15 }
 0x3ed   : > { %v2087_v55 = vsel %vm295_vm0, %v9252_v8, %v11712_v56  ;;  %v9681_v21 = vperm.slane %v2075_v58, %v8581_v12  ;;  %v2057_v10 = vsel %vm295_vm0, %v2056_v6, %v2015_v14  ;;  %v9690_v16 = vperm.slane %v2023_v2, %v8583_v19 }
 0x3ee   : > { %v9684_v51 = vperm.slane %v2087_v55, %v8581_v12  ;;  %v2047_v8 = vsel %vm295_vm0, %v9671_v23, %v2046_v35  ;;  %v9695_v36 = vrot.slane %v3057_v20, 7  ;;  %v3060_v0 = vshll.u32 %v2934_v60, 16 }
 0x3ef   : > { %v9697_v13 = vpack.c.bf16 %v2057_v10, %v2057_v10  ;;  %v9700_v24 = vperm.slane %v2047_v8, %v8583_v19  ;;  %v2070_v63 = vrot.slane %v9690_v16, 4  ;;  %v9705_v48 = vperm.slane %v9307_v33, %v8581_v12 }
 0x3f0   : > { %v2132_v27 = vrot.slane %v9684_v51, 4  ;;  %v1949_v22 = vsel %vm295_vm0, %v1948_v59, %v9561_v18  ;;  %v9713_v39 = vperm.slane %v9296_v34, %v8581_v12  ;;  %v2058_v62 = vrot.slane %v2015_v14, 4 }
 0x3f1   : > { %v2963_v26 = vshrl.u32 %v9697_v13, 16  ;;  %v2926_v60 = vpack.c.bf16 %v1949_v22, %v1949_v22  ;;  %v2071_v17 = vsel %vm295_vm0, %v9700_v24, %v2070_v63  ;;  %v2156_v58 = vrot.slane %v9705_v48, 4 }
 0x3f2   : > { %v2133_v33 = vsel %vm295_vm0, %v2132_v27, %v9681_v21  ;;  %v1958_v6 = vrot.slane %v9610_v29, 4  ;;  %v2220_v18 = vrot.slane %v9272_v41, 4  ;;  %v3062_v35 = vor.u32 %v3060_v0, %v9695_v36 }
 0x3f3   : > { %v9723_v56 = vrot.slane %v2963_v26, 7  ;;  %v9725_v34 = vpack.c.bf16 %v2071_v17, %v2071_v17  ;;  %v2157_v14 = vsel %vm295_vm0, %v2156_v58, %v9713_v39  ;;  %v2989_v55 = vshrl.u32 %v2926_v60, 16 }
 0x3f4   : > { %v2059_v20 = vsel %vm295_vm0, %v2039_v7, %v2058_v62  ;;  %v1959_v2 = vsel %vm295_vm0, %v1943_v38, %v1958_v6  ;;  %v2139_v41 = vperm.slane %v2133_v33, %v8583_v19  ;;  %v2163_v8 = vperm.slane %v2157_v14, %v8583_v19  ;;  %3262 = vrot.lane.b32.xlu2 %v3062_v35, %s11705_s15 }
 0x3f5   : > { %v2970_v10 = vrot.slane %v9723_v56, 4  ;;  %v3082_v29 = vshrl.u32 %v9725_v34, 16  ;;  %v9736_v59 = vpack.c.bf16 %v2059_v20, %v2059_v20  ;;  %v2936_v0 = vpack.c.bf16 %v1959_v2, %v1959_v2 }
 0x3f6   : > { %v11713_v63 = vrot.slane %v9217_v49, 4  ;;  %v11714_v38 = vrot.slane %v9206_v11, 4  ;;  %v9750_v22 = vperm.slane %v9283_v42, %v8581_v12  ;;  %v2176_v62 = vrot.slane %v2163_v8, 4 }
 0x3f7   : > { %3230 = vrot.lane.b32.xlu1 %v2970_v10, %s11705_s15  ;;  %v9753_v26 = vrot.slane %v3082_v29, 7  ;;  %v9758_v17 = vrot.slane %v2989_v55, 7  ;;  %v11715_v33 = vrot.slane %v9239_v4, 4  ;;  %v3074_v35 = vshrl.u32 %v2936_v0, 16 }
 0x3f8   : > { %v9742_v7 = vsel %vm295_vm0, %v9148_v31, %v11713_v63  ;;  %v2185_v27 = vsel %vm295_vm0, %v11714_v38, %v9235_v30  ;;  %v2980_v31 = vshrl.u32 %v9736_v59, 16  ;;  %v2177_v6 = vsel %vm295_vm0, %v2176_v62, %v2139_v41 }
 0x3f9   : > { %v9756_v49 = vperm.slane %v2185_v27, %v8581_v12  ;;  %v2197_v58 = vsel %vm295_vm0, %v11715_v33, %v9742_v7  ;;  %v3089_v42 = vrot.slane %v9753_v26, 4  ;;  %v2946_v20 = vpack.c.bf16 %v2177_v6, %v2177_v6 }
 0x3fa   : > { %v9768_v14 = vperm.slane %v2197_v58, %v8581_v12  ;;  %v2992_v2 = vshll.u32 %v2926_v60, 16  ;;  %v2221_v55 = vsel %vm295_vm0, %v2220_v18, %v9268_v43  ;;  %v2258_v63 = vrot.slane %v9750_v22, 4 }
 0x3fb   : > { %3272 = vrot.lane.b32.xlu0 %v3089_v42, %s11705_s15  ;;  %v9774_v10 = vperm.slane %v2221_v55, %v8581_v12  ;;  %v2234_v29 = vrot.slane %v9756_v49, 4  ;;  %v3159_v38 = vshrl.u32 %v2946_v20, 16  ;;  %v9779_v62 = vrot.slane %v2980_v31, 7 }
 0x3fc   : > { %v2994_v27 = vor.u32 %v2992_v2, %v9758_v17  ;;  %v3162_v33 = vshll.u32 %v2946_v20, 16  ;;  %v9781_v58 = vrot.slane %v3074_v35, 7  ;;  %v2178_v55 = vrot.slane %v2139_v41, 4 }
 0x3fd   : > { %v2235_v43 = vsel %vm295_vm0, %v9768_v14, %v2234_v29  ;;  %v2259_v60 = vsel %vm295_vm0, %v9774_v10, %v2258_v63  ;;  %v9787_v18 = vrot.slane %v3159_v38, 7  ;;  %v3077_v31 = vshll.u32 %v2936_v0, 16 }
 0x3fe   : > { %v2243_v42 = vperm.slane %v2235_v43, %v8583_v19  ;;  %v2267_v6 = vperm.slane %v2259_v60, %v8583_v19  ;;  %v2020_v20 = vrot.slane %v9662_v54, 4  ;;  %v2044_v35 = vrot.slane %v9671_v23, 4 }
 0x3ff   : > { %3238 = vrot.lane.b32.xlu1 %v2994_v27, %s11705_s15  ;;  %v2120_v2 = vrot.slane %v9443_v32, 4  ;;  %v3164_v29 = vor.u32 %v3162_v33, %v9787_v18  ;;  %v2179_v63 = vsel %vm295_vm0, %v2163_v8, %v2178_v55  ;;  %v2144_v38 = vrot.slane %v9511_v9, 4 }
 0x400   : > { %v2284_v1 = vrot.slane %v2267_v6, 4  ;;  %v2987_v43 = vrot.slane %v9779_v62, 4  ;;  %v2021_v41 = vsel %vm295_vm0, %v2020_v20, %v9649_v53  ;;  %v2045_v0 = vsel %vm295_vm0, %v2044_v35, %v9655_v5 }
 0x401   : > { %v2121_v54 = vsel %vm295_vm0, %v2120_v2, %v9419_v44  ;;  %3298 = vrot.lane.b32.xlu2 %v3164_v29, %s11705_s15  ;;  %v3079_v32 = vor.u32 %v3077_v31, %v9781_v58  ;;  %v9809_v9 = vperm.slane %v2021_v41, %v8583_v19  ;;  %v2948_v53 = vpack.c.bf16 %v2179_v63, %v2179_v63 }
 0x402   : > { %v2285_v23 = vsel %vm295_vm0, %v2284_v1, %v2243_v42  ;;  %v9813_v27 = vperm.slane %v2045_v0, %v8583_v19  ;;  %v2145_v44 = vsel %vm295_vm0, %v2144_v38, %v9413_v57  ;;  %v9819_v33 = vperm.slane %v2121_v54, %v8583_v19 }
 0x403   : > { %3236 = vrot.lane.b32.xlu0 %v2987_v43, %s11705_s15  ;;  %v2943_v8 = vpack.c.bf16 %v2285_v23, %v2285_v23  ;;  %v2066_v5 = vrot.slane %v9809_v9, 4  ;;  %v9822_v1 = vperm.slane %v2145_v44, %v8583_v19  ;;  %v2286_v60 = vrot.slane %v2243_v42, 4 }
 0x404   : > { %v3131_v31 = vrot.slane %v9564_v52, 4  ;;  %v2134_v20 = vrot.slane %v9681_v21, 4  ;;  %v2158_v29 = vrot.slane %v9713_v39, 4  ;;  %v3176_v43 = vshrl.u32 %v2948_v53, 16 }
 0x405   : > { %v3133_v55 = vshrl.u32 %v2943_v8, 16  ;;  %v2067_v35 = vsel %vm295_vm0, %v9813_v27, %v2066_v5  ;;  %v2168_v57 = vrot.slane %v9822_v1, 4  ;;  %v2287_v2 = vsel %vm295_vm0, %v2267_v6, %v2286_v60 }
 0x406   : > { %v3136_v38 = vshll.u32 %v2943_v8, 16  ;;  %v2933_v41 = vpack.c.bf16 %v2067_v35, %v2067_v35  ;;  %v2945_v21 = vpack.c.bf16 %v2287_v2, %v2287_v2  ;;  %v2159_v0 = vsel %vm295_vm0, %v9705_v48, %v2158_v29 }
 0x407   : > { %v3135_v63 = vrot.slane %v3133_v55, 7  ;;  %v2169_v52 = vsel %vm295_vm0, %v2168_v57, %v9819_v33  ;;  %v2068_v6 = vrot.slane %v9700_v24, 4  ;;  %v2135_v8 = vsel %vm295_vm0, %v9684_v51, %v2134_v20 }
 0x408   : > { %v3048_v23 = vshrl.u32 %v2933_v41, 16  ;;  %v2938_v44 = vpack.c.bf16 %v2169_v52, %v2169_v52  ;;  %v9848_v48 = vperm.slane %v2159_v0, %v8583_v19  ;;  %v2186_v55 = vrot.slane %v9235_v30, 4 }
 0x409   : > { %v3140_v54 = vrot.slane %v3135_v63, 4  ;;  %v3138_v39 = vor.u32 %v3136_v38, %v3135_v63  ;;  %3268 = vrot.lane.b32.xlu2 %v3079_v32, %s11705_s15  ;;  %v2069_v24 = vsel %vm295_vm0, %v2068_v6, %v9690_v16  ;;  %v9854_v51 = vrot.slane %v3176_v43, 7 }
 0x40a   : > { %v3050_v60 = vrot.slane %v3048_v23, 7  ;;  %v3150_v32 = vshrl.u32 %v2945_v21, 16  ;;  %v9857_v20 = vperm.slane %v2135_v8, %v8583_v19  ;;  %v2198_v35 = vrot.slane %v9742_v7, 4 }
 0x40b   : > { %3290 = vrot.lane.b32.xlu1 %v3140_v54, %s11705_s15  ;;  %v3139_v5 = vsel %vm9832_vm5, %v3131_v31, %v3138_v39  ;;  %v9862_v31 = vperm.slane %v9300_v15, %v8581_v12  ;;  %v3051_v57 = vshll.u32 %v2933_v41, 16  ;;  %v2180_v16 = vrot.slane %v9848_v48, 4 }
 0x40c   : > { %3288 = vrot.lane.b32.xlu0 %v3139_v5, %s11705_s15  ;;  %v3179_v2 = vshll.u32 %v2948_v53, 16  ;;  %v3091_v30 = vshrl.u32 %v2938_v44, 16  ;;  %v2935_v29 = vpack.c.bf16 %v2069_v24, %v2069_v24  ;;  %v3046_v63 = vrot.slane %v9584_v3, 4  ;;  %v2341_v24 = vld [vmem:[#allocation2 + $0x84] sm:$0x1] }
 0x40d   : > { %v3053_v38 = vor.u32 %v3051_v57, %v3050_v60  ;;  %v9876_v15 = vperm.slane %v9286_v47, %v8581_v12  ;;  %v3152_v43 = vrot.slane %v3150_v32, 7  ;;  %v2181_v53 = vsel %vm295_vm0, %v2180_v16, %v9857_v20 }
 0x40e   : > { %v3181_v7 = vor.u32 %v3179_v2, %v9854_v51  ;;  %v3055_v41 = vrot.slane %v3050_v60, 4  ;;  %v2187_v3 = vsel %vm295_vm0, %v9206_v11, %v2186_v55  ;;  %v2199_v52 = vsel %vm295_vm0, %v9239_v4, %v2198_v35  ;;  %v2438_v4 = vld [vmem:[%s9872_s26 + $0xa0] sm:$0xff] }
 0x40f   : > { %v2268_v0 = vrot.slane %v9862_v31, 4  ;;  %v9887_v47 = vrot.slane %v3091_v30, 7  ;;  %v3153_v6 = vshll.u32 %v2945_v21, 16  ;;  %v3065_v54 = vshrl.u32 %v2935_v29, 16 }
 0x410   : > { %v3054_v39 = vsel %vm9832_vm5, %v3046_v63, %v3053_v38  ;;  %v2950_v23 = vpack.c.bf16 %v2181_v53, %v2181_v53  ;;  %v9893_v8 = vperm.slane %v2199_v52, %v8581_v12  ;;  %v3094_v5 = vshll.u32 %v2938_v44, 16 }
 0x411   : > { %3304 = vrot.lane.b32.xlu2 %v3181_v7, %s11705_s15  ;;  %v2269_v11 = vsel %vm295_vm0, %v2268_v0, %v9876_v15  ;;  %v3148_v60 = vrot.slane %v9586_v45, 4  ;;  %v3155_v55 = vor.u32 %v3153_v6, %v3152_v43  ;;  %v9902_v32 = vperm.slane %v2187_v3, %v8581_v12 }
 0x412   : > { %v2275_v21 = vperm.slane %v2269_v11, %v8583_v19  ;;  %v2244_v35 = vrot.slane %v9893_v8, 4  ;;  %v3096_v57 = vor.u32 %v3094_v5, %v9887_v47  ;;  %v3063_v16 = vrot.slane %v9695_v36, 4 }
 0x413   : > { %3260 = vrot.lane.b32.xlu1 %v3055_v41, %s11705_s15  ;;  %v11718_v44 = vmov 0  ;;  %v2470_v45 = vpack.c.bf16 %v2438_v4, %v2438_v4  ;;  %v3193_v30 = vshrl.u32 %v2950_v23, 16  ;;  %v3067_v63 = vrot.slane %v3065_v54, 7 }
 0x414   : > { %3258 = vrot.lane.b32.xlu0 %v3054_v39, %s11705_s15  ;;  %v2288_v2 = vrot.slane %v2275_v21, 4  ;;  %v11719_v44 = vsel %vm9909_vm7, 4294967295, %v11718_v44  ;;  %v2245_v12 = vsel %vm295_vm0, %v2244_v35, %v9902_v32  ;;  %v2342_v38 = vsel %vm9909_vm7, 0, %v2341_v24 }
 0x415   : > { %11720 = vst [vmem:[#allocation7_spill] sm:$0xff] %v11719_v44  ;;  %v2251_v7 = vperm.slane %v2245_v12, %v8583_v19  ;;  %v2655_v36 = vshrl.u32 %v2470_v45, 16  ;;  %v2658_v53 = vshll.u32 %v2470_v45, 16  ;;  %v2170_v41 = vrot.slane %v9819_v33, 4 }
 0x416   : > { %2343 = vst [vmem:[#allocation2 + $0x84] sm:$0x1] %v2342_v38  ;;  %v3157_v3 = vrot.slane %v3152_v43, 4  ;;  %v3156_v52 = vsel %vm9832_vm5, %v3148_v60, %v3155_v55  ;;  %v3068_v0 = vshll.u32 %v2935_v29, 16  ;;  %v2966_v4 = vshll.u32 %v9697_v13, 16 }
 0x417   : > { %v2289_v6 = vsel %vm295_vm0, %v2288_v2, %v2251_v7  ;;  %v9923_v54 = vrot.slane %v2655_v36, 7  ;;  %v2290_v39 = vrot.slane %v2251_v7, 4  ;;  %v2232_v43 = vrot.slane %v9768_v14, 4 }
 0x418   : > { %v3070_v11 = vor.u32 %v3068_v0, %v3067_v63  ;;  %v2947_v33 = vpack.c.bf16 %v2289_v6, %v2289_v6  ;;  %v9929_v29 = vrot.slane %v3193_v30, 7  ;;  %v2171_v60 = vsel %vm295_vm0, %v9822_v1, %v2170_v41  ;;  %v2326_v41 = vld [vmem:[#allocation2 + $0x48] sm:$0x1] }
 0x419   : > { %3274 = vrot.lane.b32.xlu2 %v3096_v57, %s11705_s15  ;;  %v2660_v5 = vor.u32 %v2658_v53, %v9923_v54  ;;  %v2291_v24 = vsel %vm295_vm0, %v2275_v21, %v2290_v39  ;;  %v2010_v55 = vrot.slane %v9625_v50, 4  ;;  %v2961_v35 = vrot.slane %v9589_v28, 4 }
 0x41a   : > { %v2968_v13 = vor.u32 %v2966_v4, %v9723_v56  ;;  %v3196_v57 = vshll.u32 %v2950_v23, 16  ;;  %v3167_v2 = vshrl.u32 %v2947_v33, 16  ;;  %v2233_v45 = vsel %vm295_vm0, %v2232_v43, %v9756_v49 }
 0x41b   : > { %3296 = vrot.lane.b32.xlu1 %v3157_v3, %s11705_s15  ;;  %v2256_v1 = vrot.slane %v9774_v10, 4  ;;  %v3072_v21 = vrot.slane %v3067_v63, 4  ;;  %v9947_v50 = vpack.c.bf16 %v2171_v60, %v2171_v60  ;;  %v9949_v28 = vpack.c.bf16 %v2291_v24, %v2291_v24  ;;  %v2428_v3 = vld [vmem:[%s9872_s26 + $0x50] sm:$0xff] }
 0x41c   : > { %3294 = vrot.lane.b32.xlu0 %v3156_v52, %s11705_s15  ;;  %v3198_v56 = vor.u32 %v3196_v57, %v9929_v29  ;;  %v3071_v12 = vsel %vm9832_vm5, %v3063_v16, %v3070_v11  ;;  %v2969_v10 = vsel %vm9832_vm5, %v2961_v35, %v2968_v13  ;;  %v3165_v63 = vrot.slane %v9787_v18, 4 }
 0x41d   : > { %v2880_v30 = vld [vmem:[#allocation2 + $0x84] sm:$0xf]  ;;  %v2257_v49 = vsel %vm295_vm0, %v2256_v1, %v9750_v22  ;;  %v9962_v38 = vperm.slane %v2233_v45, %v8583_v19  ;;  %v3169_v16 = vrot.slane %v3167_v2, 7  ;;  %v3080_v36 = vrot.slane %v9781_v58, 4 }
 0x41e   : > { %v2881_v23 = vsel %vm9940_vm10, %v2660_v5, %v2880_v30  ;;  %v9965_v7 = vperm.slane %v2257_v49, %v8583_v19  ;;  %v2011_v22 = vsel %vm295_vm0, %v9607_v37, %v2010_v55  ;;  %v2034_v53 = vrot.slane %v9617_v46, 4 }
 0x41f   : > { %2882 = vst [vmem:[#allocation2 + $0x84] sm:$0xf] %v2881_v23  ;;  %v3170_v18 = vshll.u32 %v2947_v33, 16  ;;  %v3108_v52 = vshrl.u32 %v9947_v50, 16  ;;  %v3184_v0 = vshrl.u32 %v9949_v28, 16  ;;  %v2019_v39 = vperm.slane %v2011_v22, %v8583_v19  ;;  %v2440_v22 = vld [vmem:[%s9872_s26 + $0xb0] sm:$0xff] }
 0x420   : > { %v2280_v6 = vrot.slane %v9965_v7, 4  ;;  %v2035_v37 = vsel %vm295_vm0, %v9578_v61, %v2034_v53  ;;  %v2327_v46 = vsel %vm9909_vm7, 0, %v2326_v41  ;;  %v2460_v11 = vpack.c.bf16 %v2428_v3, %v2428_v3 }
 0x421   : > { %3310 = vrot.lane.b32.xlu2 %v3198_v56, %s11705_s15  ;;  %v3111_v4 = vshll.u32 %v9947_v50, 16  ;;  %v3085_v33 = vshll.u32 %v9725_v34, 16  ;;  %v2043_v5 = vperm.slane %v2035_v37, %v8583_v19  ;;  %2328 = vst [vmem:[#allocation2 + $0x48] sm:$0x1] %v2327_v46  ;;  %v3172_v60 = vor.u32 %v3170_v18, %v3169_v16 }
 0x422   : > { %v2281_v43 = vsel %vm295_vm0, %v2280_v6, %v9962_v38  ;;  %v2062_v24 = vrot.slane %v2019_v39, 4  ;;  %v2570_v55 = vshrl.u32 %v2460_v11, 16  ;;  %v2573_v35 = vshll.u32 %v2460_v11, 16 }
 0x423   : > { %3266 = vrot.lane.b32.xlu1 %v3072_v21, %s11705_s15  ;;  %v9988_v13 = vrot.slane %v3108_v52, 7  ;;  %v2060_v61 = vrot.slane %v2043_v5, 4  ;;  %v2246_v57 = vrot.slane %v9902_v32, 4  ;;  %v2270_v2 = vrot.slane %v9876_v15, 4 }
 0x424   : > { %3264 = vrot.lane.b32.xlu0 %v3071_v12, %s11705_s15  ;;  %v3174_v45 = vrot.slane %v3169_v16, 4  ;;  %v9992_v34 = vrot.slane %v3184_v0, 7  ;;  %v2063_v1 = vsel %vm295_vm0, %v2043_v5, %v2062_v24  ;;  %v9995_v21 = vrot.slane %v2570_v55, 7  ;;  %v2344_v16 = vld [vmem:[#allocation2 + $0x90] sm:$0x1] }
 0x425   : > { %v2929_v30 = vpack.c.bf16 %v2063_v1, %v2063_v1  ;;  %v2061_v50 = vsel %vm295_vm0, %v2060_v61, %v2019_v39  ;;  %v2247_v56 = vsel %vm295_vm0, %v9893_v8, %v2246_v57  ;;  %v2271_v12 = vsel %vm295_vm0, %v9862_v31, %v2270_v2  ;;  %v2329_v2 = vld [vmem:[#allocation2 + $0x54] sm:$0x1] }
 0x426   : > { %v3173_v15 = vsel %vm9832_vm5, %v3165_v63, %v3172_v60  ;;  %v3012_v32 = vrot.slane %v9594_v25, 4  ;;  %v2575_v23 = vor.u32 %v2573_v35, %v9995_v21  ;;  %v2927_v49 = vpack.c.bf16 %v2061_v50, %v2061_v50 }
 0x427   : > { %v3014_v53 = vshrl.u32 %v2929_v30, 16  ;;  %v2995_v8 = vrot.slane %v9758_v17, 4  ;;  %v2345_v31 = vsel %vm9909_vm7, 0, %v2344_v16  ;;  %v10013_v63 = vpack.c.bf16 %v2281_v43, %v2281_v43 }
 0x428   : > { %v3017_v25 = vshll.u32 %v2929_v30, 16  ;;  %v2845_v41 = vld [vmem:[#allocation2 + $0x48] sm:$0xf]  ;;  %v2997_v3 = vshrl.u32 %v2927_v49, 16  ;;  %v10016_v18 = vperm.slane %v2247_v56, %v8583_v19  ;;  %2346 = vst [vmem:[#allocation2 + $0x90] sm:$0x1] %v2345_v31  ;;  %v10025_v46 = vperm.slane %v2271_v12, %v8583_v19 }
 0x429   : > { %3228 = vrot.lane.b32.xlu2 %v2969_v10, %s11705_s15  ;;  %v2472_v10 = vpack.c.bf16 %v2440_v22, %v2440_v22  ;;  %v10018_v52 = vrot.slane %v3014_v53, 7  ;;  %v2846_v0 = vsel %vm9940_vm10, %v2575_v23, %v2845_v41  ;;  %v3000_v37 = vshll.u32 %v2927_v49, 16 }
 0x42a   : > { %2847 = vst [vmem:[#allocation2 + $0x48] sm:$0xf] %v2846_v0  ;;  %v10022_v39 = vrot.slane %v2997_v3, 7  ;;  %v2064_v11 = vrot.slane %v9813_v27, 4  ;;  %v3087_v43 = vor.u32 %v3085_v33, %v9753_v26  ;;  %v2983_v5 = vshll.u32 %v9736_v59, 16 }
 0x42b   : > { %3302 = vrot.lane.b32.xlu1 %v3174_v45, %s11705_s15  ;;  %v2672_v17 = vshrl.u32 %v2472_v10, 16  ;;  %v2675_v6 = vshll.u32 %v2472_v10, 16  ;;  %v3019_v60 = vor.u32 %v3017_v25, %v10018_v52  ;;  %v3113_v55 = vor.u32 %v3111_v4, %v9988_v13  ;;  %v2430_v45 = vld [vmem:[%s9872_s26 + $0x60] sm:$0xff] }
 0x42c   : > { %3300 = vrot.lane.b32.xlu0 %v3173_v15, %s11705_s15  ;;  %v3002_v35 = vor.u32 %v3000_v37, %v10022_v39  ;;  %v2292_v61 = vrot.slane %v10025_v46, 4  ;;  %v2282_v19 = vrot.slane %v9962_v38, 4  ;;  %v3191_v57 = vrot.slane %v9992_v34, 4 }
 0x42d   : > { %v10031_v24 = vrot.slane %v2672_v17, 7  ;;  %v3099_v27 = vshrl.u32 %v10013_v63, 16  ;;  %v10041_v59 = vsel %vm9832_vm5, %v3012_v32, %v3019_v60  ;;  %v2065_v38 = vsel %vm295_vm0, %v2064_v11, %v9809_v9  ;;  %v2347_v11 = vld [vmem:[#allocation2 + $0x9c] sm:$0x1] }
 0x42e   : > { %v10047_v4 = vsel %vm9832_vm5, %v2995_v8, %v3002_v35  ;;  %v2293_v33 = vsel %vm295_vm0, %v2292_v61, %v10016_v18  ;;  %v2283_v1 = vsel %vm295_vm0, %v9965_v7, %v2282_v19  ;;  %v3088_v30 = vsel %vm9832_vm5, %v3080_v36, %v3087_v43  ;;  %v11725_v43 = vld [vmem:[#allocation6_spill] sm:$0xff] }
 0x42f   : > { %v2677_v26 = vor.u32 %v2675_v6, %v10031_v24  ;;  %v2978_v50 = vrot.slane %v9603_v40, 4  ;;  %v2985_v56 = vor.u32 %v2983_v5, %v9779_v62  ;;  %v2330_v12 = vsel %vm9909_vm7, 0, %v2329_v2  ;;  %v2887_v15 = vld [vmem:[#allocation2 + $0x90] sm:$0xf]  ;;  %v2442_v61 = vld [vmem:[%s9872_s26 + $0xc0] sm:$0xff] }
 0x430   : > { %v3182_v9 = vrot.slane %v9854_v51, 4  ;;  %v3187_v7 = vshll.u32 %v9949_v28, 16  ;;  %2331 = vst [vmem:[#allocation2 + $0x54] sm:$0x1] %v2330_v12  ;;  %v2462_v32 = vpack.c.bf16 %v2430_v45, %v2430_v45  ;;  %v3101_v58 = vrot.slane %v3099_v27, 7 }
 0x431   : > { %3280 = vrot.lane.b32.xlu2 %v3113_v55, %s11705_s15  ;;  %v2888_v36 = vsel %vm9940_vm10, %v2677_v26, %v2887_v15  ;;  %v10070_v23 = vpack.c.bf16 %v2293_v33, %v2293_v33  ;;  %v10072_v40 = vpack.c.bf16 %v2065_v38, %v2065_v38  ;;  %v3445_v51 = vld [vmem:[#allocation2 + $0x84] sm:$0xf]  ;;  %v2986_v22 = vsel %vm9832_vm5, %v2978_v50, %v2985_v56  ;;  %v3410_v26 = vld [vmem:[#allocation2 + $0x48] sm:$0xf]  ;;  %v2424_v56 = vld [vmem:[%s9872_s26 + $0x30] sm:$0xff] }
 0x432   : > { %v3189_v28 = vor.u32 %v3187_v7, %v9992_v34  ;;  %2889 = vst [vmem:[#allocation2 + $0x90] sm:$0xf] %v2888_v36  ;;  %v2587_v49 = vshrl.u32 %v2462_v32, 16  ;;  %v2590_v16 = vshll.u32 %v2462_v32, 16  ;;  %v3097_v8 = vrot.slane %v9887_v47, 4  ;;  %v2418_v50 = vld [vmem:[%s9872_s26] sm:$0xff] }
 0x433   : > { %3308 = vrot.lane.b32.xlu1 %v3191_v57, %s11705_s15  ;;  %v3199_v31 = vrot.slane %v9929_v29, 4  ;;  %v2294_v25 = vrot.slane %v10016_v18, 4  ;;  %v3106_v34 = vrot.slane %v3101_v58, 4  ;;  %v3201_v3 = vshrl.u32 %v10070_v23, 16  ;;  %v2320_v7 = vld [vmem:[#allocation2 + $0x30] sm:$0x1] }
 0x434   : > { %3270 = vrot.lane.b32.xlu0 %v3088_v30, %s11705_s15  ;;  %v10085_v10 = vrot.slane %v2587_v49, 7  ;;  %v3031_v0 = vshrl.u32 %v10072_v40, 16  ;;  %v3190_v17 = vsel %vm9832_vm5, %v3182_v9, %v3189_v28  ;;  %v3021_v6 = vrot.slane %v10018_v52, 4  ;;  %v2311_v30 = vld [vmem:[#allocation2 + $0xc] sm:$0x1]  ;;  %v2432_v36 = vld [vmem:[%s9872_s26 + $0x70] sm:$0xff] }
 0x435   : > { %v3102_v37 = vshll.u32 %v10013_v63, 16  ;;  %v3029_v5 = vrot.slane %v11725_v43, 4  ;;  %v3114_v55 = vrot.slane %v9988_v13, 4  ;;  %v2348_v35 = vsel %vm9909_vm7, 0, %v2347_v11  ;;  %v2332_v32 = vld [vmem:[#allocation2 + $0x60] sm:$0x1] }
 0x436   : > { %v3287_v53 = vpop.permute.xlu2 %3286  ;;  %v2592_v18 = vor.u32 %v2590_v16, %v10085_v10  ;;  %v10106_v52 = vsel %vm295_vm0, %v10025_v46, %v2294_v25  ;;  %v3034_v63 = vshll.u32 %v10072_v40, 16  ;;  %v2182_v57 = vrot.slane %v9857_v20, 4  ;;  %2349 = vst [vmem:[#allocation2 + $0x9c] sm:$0x1] %v2348_v35 }
 0x437   : > { %v3446_v41 = vsel %vm10076_vm12, %v3287_v53, %v3445_v51  ;;  %v2852_v60 = vld [vmem:[#allocation2 + $0x54] sm:$0xf]  ;;  %v2474_v27 = vpack.c.bf16 %v2442_v61, %v2442_v61  ;;  %v10113_v33 = vrot.slane %v3201_v3, 7  ;;  %v10115_v38 = vrot.slane %v3031_v0, 7 }
 0x438   : > { %3447 = vst [vmem:[#allocation2 + $0x84] sm:$0xf] %v3446_v41  ;;  %v2853_v19 = vsel %vm9940_vm10, %v2592_v18, %v2852_v60  ;;  %v3104_v46 = vor.u32 %v3102_v37, %v3101_v58  ;;  %v10119_v12 = vpack.c.bf16 %v2283_v1, %v2283_v1  ;;  %v2312_v20 = vsel %vm9909_vm7, 0, %v2311_v30  ;;  %v2323_v30 = vld [vmem:[#allocation2 + $0x3c] sm:$0x1] }
 0x439   : > { %3234 = vrot.lane.b32.xlu2 %v2986_v22, %s11705_s15  ;;  %2854 = vst [vmem:[#allocation2 + $0x54] sm:$0xf] %v2853_v19  ;;  %v2689_v2 = vshrl.u32 %v2474_v27, 16  ;;  %v2692_v45 = vshll.u32 %v2474_v27, 16  ;;  %v2450_v9 = vpack.c.bf16 %v2418_v50, %v2418_v50  ;;  %v2456_v15 = vpack.c.bf16 %v2424_v56, %v2424_v56  ;;  %v3452_v60 = vld [vmem:[#allocation2 + $0x90] sm:$0xf] }
 0x43a   : > { %2313 = vst [vmem:[#allocation2 + $0xc] sm:$0x1] %v2312_v20  ;;  %v2321_v58 = vsel %vm9909_vm7, 0, %v2320_v7  ;;  %v2333_v28 = vsel %vm9909_vm7, 0, %v2332_v32  ;;  %v2464_v1 = vpack.c.bf16 %v2432_v36, %v2432_v36  ;;  %v3105_v0 = vsel %vm9832_vm5, %v3097_v8, %v3104_v46  ;;  %v2444_v7 = vld [vmem:[%s9872_s26 + $0xd0] sm:$0xff] }
 0x43b   : > { %3278 = vrot.lane.b32.xlu1 %v3106_v34, %s11705_s15  ;;  %v10124_v51 = vrot.slane %v2689_v2, 7  ;;  %v2485_v16 = vshrl.u32 %v2450_v9, 16  ;;  %v2488_v22 = vshll.u32 %v2450_v9, 16  ;;  %2322 = vst [vmem:[#allocation2 + $0x30] sm:$0x1] %v2321_v58  ;;  %v2536_v53 = vshrl.u32 %v2456_v15, 16 }
 0x43c   : > { %3306 = vrot.lane.b32.xlu0 %v3190_v17, %s11705_s15  ;;  %v2539_v41 = vshll.u32 %v2456_v15, 16  ;;  %v2604_v34 = vshrl.u32 %v2464_v1, 16  ;;  %v2607_v3 = vshll.u32 %v2464_v1, 16  ;;  %2334 = vst [vmem:[#allocation2 + $0x60] sm:$0x1] %v2333_v28  ;;  %v3204_v8 = vshll.u32 %v10070_v23, 16 }
 0x43d   : > { %v2694_v25 = vor.u32 %v2692_v45, %v10124_v51  ;;  %v2894_v17 = vld [vmem:[#allocation2 + $0x9c] sm:$0xf]  ;;  %v10140_v37 = vrot.slane %v2485_v16, 7  ;;  %v10142_v18 = vrot.slane %v2536_v53, 7  ;;  %v3119_v35 = vshll.u32 %v10119_v12, 16  ;;  %v2420_v45 = vld [vmem:[%s9872_s26 + $0x10] sm:$0xff] }
 0x43e   : > { %v3257_v40 = vpop.permute.xlu2 %3256  ;;  %v10149_v47 = vrot.slane %v2604_v34, 7  ;;  %v3036_v27 = vor.u32 %v3034_v63, %v10115_v38  ;;  %v3038_v46 = vrot.slane %v10115_v38, 4  ;;  %v2314_v2 = vld [vmem:[#allocation2 + $0x18] sm:$0x1]  ;;  %v3206_v23 = vor.u32 %v3204_v8, %v10113_v33  ;;  %v2426_v9 = vld [vmem:[%s9872_s26 + $0x40] sm:$0xff] }
 0x43f   : > { %v3411_v49 = vsel %vm10076_vm12, %v3257_v40, %v3410_v26  ;;  %v2895_v11 = vsel %vm9940_vm10, %v2694_v25, %v2894_v17  ;;  %v2490_v61 = vor.u32 %v2488_v22, %v10140_v37  ;;  %v2541_v19 = vor.u32 %v2539_v41, %v10142_v18 }
 0x440   : > { %3412 = vst [vmem:[#allocation2 + $0x48] sm:$0xf] %v3411_v49  ;;  %v2183_v26 = vsel %vm295_vm0, %v9848_v48, %v2182_v57  ;;  %v2609_v56 = vor.u32 %v2607_v3, %v10149_v47  ;;  %v2452_v20 = vpack.c.bf16 %v2420_v45, %v2420_v45  ;;  %v3208_v15 = vrot.slane %v10113_v33, 4  ;;  %v2350_v49 = vld [vmem:[#allocation2 + $0xa8] sm:$0x1]  ;;  %vm10194_vm0 = vmand %vm2299_vm6, %vm2362_vm8 }
 0x441   : > { %3246 = vrot.lane.b32.xlu2 %v10041_v59, %s11705_s15  ;;  %v3116_v59 = vshrl.u32 %v10119_v12, 16  ;;  %2896 = vst [vmem:[#allocation2 + $0x9c] sm:$0xf] %v2895_v11  ;;  %v2807_v50 = vld [vmem:[#allocation2 + $0xc] sm:$0xf]  ;;  %v2315_v12 = vsel %vm9909_vm7, 0, %v2314_v2  ;;  %v2458_v36 = vpack.c.bf16 %v2426_v9, %v2426_v9  ;;  %v10177_v33 = vpack.c.bf16 %v2183_v26, %v2183_v26 }
 0x442   : > { %v2808_v57 = vsel %vm9940_vm10, %v2490_v61, %v2807_v50  ;;  %v2831_v32 = vld [vmem:[#allocation2 + $0x30] sm:$0xf]  ;;  %2316 = vst [vmem:[#allocation2 + $0x18] sm:$0x1] %v2315_v12  ;;  %v2502_v28 = vshrl.u32 %v2452_v20, 16  ;;  %v2505_v1 = vshll.u32 %v2452_v20, 16  ;;  %v2476_v25 = vpack.c.bf16 %v2444_v7, %v2444_v7 }
 0x443   : > { %3248 = vrot.lane.b32.xlu1 %v3021_v6, %s11705_s15  ;;  %v3004_v6 = vrot.slane %v10022_v39, 4  ;;  %v10167_v48 = vrot.slane %v3116_v59, 7  ;;  %2809 = vst [vmem:[#allocation2 + $0xc] sm:$0xf] %v2808_v57  ;;  %v2832_v58 = vsel %vm9940_vm10, %v2541_v19, %v2831_v32  ;;  %v2859_v16 = vld [vmem:[#allocation2 + $0x60] sm:$0xf]  ;;  %v3207_v41 = vsel %vm9832_vm5, %v3199_v31, %v3206_v23 }
 0x444   : > { %3276 = vrot.lane.b32.xlu0 %v3105_v0, %s11705_s15  ;;  %v2324_v22 = vsel %vm9909_vm7, 0, %v2323_v30  ;;  %v2553_v53 = vshrl.u32 %v2458_v36, 16  ;;  %2833 = vst [vmem:[#allocation2 + $0x30] sm:$0xf] %v2832_v58  ;;  %v10188_v34 = vrot.slane %v2502_v28, 7  ;;  %v2351_v3 = vsel %vm9909_vm7, 0, %v2350_v49 }
 0x445   : > { %v11726_v0 = vmov 0  ;;  %v3417_v29 = vld [vmem:[#allocation2 + $0x54] sm:$0xf]  ;;  %v3123_v31 = vrot.slane %v10167_v48, 4  ;;  %v2706_v17 = vshrl.u32 %v2476_v25, 16  ;;  %v2709_v8 = vshll.u32 %v2476_v25, 16 }
 0x446   : > { %v3293_v63 = vpop.permute.xlu2 %3292  ;;  %v11727_v0 = vsel %vm10194_vm0, 4294967295, %v11726_v0  ;;  %v2507_v59 = vor.u32 %v2505_v1, %v10188_v34  ;;  %2325 = vst [vmem:[#allocation2 + $0x3c] sm:$0x1] %v2324_v22  ;;  %v10201_v11 = vrot.slane %v2553_v53, 7  ;;  %v3037_v61 = vsel %vm9832_vm5, %v3029_v5, %v3036_v27  ;;  %v2367_v26 = vld [vmem:[#allocation2 + $0x14] sm:$0x1] }
 0x447   : > { %v3453_v40 = vsel %vm10076_vm12, %v3293_v63, %v3452_v60  ;;  %11728 = vst [vmem:[#allocation6_spill] sm:$0xff] %v11727_v0  ;;  %v2556_v60 = vshll.u32 %v2458_v36, 16  ;;  %v10207_v19 = vrot.slane %v2706_v17, 7  ;;  %v2419_v2 = vld [vmem:[%s9872_s26 + $0x8] sm:$0xff]  ;;  %v3121_v45 = vor.u32 %v3119_v35, %v10167_v48  ;;  %v2433_v12 = vld [vmem:[%s9872_s26 + $0x78] sm:$0xff]  ;;  %v2434_v1 = vld [vmem:[%s9872_s26 + $0x80] sm:$0xff] }
 0x448   : > { %3454 = vst [vmem:[#allocation2 + $0x90] sm:$0xf] %v3453_v40  ;;  %v3210_v30 = vshrl.u32 %v10177_v33, 16  ;;  %v2368_v50 = vsel %vm10194_vm0, 0, %v2367_v26  ;;  %v3213_v20 = vshll.u32 %v10177_v33, 16  ;;  %v10220_v5 = vpack.c.bf16 %v10106_v52, %v10106_v52 }
 0x449   : > { %3240 = vrot.lane.b32.xlu2 %v10047_v4, %s11705_s15  ;;  %v2860_v4 = vsel %vm9940_vm10, %v2609_v56, %v2859_v16  ;;  %2352 = vst [vmem:[#allocation2 + $0xa8] sm:$0x1] %v2351_v3  ;;  %v2817_v23 = vld [vmem:[#allocation2 + $0x18] sm:$0xf]  ;;  %v10214_v56 = vpack.c.bf16 %v2419_v2, %v2419_v2  ;;  %v2388_v35 = vld [vmem:[#allocation2 + $0x68] sm:$0x1]  ;;  %v10224_v9 = vpack.c.bf16 %v2433_v12, %v2433_v12 }
 0x44a   : > { %2861 = vst [vmem:[#allocation2 + $0x60] sm:$0xf] %v2860_v4  ;;  %v2818_v27 = vsel %vm9940_vm10, %v2507_v59, %v2817_v23  ;;  %v2558_v63 = vor.u32 %v2556_v60, %v10201_v11  ;;  %v2389_v52 = vsel %vm10194_vm0, 0, %v2388_v35  ;;  %v2335_v48 = vld [vmem:[#allocation2 + $0x6c] sm:$0x1]  ;;  %v2711_v57 = vor.u32 %v2709_v8, %v10207_v19  ;;  %v2422_v60 = vld [vmem:[%s9872_s26 + $0x20] sm:$0xff] }
 0x44b   : > { %3314 = vrot.lane.b32.xlu1 %v3208_v15, %s11705_s15  ;;  %2369 = vst [vmem:[#allocation2 + $0x14] sm:$0x1] %v2368_v50  ;;  %v2493_v15 = vshrl.u32 %v10214_v56, 16  ;;  %v2612_v32 = vshrl.u32 %v10224_v9, 16  ;;  %v2336_v36 = vsel %vm9909_vm7, 0, %v2335_v48  ;;  %v3122_v40 = vsel %vm9832_vm5, %v3114_v55, %v3121_v45 }
 0x44c   : > { %3312 = vrot.lane.b32.xlu0 %v3207_v41, %s11705_s15  ;;  %2819 = vst [vmem:[#allocation2 + $0x18] sm:$0xf] %v2818_v27  ;;  %v3372_v58 = vld [vmem:[#allocation2 + $0xc] sm:$0xf]  ;;  %v10246_v49 = vrot.slane %v3210_v30, 7  ;;  %v2466_v22 = vpack.c.bf16 %v2434_v1, %v2434_v1  ;;  %v3218_v13 = vshrl.u32 %v10220_v5, 16  ;;  %v2454_v2 = vpack.c.bf16 %v2422_v60, %v2422_v60 }
 0x44d   : > { %v10242_v28 = vrot.slane %v2493_v15, 7  ;;  %2390 = vst [vmem:[#allocation2 + $0x68] sm:$0x1] %v2389_v52  ;;  %v2838_v33 = vld [vmem:[#allocation2 + $0x3c] sm:$0xf]  ;;  %v10248_v16 = vrot.slane %v2612_v32, 7 }
 0x44e   : > { %v3263_v43 = vpop.permute.xlu2 %3262  ;;  %2337 = vst [vmem:[#allocation2 + $0x6c] sm:$0x1] %v2336_v36  ;;  %v3396_v53 = vld [vmem:[#allocation2 + $0x30] sm:$0xf]  ;;  %v2839_v55 = vsel %vm9940_vm10, %v2558_v63, %v2838_v33  ;;  %v2621_v17 = vshrl.u32 %v2466_v22, 16  ;;  %v2624_v59 = vshll.u32 %v2466_v22, 16  ;;  %v3215_v45 = vor.u32 %v3213_v20, %v10246_v49 }
 0x44f   : > { %v3418_v7 = vsel %vm10076_vm12, %v3263_v43, %v3417_v29  ;;  %v2500_v41 = vrot.slane %v10242_v28, 4  ;;  %2840 = vst [vmem:[#allocation2 + $0x3c] sm:$0xf] %v2839_v55  ;;  %v2317_v26 = vld [vmem:[#allocation2 + $0x24] sm:$0x1]  ;;  %v3220_v35 = vrot.slane %v3218_v13, 7 }
 0x450   : > { %3419 = vst [vmem:[#allocation2 + $0x54] sm:$0xf] %v3418_v7  ;;  %v2901_v25 = vld [vmem:[#allocation2 + $0xa8] sm:$0xf]  ;;  %v3459_v30 = vld [vmem:[#allocation2 + $0x9c] sm:$0xf] }
 0x451   : > { %3252 = vrot.lane.b32.xlu2 %v3037_v61, %s11705_s15  ;;  %v2902_v29 = vsel %vm9940_vm10, %v2711_v57, %v2901_v25  ;;  %v10269_v12 = vrot.slane %v2621_v17, 7  ;;  %v2318_v43 = vsel %vm9909_vm7, 0, %v2317_v26  ;;  %v2519_v7 = vshrl.u32 %v2454_v2, 16  ;;  %v2370_v20 = vld [vmem:[#allocation2 + $0x20] sm:$0x1]  ;;  %v2421_v57 = vld [vmem:[%s9872_s26 + $0x18] sm:$0xff] }
 0x452   : > { %2903 = vst [vmem:[#allocation2 + $0xa8] sm:$0xf] %v2902_v29  ;;  %v2814_v61 = vld [vmem:[#allocation2 + $0x14] sm:$0x1]  ;;  %v2522_v48 = vshll.u32 %v2454_v2, 16  ;;  %v2446_v1 = vld [vmem:[%s9872_s26 + $0xe0] sm:$0xff] }
 0x453   : > { %3284 = vrot.lane.b32.xlu1 %v3123_v31, %s11705_s15  ;;  %v2619_v31 = vrot.slane %v10248_v16, 4  ;;  %v2815_v50 = vsel %vm10256_vm14, %v2500_v41, %v2814_v61  ;;  %v3382_v63 = vld [vmem:[#allocation2 + $0x18] sm:$0xf]  ;;  %v2626_v52 = vor.u32 %v2624_v59, %v10269_v12  ;;  %2319 = vst [vmem:[#allocation2 + $0x24] sm:$0x1] %v2318_v43  ;;  %v3216_v55 = vrot.slane %v10246_v49, 4 }
 0x454   : > { %3282 = vrot.lane.b32.xlu0 %v3122_v40, %s11705_s15  ;;  %v3227_v3 = vpop.permute.xlu1 %3226  ;;  %2816 = vst [vmem:[#allocation2 + $0x14] sm:$0x1] %v2815_v50  ;;  %v2863_v15 = vld [vmem:[#allocation2 + $0x68] sm:$0x1]  ;;  %v10283_v40 = vrot.slane %v2519_v7, 7  ;;  %v3221_v25 = vshll.u32 %v10220_v5, 16 }
 0x455   : > { %v3373_v8 = vsel %vm10076_vm12, %v3227_v3, %v3372_v58  ;;  %v2864_v32 = vsel %vm10256_vm14, %v2619_v31, %v2863_v15  ;;  %v2866_v36 = vld [vmem:[#allocation2 + $0x6c] sm:$0xf]  ;;  %v10285_v58 = vpack.c.bf16 %v2421_v57, %v2421_v57  ;;  %v2353_v22 = vld [vmem:[#allocation2 + $0xb4] sm:$0x1]  ;;  %v2496_v15 = vshll.u32 %v10214_v56, 16 }
 0x456   : > { %3374 = vst [vmem:[#allocation2 + $0xc] sm:$0xf] %v3373_v8  ;;  %v3245_v23 = vpop.permute.xlu0 %3244  ;;  %v2867_v38 = vsel %vm9940_vm10, %v2626_v52, %v2866_v36  ;;  %v3403_v41 = vld [vmem:[#allocation2 + $0x3c] sm:$0xf]  ;;  %v2354_v3 = vsel %vm9909_vm7, 0, %v2353_v22  ;;  %v3223_v17 = vor.u32 %v3221_v25, %v3220_v35  ;;  %v2524_v59 = vor.u32 %v2522_v48, %v10283_v40  ;;  %v2439_v60 = vld [vmem:[%s9872_s26 + $0xa8] sm:$0xff] }
 0x457   : > { %v3397_v27 = vsel %vm10076_vm12, %v3245_v23, %v3396_v53  ;;  %2865 = vst [vmem:[#allocation2 + $0x68] sm:$0x1] %v2864_v32  ;;  %v2478_v53 = vpack.c.bf16 %v2446_v1, %v2446_v1  ;;  %v2510_v39 = vshrl.u32 %v10285_v58, 16  ;;  %v2397_v5 = vld [vmem:[#allocation2 + $0x8c] sm:$0x1]  ;;  %v3225_v8 = vrot.slane %v3220_v35, 4 }
 0x458   : > { %3398 = vst [vmem:[#allocation2 + $0x30] sm:$0xf] %v3397_v27  ;;  %v2398_v26 = vsel %vm10194_vm0, 0, %v2397_v5  ;;  %v2471_v2 = vpack.c.bf16 %v2439_v60, %v2439_v60  ;;  %v3224_v35 = vsel %vm9832_vm5, %v3216_v55, %v3223_v17  ;;  %v2661_v57 = vrot.slane %v9923_v54, 4 }
 0x459   : > { %3316 = vrot.lane.b32.xlu2 %v3215_v45, %s11705_s15  ;;  %2868 = vst [vmem:[#allocation2 + $0x6c] sm:$0xf] %v2867_v38  ;;  %v2723_v29 = vshrl.u32 %v2478_v53, 16  ;;  %v10305_v49 = vrot.slane %v2510_v39, 7  ;;  %v3424_v45 = vld [vmem:[#allocation2 + $0x60] sm:$0xf] }
 0x45a   : > { %2355 = vst [vmem:[#allocation2 + $0xb4] sm:$0x1] %v2354_v3  ;;  %v2726_v50 = vshll.u32 %v2478_v53, 16  ;;  %v2824_v43 = vld [vmem:[#allocation2 + $0x24] sm:$0xf]  ;;  %v2663_v27 = vshrl.u32 %v2471_v2, 16  ;;  %v2498_v53 = vor.u32 %v2496_v15, %v10242_v28 }
 0x45b   : > { %3254 = vrot.lane.b32.xlu1 %v3038_v46, %s11705_s15  ;;  %v3299_v33 = vpop.permute.xlu2 %3298  ;;  %v2371_v46 = vsel %vm10194_vm0, 0, %v2370_v20  ;;  %v10312_v23 = vrot.slane %v2723_v29, 7  ;;  %v2666_v7 = vshll.u32 %v2471_v2, 16  ;;  %v2825_v20 = vsel %vm9940_vm10, %v2524_v59, %v2824_v43  ;;  %2399 = vst [vmem:[#allocation2 + $0x8c] sm:$0x1] %v2398_v26 }
 0x45c   : > { %3242 = vrot.lane.b32.xlu0 %v3004_v6, %s11705_s15  ;;  %v3460_v13 = vsel %vm10076_vm12, %v3299_v33, %v3459_v30  ;;  %v3233_v6 = vpop.permute.xlu1 %3232  ;;  %2372 = vst [vmem:[#allocation2 + $0x20] sm:$0x1] %v2371_v46  ;;  %v2665_v48 = vrot.slane %v2663_v27, 7  ;;  %v3379_v36 = vld [vmem:[#allocation2 + $0x14] sm:$0x1]  ;;  %v2491_v33 = vrot.slane %v10140_v37, 4 }
 0x45d   : > { %3461 = vst [vmem:[#allocation2 + $0x9c] sm:$0xf] %v3460_v13  ;;  %v3383_v31 = vsel %vm10076_vm12, %v3233_v6, %v3382_v63  ;;  %v2517_v63 = vrot.slane %v10305_v49, 4  ;;  %v2728_v1 = vor.u32 %v2726_v50, %v10312_v23  ;;  %v2382_v38 = vld [vmem:[#allocation2 + $0x50] sm:$0x1]  ;;  %v2429_v46 = vld [vmem:[%s9872_s26 + $0x58] sm:$0xff] }
 0x45e   : > { %3384 = vst [vmem:[#allocation2 + $0x18] sm:$0xf] %v3383_v31  ;;  %v3251_v61 = vpop.permute.xlu0 %3250  ;;  %v2668_v22 = vor.u32 %v2666_v7, %v2665_v48  ;;  %v2383_v13 = vsel %vm10194_vm0, 0, %v2382_v38  ;;  %v2461_v55 = vpack.c.bf16 %v2429_v46, %v2429_v46  ;;  %v2670_v25 = vrot.slane %v2665_v48, 4  ;;  %v3923_v39 = vld [vmem:[%s11692_s4 + $0x4] sm:$0xf] }
 0x45f   : > { %v3404_v30 = vsel %vm10076_vm12, %v3251_v61, %v3403_v41  ;;  %2826 = vst [vmem:[#allocation2 + $0x24] sm:$0xf] %v2825_v20  ;;  %vm4020_vm8 = vcmask 1043456   ;;  %v3466_v29 = vld [vmem:[#allocation2 + $0xa8] sm:$0xf]  ;;  %v2576_v26 = vrot.slane %v9995_v21, 4 }
 0x460   : > { %3405 = vst [vmem:[#allocation2 + $0x3c] sm:$0xf] %v3404_v30  ;;  %v2669_v6 = vsel %vm9832_vm5, %v2661_v57, %v2668_v22  ;;  %v2578_v41 = vshrl.u32 %v2461_v55, 16  ;;  %v4022_v3 = vsel %vm4020_vm8, %v3923_v39, 0  ;;  %v2581_v59 = vshll.u32 %v2461_v55, 16  ;;  %v2431_v39 = vld [vmem:[%s9872_s26 + $0x68] sm:$0xff] }
 0x461   : > { %2384 = vst [vmem:[#allocation2 + $0x50] sm:$0x1] %v2383_v13  ;;  %v2908_v28 = vld [vmem:[#allocation2 + $0xb4] sm:$0xf]  ;;  %4031 = vmatpush.bf16.msrb.mxu0 %v4022_v3  ;;  %8169 = vmatpush.bf16.msra.mxu3 %v4022_v3  ;;  %v3428_v2 = vld [vmem:[#allocation2 + $0x68] sm:$0x1] }
 0x462   : > { %v2909_v17 = vsel %vm9940_vm10, %v2728_v1, %v2908_v28  ;;  %2883 = vst.msk [vmem:[#allocation2 + $0x88] sm:$0xf] %vm2805_vm9, %v2669_v6  ;;  %v2884_v60 = vld [vmem:[#allocation2 + $0x8c] sm:$0x1]  ;;  %v2580_v61 = vrot.slane %v2578_v41, 7  ;;  %8168 = vmatpush.bf16.msra.mxu2 %v4022_v3  ;;  %8167 = vmatpush.bf16.msrb.mxu1 %v4022_v3  ;;  %v2436_v1 = vld [vmem:[%s9872_s26 + $0x90] sm:$0xff] }
 0x463   : > { %3320 = vrot.lane.b32.xlu1 %v3225_v8, %s11705_s15  ;;  %v3269_v52 = vpop.permute.xlu2 %3268  ;;  %v2821_v56 = vld [vmem:[#allocation2 + $0x20] sm:$0x1]  ;;  %2910 = vst [vmem:[#allocation2 + $0xb4] sm:$0xf] %v2909_v17  ;;  %v2499_v8 = vsel %vm9832_vm5, %v2491_v33, %v2498_v53  ;;  %v2441_v33 = vld [vmem:[%s9872_s26 + $0xb8] sm:$0xff]  ;;  %v2468_v46 = vpack.c.bf16 %v2436_v1, %v2436_v1  ;;  %v2678_v41 = vrot.slane %v10031_v24, 4 }
 0x464   : > { %3318 = vrot.lane.b32.xlu0 %v3224_v35, %s11705_s15  ;;  %v3425_v32 = vsel %vm10076_vm12, %v3269_v52, %v3424_v45  ;;  %v2822_v37 = vsel %vm10256_vm14, %v2517_v63, %v2821_v56  ;;  %v2885_v45 = vsel %vm10256_vm14, %v2670_v25, %v2884_v60  ;;  %v2585_v50 = vrot.slane %v2580_v61, 4  ;;  %2811 = vst.msk [vmem:[#allocation2 + $0x10] sm:$0xf] %vm2805_vm9, %v2499_v8  ;;  %v3431_v52 = vld [vmem:[#allocation2 + $0x6c] sm:$0xf] }
 0x465   : > { %3426 = vst [vmem:[#allocation2 + $0x60] sm:$0xf] %v3425_v32  ;;  %v2583_v43 = vor.u32 %v2581_v59, %v2580_v61  ;;  %v8489_v32 = vmov 0   ;;  %v2473_v56 = vpack.c.bf16 %v2441_v33, %v2441_v33  ;;  %v2513_v25 = vshll.u32 %v10285_v58, 16  ;;  %v3509_v3 = vld [vmem:[#allocation2 + $0x84] sm:$0xf] }
 0x466   : > { %2823 = vst [vmem:[#allocation2 + $0x20] sm:$0x1] %v2822_v37  ;;  %v3389_v63 = vld [vmem:[#allocation2 + $0x24] sm:$0xf]  ;;  %v2400_v37 = vld [vmem:[#allocation2 + $0x98] sm:$0x1]  ;;  %v10381_v59 = vpack.c.bf16 %v2431_v39, %v2431_v39 }
 0x467   : > { %2886 = vst [vmem:[#allocation2 + $0x8c] sm:$0x1] %v2885_v45  ;;  %v2584_v20 = vsel %vm9832_vm5, %v2576_v26, %v2583_v43  ;;  %v2680_v6 = vshrl.u32 %v2473_v56, 16  ;;  %v3804_v17 = vshrl.u32 %v3509_v3, 16  ;;  %v2641_v60 = vshll.u32 %v2468_v46, 16 }
 0x468   : > { %v2849_v35 = vld [vmem:[#allocation2 + $0x50] sm:$0x1]  ;;  %2848 = vst.msk [vmem:[#allocation2 + $0x4c] sm:$0xf] %vm2805_vm9, %v2584_v20  ;;  %v2401_v58 = vsel %vm10194_vm0, 0, %v2400_v37  ;;  %v2508_v8 = vrot.slane %v10188_v34, 4  ;;  %v2515_v45 = vor.u32 %v2513_v25, %v10305_v49 }
 0x469   : > { %v3231_v31 = vpop.permute.xlu1 %3230  ;;  %v2850_v15 = vsel %vm10256_vm14, %v2585_v50, %v2849_v35  ;;  %2297 = vst.msk [vmem:[#allocation2] sm:$0xf] %vm2296_vm3, %v8489_v32  ;;  %v3807_v61 = vshll.u32 %v3509_v3, 16  ;;  %v10388_v24 = vrot.slane %v2680_v6, 7  ;;  %v2595_v35 = vshrl.u32 %v10381_v59, 16 }
 0x46a   : > { %v3380_v5 = vsel %vm10333_vm4, %v3231_v31, %v3379_v36  ;;  %2851 = vst [vmem:[#allocation2 + $0x50] sm:$0x1] %v2850_v15  ;;  %v2338_v36 = vld [vmem:[#allocation2 + $0x78] sm:$0x1]  ;;  %v2683_v31 = vshll.u32 %v2473_v56, 16  ;;  %v2593_v25 = vrot.slane %v10085_v10, 4 }
 0x46b   : > { %3381 = vst [vmem:[#allocation2 + $0x14] sm:$0x1] %v3380_v5  ;;  %v3305_v30 = vpop.permute.xlu2 %3304  ;;  %v2339_v53 = vsel %vm9909_vm7, 0, %v2338_v36  ;;  %v3473_v5 = vld [vmem:[#allocation2 + $0xb4] sm:$0xf]  ;;  %v3809_v43 = vrot.slane %v3807_v61, 5 }
 0x46c   : > { %v3467_v27 = vsel %vm10076_vm12, %v3305_v30, %v3466_v29  ;;  %2298 = vst.msk [vmem:[#allocation2 + $0x4] sm:$0xf] %vm2296_vm3, %v8489_v32  ;;  %v2638_v29 = vshrl.u32 %v2468_v46, 16  ;;  %v3806_v30 = vrot.slane %v3804_v17, 4  ;;  %v10408_v46 = vrot.slane %v2595_v35, 7 }
 0x46d   : > { %v3273_v7 = vpop.permute.xlu0 %3272  ;;  %3468 = vst [vmem:[#allocation2 + $0xa8] sm:$0xf] %v3467_v27  ;;  %v3386_v38 = vld [vmem:[#allocation2 + $0x20] sm:$0x1]  ;;  %v2385_v27 = vld [vmem:[#allocation2 + $0x5c] sm:$0x1] }
 0x46e   : > { %v3429_v21 = vsel %vm10333_vm4, %v3273_v7, %v3428_v2  ;;  %2300 = vst.msk [vmem:[#allocation2 + $0x8] sm:$0x1] %vm2299_vm6, %v8489_v32  ;;  %v3449_v26 = vld [vmem:[#allocation2 + $0x8c] sm:$0x1]  ;;  %v10394_v34 = vrot.slane %v2638_v29, 7 }
 0x46f   : > { %3430 = vst [vmem:[#allocation2 + $0x68] sm:$0x1] %v3429_v21  ;;  %v2685_v21 = vor.u32 %v2683_v31, %v10388_v24 }
 0x470   : > { %2302 = vst.msk [vmem:[#allocation2 + $0xcc] sm:$0xf] %vm2296_vm3, %v8489_v32  ;;  %v2308_v2 = vld [vmem:[#allocation2] sm:$0x1]  ;;  %v2643_v56 = vor.u32 %v2641_v60, %v10394_v34 }
 0x471   : > { %v3239_v48 = vpop.permute.xlu1 %3238  ;;  %2303 = vst.msk [vmem:[#allocation2 + $0xd0] sm:$0xf] %vm2296_vm3, %v8489_v32  ;;  %v2309_v50 = vsel %vm9909_vm7, 0, %v2308_v2  ;;  %v3414_v6 = vld [vmem:[#allocation2 + $0x50] sm:$0x1] }
 0x472   : > { %v3390_v57 = vsel %vm10076_vm12, %v3239_v48, %v3389_v63  ;;  %2304 = vst.msk [vmem:[#allocation2 + $0xd4] sm:$0x1] %vm2299_vm6, %v8489_v32  ;;  %vm3537_vm6 = vsmask.f32 7440  ;;  %v3810_v32 = vor.u32 %v3809_v43, %v3806_v30  ;;  %v3521_v31 = vld [vmem:[#allocation2 + $0x14] sm:$0x1] }
 0x473   : > { %3391 = vst [vmem:[#allocation2 + $0x24] sm:$0xf] %v3390_v57  ;;  %v3275_v22 = vpop.permute.xlu2 %3274  ;;  %v3488_v7 = vld [vmem:[#allocation2 + $0x4] sm:$0xf]  ;;  %v2516_v57 = vsel %vm9832_vm5, %v2508_v8, %v2515_v45  ;;  %vm10443_vm3 = vmor %vm3536_vm15, %vm3537_vm6 }
 0x474   : > { %v3432_v13 = vsel %vm10076_vm12, %v3275_v22, %v3431_v52  ;;  %2310 = vst [vmem:[#allocation2] sm:$0x1] %v2309_v50  ;;  %v3549_v15 = vshll.u32 %v3488_v7, 16  ;;  %v3553_v48 = vshrl.u32 %v3488_v7, 16  ;;  %v2687_v22 = vrot.slane %v10388_v24, 4 }
 0x475   : > { %v3237_v55 = vpop.permute.xlu0 %3236  ;;  %3433 = vst [vmem:[#allocation2 + $0x6c] sm:$0xf] %v3432_v13  ;;  %v2364_v63 = vld [vmem:[#allocation2 + $0x8] sm:$0x1]  ;;  %v2598_v13 = vshll.u32 %v10381_v59, 16  ;;  %v10419_v29 = vrot.slane %v3810_v32, 4 }
 0x476   : > { %v3387_v28 = vsel %vm10333_vm4, %v3237_v55, %v3386_v38  ;;  %2340 = vst [vmem:[#allocation2 + $0x78] sm:$0x1] %v2339_v53  ;;  %v2365_v33 = vsel %vm10194_vm0, 0, %v2364_v63  ;;  %v2386_v38 = vsel %vm10194_vm0, 0, %v2385_v27  ;;  %v2686_v53 = vsel %vm9832_vm5, %v2678_v41, %v2685_v21  ;;  %v3489_v55 = vld [vmem:[#allocation2 + $0xc] sm:$0xf] }
 0x477   : > { %3388 = vst [vmem:[#allocation2 + $0x20] sm:$0x1] %v3387_v28  ;;  %v10416_v37 = vrot.slane %v3549_v15, 5  ;;  %v3564_v39 = vshrl.u32 %v3489_v55, 16  ;;  %v3567_v28 = vshll.u32 %v3489_v55, 16  ;;  %v3555_v3 = vrot.slane %v3553_v48, 4 }
 0x478   : > { %2402 = vst [vmem:[#allocation2 + $0x98] sm:$0x1] %v2401_v58  ;;  %v2602_v41 = vrot.slane %v10408_v46, 4  ;;  %v2600_v10 = vor.u32 %v2598_v13, %v10408_v46  ;;  %v3583_v24 = vshll.u32 %v3521_v31, 16  ;;  %v3519_v27 = vld [vmem:[%s11692_s4] sm:$0xf] }
 0x479   : > { %2366 = vst [vmem:[#allocation2 + $0x8] sm:$0x1] %v2365_v33  ;;  %v3566_v59 = vrot.slane %v3564_v39, 4  ;;  %v3569_v2 = vrot.slane %v3567_v28, 5  ;;  %v3556_v43 = vor.u32 %v3555_v3, %v10416_v37  ;;  %v4242_v15 = vsel %vm4020_vm8, %v3519_v27, 0 }
 0x47a   : > { %2890 = vst.msk [vmem:[#allocation2 + $0x94] sm:$0xf] %vm2805_vm9, %v2686_v53  ;;  %v2601_v32 = vsel %vm9832_vm5, %v2593_v25, %v2600_v10  ;;  %4251 = vmatpush.bf16.msrb.mxu3 %v4242_v15  ;;  %v10447_v13 = vrot.slane %v3583_v24, 5 }
 0x47b   : > { %v3311_v20 = vpop.permute.xlu2 %3310  ;;  %v3487_v17 = vld [vmem:[#allocation2] sm:$0xf]  ;;  %2820 = vst.msk [vmem:[#allocation2 + $0x1c] sm:$0xf] %vm2805_vm9, %v2516_v57  ;;  %v3570_v63 = vor.u32 %v3569_v2, %v3566_v59 }
 0x47c   : > { %v3474_v49 = vsel %vm10076_vm12, %v3311_v20, %v3473_v5  ;;  %v3540_v5 = vshrl.u32 %v3487_v17, 16  ;;  %v3543_v60 = vshll.u32 %v3487_v17, 16  ;;  %2387 = vst [vmem:[#allocation2 + $0x5c] sm:$0x1] %v2386_v38  ;;  %v2542_v17 = vrot.slane %v10142_v18, 4 }
 0x47d   : > { %v3291_v52 = vpop.permute.xlu1 %3290  ;;  %3475 = vst [vmem:[#allocation2 + $0xb4] sm:$0xf] %v3474_v49  ;;  %v2873_v58 = vld [vmem:[#allocation2 + $0x78] sm:$0xf]  ;;  %v10450_v28 = vrot.slane %v3570_v63, 4 }
 0x47e   : > { %v3450_v36 = vsel %vm10333_vm4, %v3291_v52, %v3449_v26  ;;  %v3289_v1 = vpop.permute.xlu0 %3288  ;;  %v2874_v61 = vsel %vm9940_vm10, %v2643_v56, %v2873_v58  ;;  %v3542_v30 = vrot.slane %v3540_v5, 4  ;;  %v3545_v50 = vrot.slane %v3543_v60, 5  ;;  %v2425_v49 = vld [vmem:[%s9872_s26 + $0x38] sm:$0xff]  ;;  %2855 = vst.msk [vmem:[#allocation2 + $0x58] sm:$0xf] %vm2805_vm9, %v2601_v32 }
 0x47f   : > { %3451 = vst [vmem:[#allocation2 + $0x8c] sm:$0x1] %v3450_v36  ;;  %v2891_v26 = vld [vmem:[#allocation2 + $0x98] sm:$0x1]  ;;  %v2457_v36 = vpack.c.bf16 %v2425_v49, %v2425_v49 }
 0x480   : > { %3448 = vst.msk [vmem:[#allocation2 + $0x88] sm:$0xf] %vm3370_vm11, %v3289_v1  ;;  %v2892_v35 = vsel %vm10256_vm14, %v2687_v22, %v2891_v26  ;;  %v3546_v52 = vor.u32 %v3545_v50, %v3542_v30  ;;  %v3520_v1 = vld [vmem:[#allocation2 + $0x8] sm:$0x1]  ;;  %v3557_v22 = vrot.slane %v3556_v43, 4 }
 0x481   : > { %2875 = vst [vmem:[#allocation2 + $0x78] sm:$0xf] %v2874_v61  ;;  %v3559_v53 = vshll.u32 %v3520_v1, 16  ;;  %v2544_v59 = vshrl.u32 %v2457_v36, 16  ;;  %v2547_v61 = vshll.u32 %v2457_v36, 16 }
 0x482   : > { %v3547_v56 = vrot.slane %v3546_v52, 4  ;;  %2893 = vst [vmem:[#allocation2 + $0x98] sm:$0x1] %v2892_v35 }
 0x483   : > { %v3229_v8 = vpop.permute.xlu2 %3228  ;;  %v3561_v3 = vrot.slane %v3559_v53, 5  ;;  %v2856_v31 = vld [vmem:[#allocation2 + $0x5c] sm:$0x1]  ;;  %v10465_v27 = vrot.slane %v2544_v59, 7 }
 0x484   : > { %3376 = vst.msk [vmem:[#allocation2 + $0x10] sm:$0xf] %vm3370_vm11, %v3229_v8  ;;  %v2857_v10 = vsel %vm10256_vm14, %v2602_v41, %v2856_v31  ;;  %v5434_v31 = vld [vmem:[%s11692_s4 + $0x10] sm:$0xf] }
 0x485   : > { %v3261_v45 = vpop.permute.xlu1 %3260  ;;  %v3562_v26 = vsel %vm10443_vm3, %v3557_v22, %v3561_v3  ;;  %2858 = vst [vmem:[#allocation2 + $0x5c] sm:$0x1] %v2857_v10  ;;  %v2549_v52 = vor.u32 %v2547_v61, %v10465_v27 }
 0x486   : > { %v3415_v7 = vsel %vm10333_vm4, %v3261_v45, %v3414_v6  ;;  %v3259_v21 = vpop.permute.xlu0 %3258  ;;  %v3531_v20 = vld [vmem:[#allocation2 + $0x8c] sm:$0x1]  ;;  %v3552_v6 = vsel %vm10443_vm3, %v3547_v56, %v10416_v37  ;;  %v3925_v30 = vunpack.c.l.b16 %v3562_v26 }
 0x487   : > { %3416 = vst [vmem:[#allocation2 + $0x50] sm:$0x1] %v3415_v7  ;;  %v3510_v48 = vld [vmem:[#allocation2 + $0x88] sm:$0xf]  ;;  %v3823_v57 = vshll.u32 %v3531_v20, 16  ;;  %v3924_v5 = vunpack.c.l.b16 %v3552_v6  ;;  %v2550_v22 = vsel %vm9832_vm5, %v2542_v17, %v2549_v52 }
 0x488   : > { %3413 = vst.msk [vmem:[#allocation2 + $0x4c] sm:$0xf] %vm3370_vm11, %v3259_v21  ;;  %v3813_v38 = vshll.u32 %v3510_v48, 16  ;;  %v3817_v46 = vshrl.u32 %v3510_v48, 16  ;;  %v3438_v2 = vld [vmem:[#allocation2 + $0x78] sm:$0xf] }
 0x489   : > { %v3825_v39 = vrot.slane %v3823_v57, 5  ;;  %v2443_v7 = vld [vmem:[%s9872_s26 + $0xc8] sm:$0xff]  ;;  %v3956_v63 = vpack.c.b16 %v3925_v30, %v3924_v5  ;;  %v3456_v15 = vld [vmem:[#allocation2 + $0x98] sm:$0x1]  ;;  %2834 = vst.msk [vmem:[#allocation2 + $0x34] sm:$0xf] %vm2805_vm9, %v2550_v22 }
 0x48a   : > { %v3815_v55 = vrot.slane %v3813_v38, 5  ;;  %v3819_v25 = vrot.slane %v3817_v46, 4  ;;  %v3499_v20 = vld [vmem:[#allocation2 + $0x48] sm:$0xf]  ;;  %v2403_v38 = vld [vmem:[#allocation2 + $0xa4] sm:$0x1]  ;;  %v2475_v46 = vpack.c.bf16 %v2443_v7, %v2443_v7 }
 0x48b   : > { %v3281_v60 = vpop.permute.xlu2 %3280  ;;  %v3490_v8 = vld [vmem:[#allocation2 + $0x10] sm:$0xf]  ;;  %7728 = vmatmul.msk.bf16.vlgmr.msrb.gmra.mxu0 %vm437_vm2, %v3956_v63  ;;  %v3684_v53 = vshrl.u32 %v3499_v20, 16  ;;  %v2404_v17 = vsel %vm10194_vm0, 0, %v2403_v38  ;;  %v5532_v63 = vsel %vm4020_vm8, %v5434_v31, 0  ;;  %v2445_v38 = vld [vmem:[%s9872_s26 + $0xd8] sm:$0xff] }
 0x48c   : > { %v3820_v58 = vor.u32 %v3819_v25, %v3815_v55  ;;  %v3816_v37 = vsel %vm10443_vm3, %v10419_v29, %v3815_v55  ;;  %v3573_v18 = vshll.u32 %v3490_v8, 16  ;;  %v3577_v45 = vshrl.u32 %v3490_v8, 16  ;;  %v3421_v5 = vld [vmem:[#allocation2 + $0x5c] sm:$0x1]  ;;  %2405 = vst [vmem:[#allocation2 + $0xa4] sm:$0x1] %v2404_v17  ;;  %5541 = vmatpush.bf16.msrb.mxu2 %v5532_v63 }
 0x48d   : > { %v3297_v24 = vpop.permute.xlu1 %3296  ;;  %v3439_v50 = vsel %vm10076_vm12, %v3281_v60, %v3438_v2  ;;  %v3946_v49 = vunpack.c.l.b16 %v3816_v37  ;;  %v3687_v55 = vshll.u32 %v3499_v20, 16  ;;  %v3686_v60 = vrot.slane %v3684_v53, 4 }
 0x48e   : > { %v3295_v43 = vpop.permute.xlu0 %3294  ;;  %v3821_v41 = vrot.slane %v3820_v58, 4  ;;  %3440 = vst [vmem:[#allocation2 + $0x78] sm:$0xf] %v3439_v50  ;;  %v3575_v21 = vrot.slane %v3573_v18, 5  ;;  %v3579_v35 = vrot.slane %v3577_v45, 4  ;;  %v3457_v57 = vsel %vm10333_vm4, %v3297_v24, %v3456_v15  ;;  %v2423_v24 = vld [vmem:[%s9872_s26 + $0x28] sm:$0xff] }
 0x48f   : > { %3455 = vst.msk [vmem:[#allocation2 + $0x94] sm:$0xf] %vm3370_vm11, %v3295_v43  ;;  %v3500_v48 = vld [vmem:[#allocation2 + $0x4c] sm:$0xf]  ;;  %v3526_v1 = vld [vmem:[#allocation2 + $0x50] sm:$0x1]  ;;  %v2455_v15 = vpack.c.bf16 %v2423_v24, %v2423_v24 }
 0x490   : > { %v3826_v29 = vsel %vm10443_vm3, %v3821_v41, %v3825_v39  ;;  %v3580_v36 = vor.u32 %v3579_v35, %v3575_v21  ;;  %3458 = vst [vmem:[#allocation2 + $0x98] sm:$0x1] %v3457_v57  ;;  %v3576_v56 = vsel %vm10443_vm3, %v10450_v28, %v3575_v21  ;;  %v3693_v6 = vshll.u32 %v3500_v48, 16  ;;  %v3511_v43 = vld [vmem:[#allocation2 + $0x90] sm:$0xf] }
 0x491   : > { %v3947_v32 = vunpack.c.l.b16 %v3826_v29  ;;  %v3697_v3 = vshrl.u32 %v3500_v48, 16  ;;  %v3689_v28 = vrot.slane %v3687_v55, 5  ;;  %v3703_v58 = vshll.u32 %v3526_v1, 16 }
 0x492   : > { %v3581_v39 = vrot.slane %v3580_v36, 4  ;;  %v3695_v61 = vrot.slane %v3693_v6, 5  ;;  %v2697_v2 = vshrl.u32 %v2475_v46, 16  ;;  %v10494_v45 = vunpack.c.l.b16 %v3576_v56 }
 0x493   : > { %v3967_v25 = vpack.c.b16 %v3947_v32, %v3946_v49  ;;  %v3235_v59 = vpop.permute.xlu2 %3234  ;;  %v3699_v26 = vrot.slane %v3697_v3, 4  ;;  %v3690_v50 = vor.u32 %v3689_v28, %v3686_v60  ;;  %v2700_v21 = vshll.u32 %v2475_v46, 16 }
 0x494   : > { %3385 = vst.msk [vmem:[#allocation2 + $0x1c] sm:$0xf] %vm3370_vm11, %v3235_v59  ;;  %v3586_v8 = vsel %vm10443_vm3, %v3581_v39, %v10447_v13  ;;  %v2699_v7 = vrot.slane %v2697_v2, 7  ;;  %v2695_v13 = vrot.slane %v10124_v51, 4  ;;  %v3705_v20 = vrot.slane %v3703_v58, 5  ;;  %v2427_v59 = vld [vmem:[%s9872_s26 + $0x48] sm:$0xff] }
 0x495   : > { %7739 = vmatmul.msk.bf16.vlgmr.msra.gmra.mxu3 %vm437_vm2, %v3967_v25  ;;  %v3267_v10 = vpop.permute.xlu1 %3266  ;;  %v10496_v30 = vunpack.c.l.b16 %v3586_v8  ;;  %v3700_v41 = vor.u32 %v3699_v26, %v3695_v61  ;;  %v3691_v35 = vrot.slane %v3690_v50, 4  ;;  %v2525_v48 = vrot.slane %v10283_v40, 4  ;;  %v2406_v25 = vld [vmem:[#allocation2 + $0xb0] sm:$0x1]  ;;  %v3491_v2 = vld [vmem:[#allocation2 + $0x18] sm:$0xf] }
 0x496   : > { %v3422_v37 = vsel %vm10333_vm4, %v3267_v10, %v3421_v5  ;;  %v3265_v18 = vpop.permute.xlu0 %3264  ;;  %v2704_v49 = vrot.slane %v2699_v7, 4  ;;  %v2702_v52 = vor.u32 %v2700_v21, %v2699_v7  ;;  %v3512_v57 = vld [vmem:[#allocation2 + $0x94] sm:$0xf]  ;;  %v2527_v51 = vshrl.u32 %v2455_v15, 16  ;;  %v2898_v5 = vld [vmem:[#allocation2 + $0xa4] sm:$0x1] }
 0x497   : > { %3423 = vst [vmem:[#allocation2 + $0x5c] sm:$0x1] %v3422_v37  ;;  %v3701_v29 = vrot.slane %v3700_v41, 4  ;;  %v3696_v32 = vsel %vm10443_vm3, %v3691_v35, %v3695_v61  ;;  %v2530_v36 = vshll.u32 %v2455_v15, 16  ;;  %v3828_v1 = vshrl.u32 %v3511_v43, 16 }
 0x498   : > { %3420 = vst.msk [vmem:[#allocation2 + $0x58] sm:$0xf] %vm3370_vm11, %v3265_v18  ;;  %v3936_v56 = vunpack.c.l.b16 %v3696_v32  ;;  %v2703_v22 = vsel %vm9832_vm5, %v2695_v13, %v2702_v52  ;;  %v3532_v53 = vld [vmem:[#allocation2 + $0x98] sm:$0x1]  ;;  %v3831_v55 = vshll.u32 %v3511_v43, 16  ;;  %v10510_v6 = vrot.slane %v2527_v51, 7 }
 0x499   : > { %v3706_v46 = vsel %vm10443_vm3, %v3701_v29, %v3705_v20  ;;  %2897 = vst.msk [vmem:[#allocation2 + $0xa0] sm:$0xf] %vm2805_vm9, %v2703_v22  ;;  %v3830_v3 = vrot.slane %v3828_v1, 4  ;;  %v3837_v31 = vshll.u32 %v3512_v57, 16  ;;  %v3841_v28 = vshrl.u32 %v3512_v57, 16 }
 0x49a   : > { %v3937_v39 = vunpack.c.l.b16 %v3706_v46  ;;  %v3833_v60 = vrot.slane %v3831_v55, 5  ;;  %v10514_v58 = vpack.c.bf16 %v2445_v38, %v2445_v38  ;;  %v3957_v17 = vpack.c.b16 %v10496_v30, %v10494_v45  ;;  %v3522_v32 = vld [vmem:[#allocation2 + $0x20] sm:$0x1]  ;;  %v3501_v22 = vld [vmem:[#allocation2 + $0x54] sm:$0xf] }
 0x49b   : > { %v3247_v40 = vpop.permute.xlu2 %3246  ;;  %v2899_v8 = vsel %vm10256_vm14, %v2704_v49, %v2898_v5  ;;  %v2532_v26 = vor.u32 %v2530_v36, %v10510_v6  ;;  %v3839_v37 = vrot.slane %v3837_v31, 5  ;;  %v3843_v18 = vrot.slane %v3841_v28, 4  ;;  %v3492_v41 = vld [vmem:[#allocation2 + $0x1c] sm:$0xf]  ;;  %v2435_v5 = vld [vmem:[%s9872_s26 + $0x88] sm:$0xff] }
 0x49c   : > { %3399 = vst.msk [vmem:[#allocation2 + $0x34] sm:$0xf] %vm3370_vm11, %v3247_v40  ;;  %v3962_v10 = vpack.c.b16 %v3937_v39, %v3936_v56  ;;  %v3834_v24 = vor.u32 %v3833_v60, %v3830_v3  ;;  %v3847_v50 = vshll.u32 %v3532_v53, 16  ;;  %v2407_v30 = vsel %vm10194_vm0, 0, %v2406_v25  ;;  %7729 = vmatmul.msk.bf16.gmra.mxu0 %vm437_vm2, %v3957_v17 }
 0x49d   : > { %2900 = vst [vmem:[#allocation2 + $0xa4] sm:$0x1] %v2899_v8  ;;  %v2533_v45 = vsel %vm9832_vm5, %v2525_v48, %v2532_v26  ;;  %v2714_v43 = vshrl.u32 %v10514_v58, 16  ;;  %v10528_v7 = vpack.c.bf16 %v2427_v59, %v2427_v59  ;;  %v3844_v21 = vor.u32 %v3843_v18, %v3839_v37  ;;  %v3303_v63 = vpop.permute.xlu1 %3302 }
 0x49e   : > { %v3301_v61 = vpop.permute.xlu0 %3300  ;;  %7734 = vmatmul.msk.bf16.vlgmr.msra.gmra.mxu2 %vm437_vm2, %v3962_v10  ;;  %2827 = vst.msk [vmem:[#allocation2 + $0x28] sm:$0xf] %vm2805_vm9, %v2533_v45  ;;  %v3835_v13 = vrot.slane %v3834_v24, 4  ;;  %v3849_v35 = vrot.slane %v3847_v50, 5  ;;  %v2610_v20 = vrot.slane %v10149_v47, 4  ;;  %v2615_v29 = vshll.u32 %v10224_v9, 16 }
 0x49f   : > { %3462 = vst.msk [vmem:[#allocation2 + $0xa0] sm:$0xf] %vm3370_vm11, %v3301_v61  ;;  %v10533_v15 = vrot.slane %v2714_v43, 7  ;;  %v3588_v49 = vshrl.u32 %v3491_v2, 16  ;;  %v3591_v52 = vshll.u32 %v3491_v2, 16  ;;  %v3845_v57 = vrot.slane %v3844_v21, 4 }
 0x4a0   : > { %2408 = vst [vmem:[#allocation2 + $0xb0] sm:$0x1] %v2407_v30  ;;  %v3840_v48 = vsel %vm10443_vm3, %v3835_v13, %v3839_v37  ;;  %v3597_v51 = vshll.u32 %v3492_v41, 16  ;;  %v3601_v36 = vshrl.u32 %v3492_v41, 16  ;;  %v2617_v46 = vor.u32 %v2615_v29, %v10248_v16  ;;  %v3502_v8 = vld [vmem:[#allocation2 + $0x58] sm:$0xf] }
 0x4a1   : > { %v3948_v38 = vunpack.c.l.b16 %v3840_v48  ;;  %v2721_v47 = vrot.slane %v10533_v15, 4  ;;  %v3590_v56 = vrot.slane %v3588_v49, 4  ;;  %v3850_v9 = vsel %vm10443_vm3, %v3845_v57, %v3849_v35  ;;  %v2448_v37 = vld [vmem:[%s9872_s26 + $0xf0] sm:$0xff]  ;;  %v3527_v41 = vld [vmem:[#allocation2 + $0x5c] sm:$0x1] }
 0x4a2   : > { %v3593_v53 = vrot.slane %v3591_v52, 5  ;;  %v3599_v55 = vrot.slane %v3597_v51, 5  ;;  %v3603_v25 = vrot.slane %v3601_v36, 4  ;;  %v3949_v39 = vunpack.c.l.b16 %v3850_v9  ;;  %v2391_v29 = vld [vmem:[#allocation2 + $0x74] sm:$0x1] }
 0x4a3   : > { %v3241_v1 = vpop.permute.xlu2 %3240  ;;  %v2618_v3 = vsel %vm9832_vm5, %v2610_v20, %v2617_v46  ;;  %v3607_v59 = vshll.u32 %v3522_v32, 16  ;;  %v2559_v16 = vrot.slane %v10201_v11, 4  ;;  %v2561_v10 = vshrl.u32 %v10528_v7, 16  ;;  %v4496_v32 = vld [vmem:[%s11692_s4 + $0x8] sm:$0xf] }
 0x4a4   : > { %3392 = vst.msk [vmem:[#allocation2 + $0x28] sm:$0xf] %vm3370_vm11, %v3241_v1  ;;  %v3463_v40 = vld [vmem:[#allocation2 + $0xa4] sm:$0x1]  ;;  %v3594_v28 = vor.u32 %v3593_v53, %v3590_v56  ;;  %v3604_v17 = vor.u32 %v3603_v25, %v3599_v55  ;;  %v3968_v61 = vpack.c.b16 %v3949_v39, %v3948_v38  ;;  %v2564_v2 = vshll.u32 %v10528_v7, 16 }
 0x4a5   : > { %v3464_v60 = vsel %vm10333_vm4, %v3303_v63, %v3463_v40  ;;  %2862 = vst.msk [vmem:[#allocation2 + $0x64] sm:$0xf] %vm2805_vm9, %v2618_v3  ;;  %v3609_v26 = vrot.slane %v3607_v59, 5  ;;  %v3708_v24 = vshrl.u32 %v3501_v22, 16  ;;  %v10554_v45 = vpack.c.bf16 %v2435_v5, %v2435_v5  ;;  %v3309_v49 = vpop.permute.xlu1 %3308  ;;  %v2356_v56 = vld [vmem:[#allocation2 + $0xc0] sm:$0x1] }
 0x4a6   : > { %v3271_v31 = vpop.permute.xlu0 %3270  ;;  %3465 = vst [vmem:[#allocation2 + $0xa4] sm:$0x1] %v3464_v60  ;;  %v3595_v11 = vrot.slane %v3594_v28, 4  ;;  %v3605_v50 = vrot.slane %v3604_v17, 4  ;;  %7740 = vmatmul.msk.bf16.gmra.mxu3 %vm437_vm2, %v3968_v61  ;;  %v10559_v43 = vrot.slane %v2561_v10, 7  ;;  %v3711_v21 = vshll.u32 %v3501_v22, 16 }
 0x4a7   : > { %v2905_v18 = vld [vmem:[#allocation2 + $0xb0] sm:$0x1]  ;;  %3427 = vst.msk [vmem:[#allocation2 + $0x64] sm:$0xf] %vm3370_vm11, %v3271_v31  ;;  %v3710_v13 = vrot.slane %v3708_v24, 4  ;;  %v3717_v20 = vshll.u32 %v3502_v8, 16  ;;  %v2480_v51 = vpack.c.bf16 %v2448_v37, %v2448_v37 }
 0x4a8   : > { %v2906_v30 = vsel %vm10256_vm14, %v2721_v47, %v2905_v18  ;;  %v3600_v7 = vsel %vm10443_vm3, %v3595_v11, %v3599_v55  ;;  %v3610_v35 = vsel %vm10443_vm3, %v3605_v50, %v3609_v26  ;;  %v3721_v63 = vshrl.u32 %v3502_v8, 16  ;;  %v3513_v31 = vld [vmem:[#allocation2 + $0x9c] sm:$0xf]  ;;  %v3514_v28 = vld [vmem:[#allocation2 + $0xa0] sm:$0xf] }
 0x4a9   : > { %2907 = vst [vmem:[#allocation2 + $0xb0] sm:$0x1] %v2906_v30  ;;  %v3928_v52 = vunpack.c.l.b16 %v3600_v7  ;;  %v3929_v48 = vunpack.c.l.b16 %v3610_v35  ;;  %v2566_v57 = vor.u32 %v2564_v2, %v10559_v43  ;;  %v3713_v1 = vrot.slane %v3711_v21, 5  ;;  %v2376_v21 = vld [vmem:[#allocation2 + $0x38] sm:$0x1]  ;;  %v2447_v7 = vld [vmem:[%s9872_s26 + $0xe8] sm:$0xff] }
 0x4aa   : > { %v3719_v38 = vrot.slane %v3717_v20, 5  ;;  %v3723_v47 = vrot.slane %v3721_v63, 4  ;;  %v3727_v46 = vshll.u32 %v3527_v41, 16  ;;  %v2392_v53 = vsel %vm10194_vm0, 0, %v2391_v29 }
 0x4ab   : > { %v3253_v36 = vpop.permute.xlu2 %3252  ;;  %v3958_v22 = vpack.c.b16 %v3929_v48, %v3928_v52  ;;  %v2567_v9 = vsel %vm9832_vm5, %v2559_v16, %v2566_v57  ;;  %v3714_v55 = vor.u32 %v3713_v1, %v3710_v13  ;;  %v2629_v39 = vshrl.u32 %v10554_v45, 16  ;;  %2393 = vst [vmem:[#allocation2 + $0x74] sm:$0x1] %v2392_v53 }
 0x4ac   : > { %2841 = vst.msk [vmem:[#allocation2 + $0x40] sm:$0xf] %vm2805_vm9, %v2567_v9  ;;  %v3724_v25 = vor.u32 %v3723_v47, %v3719_v38  ;;  %v3729_v40 = vrot.slane %v3727_v46, 5  ;;  %v2712_v59 = vrot.slane %v10207_v19, 4  ;;  %v2717_v5 = vshll.u32 %v10514_v58, 16 }
 0x4ad   : > { %3406 = vst.msk [vmem:[#allocation2 + $0x40] sm:$0xf] %vm3370_vm11, %v3253_v36  ;;  %v4594_v16 = vsel %vm4020_vm8, %v4496_v32, 0  ;;  %v2357_v60 = vsel %vm9909_vm7, 0, %v2356_v56  ;;  %v3715_v17 = vrot.slane %v3714_v55, 4  ;;  %v2631_v8 = vrot.slane %v2629_v39, 7  ;;  %7730 = vmatmul.msk.bf16.gmra.mxu0 %vm437_vm2, %v3958_v22  ;;  %v10596_v48 = vpop.permute.xlu1 %3278 }
 0x4ae   : > { %v3307_v3 = vpop.permute.xlu0 %3306  ;;  %v3725_v10 = vrot.slane %v3724_v25, 4  ;;  %4603 = vmatpush.bf16.msra.mxu0 %v4594_v16  ;;  %v2740_v61 = vshrl.u32 %v2480_v51, 16  ;;  %v2719_v19 = vor.u32 %v2717_v5, %v10533_v15  ;;  %2358 = vst [vmem:[#allocation2 + $0xc0] sm:$0x1] %v2357_v60  ;;  %v2743_v58 = vshll.u32 %v2480_v51, 16 }
 0x4af   : > { %v3852_v2 = vshrl.u32 %v3513_v31, 16  ;;  %v3720_v37 = vsel %vm10443_vm3, %v3715_v17, %v3719_v38  ;;  %v2636_v11 = vrot.slane %v2631_v8, 4  ;;  %v3533_v50 = vld [vmem:[#allocation2 + $0xa4] sm:$0x1]  ;;  %v3855_v20 = vshll.u32 %v3513_v31, 16 }
 0x4b0   : > { %v3470_v26 = vld [vmem:[#allocation2 + $0xb0] sm:$0x1]  ;;  %v3730_v18 = vsel %vm10443_vm3, %v3725_v10, %v3729_v40  ;;  %v3938_v30 = vunpack.c.l.b16 %v3720_v37  ;;  %v2720_v15 = vsel %vm9832_vm5, %v2712_v59, %v2719_v19  ;;  %v10591_v13 = vrot.slane %v2740_v61, 7  ;;  %v3503_v51 = vld [vmem:[#allocation2 + $0x60] sm:$0xf] }
 0x4b1   : > { %v3471_v24 = vsel %vm10333_vm4, %v3309_v49, %v3470_v26  ;;  %v3939_v41 = vunpack.c.l.b16 %v3730_v18  ;;  %2904 = vst.msk [vmem:[#allocation2 + $0xac] sm:$0xf] %vm2805_vm9, %v2720_v15  ;;  %v3854_v35 = vrot.slane %v3852_v2, 4  ;;  %v3861_v63 = vshll.u32 %v3514_v28, 16  ;;  %v3504_v46 = vld [vmem:[#allocation2 + $0x64] sm:$0xf] }
 0x4b2   : > { %3472 = vst [vmem:[#allocation2 + $0xb0] sm:$0x1] %v3471_v24  ;;  %v3865_v29 = vshrl.u32 %v3514_v28, 16  ;;  %v2551_v49 = vrot.slane %v10465_v27, 4  ;;  %v2745_v57 = vor.u32 %v2743_v58, %v10591_v13  ;;  %v3871_v32 = vshll.u32 %v3533_v50, 16 }
 0x4b3   : > { %v3963_v52 = vpack.c.b16 %v3939_v41, %v3938_v30  ;;  %3469 = vst.msk [vmem:[#allocation2 + $0xac] sm:$0xf] %vm3370_vm11, %v3307_v3  ;;  %v3857_v36 = vrot.slane %v3855_v20, 5  ;;  %v3863_v1 = vrot.slane %v3861_v63, 5  ;;  %v2377_v47 = vsel %vm10194_vm0, 0, %v2376_v21  ;;  %v2437_v30 = vld [vmem:[%s9872_s26 + $0x98] sm:$0xff] }
 0x4b4   : > { %v3867_v38 = vrot.slane %v3865_v29, 4  ;;  %v2870_v56 = vld [vmem:[#allocation2 + $0x74] sm:$0x1]  ;;  %v3873_v27 = vrot.slane %v3871_v32, 5  ;;  %2378 = vst [vmem:[#allocation2 + $0x38] sm:$0x1] %v2377_v47  ;;  %v10604_v9 = vpack.c.bf16 %v2447_v7, %v2447_v7 }
 0x4b5   : > { %7735 = vmatmul.msk.bf16.gmra.mxu2 %vm437_vm2, %v3963_v52  ;;  %v2627_v22 = vrot.slane %v10269_v12, 4  ;;  %v2871_v53 = vsel %vm10256_vm14, %v2636_v11, %v2870_v56  ;;  %v2915_v55 = vld [vmem:[#allocation2 + $0xc0] sm:$0xf]  ;;  %v3858_v25 = vor.u32 %v3857_v36, %v3854_v35  ;;  %v2632_v39 = vshll.u32 %v10554_v45, 16  ;;  %v3528_v31 = vld [vmem:[#allocation2 + $0x68] sm:$0x1]  ;;  %v3317_v35 = vpop.permute.xlu2 %3316  ;;  %v3249_v29 = vpop.permute.xlu1 %3248 }
 0x4b6   : > { %v3868_v40 = vor.u32 %v3867_v38, %v3863_v1  ;;  %v3277_v3 = vpop.permute.xlu0 %3276  ;;  %2872 = vst [vmem:[#allocation2 + $0x74] sm:$0x1] %v2871_v53  ;;  %v2916_v59 = vsel %vm9940_vm10, %v2745_v57, %v2915_v55  ;;  %v3732_v5 = vshrl.u32 %v3503_v51, 16  ;;  %v3735_v16 = vshll.u32 %v3503_v51, 16  ;;  %v2409_v45 = vld [vmem:[#allocation2 + $0xbc] sm:$0x1] }
 0x4b7   : > { %v3741_v60 = vshll.u32 %v3504_v46, 16  ;;  %2917 = vst [vmem:[#allocation2 + $0xc0] sm:$0xf] %v2916_v59  ;;  %v3859_v12 = vrot.slane %v3858_v25, 4  ;;  %v2634_v17 = vor.u32 %v2632_v39, %v2631_v8  ;;  %v3745_v10 = vshrl.u32 %v3504_v46, 16 }
 0x4b8   : > { %v3869_v28 = vrot.slane %v3868_v40, 4  ;;  %v3734_v61 = vrot.slane %v3732_v5, 4  ;;  %v3737_v26 = vrot.slane %v3735_v16, 5  ;;  %v3751_v58 = vshll.u32 %v3528_v31, 16  ;;  %v3515_v50 = vld [vmem:[#allocation2 + $0xa8] sm:$0xf] }
 0x4b9   : > { %v3743_v19 = vrot.slane %v3741_v60, 5  ;;  %v3864_v2 = vsel %vm10443_vm3, %v3859_v12, %v3863_v1  ;;  %v2635_v24 = vsel %vm9832_vm5, %v2627_v22, %v2634_v17  ;;  %v3747_v37 = vrot.slane %v3745_v10, 4  ;;  %v3534_v32 = vld [vmem:[#allocation2 + $0xb0] sm:$0x1]  ;;  %v2394_v60 = vld [vmem:[#allocation2 + $0x80] sm:$0x1] }
 0x4ba   : > { %v3874_v14 = vsel %vm10443_vm3, %v3869_v28, %v3873_v27  ;;  %v3950_v18 = vunpack.c.l.b16 %v3864_v2  ;;  %2869 = vst.msk [vmem:[#allocation2 + $0x70] sm:$0xf] %vm2805_vm9, %v2635_v24  ;;  %v3738_v8 = vor.u32 %v3737_v26, %v3734_v61  ;;  %v3753_v21 = vrot.slane %v3751_v58, 5  ;;  %v3516_v22 = vld [vmem:[#allocation2 + $0xac] sm:$0xf] }
 0x4bb   : > { %v3951_v11 = vunpack.c.l.b16 %v3874_v14  ;;  %v2835_v41 = vld [vmem:[#allocation2 + $0x38] sm:$0x1]  ;;  %3434 = vst.msk [vmem:[#allocation2 + $0x70] sm:$0xf] %vm3370_vm11, %v3277_v3  ;;  %v3748_v15 = vor.u32 %v3747_v37, %v3743_v19  ;;  %v2410_v7 = vsel %vm10194_vm0, 0, %v2409_v45  ;;  %v2731_v57 = vshrl.u32 %v10604_v9, 16 }
 0x4bc   : > { %v2836_v63 = vsel %vm10256_vm14, %v2551_v49, %v2835_v41  ;;  %v3739_v52 = vrot.slane %v3738_v8, 4  ;;  %2411 = vst [vmem:[#allocation2 + $0xbc] sm:$0x1] %v2410_v7  ;;  %v2729_v1 = vrot.slane %v10312_v23, 4  ;;  %v10626_v38 = vpack.c.bf16 %v2437_v30, %v2437_v30  ;;  %v3495_v10 = vld [vmem:[#allocation2 + $0x30] sm:$0xf] }
 0x4bd   : > { %v3969_v20 = vpack.c.b16 %v3951_v11, %v3950_v18  ;;  %v3435_v51 = vld [vmem:[#allocation2 + $0x74] sm:$0x1]  ;;  %2837 = vst [vmem:[#allocation2 + $0x38] sm:$0x1] %v2836_v63  ;;  %v3749_v36 = vrot.slane %v3748_v15, 4  ;;  %v2733_v56 = vrot.slane %v2731_v57, 7  ;;  %v3315_v41 = vpop.permute.xlu1 %3314 }
 0x4be   : > { %v3436_v47 = vsel %vm10333_vm4, %v10596_v48, %v3435_v51  ;;  %v3480_v46 = vld [vmem:[#allocation2 + $0xc0] sm:$0xf]  ;;  %v3744_v49 = vsel %vm10443_vm3, %v3739_v52, %v3743_v19  ;;  %v2734_v27 = vshll.u32 %v10604_v9, 16  ;;  %v3313_v25 = vpop.permute.xlu0 %3312  ;;  %v3876_v48 = vshrl.u32 %v3515_v50, 16  ;;  %v10642_v61 = vld [vmem:[#allocation2 + $0x34] sm:$0xf] }
 0x4bf   : > { %7741 = vmatmul.msk.bf16.gmra.mxu3 %vm437_vm2, %v3969_v20  ;;  %3437 = vst [vmem:[#allocation2 + $0x74] sm:$0x1] %v3436_v47  ;;  %v3481_v23 = vsel %vm10076_vm12, %v3317_v35, %v3480_v46  ;;  %v3754_v53 = vsel %vm10443_vm3, %v3749_v36, %v3753_v21  ;;  %v3940_v55 = vunpack.c.l.b16 %v3744_v49  ;;  %v2738_v39 = vrot.slane %v2733_v56, 4  ;;  %v3505_v30 = vld [vmem:[#allocation2 + $0x6c] sm:$0xf] }
 0x4c0   : > { %3482 = vst [vmem:[#allocation2 + $0xc0] sm:$0xf] %v3481_v23  ;;  %v3941_v40 = vunpack.c.l.b16 %v3754_v53  ;;  %v2736_v3 = vor.u32 %v2734_v27, %v2733_v56  ;;  %v3879_v31 = vshll.u32 %v3515_v50, 16  ;;  %v3878_v59 = vrot.slane %v3876_v48, 4 }
 0x4c1   : > { %v3885_v5 = vshll.u32 %v3516_v22, 16  ;;  %v3889_v16 = vshrl.u32 %v3516_v22, 16  ;;  %v3895_v9 = vshll.u32 %v3534_v32, 16  ;;  %v2534_v12 = vrot.slane %v10510_v6, 4 }
 0x4c2   : > { %v3964_v62 = vpack.c.b16 %v3941_v40, %v3940_v55  ;;  %v2737_v28 = vsel %vm9832_vm5, %v2729_v1, %v2736_v3  ;;  %v3881_v17 = vrot.slane %v3879_v31, 5  ;;  %v2395_v37 = vsel %vm10194_vm0, 0, %v2394_v60  ;;  %v3506_v51 = vld [vmem:[#allocation2 + $0x70] sm:$0xf]  ;;  %v2449_v3 = vld [vmem:[%s9872_s26 + $0xf8] sm:$0xff]  ;;  %s267_s26 = scalar_lea.vmem [#allocation3], %s7717_s11 }
 0x4c3   : > { %v2912_v26 = vld [vmem:[#allocation2 + $0xbc] sm:$0x1]  ;;  %2911 = vst.msk [vmem:[#allocation2 + $0xb8] sm:$0xf] %vm2805_vm9, %v2737_v28  ;;  %v3887_v19 = vrot.slane %v3885_v5, 5  ;;  %v3891_v58 = vrot.slane %v3889_v16, 4 }
 0x4c4   : > { %v3400_v45 = vld [vmem:[#allocation2 + $0x38] sm:$0x1]  ;;  %v2913_v2 = vsel %vm10256_vm14, %v2738_v39, %v2912_v26  ;;  %3476 = vst.msk [vmem:[#allocation2 + $0xb8] sm:$0xf] %vm3370_vm11, %v3313_v25  ;;  %v3882_v14 = vor.u32 %v3881_v17, %v3878_v59  ;;  %v3897_v24 = vrot.slane %v3895_v9, 5  ;;  %v2646_v8 = vshrl.u32 %v10626_v38, 16 }
 0x4c5   : > { %7736 = vmatmul.msk.bf16.gmra.mxu2 %vm437_vm2, %v3964_v62  ;;  %v3401_v18 = vsel %vm10333_vm4, %v3249_v29, %v3400_v45  ;;  %2914 = vst [vmem:[#allocation2 + $0xbc] sm:$0x1] %v2913_v2  ;;  %v3892_v11 = vor.u32 %v3891_v58, %v3887_v19  ;;  %v2644_v50 = vrot.slane %v10394_v34, 4  ;;  %v2649_v21 = vshll.u32 %v10626_v38, 16  ;;  %v2379_v39 = vld [vmem:[#allocation2 + $0x44] sm:$0x1] }
 0x4c6   : > { %3402 = vst [vmem:[#allocation2 + $0x38] sm:$0x1] %v3401_v18  ;;  %v3883_v15 = vrot.slane %v3882_v14, 4  ;;  %v3636_v7 = vshrl.u32 %v3495_v10, 16  ;;  %v3639_v35 = vshll.u32 %v3495_v10, 16  ;;  %v2648_v63 = vrot.slane %v2646_v8, 7  ;;  %v3283_v49 = vpop.permute.xlu0 %3282 }
 0x4c7   : > { %v3893_v20 = vrot.slane %v3892_v11, 4  ;;  %2396 = vst [vmem:[#allocation2 + $0x80] sm:$0x1] %v2395_v37  ;;  %v3645_v52 = vshll.u32 %v10642_v61, 16  ;;  %v3649_v29 = vshrl.u32 %v10642_v61, 16  ;;  %v3756_v36 = vshrl.u32 %v3505_v30, 16 }
 0x4c8   : > { %v3888_v57 = vsel %vm10443_vm3, %v3883_v15, %v3887_v19  ;;  %v3638_v32 = vrot.slane %v3636_v7, 4  ;;  %v3641_v34 = vrot.slane %v3639_v35, 5  ;;  %v2653_v47 = vrot.slane %v2648_v63, 4  ;;  %v3529_v55 = vld [vmem:[#allocation2 + $0x74] sm:$0x1]  ;;  %s7614_s28 = sshll.u32 %s267_s26, 4  ;;  %s7615_s28 = int_to_ptr.vmem [resolvable:$true] %s7614_s28 }
 0x4c9   : > { %v3898_v1 = vsel %vm10443_vm3, %v3893_v20, %v3897_v24  ;;  %v3952_v38 = vunpack.c.l.b16 %v3888_v57  ;;  %v2651_v46 = vor.u32 %v2649_v21, %v2648_v63  ;;  %v3647_v22 = vrot.slane %v3645_v52, 5  ;;  %v2373_v60 = vld [vmem:[#allocation2 + $0x2c] sm:$0x1]  ;;  %v3517_v8 = vld [vmem:[#allocation2 + $0xb4] sm:$0xf] }
 0x4ca   : > { %v3953_v56 = vunpack.c.l.b16 %v3898_v1  ;;  %v3642_v27 = vor.u32 %v3641_v34, %v3638_v32  ;;  %v3651_v23 = vrot.slane %v3649_v29, 4  ;;  %v3758_v25 = vrot.slane %v3756_v36, 4  ;;  %v4749_v62 = vld [vmem:[%s11692_s4 + $0xc] sm:$0xf]  ;;  %v2412_v35 = vld [vmem:[#allocation2 + $0xc8] sm:$0x1] }
 0x4cb   : > { %v2652_v53 = vsel %vm9832_vm5, %v2644_v50, %v2651_v46  ;;  %v3759_v48 = vshll.u32 %v3505_v30, 16  ;;  %v3765_v40 = vshll.u32 %v3506_v51, 16  ;;  %v3769_v9 = vshrl.u32 %v3506_v51, 16  ;;  %v3518_v50 = vld [vmem:[#allocation2 + $0xb8] sm:$0xf]  ;;  %v3285_v30 = vpop.permute.xlu1 %3284 }
 0x4cc   : > { %v3477_v31 = vld [vmem:[#allocation2 + $0xbc] sm:$0x1]  ;;  %v3970_v59 = vpack.c.b16 %v3953_v56, %v3952_v38  ;;  %2876 = vst.msk [vmem:[#allocation2 + $0x7c] sm:$0xf] %vm2805_vm9, %v2652_v53  ;;  %v3643_v5 = vrot.slane %v3642_v27, 4  ;;  %v3652_v16 = vor.u32 %v3651_v23, %v3647_v22  ;;  %v2568_v19 = vrot.slane %v10559_v43, 4 }
 0x4cd   : > { %v3478_v28 = vsel %vm10333_vm4, %v3315_v41, %v3477_v31  ;;  %3441 = vst.msk [vmem:[#allocation2 + $0x7c] sm:$0xf] %vm3370_vm11, %v3283_v49  ;;  %v10672_v17 = vld [vmem:[#allocation2 + $0x38] sm:$0x1]  ;;  %v3761_v10 = vrot.slane %v3759_v48, 5  ;;  %v3767_v26 = vrot.slane %v3765_v40, 5  ;;  %v10679_v14 = vpack.c.bf16 %v2449_v3, %v2449_v3 }
 0x4ce   : > { %3479 = vst [vmem:[#allocation2 + $0xbc] sm:$0x1] %v3478_v28  ;;  %v2877_v58 = vld [vmem:[#allocation2 + $0x80] sm:$0x1]  ;;  %v3648_v45 = vsel %vm10443_vm3, %v3643_v5, %v3647_v22  ;;  %v3655_v2 = vshll.u32 %v10672_v17, 16  ;;  %v3653_v37 = vrot.slane %v3652_v16, 4 }
 0x4cf   : > { %7742 = vmatmul.msk.bf16.gmra.mxu3 %vm437_vm2, %v3970_v59  ;;  %v2878_v24 = vsel %vm10256_vm14, %v2653_v47, %v2877_v58  ;;  %v3762_v18 = vor.u32 %v3761_v10, %v3758_v25  ;;  %v3771_v11 = vrot.slane %v3769_v9, 4  ;;  %v3932_v15 = vunpack.c.l.b16 %v3648_v45  ;;  %v10692_v47 = vpop.permute.xlu0 %3242  ;;  %v3507_v59 = vld [vmem:[#allocation2 + $0x78] sm:$0xf] }
 0x4d0   : > { %2879 = vst [vmem:[#allocation2 + $0x80] sm:$0x1] %v2878_v24  ;;  %v3657_v41 = vrot.slane %v3655_v2, 5  ;;  %v3775_v21 = vshll.u32 %v3529_v55, 16  ;;  %v2380_v7 = vsel %vm10194_vm0, 0, %v2379_v39  ;;  %v2374_v52 = vsel %vm10194_vm0, 0, %v2373_v60 }
 0x4d1   : > { %v3763_v20 = vrot.slane %v3762_v18, 4  ;;  %v3772_v63 = vor.u32 %v3771_v11, %v3767_v26  ;;  %2381 = vst [vmem:[#allocation2 + $0x44] sm:$0x1] %v2380_v7  ;;  %v4879_v29 = vsel %vm4020_vm8, %v4749_v62, 0  ;;  %v3900_v34 = vshrl.u32 %v3517_v8, 16 }
 0x4d2   : > { %v3658_v57 = vsel %vm10443_vm3, %v3653_v37, %v3657_v41  ;;  %v3777_v32 = vrot.slane %v3775_v21, 5  ;;  %2375 = vst [vmem:[#allocation2 + $0x2c] sm:$0x1] %v2374_v52  ;;  %4888 = vmatpush.bf16.msra.mxu1 %v4879_v29  ;;  %v3903_v51 = vshll.u32 %v3517_v8, 16  ;;  %v3909_v46 = vshll.u32 %v3518_v50, 16 }
 0x4d3   : > { %v3933_v36 = vunpack.c.l.b16 %v3658_v57  ;;  %v3768_v1 = vsel %vm10443_vm3, %v3763_v20, %v3767_v26  ;;  %v3773_v38 = vrot.slane %v3772_v63, 4  ;;  %v3902_v56 = vrot.slane %v3900_v34, 4  ;;  %v10717_v20 = vld [vmem:[#allocation2 + $0x40] sm:$0xf] }
 0x4d4   : > { %v3942_v49 = vunpack.c.l.b16 %v3768_v1  ;;  %v3905_v27 = vrot.slane %v3903_v51, 5  ;;  %v3913_v22 = vshrl.u32 %v3518_v50, 16  ;;  %v3911_v25 = vrot.slane %v3909_v46, 5  ;;  %v3508_v45 = vld [vmem:[#allocation2 + $0x7c] sm:$0xf] }
 0x4d5   : > { %v3960_v23 = vpack.c.b16 %v3933_v36, %v3932_v15  ;;  %v3778_v53 = vsel %vm10443_vm3, %v3773_v38, %v3777_v32  ;;  %v3535_v55 = vld [vmem:[#allocation2 + $0xbc] sm:$0x1]  ;;  %v2413_v48 = vsel %vm10194_vm0, 0, %v2412_v35  ;;  %v2748_v16 = vshrl.u32 %v10679_v14, 16 }
 0x4d6   : > { %v3943_v40 = vunpack.c.l.b16 %v3778_v53  ;;  %v3906_v39 = vor.u32 %v3905_v27, %v3902_v56  ;;  %v3915_v3 = vrot.slane %v3913_v22, 4  ;;  %v3919_v31 = vshll.u32 %v3535_v55, 16  ;;  %2414 = vst [vmem:[#allocation2 + $0xc8] sm:$0x1] %v2413_v48  ;;  %v3497_v50 = vld [vmem:[#allocation2 + $0x3c] sm:$0xf] }
 0x4d7   : > { %v3442_v5 = vld [vmem:[#allocation2 + $0x80] sm:$0x1]  ;;  %7732 = vmatmul.msk.bf16.vlgmr.msrb.gmra.mxu1 %vm437_vm2, %v3960_v23  ;;  %v2746_v9 = vrot.slane %v10591_v13, 4  ;;  %v2751_v60 = vshll.u32 %v10679_v14, 16  ;;  %v2750_v18 = vrot.slane %v2748_v16, 7  ;;  %v3255_v13 = vpop.permute.xlu1 %3254  ;;  %v3780_v43 = vshrl.u32 %v3507_v59, 16  ;;  %v3319_v29 = vpop.permute.xlu0 %3318 }
 0x4d8   : > { %v3443_v62 = vsel %vm10333_vm4, %v3285_v30, %v3442_v5  ;;  %v3965_v28 = vpack.c.b16 %v3943_v40, %v3942_v49  ;;  %v2842_v10 = vld [vmem:[#allocation2 + $0x44] sm:$0x1]  ;;  %v3907_v26 = vrot.slane %v3906_v39, 4  ;;  %v3916_v58 = vor.u32 %v3915_v3, %v3911_v25  ;;  %v10732_v5 = vld [vmem:[#allocation2 + $0x28] sm:$0xf] }
 0x4d9   : > { %3444 = vst [vmem:[#allocation2 + $0x80] sm:$0x1] %v3443_v62  ;;  %v2843_v2 = vsel %vm10256_vm14, %v2568_v19, %v2842_v10  ;;  %v2828_v24 = vld [vmem:[#allocation2 + $0x2c] sm:$0x1]  ;;  %v3921_v37 = vrot.slane %v3919_v31, 5  ;;  %v2755_v30 = vrot.slane %v2750_v18, 4  ;;  %v2753_v41 = vor.u32 %v2751_v60, %v2750_v18 }
 0x4da   : > { %7737 = vmatmul.msk.bf16.gmra.mxu2 %vm437_vm2, %v3965_v28  ;;  %2844 = vst [vmem:[#allocation2 + $0x44] sm:$0x1] %v2843_v2  ;;  %v2829_v14 = vsel %vm10256_vm14, %v2534_v12, %v2828_v24  ;;  %v3912_v11 = vsel %vm10443_vm3, %v3907_v26, %v3911_v25  ;;  %v3917_v8 = vrot.slane %v3916_v58, 4  ;;  %v3783_v15 = vshll.u32 %v3507_v59, 16  ;;  %v3493_v27 = vld [vmem:[#allocation2 + $0x24] sm:$0xf] }
 0x4db   : > { %2830 = vst [vmem:[#allocation2 + $0x2c] sm:$0x1] %v2829_v14  ;;  %v3954_v19 = vunpack.c.l.b16 %v3912_v11  ;;  %v3782_v7 = vrot.slane %v3780_v43, 4  ;;  %v3789_v35 = vshll.u32 %v3508_v45, 16  ;;  %v3793_v6 = vshrl.u32 %v3508_v45, 16 }
 0x4dc   : > { %v3922_v21 = vsel %vm10443_vm3, %v3917_v8, %v3921_v37  ;;  %v2754_v52 = vsel %vm9832_vm5, %v2746_v9, %v2753_v41  ;;  %v3785_v57 = vrot.slane %v3783_v15, 5  ;;  %v3660_v32 = vshrl.u32 %v3497_v50, 16  ;;  %v5002_v26 = vld [vmem:[#allocation2 + $0xc] sm:$0xf]  ;;  %v10746_v8 = vld [vmem:[#allocation2 + $0x10] sm:$0xf] }
 0x4dd   : > { %v3955_v12 = vunpack.c.l.b16 %v3922_v21  ;;  %v2919_v63 = vld [vmem:[#allocation2 + $0xc8] sm:$0x1]  ;;  %2918 = vst.msk [vmem:[#allocation2 + $0xc4] sm:$0xf] %vm2805_vm9, %v2754_v52  ;;  %v3791_v51 = vrot.slane %v3789_v35, 5  ;;  %v3795_v36 = vrot.slane %v3793_v6, 4 }
 0x4de   : > { %v2920_v34 = vsel %vm10256_vm14, %v2755_v30, %v2919_v63  ;;  %v3663_v1 = vshll.u32 %v3497_v50, 16  ;;  %v3786_v46 = vor.u32 %v3785_v57, %v3782_v7  ;;  %v3662_v49 = vrot.slane %v3660_v32, 4  ;;  %3483 = vst.msk [vmem:[#allocation2 + $0xc4] sm:$0xf] %vm3370_vm11, %v3319_v29  ;;  %v10752_v6 = vld [vmem:[#allocation2 + $0x14] sm:$0x1] }
 0x4df   : > { %v3971_v38 = vpack.c.b16 %v3955_v12, %v3954_v19  ;;  %2921 = vst [vmem:[#allocation2 + $0xc8] sm:$0x1] %v2920_v34  ;;  %v3669_v56 = vshll.u32 %v10717_v20, 16  ;;  %v3796_v22 = vor.u32 %v3795_v36, %v3791_v51  ;;  %v3673_v4 = vshrl.u32 %v10717_v20, 16  ;;  %v3321_v28 = vpop.permute.xlu1 %3320  ;;  %v7167_v57 = vld [vmem:[%s11692_s4 + $0x20] sm:$0xf] }
 0x4e0   : > { %v3530_v42 = vld [vmem:[#allocation2 + $0x80] sm:$0x1]  ;;  %v3665_v23 = vrot.slane %v3663_v1, 5  ;;  %v3787_v55 = vrot.slane %v3786_v46, 4  ;;  %v3612_v62 = vshrl.u32 %v3493_v27, 16  ;;  %v3615_v10 = vshll.u32 %v3493_v27, 16 }
 0x4e1   : > { %v3407_v53 = vld [vmem:[#allocation2 + $0x44] sm:$0x1]  ;;  %7743 = vmatmul.msk.bf16.gmra.mxu3 %vm437_vm2, %v3971_v38  ;;  %v3799_v25 = vshll.u32 %v3530_v42, 16  ;;  %v10728_v48 = vrot.slane %v3669_v56, 5  ;;  %v3797_v3 = vrot.slane %v3796_v22, 4  ;;  %v3675_v59 = vrot.slane %v3673_v4, 4 }
 0x4e2   : > { %v3408_v40 = vsel %vm10333_vm4, %v3255_v13, %v3407_v53  ;;  %v3393_v39 = vld [vmem:[#allocation2 + $0x2c] sm:$0x1]  ;;  %v3666_v31 = vor.u32 %v3665_v23, %v3662_v49  ;;  %v3792_v9 = vsel %vm10443_vm3, %v3787_v55, %v3791_v51  ;;  %v3614_v45 = vrot.slane %v3612_v62, 4  ;;  %v8119_v23 = vld [vmem:[#allocation2] sm:$0xff] }
 0x4e3   : > { %3409 = vst [vmem:[#allocation2 + $0x44] sm:$0x1] %v3408_v40  ;;  %v3394_v16 = vsel %vm10333_vm4, %v10692_v47, %v3393_v39  ;;  %v3801_v60 = vrot.slane %v3799_v25, 5  ;;  %v3621_v2 = vshll.u32 %v10732_v5, 16  ;;  %v3625_v24 = vshrl.u32 %v10732_v5, 16 }
 0x4e4   : > { %3395 = vst [vmem:[#allocation2 + $0x2c] sm:$0x1] %v3394_v16  ;;  %v5831_v47 = vld [vmem:[%s11692_s4 + $0x14] sm:$0xf]  ;;  %v3944_v18 = vunpack.c.l.b16 %v3792_v9  ;;  %v3667_v14 = vrot.slane %v3666_v31, 4  ;;  %v3617_v11 = vrot.slane %v3615_v10, 5  ;;  %v3676_v50 = vor.u32 %v3675_v59, %v10728_v48 }
 0x4e5   : > { %v3802_v58 = vsel %vm10443_vm3, %v3797_v3, %v3801_v60  ;;  %v3623_v19 = vrot.slane %v3621_v2, 5  ;;  %v3627_v30 = vrot.slane %v3625_v24, 4  ;;  %v5929_v21 = vsel %vm4020_vm8, %v5831_v47, 0  ;;  %v6085_v40 = vld [vmem:[%s11692_s4 + $0x18] sm:$0xf] }
 0x4e6   : > { %v3484_v37 = vld [vmem:[#allocation2 + $0xc8] sm:$0x1]  ;;  %v3945_v13 = vunpack.c.l.b16 %v3802_v58  ;;  %v3618_v15 = vor.u32 %v3617_v11, %v3614_v45  ;;  %v5051_v7 = vshrl.u32 %v5002_v26, 16  ;;  %5938 = vmatpush.bf16.msra.mxu3 %v5929_v21  ;;  %v5054_v12 = vshll.u32 %v5002_v26, 16  ;;  %v6770_v31 = vld [vmem:[%s11692_s4 + $0x1c] sm:$0xf] }
 0x4e7   : > { %v3485_v43 = vsel %vm10333_vm4, %v3321_v28, %v3484_v37  ;;  %v3628_v35 = vor.u32 %v3627_v30, %v3623_v19  ;;  %v5060_v63 = vshll.u32 %v10746_v8, 16  ;;  %v5064_v54 = vshrl.u32 %v10746_v8, 16  ;;  %v5006_v58 = vld [vmem:[#allocation2 + $0x1c] sm:$0xf]  ;;  %v8337_v24 = vld [vmem:[#allocation2 + $0x4] sm:$0xf] }
 0x4e8   : > { %3486 = vst [vmem:[#allocation2 + $0xc8] sm:$0x1] %v3485_v43  ;;  %v3966_v41 = vpack.c.b16 %v3945_v13, %v3944_v18  ;;  %v5053_v29 = vrot.slane %v5051_v7, 4  ;;  %v3672_v32 = vsel %vm10443_vm3, %v3667_v14, %v10728_v48  ;;  %v5056_v36 = vrot.slane %v5054_v12, 5  ;;  %v5005_v18 = vld [vmem:[#allocation2 + $0x18] sm:$0xf] }
 0x4e9   : > { %v5062_v1 = vrot.slane %v5060_v63, 5  ;;  %v3619_v38 = vrot.slane %v3618_v15, 4  ;;  %v5066_v49 = vrot.slane %v5064_v54, 4  ;;  %v5070_v56 = vshll.u32 %v10752_v6, 16  ;;  %v4333_v11 = vld [vmem:[#allocation2] sm:$0xe] }
 0x4ea   : > { %7738 = vmatmul.msk.bf16.gmra.mxu2 %vm437_vm2, %v3966_v41  ;;  %v10757_v52 = vld [vmem:[#allocation2 + $0x44] sm:$0x1]  ;;  %v3677_v27 = vrot.slane %v3676_v50, 4  ;;  %v3629_v22 = vrot.slane %v3628_v35, 4  ;;  %v5057_v4 = vor.u32 %v5056_v36, %v5053_v29  ;;  %v7265_v48 = vsel %vm4020_vm8, %v7167_v57, 0 }
 0x4eb   : > { %v3679_v34 = vshll.u32 %v10757_v52, 16  ;;  %v10766_v51 = vld [vmem:[#allocation2 + $0x2c] sm:$0x1]  ;;  %v3624_v53 = vsel %vm10443_vm3, %v3619_v38, %v3623_v19  ;;  %v5067_v25 = vor.u32 %v5066_v49, %v5062_v1  ;;  %v3934_v3 = vunpack.c.l.b16 %v3672_v32  ;;  %7274 = vmatpush.bf16.msra.mxu2 %v7265_v48  ;;  %v8338_v43 = vld [vmem:[#allocation2 + $0x8] sm:$0x1] }
 0x4ec   : > { %v3631_v46 = vshll.u32 %v10766_v51, 16  ;;  %v5072_v60 = vrot.slane %v5070_v56, 5  ;;  %v3930_v62 = vunpack.c.l.b16 %v3624_v53  ;;  %v5058_v10 = vrot.slane %v5057_v4, 4  ;;  %v5007_v57 = vld [vmem:[#allocation2 + $0x20] sm:$0x1] }
 0x4ed   : > { %v3681_v42 = vrot.slane %v3679_v34, 5  ;;  %v5068_v9 = vrot.slane %v5067_v25, 4  ;;  %v6215_v26 = vsel %vm4020_vm8, %v6085_v40, 0  ;;  %v4386_v47 = vrot.slane %v8337_v24, 5  ;;  %v5009_v53 = vld [vmem:[#allocation2 + $0x28] sm:$0xf] }
 0x4ee   : > { %v3633_v55 = vrot.slane %v3631_v46, 5  ;;  %6224 = vmatpush.bf16.msrb.mxu0 %v6215_v26  ;;  %v6868_v37 = vsel %vm4020_vm8, %v6770_v31, 0  ;;  %v5063_v14 = vsel %vm10443_vm3, %v5058_v10, %v5062_v1  ;;  %v4389_v50 = vrot.slane %v8338_v43, 5  ;;  %v8135_v40 = vld [vmem:[#allocation2 + $0xc] sm:$0xff] }
 0x4ef   : > { %v3682_v39 = vsel %vm10443_vm3, %v3677_v27, %v3681_v42  ;;  %v5073_v2 = vsel %vm10443_vm3, %v5068_v9, %v5072_v60  ;;  %6877 = vmatpush.bf16.msrb.mxu1 %v6868_v37  ;;  %vm4381_vm5 = vcmask 1042432   ;;  %v5084_v30 = vshll.u32 %v5006_v58, 16  ;;  %v8339_v31 = vld [vmem:[#allocation2 + $0x10] sm:$0xf]  ;;  %v5010_v26 = vld [vmem:[#allocation2 + $0x2c] sm:$0x1] }
 0x4f0   : > { %v3935_v59 = vunpack.c.l.b16 %v3682_v39  ;;  %v3634_v16 = vsel %vm10443_vm3, %v3629_v22, %v3633_v55  ;;  %v5436_v19 = vunpack.c.l.b16 %v5073_v2  ;;  %vm4382_vm9 = vcmask 1046532   ;;  %v5008_v39 = vld [vmem:[#allocation2 + $0x24] sm:$0xf]  ;;  %v8340_v37 = vld [vmem:[#allocation2 + $0x14] sm:$0x1] }
 0x4f1   : > { %v3931_v28 = vunpack.c.l.b16 %v3634_v16  ;;  %7808 = vmatmul.msk.bf16.vlgmr.msrb.gmra.mxu3 %vm437_vm2, %v8119_v23  ;;  %v5075_v41 = vshrl.u32 %v5005_v18, 16  ;;  %v5078_v15 = vshll.u32 %v5005_v18, 16  ;;  %v5088_v21 = vshrl.u32 %v5006_v58, 16  ;;  %vm10792_vm10 = vmor %vm4381_vm5, %vm4382_vm9  ;;  %v8120_v23 = vld [vmem:[#allocation2 + $0xc] sm:$0xff] }
 0x4f2   : > { %v3961_v45 = vpack.c.b16 %v3935_v59, %v3934_v3  ;;  %v5435_v7 = vunpack.c.l.b16 %v5063_v14  ;;  %v7824_v35 = vrot.slane %v4333_v11, 9  ;;  %v4388_v12 = vrot.slane %v4386_v47, 4 }
 0x4f3   : > { %v3959_v13 = vpack.c.b16 %v3931_v28, %v3930_v62  ;;  %v5086_v63 = vrot.slane %v5084_v30, 5  ;;  %v5090_v54 = vrot.slane %v5088_v21, 4  ;;  %v5077_v34 = vrot.slane %v5075_v41, 4 }
 0x4f4   : > { %7733 = vmatmul.msk.bf16.gmra.mxu1 %vm437_vm2, %v3961_v45  ;;  %v5467_v29 = vpack.c.b16 %v5436_v19, %v5435_v7  ;;  %v5080_v36 = vrot.slane %v5078_v15, 5  ;;  %v4387_v38 = vsel %vm10792_vm10, %v7824_v35, %v4386_v47  ;;  %v4390_v46 = vsel %vm10792_vm10, %v4388_v12, %v4389_v50  ;;  %v4334_v47 = vld [vmem:[#allocation2 + $0xc] sm:$0xe]  ;;  %v8121_v7 = vld [vmem:[#allocation2 + $0x18] sm:$0xff]  ;;  %v5011_v12 = vld [vmem:[#allocation2 + $0x30] sm:$0xf] }
 0x4f5   : > { %7731 = vmatmul.msk.bf16.gmra.mxu0 %vm437_vm2, %v3959_v13  ;;  %v5091_v1 = vor.u32 %v5090_v54, %v5086_v63  ;;  %v5094_v49 = vshll.u32 %v5007_v57, 16  ;;  %v4497_v56 = vunpack.c.l.b16 %v4387_v38  ;;  %v4498_v27 = vunpack.c.l.b16 %v4390_v46  ;;  %v5012_v54 = vld [vmem:[#allocation2 + $0x34] sm:$0xf] }
 0x4f6   : > { %v5081_v42 = vor.u32 %v5080_v36, %v5077_v34  ;;  %v4393_v59 = vrot.slane %v8339_v31, 5  ;;  %v5108_v16 = vshll.u32 %v5009_v53, 16  ;;  %v5112_v9 = vshrl.u32 %v5009_v53, 16  ;;  %v8136_v36 = vld [vmem:[#allocation2 + $0x18] sm:$0xff] }
 0x4f7   : > { %v5092_v22 = vrot.slane %v5091_v1, 4  ;;  %v5096_v4 = vrot.slane %v5094_v49, 5  ;;  %v4529_v55 = vpack.c.b16 %v4498_v27, %v4497_v56  ;;  %v5099_v62 = vshrl.u32 %v5008_v39, 16 }
 0x4f8   : > { %v5082_v25 = vrot.slane %v5081_v42, 4  ;;  %v5102_v28 = vshll.u32 %v5008_v39, 16  ;;  %v4395_v58 = vrot.slane %v4393_v59, 4  ;;  %v5110_v45 = vrot.slane %v5108_v16, 5 }
 0x4f9   : > { %v5097_v48 = vsel %vm10443_vm3, %v5092_v22, %v5096_v4  ;;  %v5114_v2 = vrot.slane %v5112_v9, 4  ;;  %v4396_v18 = vrot.slane %v8340_v37, 5  ;;  %v5101_v13 = vrot.slane %v5099_v62, 4  ;;  %v8341_v22 = vld [vmem:[#allocation2 + $0x1c] sm:$0xf] }
 0x4fa   : > { %7936 = vmatmul.msk.bf16.vlgmr.msrb.gmra.mxu2 %vm437_vm2, %v5467_v29  ;;  %v5087_v3 = vsel %vm10443_vm3, %v5082_v25, %v5086_v63  ;;  %v5438_v60 = vunpack.c.l.b16 %v5097_v48  ;;  %v5104_v14 = vrot.slane %v5102_v28, 5  ;;  %v5118_v11 = vshll.u32 %v5010_v26, 16  ;;  %v4336_v29 = vld [vmem:[#allocation2 + $0x24] sm:$0xe]  ;;  %v5013_v48 = vld [vmem:[#allocation2 + $0x38] sm:$0x1] }
 0x4fb   : > { %v5437_v10 = vunpack.c.l.b16 %v5087_v3  ;;  %v7825_v43 = vrot.slane %v4334_v47, 9  ;;  %v4397_v50 = vsel %vm10792_vm10, %v4395_v58, %v4396_v18  ;;  %v5115_v19 = vor.u32 %v5114_v2, %v5110_v45  ;;  %v8342_v58 = vld [vmem:[#allocation2 + $0x20] sm:$0x1] }
 0x4fc   : > { %v5105_v41 = vor.u32 %v5104_v14, %v5101_v13  ;;  %v5120_v15 = vrot.slane %v5118_v11, 5  ;;  %v4500_v21 = vunpack.c.l.b16 %v4397_v50  ;;  %v5123_v38 = vshrl.u32 %v5011_v12, 16 }
 0x4fd   : > { %v5468_v24 = vpack.c.b16 %v5438_v60, %v5437_v10  ;;  %v4394_v30 = vsel %vm10792_vm10, %v7825_v43, %v4393_v59  ;;  %v5116_v35 = vrot.slane %v5115_v19, 4  ;;  %v5132_v49 = vshll.u32 %v5012_v54, 16  ;;  %v8122_v43 = vld [vmem:[#allocation2 + $0x24] sm:$0xff]  ;;  %v5015_v19 = vld [vmem:[#allocation2 + $0x40] sm:$0xf] }
 0x4fe   : > { %v4499_v63 = vunpack.c.l.b16 %v4394_v30  ;;  %v5106_v57 = vrot.slane %v5105_v41, 4  ;;  %v5136_v56 = vshrl.u32 %v5012_v54, 16  ;;  %v7827_v27 = vrot.slane %v4336_v29, 9 }
 0x4ff   : > { %v5121_v34 = vsel %vm10443_vm3, %v5116_v35, %v5120_v15  ;;  %v4407_v4 = vrot.slane %v10732_v5, 5  ;;  %v4410_v53 = vrot.slane %v10766_v51, 5  ;;  %v5134_v3 = vrot.slane %v5132_v49, 5  ;;  %v4335_v5 = vld [vmem:[#allocation2 + $0x18] sm:$0xe] }
 0x500   : > { %v4530_v1 = vpack.c.b16 %v4500_v21, %v4499_v63  ;;  %v5111_v46 = vsel %vm10443_vm3, %v5106_v57, %v5110_v45  ;;  %v5440_v42 = vunpack.c.l.b16 %v5121_v34  ;;  %v5138_v31 = vrot.slane %v5136_v56, 4  ;;  %v8137_v21 = vld [vmem:[#allocation2 + $0x24] sm:$0xff] }
 0x501   : > { %7809 = vmatmul.msk.bf16.gmra.mxu3 %vm437_vm2, %v8120_v23  ;;  %v4400_v23 = vrot.slane %v8341_v22, 5  ;;  %v5439_v25 = vunpack.c.l.b16 %v5111_v46  ;;  %v4409_v39 = vrot.slane %v4407_v4, 4  ;;  %v5125_v9 = vrot.slane %v5123_v38, 4  ;;  %v5016_v46 = vld [vmem:[#allocation2 + $0x44] sm:$0x1] }
 0x502   : > { %v5142_v28 = vshll.u32 %v5013_v48, 16  ;;  %v4403_v45 = vrot.slane %v8342_v58, 5  ;;  %v5139_v2 = vor.u32 %v5138_v31, %v5134_v3  ;;  %v7826_v47 = vrot.slane %v4335_v5, 9  ;;  %v8138_v5 = vld [vmem:[#allocation2 + $0x30] sm:$0xff] }
 0x503   : > { %v5469_v59 = vpack.c.b16 %v5440_v42, %v5439_v25  ;;  %v4402_v16 = vrot.slane %v4400_v23, 4  ;;  %v4411_v60 = vsel %vm10792_vm10, %v4409_v39, %v4410_v53  ;;  %v5156_v29 = vshll.u32 %v5015_v19, 16  ;;  %v8123_v39 = vld [vmem:[#allocation2 + $0x30] sm:$0xff] }
 0x504   : > { %7920 = vmatmul.msk.bf16.vlgmr.msra.gmra.mxu1 %vm437_vm2, %v8135_v40  ;;  %v4408_v40 = vsel %vm10792_vm10, %v7827_v27, %v4407_v4  ;;  %v4504_v26 = vunpack.c.l.b16 %v4411_v60  ;;  %v5144_v13 = vrot.slane %v5142_v28, 5  ;;  %v4401_v14 = vsel %vm10792_vm10, %v7826_v47, %v4400_v23 }
 0x505   : > { %7840 = vmatmul.msk.bf16.vlgmr.msra.gmra.mxu0 %vm437_vm2, %v4529_v55  ;;  %v5126_v55 = vshll.u32 %v5011_v12, 16  ;;  %v4503_v10 = vunpack.c.l.b16 %v4408_v40  ;;  %v4404_v37 = vsel %vm10792_vm10, %v4402_v16, %v4403_v45  ;;  %v5140_v50 = vrot.slane %v5139_v2, 4  ;;  %v5018_v40 = vld [vmem:[#allocation2 + $0x4c] sm:$0xf]  ;;  %v5017_v16 = vld [vmem:[#allocation2 + $0x48] sm:$0xf] }
 0x506   : > { %v4502_v11 = vunpack.c.l.b16 %v4404_v37  ;;  %v4501_v30 = vunpack.c.l.b16 %v4401_v14  ;;  %v5160_v57 = vshrl.u32 %v5015_v19, 16  ;;  %v5158_v49 = vrot.slane %v5156_v29, 5  ;;  %v5021_v29 = vld [vmem:[#allocation2 + $0x58] sm:$0xf] }
 0x507   : > { %v5128_v51 = vrot.slane %v5126_v55, 5  ;;  %v5145_v15 = vsel %vm10443_vm3, %v5140_v50, %v5144_v13  ;;  %v5166_v23 = vshll.u32 %v5016_v46, 16  ;;  %v5184_v60 = vshrl.u32 %v5018_v40, 16  ;;  %v5655_v46 = vld [vmem:[#allocation2 + $0xc] sm:$0xe] }
 0x508   : > { %v4531_v35 = vpack.c.b16 %v4502_v11, %v4501_v30  ;;  %v5442_v34 = vunpack.c.l.b16 %v5145_v15  ;;  %v5162_v56 = vrot.slane %v5160_v57, 4  ;;  %v4414_v47 = vrot.slane %v10642_v61, 5  ;;  %v10861_v13 = vpop.f32.mrf.mxu0  ;;  %v4337_v30 = vld [vmem:[#allocation2 + $0x30] sm:$0xe] }
 0x509   : > { %v5129_v18 = vor.u32 %v5128_v51, %v5125_v9  ;;  %v5168_v48 = vrot.slane %v5166_v23, 5  ;;  %v5180_v9 = vshll.u32 %v5018_v40, 16  ;;  %v5186_v45 = vrot.slane %v5184_v60, 4 }
 0x50a   : > { %7937 = vmatmul.msk.bf16.gmra.mxu2 %vm437_vm2, %v5468_v24  ;;  %v4532_v24 = vpack.c.b16 %v4504_v26, %v4503_v10  ;;  %v5163_v4 = vor.u32 %v5162_v56, %v5158_v49  ;;  %v5171_v10 = vshrl.u32 %v5017_v16, 16  ;;  %v5174_v26 = vshll.u32 %v5017_v16, 16 }
 0x50b   : > { %v5130_v41 = vrot.slane %v5129_v18, 4  ;;  %v5182_v58 = vrot.slane %v5180_v9, 5  ;;  %v4417_v11 = vrot.slane %v10672_v17, 5 }
 0x50c   : > { %v5173_v50 = vrot.slane %v5171_v10, 4  ;;  %v5176_v19 = vrot.slane %v5174_v26, 5 }
 0x50d   : > { %v5135_v12 = vsel %vm10443_vm3, %v5130_v41, %v5134_v3  ;;  %v5164_v3 = vrot.slane %v5163_v4, 4  ;;  %v5187_v41 = vor.u32 %v5186_v45, %v5182_v58  ;;  %v4424_v45 = vrot.slane %v10757_v52, 5 }
 0x50e   : > { %v5441_v38 = vunpack.c.l.b16 %v5135_v12  ;;  %v5721_v12 = vrot.slane %v10746_v8, 5  ;;  %v5020_v8 = vld [vmem:[#allocation2 + $0x54] sm:$0xf] }
 0x50f   : > { %v5198_v16 = vshll.u32 %v5020_v8, 16 }
 0x510   : > { %v5470_v27 = vpack.c.b16 %v5442_v34, %v5441_v38  ;;  %v8124_v34 = vld [vmem:[#allocation2 + $0x3c] sm:$0xff]  ;;  %v5723_v23 = vrot.slane %v5721_v12, 4  ;;  %v10877_v4 = vpop.f32.mrf.mxu0 }
 0x511   : > { %7810 = vmatmul.msk.bf16.gmra.mxu3 %vm437_vm2, %v8121_v7  ;;  %v5014_v7 = vld [vmem:[#allocation2 + $0x3c] sm:$0xf] }
 0x514   : > { %7921 = vmatmul.msk.bf16.gmra.mxu1 %vm437_vm2, %v8136_v36  ;;  %v5147_v36 = vshrl.u32 %v5014_v7, 16 }
 0x515   : > { %7841 = vmatmul.msk.bf16.gmra.mxu0 %vm437_vm2, %v4530_v1  ;;  %v5150_v1 = vshll.u32 %v5014_v7, 16  ;;  %v5177_v7 = vor.u32 %v5176_v19, %v5173_v50  ;;  %v4338_v50 = vld [vmem:[#allocation2 + $0x3c] sm:$0xe] }
 0x516   : > { %v5149_v42 = vrot.slane %v5147_v36, 4 }
 0x517   : > { %v5152_v22 = vrot.slane %v5150_v1, 5  ;;  %v5178_v38 = vrot.slane %v5177_v7, 4 }
 0x518   : > { %v10826_v62 = vpop.f32.mrf.mxu3 }
 0x519   : > { %v5153_v25 = vor.u32 %v5152_v22, %v5149_v42  ;;  %v5204_v42 = vshll.u32 %v5021_v29, 16  ;;  %v5208_v22 = vshrl.u32 %v5021_v29, 16  ;;  %v5183_v40 = vsel %vm10443_vm3, %v5178_v38, %v5182_v58 }
 0x51a   : > { %7938 = vmatmul.msk.bf16.gmra.mxu2 %vm437_vm2, %v5469_v59  ;;  %v5169_v59 = vsel %vm10443_vm3, %v5164_v3, %v5168_v48  ;;  %v5724_v3 = vrot.slane %v10752_v6, 5 }
 0x51b   : > { %v5154_v31 = vrot.slane %v5153_v25, 4  ;;  %v5444_v28 = vunpack.c.l.b16 %v5169_v59  ;;  %v8139_v25 = vld [vmem:[#allocation2 + $0x3c] sm:$0xff]  ;;  %v5195_v59 = vshrl.u32 %v5020_v8, 16  ;;  %v5206_v9 = vrot.slane %v5204_v42, 5  ;;  %v8140_v8 = vld [vmem:[#allocation2 + $0x48] sm:$0xff] }
 0x51c   : > { %v5210_v60 = vrot.slane %v5208_v22, 4  ;;  %v5725_v10 = vsel %vm10792_vm10, %v5723_v23, %v5724_v3 }
 0x51d   : > { %v5159_v51 = vsel %vm10443_vm3, %v5154_v31, %v5158_v49  ;;  %v5833_v6 = vunpack.c.l.b16 %v5725_v10 }
 0x51e   : > { %v5443_v2 = vunpack.c.l.b16 %v5159_v51  ;;  %v5445_v51 = vunpack.c.l.b16 %v5183_v40  ;;  %v5211_v19 = vor.u32 %v5210_v60, %v5206_v9 }
 0x520   : > { %v10840_v54 = vpop.f32.mrf.mxu3  ;;  %v5471_v14 = vpack.c.b16 %v5444_v28, %v5443_v2  ;;  %v4421_v28 = vrot.slane %v10717_v20, 5  ;;  %v5022_v2 = vld [vmem:[#allocation2 + $0x5c] sm:$0x1] }
 0x521   : > { %7811 = vmatmul.msk.bf16.gmra.mxu3 %vm437_vm2, %v8122_v43  ;;  %v10838_v63 = vpop.f32.mrf.mxu2  ;;  %v5019_v43 = vld [vmem:[#allocation2 + $0x50] sm:$0x1] }
 0x522   : > { %v5190_v15 = vshll.u32 %v5019_v43, 16  ;;  %v4423_v20 = vrot.slane %v4421_v28, 4 }
 0x524   : > { %7922 = vmatmul.msk.bf16.gmra.mxu1 %vm437_vm2, %v8137_v21  ;;  %v7828_v21 = vrot.slane %v4337_v30, 9  ;;  %v5192_v1 = vrot.slane %v5190_v15, 5  ;;  %v7829_v15 = vrot.slane %v4338_v50, 9  ;;  %v4425_v52 = vsel %vm10792_vm10, %v4423_v20, %v4424_v45  ;;  %v8344_v45 = vld [vmem:[#allocation2 + $0x50] sm:$0x1] }
 0x525   : > { %7842 = vmatmul.msk.bf16.gmra.mxu0 %vm437_vm2, %v4531_v35  ;;  %v5188_v35 = vrot.slane %v5187_v41, 4  ;;  %v5214_v41 = vshll.u32 %v5022_v2, 16  ;;  %v4431_v2 = vrot.slane %v8344_v45, 5 }
 0x526   : > { %v4415_v17 = vsel %vm10792_vm10, %v7828_v21, %v4414_v47  ;;  %v4422_v7 = vsel %vm10792_vm10, %v7829_v15, %v4421_v28  ;;  %v5025_v28 = vld [vmem:[#allocation2 + $0x68] sm:$0x1] }
 0x527   : > { %v4505_v49 = vunpack.c.l.b16 %v4415_v17  ;;  %v8125_v17 = vld [vmem:[#allocation2 + $0x48] sm:$0xff]  ;;  %v5216_v29 = vrot.slane %v5214_v41, 5 }
 0x529   : > { %v10845_v53 = vpop.f32.mrf.mxu2  ;;  %v10847_v55 = vpop.f32.mrf.mxu3 }
 0x52a   : > { %7939 = vmatmul.msk.bf16.gmra.mxu2 %vm437_vm2, %v5470_v27  ;;  %v5193_v27 = vsel %vm10443_vm3, %v5188_v35, %v5192_v1  ;;  %v5024_v35 = vld [vmem:[#allocation2 + $0x64] sm:$0xf] }
 0x52b   : > { %v5446_v31 = vunpack.c.l.b16 %v5193_v27  ;;  %v5232_v27 = vshrl.u32 %v5024_v35, 16 }
 0x52d   : > { %v5472_v58 = vpack.c.b16 %v5446_v31, %v5445_v51 }
 0x531   : > { %7812 = vmatmul.msk.bf16.gmra.mxu3 %vm437_vm2, %v8123_v39  ;;  %v10859_v18 = vpop.f32.mrf.mxu3  ;;  %v7952_v39 = vrot.slane %v5655_v46, 9  ;;  %v5023_v46 = vld [vmem:[#allocation2 + $0x60] sm:$0xf] }
 0x532   : > { %v5222_v3 = vshll.u32 %v5023_v46, 16 }
 0x534   : > { %7923 = vmatmul.msk.bf16.gmra.mxu1 %vm437_vm2, %v8138_v5  ;;  %v5722_v5 = vsel %vm10792_vm10, %v7952_v39, %v5721_v12  ;;  %v4508_v12 = vunpack.c.l.b16 %v4425_v52  ;;  %v5219_v39 = vshrl.u32 %v5023_v46, 16  ;;  %v5027_v52 = vld [vmem:[#allocation2 + $0x70] sm:$0xf] }
 0x535   : > { %7843 = vmatmul.msk.bf16.gmra.mxu0 %vm437_vm2, %v4532_v24  ;;  %v4416_v24 = vrot.slane %v4414_v47, 4  ;;  %v5832_v26 = vunpack.c.l.b16 %v5722_v5  ;;  %v5197_v47 = vrot.slane %v5195_v59, 4  ;;  %v5234_v59 = vrot.slane %v5232_v27, 4 }
 0x536   : > { %v5221_v10 = vrot.slane %v5219_v39, 4  ;;  %v5256_v46 = vshrl.u32 %v5027_v52, 16 }
 0x537   : > { %v4418_v61 = vsel %vm10792_vm10, %v4416_v24, %v4417_v11  ;;  %v10894_v30 = vpack.c.b16 %v5833_v6, %v5832_v26  ;;  %v10897_v24 = vpop.f32.mrf.mxu0  ;;  %v5224_v26 = vrot.slane %v5222_v3, 5 }
 0x538   : > { %v10857_v37 = vpop.f32.mrf.mxu2  ;;  %v4506_v57 = vunpack.c.l.b16 %v4418_v61  ;;  %v5212_v61 = vrot.slane %v5211_v19, 4 }
 0x539   : > { %v5225_v19 = vor.u32 %v5224_v26, %v5221_v10  ;;  %v5028_v10 = vld [vmem:[#allocation2 + $0x74] sm:$0x1] }
 0x53a   : > { %7940 = vmatmul.msk.bf16.gmra.mxu2 %vm437_vm2, %v5471_v14  ;;  %v4533_v48 = vpack.c.b16 %v4506_v57, %v4505_v49  ;;  %v5200_v14 = vrot.slane %v5198_v16, 5  ;;  %v5217_v38 = vsel %vm10443_vm3, %v5212_v61, %v5216_v29  ;;  %v5228_v49 = vshll.u32 %v5024_v35, 16 }
 0x53c   : > { %v5201_v21 = vor.u32 %v5200_v14, %v5197_v47  ;;  %v5230_v31 = vrot.slane %v5228_v49, 5  ;;  %v5238_v47 = vshll.u32 %v5025_v28, 16  ;;  %v8141_v49 = vld [vmem:[#allocation2 + $0x54] sm:$0xff] }
 0x53e   : > { %v5202_v57 = vrot.slane %v5201_v21, 4  ;;  %v5235_v6 = vor.u32 %v5234_v59, %v5230_v31  ;;  %v5240_v35 = vrot.slane %v5238_v47, 5 }
 0x53f   : > { %v10914_v16 = vpop.f32.mrf.mxu0 }
 0x540   : > { %v10870_v36 = vpop.f32.mrf.mxu2  ;;  %v5207_v23 = vsel %vm10443_vm3, %v5202_v57, %v5206_v9  ;;  %v4339_v9 = vld [vmem:[#allocation2 + $0x48] sm:$0xe]  ;;  %v5236_v41 = vrot.slane %v5235_v6, 4  ;;  %v4340_v6 = vld [vmem:[#allocation2 + $0x54] sm:$0xe] }
 0x541   : > { %7813 = vmatmul.msk.bf16.gmra.mxu3 %vm437_vm2, %v8124_v34  ;;  %v4507_v34 = vunpack.c.l.b16 %v4422_v7  ;;  %v5447_v60 = vunpack.c.l.b16 %v5207_v23  ;;  %v7830_v14 = vrot.slane %v4339_v9, 9  ;;  %v8126_v7 = vld [vmem:[#allocation2 + $0x54] sm:$0xff] }
 0x542   : > { %v10873_v56 = vpop.f32.mrf.mxu3  ;;  %v5241_v57 = vsel %vm10443_vm3, %v5236_v41, %v5240_v35  ;;  %v7831_v41 = vrot.slane %v4340_v6, 9 }
 0x543   : > { %v4534_v42 = vpack.c.b16 %v4508_v12, %v4507_v34  ;;  %v5026_v34 = vld [vmem:[#allocation2 + $0x6c] sm:$0xf]  ;;  %v5450_v23 = vunpack.c.l.b16 %v5241_v57  ;;  %v8127_v57 = vld [vmem:[#allocation2 + $0x60] sm:$0xff] }
 0x544   : > { %7924 = vmatmul.msk.bf16.gmra.mxu1 %vm437_vm2, %v8139_v25  ;;  %v5448_v25 = vunpack.c.l.b16 %v5217_v38  ;;  %v5252_v38 = vshll.u32 %v5027_v52, 16  ;;  %v5246_v39 = vshll.u32 %v5026_v34, 16 }
 0x545   : > { %7844 = vmatmul.msk.bf16.gmra.mxu0 %vm437_vm2, %v4533_v48  ;;  %v8343_v48 = vld [vmem:[#allocation2 + $0x4c] sm:$0xf] }
 0x546   : > { %v4428_v40 = vrot.slane %v8343_v48, 5  ;;  %v5473_v5 = vpack.c.b16 %v5448_v25, %v5447_v60  ;;  %v8345_v25 = vld [vmem:[#allocation2 + $0x58] sm:$0xf]  ;;  %v5254_v59 = vrot.slane %v5252_v38, 5  ;;  %v5258_v60 = vrot.slane %v5256_v46, 4 }
 0x547   : > { %v10927_v12 = vpop.f32.mrf.mxu0  ;;  %v4435_v48 = vrot.slane %v8345_v25, 5  ;;  %v5248_v26 = vrot.slane %v5246_v39, 5  ;;  %v8142_v39 = vld [vmem:[#allocation2 + $0x60] sm:$0xff] }
 0x548   : > { %v10890_v11 = vpop.f32.mrf.mxu2  ;;  %v4430_v51 = vrot.slane %v4428_v40, 4  ;;  %v4429_v15 = vsel %vm10792_vm10, %v7830_v14, %v4428_v40  ;;  %v5243_v40 = vshrl.u32 %v5026_v34, 16  ;;  %v5259_v45 = vor.u32 %v5258_v60, %v5254_v59 }
 0x549   : > { %v4509_v29 = vunpack.c.l.b16 %v4429_v15  ;;  %v4437_v28 = vrot.slane %v4435_v48, 4  ;;  %v4436_v35 = vsel %vm10792_vm10, %v7831_v41, %v4435_v48 }
 0x54a   : > { %v10892_v43 = vpop.f32.mrf.mxu3  ;;  %7941 = vmatmul.msk.bf16.gmra.mxu2 %vm437_vm2, %v5472_v58  ;;  %v4432_v50 = vsel %vm10792_vm10, %v4430_v51, %v4431_v2  ;;  %v8346_v2 = vld [vmem:[#allocation2 + $0x5c] sm:$0x1] }
 0x54b   : > { %v4510_v61 = vunpack.c.l.b16 %v4432_v50  ;;  %v4438_v47 = vrot.slane %v8346_v2, 5  ;;  %v5262_v50 = vshll.u32 %v5028_v10, 16 }
 0x54d   : > { %v4535_v27 = vpack.c.b16 %v4510_v61, %v4509_v29  ;;  %v4439_v15 = vsel %vm10792_vm10, %v4437_v28, %v4438_v47  ;;  %v5264_v34 = vrot.slane %v5262_v50, 5  ;;  %v8347_v28 = vld [vmem:[#allocation2 + $0x64] sm:$0xf] }
 0x54e   : > { %v4512_v29 = vunpack.c.l.b16 %v4439_v15  ;;  %v4442_v10 = vrot.slane %v8347_v28, 5  ;;  %v5031_v15 = vld [vmem:[#allocation2 + $0x80] sm:$0x1]  ;;  %v8128_v28 = vld [vmem:[#allocation2 + $0x6c] sm:$0xff] }
 0x54f   : > { %v10942_v14 = vpop.f32.mrf.mxu0 }
 0x550   : > { %v10908_v22 = vpop.f32.mrf.mxu2  ;;  %v4444_v41 = vrot.slane %v4442_v10, 4 }
 0x551   : > { %7814 = vmatmul.msk.bf16.gmra.mxu3 %vm437_vm2, %v8125_v17  ;;  %v5226_v17 = vrot.slane %v5225_v19, 4 }
 0x552   : > { %v10904_v1 = vpop.f32.mrf.mxu3 }
 0x554   : > { %7925 = vmatmul.msk.bf16.gmra.mxu1 %vm437_vm2, %v8140_v8  ;;  %v10925_v21 = vpop.f32.mrf.mxu1  ;;  %v5231_v8 = vsel %vm10443_vm3, %v5226_v17, %v5230_v31  ;;  %v5245_v31 = vrot.slane %v5243_v40, 4  ;;  %v5030_v17 = vld [vmem:[#allocation2 + $0x7c] sm:$0xf] }
 0x555   : > { %7845 = vmatmul.msk.bf16.gmra.mxu0 %vm437_vm2, %v4534_v42  ;;  %v5280_v25 = vshrl.u32 %v5030_v17, 16 }
 0x556   : > { %v5249_v52 = vor.u32 %v5248_v26, %v5245_v31 }
 0x557   : > { %v5282_v2 = vrot.slane %v5280_v25, 4 }
 0x558   : > { %v5250_v38 = vrot.slane %v5249_v52, 4 }
 0x55a   : > { %7942 = vmatmul.msk.bf16.gmra.mxu2 %vm437_vm2, %v5473_v5  ;;  %v10917_v58 = vpop.f32.mrf.mxu3  ;;  %v5449_v5 = vunpack.c.l.b16 %v5231_v8  ;;  %v5029_v8 = vld [vmem:[#allocation2 + $0x78] sm:$0xf]  ;;  %v5255_v60 = vsel %vm10443_vm3, %v5250_v38, %v5254_v59  ;;  %v5286_v38 = vshll.u32 %v5031_v15, 16 }
 0x55b   : > { %v5267_v31 = vshrl.u32 %v5029_v8, 16  ;;  %v5270_v26 = vshll.u32 %v5029_v8, 16  ;;  %v5451_v47 = vunpack.c.l.b16 %v5255_v60 }
 0x55c   : > { %v5474_v51 = vpack.c.b16 %v5450_v23, %v5449_v5  ;;  %v10940_v9 = vpop.f32.mrf.mxu1  ;;  %v5276_v23 = vshll.u32 %v5030_v17, 16 }
 0x55d   : > { %v10921_v20 = vpop.f32.mrf.mxu2  ;;  %v5269_v52 = vrot.slane %v5267_v31, 4  ;;  %v5272_v59 = vrot.slane %v5270_v26, 5  ;;  %v5288_v31 = vrot.slane %v5286_v38, 5 }
 0x561   : > { %7815 = vmatmul.msk.bf16.gmra.mxu3 %vm437_vm2, %v8126_v7  ;;  %v5260_v7 = vrot.slane %v5259_v45, 4  ;;  %v5278_v45 = vrot.slane %v5276_v23, 5  ;;  %v5273_v23 = vor.u32 %v5272_v59, %v5269_v52  ;;  %v5032_v52 = vld [vmem:[#allocation2 + $0x84] sm:$0xf] }
 0x563   : > { %v5283_v17 = vor.u32 %v5282_v2, %v5278_v45  ;;  %v5274_v26 = vrot.slane %v5273_v23, 4 }
 0x564   : > { %7926 = vmatmul.msk.bf16.gmra.mxu1 %vm437_vm2, %v8141_v49  ;;  %v10935_v42 = vpop.f32.mrf.mxu3  ;;  %v4511_v49 = vunpack.c.l.b16 %v4436_v35  ;;  %v4341_v35 = vld [vmem:[#allocation2 + $0x60] sm:$0xe] }
 0x565   : > { %7846 = vmatmul.msk.bf16.gmra.mxu0 %vm437_vm2, %v4535_v27  ;;  %v10938_v3 = vpop.f32.mrf.mxu2  ;;  %v5265_v27 = vsel %vm10443_vm3, %v5260_v7, %v5264_v34 }
 0x566   : > { %v4536_v48 = vpack.c.b16 %v4512_v29, %v4511_v49  ;;  %v8348_v29 = vld [vmem:[#allocation2 + $0x68] sm:$0x1] }
 0x56a   : > { %7943 = vmatmul.msk.bf16.gmra.mxu2 %vm437_vm2, %v5474_v51  ;;  %v5452_v51 = vunpack.c.l.b16 %v5265_v27  ;;  %v7832_v27 = vrot.slane %v4341_v35, 9 }
 0x56c   : > { %v10945_v19 = vpop.f32.mrf.mxu3  ;;  %v5475_v50 = vpack.c.b16 %v5452_v51, %v5451_v47  ;;  %v4443_v60 = vsel %vm10792_vm10, %v7832_v27, %v4442_v10 }
 0x56d   : > { %v10949_v61 = vpop.f32.mrf.mxu2  ;;  %v4513_v15 = vunpack.c.l.b16 %v4443_v60  ;;  %v5294_v60 = vshll.u32 %v5032_v52, 16 }
 0x571   : > { %v10953_v46 = vpop.f32.mrf.mxu1  ;;  %7816 = vmatmul.msk.bf16.gmra.mxu3 %vm437_vm2, %v8127_v57  ;;  %v4445_v57 = vrot.slane %v8348_v29, 5 }
 0x572   : > { %v10958_v40 = vpop.f32.mrf.mxu0 }
 0x573   : > { %v4446_v8 = vsel %vm10792_vm10, %v4444_v41, %v4445_v57  ;;  %v5279_v57 = vsel %vm10443_vm3, %v5274_v26, %v5278_v45  ;;  %v5034_v45 = vld [vmem:[#allocation2 + $0x8c] sm:$0x1] }
 0x574   : > { %7927 = vmatmul.msk.bf16.gmra.mxu1 %vm437_vm2, %v8142_v39  ;;  %v4253_v5 = vpop.f32.mrf.mxu3  ;;  %v5284_v39 = vrot.slane %v5283_v17, 4  ;;  %v4514_v51 = vunpack.c.l.b16 %v4446_v8  ;;  %v8143_v17 = vld [vmem:[#allocation2 + $0x6c] sm:$0xff]  ;;  %v5291_v8 = vshrl.u32 %v5032_v52, 16  ;;  %v5310_v52 = vshll.u32 %v5034_v45, 16 }
 0x575   : > { %7847 = vmatmul.msk.bf16.gmra.mxu0 %vm437_vm2, %v4536_v48  ;;  %v10964_v6 = vpop.f32.mrf.mxu2  ;;  %v5033_v48 = vld [vmem:[#allocation2 + $0x88] sm:$0xf]  ;;  %v4254_v47 = vadd.f32 %v4253_v5, %v10861_v13  ;;  %v8349_v5 = vld [vmem:[#allocation2 + $0x70] sm:$0xf] }
 0x576   : > { %v5300_v2 = vshll.u32 %v5033_v48, 16  ;;  %v5289_v41 = vsel %vm10443_vm3, %v5284_v39, %v5288_v31  ;;  %v5304_v59 = vshrl.u32 %v5033_v48, 16  ;;  %v4537_v10 = vpack.c.b16 %v4514_v51, %v4513_v15 }
 0x577   : > { %v5454_v13 = vunpack.c.l.b16 %v5289_v41  ;;  %v4449_v27 = vrot.slane %v8349_v5, 5  ;;  %v5453_v31 = vunpack.c.l.b16 %v5279_v57  ;;  %v4342_v41 = vld [vmem:[#allocation2 + $0x6c] sm:$0xe]  ;;  %v5296_v5 = vrot.slane %v5294_v60, 5 }
 0x578   : > { %v5302_v48 = vrot.slane %v5300_v2, 5 }
 0x579   : > { %v10966_v7 = vpop.f32.mrf.mxu1  ;;  %v5476_v51 = vpack.c.b16 %v5454_v13, %v5453_v31  ;;  %v4451_v15 = vrot.slane %v4449_v27, 4  ;;  %v5036_v31 = vld [vmem:[#allocation2 + $0x94] sm:$0xf] }
 0x57a   : > { %v10968_v34 = vpop.f32.mrf.mxu0  ;;  %7944 = vmatmul.msk.bf16.gmra.mxu2 %vm437_vm2, %v5475_v50  ;;  %v5324_v45 = vshll.u32 %v5036_v31, 16 }
 0x57c   : > { %v4255_v49 = vpop.f32.mrf.mxu3 }
 0x57d   : > { %v5543_v25 = vpop.f32.mrf.mxu2  ;;  %v4256_v26 = vadd.f32 %v4255_v49, %v10877_v4 }
 0x581   : > { %v4890_v50 = vpop.f32.mrf.mxu1  ;;  %7817 = vmatmul.msk.bf16.gmra.mxu3 %vm437_vm2, %v8128_v28  ;;  %v5306_v28 = vrot.slane %v5304_v59, 4 }
 0x582   : > { %v4605_v35 = vpop.f32.mrf.mxu0 }
 0x583   : > { %v4685_v29 = vadd.f32 %v4605_v35, %v4254_v47  ;;  %v5307_v44 = vor.u32 %v5306_v28, %v5302_v48 }
 0x584   : > { %7928 = vmatmul.msk.bf16.gmra.mxu1 %vm437_vm2, %v8143_v17  ;;  %v4258_v38 = vpop.f32.mrf.mxu3  ;;  %v5293_v17 = vrot.slane %v5291_v8, 4 }
 0x585   : > { %v4970_v23 = vadd.f32 %v4890_v50, %v4685_v29  ;;  %7848 = vmatmul.msk.bf16.gmra.mxu0 %vm437_vm2, %v4537_v10  ;;  %v5545_v39 = vpop.f32.mrf.mxu2  ;;  %v8350_v50 = vld [vmem:[#allocation2 + $0x74] sm:$0x1]  ;;  %v5308_v49 = vrot.slane %v5307_v44, 4 }
 0x586   : > { %v4452_v29 = vrot.slane %v8350_v50, 5  ;;  %v5297_v4 = vor.u32 %v5296_v5, %v5293_v17  ;;  %v8129_v50 = vld [vmem:[#allocation2 + $0x78] sm:$0xff] }
 0x587   : > { %v10983_v47 = vadd.f32 %v5543_v25, %v4970_v23  ;;  %v7833_v25 = vrot.slane %v4342_v41, 9  ;;  %v4259_v41 = vadd.f32 %v4258_v38, %v10897_v24 }
 0x588   : > { %v4453_v57 = vsel %vm10792_vm10, %v4451_v15, %v4452_v29 }
 0x589   : > { %v4892_v35 = vpop.f32.mrf.mxu1  ;;  %v4450_v8 = vsel %vm10792_vm10, %v7833_v25, %v4449_v27  ;;  %v4516_v28 = vunpack.c.l.b16 %v4453_v57  ;;  %v8144_v27 = vld [vmem:[#allocation2 + $0x78] sm:$0xff] }
 0x58a   : > { %v4607_v10 = vpop.f32.mrf.mxu0  ;;  %7945 = vmatmul.msk.bf16.gmra.mxu2 %vm437_vm2, %v5476_v51  ;;  %v5312_v51 = vrot.slane %v5310_v52, 5  ;;  %v4515_v15 = vunpack.c.l.b16 %v4450_v8  ;;  %v8351_v25 = vld [vmem:[#allocation2 + $0x7c] sm:$0xf] }
 0x58b   : > { %v4686_v2 = vadd.f32 %v4607_v10, %v4256_v26  ;;  %v5035_v26 = vld [vmem:[#allocation2 + $0x90] sm:$0xf]  ;;  %v5328_v10 = vshrl.u32 %v5036_v31, 16  ;;  %v4456_v57 = vrot.slane %v8351_v25, 5 }
 0x58c   : > { %v4260_v59 = vpop.f32.mrf.mxu3  ;;  %v5313_v44 = vsel %vm10443_vm3, %v5308_v49, %v5312_v51  ;;  %v4538_v29 = vpack.c.b16 %v4516_v28, %v4515_v15  ;;  %v5318_v52 = vshll.u32 %v5035_v26, 16  ;;  %v5037_v28 = vld [vmem:[#allocation2 + $0x98] sm:$0x1] }
 0x58d   : > { %v4971_v13 = vadd.f32 %v4892_v35, %v4686_v2  ;;  %v5548_v23 = vpop.f32.mrf.mxu2  ;;  %v5298_v35 = vrot.slane %v5297_v4, 4  ;;  %v5456_v38 = vunpack.c.l.b16 %v5313_v44  ;;  %v5330_v4 = vrot.slane %v5328_v10, 4 }
 0x58f   : > { %v10991_v60 = vadd.f32 %v5545_v39, %v4971_v13  ;;  %v5315_v39 = vshrl.u32 %v5035_v26, 16  ;;  %v5303_v2 = vsel %vm10443_vm3, %v5298_v35, %v5302_v48  ;;  %v11000_v13 = vrot.slane %v5324_v45, 5  ;;  %v4343_v45 = vld [vmem:[#allocation2 + $0x78] sm:$0xe] }
 0x590   : > { %v5455_v8 = vunpack.c.l.b16 %v5303_v2  ;;  %v4458_v26 = vrot.slane %v4456_v57, 4  ;;  %v4261_v35 = vadd.f32 %v4260_v59, %v10914_v16 }
 0x591   : > { %v4895_v0 = vpop.f32.mrf.mxu1  ;;  %7818 = vmatmul.msk.bf16.gmra.mxu3 %vm437_vm2, %v8129_v50  ;;  %v5317_v51 = vrot.slane %v5315_v39, 4  ;;  %v5331_v15 = vor.u32 %v5330_v4, %v11000_v13 }
 0x592   : > { %v4610_v17 = vpop.f32.mrf.mxu0  ;;  %v5477_v48 = vpack.c.b16 %v5456_v38, %v5455_v8 }
 0x593   : > { %v4687_v5 = vadd.f32 %v4610_v17, %v4259_v41  ;;  %v5320_v41 = vrot.slane %v5318_v52, 5  ;;  %v8352_v17 = vld [vmem:[#allocation2 + $0x80] sm:$0x1]  ;;  %v5332_v52 = vrot.slane %v5331_v15, 4 }
 0x594   : > { %7929 = vmatmul.msk.bf16.gmra.mxu1 %vm437_vm2, %v8144_v27  ;;  %v4263_v24 = vpop.f32.mrf.mxu3  ;;  %v4459_v10 = vrot.slane %v8352_v17, 5  ;;  %v5334_v27 = vshll.u32 %v5037_v28, 16  ;;  %v8145_v17 = vld [vmem:[#allocation2 + $0x84] sm:$0xff] }
 0x595   : > { %v4972_v31 = vadd.f32 %v4895_v0, %v4687_v5  ;;  %7849 = vmatmul.msk.bf16.gmra.mxu0 %vm437_vm2, %v4538_v29  ;;  %v5550_v49 = vpop.f32.mrf.mxu2  ;;  %v7834_v29 = vrot.slane %v4343_v45, 9  ;;  %v5321_v2 = vor.u32 %v5320_v41, %v5317_v51  ;;  %v4264_v51 = vadd.f32 %v4263_v24, %v10927_v12  ;;  %v8353_v12 = vld [vmem:[#allocation2 + $0x88] sm:$0xf] }
 0x596   : > { %v4460_v39 = vsel %vm10792_vm10, %v4458_v26, %v4459_v10  ;;  %v5336_v4 = vrot.slane %v5334_v27, 5  ;;  %v4463_v24 = vrot.slane %v8353_v12, 5 }
 0x597   : > { %v11003_v50 = vadd.f32 %v5548_v23, %v4972_v31  ;;  %v4457_v59 = vsel %vm10792_vm10, %v7834_v29, %v4456_v57  ;;  %v5039_v31 = vld [vmem:[#allocation2 + $0xa0] sm:$0xf]  ;;  %v4518_v28 = vunpack.c.l.b16 %v4460_v39 }
 0x598   : > { %v5337_v45 = vsel %vm10443_vm3, %v5332_v52, %v5336_v4  ;;  %v4517_v41 = vunpack.c.l.b16 %v4457_v59  ;;  %v5348_v15 = vshll.u32 %v5039_v31, 16 }
 0x599   : > { %v4897_v44 = vpop.f32.mrf.mxu1 }
 0x59a   : > { %v4612_v0 = vpop.f32.mrf.mxu0  ;;  %7946 = vmatmul.msk.bf16.gmra.mxu2 %vm437_vm2, %v5477_v48  ;;  %v8130_v48 = vld [vmem:[#allocation2 + $0x84] sm:$0xff] }
 0x59b   : > { %v4688_v5 = vadd.f32 %v4612_v0, %v4261_v35  ;;  %v5322_v35 = vrot.slane %v5321_v2, 4 }
 0x59c   : > { %v4265_v23 = vpop.f32.mrf.mxu3 }
 0x59d   : > { %v4973_v38 = vadd.f32 %v4897_v44, %v4688_v5  ;;  %v4266_v25 = vadd.f32 %v4265_v23, %v10942_v14  ;;  %v5553_v16 = vpop.f32.mrf.mxu2  ;;  %v5038_v14 = vld [vmem:[#allocation2 + $0x9c] sm:$0xf]  ;;  %v5352_v44 = vshrl.u32 %v5039_v31, 16  ;;  %v5327_v0 = vsel %vm10443_vm3, %v5322_v35, %v11000_v13 }
 0x59e   : > { %v5458_v5 = vunpack.c.l.b16 %v5337_v45  ;;  %v5339_v23 = vshrl.u32 %v5038_v14, 16  ;;  %v5342_v29 = vshll.u32 %v5038_v14, 16  ;;  %v5457_v4 = vunpack.c.l.b16 %v5327_v0  ;;  %v8354_v14 = vld [vmem:[#allocation2 + $0x8c] sm:$0x1] }
 0x59f   : > { %v11013_v8 = vadd.f32 %v5550_v49, %v4973_v38  ;;  %v4539_v49 = vpack.c.b16 %v4518_v28, %v4517_v41  ;;  %v5350_v38 = vrot.slane %v5348_v15, 5  ;;  %v5354_v59 = vrot.slane %v5352_v44, 4  ;;  %v4344_v41 = vld [vmem:[#allocation2 + $0x84] sm:$0xe] }
 0x5a0   : > { %v5478_v13 = vpack.c.b16 %v5458_v5, %v5457_v4  ;;  %v4465_v28 = vrot.slane %v4463_v24, 4  ;;  %v5341_v35 = vrot.slane %v5339_v23, 4  ;;  %v5344_v45 = vrot.slane %v5342_v29, 5  ;;  %v5042_v29 = vld [vmem:[#allocation2 + $0xac] sm:$0xf] }
 0x5a1   : > { %v4900_v26 = vpop.f32.mrf.mxu1  ;;  %7819 = vmatmul.msk.bf16.gmra.mxu3 %vm437_vm2, %v8130_v48  ;;  %v5040_v48 = vld [vmem:[#allocation2 + $0xa4] sm:$0x1]  ;;  %v7835_v44 = vrot.slane %v4344_v41, 9 }
 0x5a2   : > { %v4615_v57 = vpop.f32.mrf.mxu0 }
 0x5a3   : > { %v4689_v10 = vadd.f32 %v4615_v57, %v4264_v51  ;;  %v5355_v57 = vor.u32 %v5354_v59, %v5350_v38  ;;  %v4464_v23 = vsel %vm10792_vm10, %v7835_v44, %v4463_v24 }
 0x5a4   : > { %7930 = vmatmul.msk.bf16.gmra.mxu1 %vm437_vm2, %v8145_v17  ;;  %v4268_v27 = vpop.f32.mrf.mxu3  ;;  %v4519_v41 = vunpack.c.l.b16 %v4464_v23 }
 0x5a5   : > { %v4974_v39 = vadd.f32 %v4900_v26, %v4689_v10  ;;  %7850 = vmatmul.msk.bf16.gmra.mxu0 %vm437_vm2, %v4539_v49  ;;  %v4269_v2 = vadd.f32 %v4268_v27, %v10958_v40  ;;  %v5555_v52 = vpop.f32.mrf.mxu2  ;;  %v4466_v26 = vrot.slane %v8354_v14, 5  ;;  %v5358_v10 = vshll.u32 %v5040_v48, 16 }
 0x5a6   : > { %v5345_v49 = vor.u32 %v5344_v45, %v5341_v35  ;;  %v5356_v12 = vrot.slane %v5355_v57, 4  ;;  %v5372_v35 = vshll.u32 %v5042_v29, 16  ;;  %v5376_v45 = vshrl.u32 %v5042_v29, 16  ;;  %v8146_v57 = vld [vmem:[#allocation2 + $0x90] sm:$0xff] }
 0x5a7   : > { %v11025_v31 = vadd.f32 %v5553_v16, %v4974_v39  ;;  %v4467_v16 = vsel %vm10792_vm10, %v4465_v28, %v4466_v26  ;;  %v5360_v4 = vrot.slane %v5358_v10, 5  ;;  %v4345_v29 = vld [vmem:[#allocation2 + $0x90] sm:$0xe] }
 0x5a8   : > { %v4520_v59 = vunpack.c.l.b16 %v4467_v16 }
 0x5a9   : > { %v4902_v51 = vpop.f32.mrf.mxu1  ;;  %v5361_v28 = vsel %vm10443_vm3, %v5356_v12, %v5360_v4  ;;  %v5378_v12 = vrot.slane %v5376_v45, 4 }
 0x5aa   : > { %v4617_v17 = vpop.f32.mrf.mxu0  ;;  %7947 = vmatmul.msk.bf16.gmra.mxu2 %vm437_vm2, %v5478_v13  ;;  %v5346_v13 = vrot.slane %v5345_v49, 4  ;;  %v4540_v14 = vpack.c.b16 %v4520_v59, %v4519_v41 }
 0x5ab   : > { %v4690_v40 = vadd.f32 %v4617_v17, %v4266_v25  ;;  %v8131_v25 = vld [vmem:[#allocation2 + $0x90] sm:$0xff]  ;;  %v5460_v17 = vunpack.c.l.b16 %v5361_v28 }
 0x5ac   : > { %v4270_v15 = vpop.f32.mrf.mxu3 }
 0x5ad   : > { %v4975_v0 = vadd.f32 %v4902_v51, %v4690_v40  ;;  %v4271_v27 = vadd.f32 %v4270_v15, %v10968_v34  ;;  %v5558_v5 = vpop.f32.mrf.mxu2  ;;  %v5041_v34 = vld [vmem:[#allocation2 + $0xa8] sm:$0xf]  ;;  %v8355_v40 = vld [vmem:[#allocation2 + $0x94] sm:$0xf] }
 0x5ae   : > { %v4470_v10 = vrot.slane %v8355_v40, 5  ;;  %v5363_v15 = vshrl.u32 %v5041_v34, 16  ;;  %v5366_v44 = vshll.u32 %v5041_v34, 16 }
 0x5af   : > { %v11033_v39 = vadd.f32 %v5555_v52, %v4975_v0  ;;  %v5351_v52 = vsel %vm10443_vm3, %v5346_v13, %v5350_v38  ;;  %v5374_v0 = vrot.slane %v5372_v35, 5 }
 0x5b0   : > { %v5459_v23 = vunpack.c.l.b16 %v5351_v52  ;;  %v4472_v38 = vrot.slane %v4470_v10, 4  ;;  %v5365_v4 = vrot.slane %v5363_v15, 4  ;;  %v5368_v13 = vrot.slane %v5366_v44, 5  ;;  %v5045_v44 = vld [vmem:[#allocation2 + $0xb8] sm:$0xf] }
 0x5b1   : > { %v4905_v48 = vpop.f32.mrf.mxu1  ;;  %7820 = vmatmul.msk.bf16.gmra.mxu3 %vm437_vm2, %v8131_v25  ;;  %v5043_v25 = vld [vmem:[#allocation2 + $0xb0] sm:$0x1]  ;;  %v5379_v28 = vor.u32 %v5378_v12, %v5374_v0 }
 0x5b2   : > { %v4620_v51 = vpop.f32.mrf.mxu0  ;;  %v5479_v59 = vpack.c.b16 %v5460_v17, %v5459_v23  ;;  %v5382_v35 = vshll.u32 %v5043_v25, 16  ;;  %v8132_v23 = vld [vmem:[#allocation2 + $0x9c] sm:$0xff] }
 0x5b3   : > { %v4691_v24 = vadd.f32 %v4620_v51, %v4269_v2  ;;  %v8356_v51 = vld [vmem:[#allocation2 + $0x98] sm:$0x1]  ;;  %v5380_v15 = vrot.slane %v5379_v28, 4  ;;  %v8147_v28 = vld [vmem:[#allocation2 + $0x9c] sm:$0xff] }
 0x5b4   : > { %7931 = vmatmul.msk.bf16.gmra.mxu1 %vm437_vm2, %v8146_v57  ;;  %v4273_v26 = vpop.f32.mrf.mxu3  ;;  %v4473_v57 = vrot.slane %v8356_v51, 5 }
 0x5b5   : > { %v4976_v16 = vadd.f32 %v4905_v48, %v4691_v24  ;;  %7851 = vmatmul.msk.bf16.gmra.mxu0 %vm437_vm2, %v4540_v14  ;;  %v5560_v49 = vpop.f32.mrf.mxu2  ;;  %v7836_v24 = vrot.slane %v4345_v29, 9  ;;  %v5369_v14 = vor.u32 %v5368_v13, %v5365_v4  ;;  %v4274_v25 = vadd.f32 %v4273_v26, %v10925_v21  ;;  %v5044_v4 = vld [vmem:[#allocation2 + $0xb4] sm:$0xf]  ;;  %v8357_v26 = vld [vmem:[#allocation2 + $0xa0] sm:$0xf] }
 0x5b6   : > { %v5396_v13 = vshll.u32 %v5045_v44, 16 }
 0x5b7   : > { %v11042_v2 = vadd.f32 %v5558_v5, %v4976_v16  ;;  %v4474_v5 = vsel %vm10792_vm10, %v4472_v38, %v4473_v57  ;;  %v4471_v40 = vsel %vm10792_vm10, %v7836_v24, %v4470_v10  ;;  %v5370_v29 = vrot.slane %v5369_v14, 4 }
 0x5b8   : > { %v4522_v12 = vunpack.c.l.b16 %v4474_v5  ;;  %v5400_v10 = vshrl.u32 %v5045_v44, 16  ;;  %v4477_v24 = vrot.slane %v8357_v26, 5  ;;  %v5390_v5 = vshll.u32 %v5044_v4, 16 }
 0x5b9   : > { %v4907_v41 = vpop.f32.mrf.mxu1 }
 0x5ba   : > { %v4622_v34 = vpop.f32.mrf.mxu0  ;;  %7948 = vmatmul.msk.bf16.gmra.mxu2 %vm437_vm2, %v5479_v59  ;;  %v5384_v59 = vrot.slane %v5382_v35, 5  ;;  %v5387_v35 = vshrl.u32 %v5044_v4, 16  ;;  %v8358_v4 = vld [vmem:[#allocation2 + $0xa4] sm:$0x1] }
 0x5bb   : > { %v4692_v48 = vadd.f32 %v4622_v34, %v4271_v27  ;;  %v4521_v27 = vunpack.c.l.b16 %v4471_v40  ;;  %v5375_v34 = vsel %vm10443_vm3, %v5370_v29, %v5374_v0  ;;  %v5398_v40 = vrot.slane %v5396_v13, 5 }
 0x5bc   : > { %v4275_v45 = vpop.f32.mrf.mxu3  ;;  %v5385_v38 = vsel %vm10443_vm3, %v5380_v15, %v5384_v59  ;;  %v5402_v15 = vrot.slane %v5400_v10, 4  ;;  %v5461_v44 = vunpack.c.l.b16 %v5375_v34  ;;  %v4479_v0 = vrot.slane %v4477_v24, 4 }
 0x5bd   : > { %v4977_v52 = vadd.f32 %v4907_v41, %v4692_v48  ;;  %v5563_v17 = vpop.f32.mrf.mxu2  ;;  %v4541_v57 = vpack.c.b16 %v4522_v12, %v4521_v27  ;;  %v5462_v21 = vunpack.c.l.b16 %v5385_v38  ;;  %v4346_v12 = vld [vmem:[#allocation2 + $0x9c] sm:$0xe]  ;;  %v5046_v27 = vld [vmem:[#allocation2 + $0xbc] sm:$0x1]  ;;  %v5389_v29 = vrot.slane %v5387_v35, 4 }
 0x5be   : > { %v4276_v38 = vadd.f32 %v4275_v45, %v10940_v9  ;;  %v7837_v10 = vrot.slane %v4346_v12, 9 }
 0x5bf   : > { %v11049_v16 = vadd.f32 %v5560_v49, %v4977_v52  ;;  %v5480_v59 = vpack.c.b16 %v5462_v21, %v5461_v44  ;;  %v8133_v44 = vld [vmem:[#allocation2 + $0xa8] sm:$0xff] }
 0x5c0   : > { %v4478_v9 = vsel %vm10792_vm10, %v7837_v10, %v4477_v24 }
 0x5c1   : > { %v4910_v51 = vpop.f32.mrf.mxu1  ;;  %7821 = vmatmul.msk.bf16.gmra.mxu3 %vm437_vm2, %v8132_v23 }
 0x5c2   : > { %v4625_v41 = vpop.f32.mrf.mxu0 }
 0x5c3   : > { %v4693_v49 = vadd.f32 %v4625_v41, %v4274_v25  ;;  %v5392_v25 = vrot.slane %v5390_v5, 5  ;;  %v5048_v5 = vld [vmem:[#allocation2 + $0xc4] sm:$0xf] }
 0x5c4   : > { %7932 = vmatmul.msk.bf16.gmra.mxu1 %vm437_vm2, %v8147_v28  ;;  %v4278_v48 = vpop.f32.mrf.mxu3  ;;  %v5403_v28 = vor.u32 %v5402_v15, %v5398_v40  ;;  %v5424_v24 = vshrl.u32 %v5048_v5, 16 }
 0x5c5   : > { %v4978_v14 = vadd.f32 %v4910_v51, %v4693_v49  ;;  %7852 = vmatmul.msk.bf16.gmra.mxu0 %vm437_vm2, %v4541_v57  ;;  %v5565_v52 = vpop.f32.mrf.mxu2  ;;  %v4480_v51 = vrot.slane %v8358_v4, 5  ;;  %v5406_v57 = vshll.u32 %v5046_v27, 16  ;;  %v5393_v21 = vor.u32 %v5392_v25, %v5389_v29  ;;  %v5047_v29 = vld [vmem:[#allocation2 + $0xc0] sm:$0xf] }
 0x5c6   : > { %v5404_v45 = vrot.slane %v5403_v28, 4  ;;  %v4279_v27 = vadd.f32 %v4278_v48, %v10953_v46  ;;  %v5420_v25 = vshll.u32 %v5048_v5, 16  ;;  %v8148_v28 = vld [vmem:[#allocation2 + $0xa8] sm:$0xff] }
 0x5c7   : > { %v11059_v23 = vadd.f32 %v5563_v17, %v4978_v14  ;;  %v4481_v34 = vsel %vm10792_vm10, %v4479_v0, %v4480_v51  ;;  %v5394_v12 = vrot.slane %v5393_v21, 4  ;;  %v8359_v48 = vld [vmem:[#allocation2 + $0xac] sm:$0xf] }
 0x5c8   : > { %v4524_v15 = vunpack.c.l.b16 %v4481_v34  ;;  %v4484_v10 = vrot.slane %v8359_v48, 5 }
 0x5c9   : > { %v4912_v41 = vpop.f32.mrf.mxu1 }
 0x5ca   : > { %v4627_v49 = vpop.f32.mrf.mxu0  ;;  %7949 = vmatmul.msk.bf16.gmra.mxu2 %vm437_vm2, %v5480_v59  ;;  %v5408_v59 = vrot.slane %v5406_v57, 5  ;;  %v5411_v57 = vshrl.u32 %v5047_v29, 16 }
 0x5cb   : > { %v4694_v13 = vadd.f32 %v4627_v49, %v4276_v38  ;;  %v4523_v38 = vunpack.c.l.b16 %v4478_v9  ;;  %v5399_v49 = vsel %vm10443_vm3, %v5394_v12, %v5398_v40  ;;  %v5422_v9 = vrot.slane %v5420_v25, 5  ;;  %v5049_v40 = vld [vmem:[#allocation2 + $0xc8] sm:$0x1] }
 0x5cc   : > { %v4280_v17 = vpop.f32.mrf.mxu3  ;;  %v5409_v0 = vsel %vm10443_vm3, %v5404_v45, %v5408_v59  ;;  %v5426_v45 = vrot.slane %v5424_v24, 4  ;;  %v5463_v5 = vunpack.c.l.b16 %v5399_v49  ;;  %v4486_v59 = vrot.slane %v4484_v10, 4 }
 0x5cd   : > { %v4979_v26 = vadd.f32 %v4912_v41, %v4694_v13  ;;  %v5568_v35 = vpop.f32.mrf.mxu2  ;;  %v4542_v51 = vpack.c.b16 %v4524_v15, %v4523_v38  ;;  %v5464_v46 = vunpack.c.l.b16 %v5409_v0  ;;  %v4281_v38 = vadd.f32 %v4280_v17, %v10966_v7 }
 0x5ce   : > { %v5413_v0 = vrot.slane %v5411_v57, 4  ;;  %v5430_v25 = vshll.u32 %v5049_v40, 16 }
 0x5cf   : > { %v11067_v14 = vadd.f32 %v5565_v52, %v4979_v26  ;;  %v5414_v26 = vshll.u32 %v5047_v29, 16  ;;  %v5481_v15 = vpack.c.b16 %v5464_v46, %v5463_v5 }
 0x5d0   : > { %v5432_v5 = vrot.slane %v5430_v25, 5  ;;  %v6339_v25 = vld [vmem:[#allocation2 + $0x1c] sm:$0xf] }
 0x5d1   : > { %v4915_v4 = vpop.f32.mrf.mxu1  ;;  %7822 = vmatmul.msk.bf16.gmra.mxu3 %vm437_vm2, %v8133_v44 }
 0x5d2   : > { %v4630_v41 = vpop.f32.mrf.mxu0 }
 0x5d3   : > { %v4695_v52 = vadd.f32 %v4630_v41, %v4279_v27  ;;  %v4347_v27 = vld [vmem:[#allocation2 + $0xa8] sm:$0xe]  ;;  %v5416_v41 = vrot.slane %v5414_v26, 5 }
 0x5d4   : > { %7933 = vmatmul.msk.bf16.gmra.mxu1 %vm437_vm2, %v8148_v28  ;;  %v4283_v13 = vpop.f32.mrf.mxu3  ;;  %v5427_v28 = vor.u32 %v5426_v45, %v5422_v9  ;;  %v8134_v45 = vld [vmem:[#allocation2 + $0xb4] sm:$0xff] }
 0x5d5   : > { %v4980_v34 = vadd.f32 %v4915_v4, %v4695_v52  ;;  %7853 = vmatmul.msk.bf16.gmra.mxu0 %vm437_vm2, %v4542_v51  ;;  %v5570_v21 = vpop.f32.mrf.mxu2  ;;  %v8360_v4 = vld [vmem:[#allocation2 + $0xb0] sm:$0x1]  ;;  %v5417_v7 = vor.u32 %v5416_v41, %v5413_v0  ;;  %v8149_v0 = vld [vmem:[#allocation2 + $0xb4] sm:$0xff] }
 0x5d6   : > { %v4487_v52 = vrot.slane %v8360_v4, 5  ;;  %v5428_v17 = vrot.slane %v5427_v28, 4 }
 0x5d7   : > { %v11077_v44 = vadd.f32 %v5568_v35, %v4980_v34  ;;  %v7838_v35 = vrot.slane %v4347_v27, 9  ;;  %v5418_v27 = vrot.slane %v5417_v7, 4 }
 0x5d8   : > { %v4488_v49 = vsel %vm10792_vm10, %v4486_v59, %v4487_v52  ;;  %v5433_v59 = vsel %vm10443_vm3, %v5428_v17, %v5432_v5 }
 0x5d9   : > { %v4917_v12 = vpop.f32.mrf.mxu1  ;;  %v4485_v57 = vsel %vm10792_vm10, %v7838_v35, %v4484_v10  ;;  %v4526_v26 = vunpack.c.l.b16 %v4488_v49  ;;  %v5423_v10 = vsel %vm10443_vm3, %v5418_v27, %v5422_v9  ;;  %v5466_v4 = vunpack.c.l.b16 %v5433_v59  ;;  %v4348_v9 = vld [vmem:[#allocation2 + $0xb4] sm:$0xe] }
 0x5da   : > { %v4632_v51 = vpop.f32.mrf.mxu0  ;;  %7950 = vmatmul.msk.bf16.gmra.mxu2 %vm437_vm2, %v5481_v15  ;;  %v4284_v15 = vadd.f32 %v4283_v13, %v10838_v63  ;;  %v8361_v63 = vld [vmem:[#allocation2 + $0xb8] sm:$0xf]  ;;  %v6396_v27 = vshll.u32 %v6339_v25, 16  ;;  %v6400_v59 = vshrl.u32 %v6339_v25, 16 }
 0x5db   : > { %v4696_v29 = vadd.f32 %v4632_v51, %v4281_v38  ;;  %v4525_v38 = vunpack.c.l.b16 %v4485_v57  ;;  %v4491_v13 = vrot.slane %v8361_v63, 5  ;;  %v7057_v57 = vrot.slane %v6339_v25, 5 }
 0x5dc   : > { %v4285_v24 = vpop.f32.mrf.mxu3  ;;  %v6402_v25 = vrot.slane %v6400_v59, 4 }
 0x5dd   : > { %v4981_v46 = vadd.f32 %v4917_v12, %v4696_v29  ;;  %v5573_v48 = vpop.f32.mrf.mxu2  ;;  %v4543_v28 = vpack.c.b16 %v4526_v26, %v4525_v38  ;;  %v5465_v29 = vunpack.c.l.b16 %v5423_v10  ;;  %v4286_v7 = vadd.f32 %v4285_v24, %v10845_v53  ;;  %v8362_v26 = vld [vmem:[#allocation2 + $0xbc] sm:$0x1]  ;;  %v6338_v38 = vld [vmem:[#allocation2 + $0x18] sm:$0xf] }
 0x5de   : > { %v7059_v24 = vrot.slane %v7057_v57, 4  ;;  %v6991_v10 = vld [vmem:[#allocation2 + $0x18] sm:$0xe]  ;;  %v6387_v63 = vshrl.u32 %v6338_v38, 16 }
 0x5df   : > { %v11085_v34 = vadd.f32 %v5570_v21, %v4981_v46  ;;  %v5482_v49 = vpack.c.b16 %v5466_v4, %v5465_v29  ;;  %v4493_v46 = vrot.slane %v4491_v13, 4 }
 0x5e1   : > { %v4920_v40 = vpop.f32.mrf.mxu1  ;;  %7823 = vmatmul.msk.bf16.gmra.mxu3 %vm437_vm2, %v8134_v45  ;;  %v4494_v45 = vrot.slane %v8362_v26, 5 }
 0x5e2   : > { %v4635_v12 = vpop.f32.mrf.mxu0 }
 0x5e3   : > { %v4697_v41 = vadd.f32 %v4635_v12, %v4284_v15 }
 0x5e4   : > { %7934 = vmatmul.msk.bf16.gmra.mxu1 %vm437_vm2, %v8149_v0  ;;  %v4288_v21 = vpop.f32.mrf.mxu3  ;;  %v4495_v0 = vsel %vm10792_vm10, %v4493_v46, %v4494_v45 }
 0x5e5   : > { %v4982_v52 = vadd.f32 %v4920_v40, %v4697_v41  ;;  %7854 = vmatmul.msk.bf16.gmra.mxu0 %vm437_vm2, %v4543_v28  ;;  %v5575_v51 = vpop.f32.mrf.mxu2  ;;  %v6340_v40 = vld [vmem:[#allocation2 + $0x20] sm:$0x1]  ;;  %v4289_v46 = vadd.f32 %v4288_v21, %v10857_v37 }
 0x5e6   : > { %v7060_v4 = vrot.slane %v6340_v40, 5 }
 0x5e7   : > { %v11095_v35 = vadd.f32 %v5573_v48, %v4982_v52  ;;  %v7839_v48 = vrot.slane %v4348_v9, 9  ;;  %v6390_v52 = vshll.u32 %v6338_v38, 16  ;;  %v8363_v9 = vld [vmem:[#allocation2 + $0x1c] sm:$0xf]  ;;  %v6389_v38 = vrot.slane %v6387_v63, 4 }
 0x5e8   : > { %v5728_v26 = vrot.slane %v8363_v9, 5  ;;  %v8364_v63 = vld [vmem:[#allocation2 + $0x20] sm:$0x1] }
 0x5e9   : > { %v4922_v17 = vpop.f32.mrf.mxu1  ;;  %v4492_v28 = vsel %vm10792_vm10, %v7839_v48, %v4491_v13  ;;  %v8080_v13 = vrot.slane %v6991_v10, 9  ;;  %v6392_v48 = vrot.slane %v6390_v52, 5  ;;  %v5731_v52 = vrot.slane %v8364_v63, 5 }
 0x5ea   : > { %v4637_v5 = vpop.f32.mrf.mxu0  ;;  %7951 = vmatmul.msk.bf16.gmra.mxu2 %vm437_vm2, %v5482_v49  ;;  %v4528_v49 = vunpack.c.l.b16 %v4495_v0  ;;  %v4527_v45 = vunpack.c.l.b16 %v4492_v28  ;;  %v5730_v28 = vrot.slane %v5728_v26, 4 }
 0x5eb   : > { %v4698_v15 = vadd.f32 %v4637_v5, %v4286_v7  ;;  %v11105_v7 = vrot.slane %v6396_v27, 5  ;;  %v7061_v5 = vsel %vm10792_vm10, %v7059_v24, %v7060_v4  ;;  %v7058_v59 = vsel %vm10792_vm10, %v8080_v13, %v7057_v57 }
 0x5ec   : > { %v4290_v12 = vpop.f32.mrf.mxu3  ;;  %v4544_v0 = vpack.c.b16 %v4528_v49, %v4527_v45  ;;  %v6406_v4 = vshll.u32 %v6340_v40, 16  ;;  %v7168_v9 = vunpack.c.l.b16 %v7058_v59  ;;  %v6393_v49 = vor.u32 %v6392_v48, %v6389_v38 }
 0x5ed   : > { %v4983_v41 = vadd.f32 %v4922_v17, %v4698_v15  ;;  %v5578_v53 = vpop.f32.mrf.mxu2  ;;  %v6403_v37 = vor.u32 %v6402_v25, %v11105_v7  ;;  %v5732_v13 = vsel %vm10792_vm10, %v5730_v28, %v5731_v52 }
 0x5ee   : > { %v6394_v38 = vrot.slane %v6393_v49, 4  ;;  %v5835_v59 = vunpack.c.l.b16 %v5732_v13 }
 0x5ef   : > { %v11103_v29 = vadd.f32 %v5575_v51, %v4983_v41  ;;  %v8150_v51 = vld [vmem:[#allocation2 + $0xc0] sm:$0xff]  ;;  %v7169_v41 = vunpack.c.l.b16 %v7061_v5  ;;  %v6404_v57 = vrot.slane %v6403_v37, 4  ;;  %v6342_v5 = vld [vmem:[#allocation2 + $0x28] sm:$0xf] }
 0x5f0   : > { %v7064_v37 = vrot.slane %v6342_v5, 5  ;;  %v6420_v63 = vshll.u32 %v6342_v5, 16  ;;  %v6424_v52 = vshrl.u32 %v6342_v5, 16 }
 0x5f1   : > { %v4925_v17 = vpop.f32.mrf.mxu1  ;;  %7968 = vmatmul.msk.bf16.vlgmr.msra.gmra.mxu3 %vm437_vm2, %v10894_v30  ;;  %v5656_v30 = vld [vmem:[#allocation2 + $0x18] sm:$0xe]  ;;  %v7200_v25 = vpack.c.b16 %v7169_v41, %v7168_v9  ;;  %v6341_v41 = vld [vmem:[#allocation2 + $0x24] sm:$0xf] }
 0x5f2   : > { %v4640_v15 = vpop.f32.mrf.mxu0  ;;  %v7953_v45 = vrot.slane %v5656_v30, 9  ;;  %v6411_v49 = vshrl.u32 %v6341_v41, 16  ;;  %v7066_v13 = vrot.slane %v7064_v37, 4 }
 0x5f3   : > { %v4699_v27 = vadd.f32 %v4640_v15, %v4289_v46  ;;  %v4291_v15 = vadd.f32 %v4290_v12, %v10870_v36  ;;  %v6399_v36 = vsel %vm10443_vm3, %v6394_v38, %v11105_v7 }
 0x5f4   : > { %7935 = vmatmul.msk.bf16.gmra.mxu1 %vm437_vm2, %v8150_v51  ;;  %v4293_v21 = vpop.f32.mrf.mxu3  ;;  %v6408_v51 = vrot.slane %v6406_v4, 5  ;;  %v5729_v40 = vsel %vm10792_vm10, %v7953_v45, %v5728_v26  ;;  %v6414_v45 = vshll.u32 %v6341_v41, 16 }
 0x5f5   : > { %v4984_v10 = vadd.f32 %v4925_v17, %v4699_v27  ;;  %7855 = vmatmul.msk.bf16.gmra.mxu0 %vm437_vm2, %v4544_v0  ;;  %v5580_v24 = vpop.f32.mrf.mxu2  ;;  %v5834_v12 = vunpack.c.l.b16 %v5729_v40  ;;  %v6426_v40 = vrot.slane %v6424_v52, 4 }
 0x5f6   : > { %v6409_v0 = vsel %vm10443_vm3, %v6404_v57, %v6408_v51 }
 0x5f7   : > { %v11117_v46 = vadd.f32 %v5578_v53, %v4984_v10  ;;  %v6343_v53 = vld [vmem:[#allocation2 + $0x2c] sm:$0x1]  ;;  %v6992_v10 = vld [vmem:[#allocation2 + $0x24] sm:$0xe]  ;;  %v6772_v9 = vunpack.c.l.b16 %v6409_v0  ;;  %v5865_v57 = vpack.c.b16 %v5835_v59, %v5834_v12  ;;  %v6416_v0 = vrot.slane %v6414_v45, 5  ;;  %v8151_v12 = vld [vmem:[#allocation2 + $0x18] sm:$0xff] }
 0x5f8   : > { %v7067_v4 = vrot.slane %v6343_v53, 5  ;;  %v8081_v51 = vrot.slane %v6992_v10, 9 }
 0x5f9   : > { %11737 = vst [vmem:[#allocation8_spill] sm:$0xff] %v11117_v46  ;;  %v4927_v17 = vpop.f32.mrf.mxu1 }
 0x5fa   : > { %v4642_v27 = vpop.f32.mrf.mxu0  ;;  %8096 = vmatmul.msk.bf16.vlgmr.msra.gmra.mxu2 %vm437_vm2, %v7200_v25  ;;  %v7068_v7 = vsel %vm10792_vm10, %v7066_v13, %v7067_v4 }
 0x5fb   : > { %v4700_v48 = vadd.f32 %v4642_v27, %v4291_v15  ;;  %v6771_v15 = vunpack.c.l.b16 %v6399_v36  ;;  %v4294_v27 = vadd.f32 %v4293_v21, %v10890_v11  ;;  %v7065_v36 = vsel %vm10792_vm10, %v8081_v51, %v7064_v37  ;;  %v8366_v21 = vld [vmem:[#allocation2 + $0x2c] sm:$0x1] }
 0x5fc   : > { %v4295_v30 = vpop.f32.mrf.mxu3  ;;  %v6430_v11 = vshll.u32 %v6343_v53, 16  ;;  %v7171_v4 = vunpack.c.l.b16 %v7068_v7  ;;  %v7170_v45 = vunpack.c.l.b16 %v7065_v36 }
 0x5fd   : > { %v4985_v28 = vadd.f32 %v4927_v17, %v4700_v48  ;;  %v5583_v26 = vpop.f32.mrf.mxu2  ;;  %v6422_v17 = vrot.slane %v6420_v63, 5  ;;  %v6803_v38 = vpack.c.b16 %v6772_v9, %v6771_v15  ;;  %v6413_v48 = vrot.slane %v6411_v49, 4  ;;  %v5657_v49 = vld [vmem:[#allocation2 + $0x24] sm:$0xe] }
 0x5fe   : > { %v7201_v37 = vpack.c.b16 %v7171_v4, %v7170_v45  ;;  %v7954_v53 = vrot.slane %v5657_v49, 9  ;;  %v4296_v7 = vadd.f32 %v4295_v30, %v10908_v22  ;;  %v6993_v49 = vld [vmem:[#allocation2 + $0x30] sm:$0xe] }
 0x5ff   : > { %v11130_v25 = vadd.f32 %v5580_v24, %v4985_v28  ;;  %v8365_v24 = vld [vmem:[#allocation2 + $0x28] sm:$0xf]  ;;  %v5738_v28 = vrot.slane %v8366_v21, 5  ;;  %v6427_v9 = vor.u32 %v6426_v40, %v6422_v17 }
 0x600   : > { %v5735_v41 = vrot.slane %v8365_v24, 5 }
 0x601   : > { %v4930_v46 = vpop.f32.mrf.mxu1  ;;  %7969 = vmatmul.msk.bf16.gmra.mxu3 %vm437_vm2, %v5865_v57  ;;  %v6417_v57 = vor.u32 %v6416_v0, %v6413_v48 }
 0x602   : > { %v4645_v5 = vpop.f32.mrf.mxu0  ;;  %v5737_v13 = vrot.slane %v5735_v41, 4  ;;  %v5736_v48 = vsel %vm10792_vm10, %v7954_v53, %v5735_v41 }
 0x603   : > { %v4701_v59 = vadd.f32 %v4645_v5, %v4294_v27  ;;  %v6432_v27 = vrot.slane %v6430_v11, 5  ;;  %v6345_v5 = vld [vmem:[#allocation2 + $0x34] sm:$0xf]  ;;  %v6418_v40 = vrot.slane %v6417_v57, 4  ;;  %v6344_v11 = vld [vmem:[#allocation2 + $0x30] sm:$0xf] }
 0x604   : > { %8064 = vmatmul.msk.bf16.vlgmr.msrb.gmra.mxu1 %vm437_vm2, %v6803_v38  ;;  %v4298_v10 = vpop.f32.mrf.mxu3  ;;  %v5739_v51 = vsel %vm10792_vm10, %v5737_v13, %v5738_v28  ;;  %v6428_v38 = vrot.slane %v6427_v9, 4  ;;  %v7071_v36 = vrot.slane %v6345_v5, 5  ;;  %v6444_v28 = vshll.u32 %v6345_v5, 16 }
 0x605   : > { %v4986_v63 = vadd.f32 %v4930_v46, %v4701_v59  ;;  %8048 = vmatmul.msk.bf16.vlgmr.msrb.gmra.mxu0 %vm437_vm2, %v8151_v12  ;;  %v5585_v52 = vpop.f32.mrf.mxu2  ;;  %v5837_v12 = vunpack.c.l.b16 %v5739_v51  ;;  %v6448_v22 = vshrl.u32 %v6345_v5, 16  ;;  %v5836_v9 = vunpack.c.l.b16 %v5736_v48 }
 0x606   : > { %v6433_v59 = vsel %vm10443_vm3, %v6428_v38, %v6432_v27  ;;  %v6435_v57 = vshrl.u32 %v6344_v11, 16  ;;  %v6438_v13 = vshll.u32 %v6344_v11, 16  ;;  %v7073_v53 = vrot.slane %v7071_v36, 4 }
 0x607   : > { %v11140_v15 = vadd.f32 %v5583_v26, %v4986_v63  ;;  %v6346_v26 = vld [vmem:[#allocation2 + $0x38] sm:$0x1]  ;;  %v6423_v63 = vsel %vm10443_vm3, %v6418_v40, %v6422_v17  ;;  %v6774_v41 = vunpack.c.l.b16 %v6433_v59  ;;  %v5866_v27 = vpack.c.b16 %v5837_v12, %v5836_v9 }
 0x608   : > { %v7074_v45 = vrot.slane %v6346_v26, 5  ;;  %v6773_v51 = vunpack.c.l.b16 %v6423_v63  ;;  %v4299_v38 = vadd.f32 %v4298_v10, %v10921_v20  ;;  %v6440_v59 = vrot.slane %v6438_v13, 5  ;;  %v8368_v10 = vld [vmem:[#allocation2 + $0x38] sm:$0x1] }
 0x609   : > { %v4932_v46 = vpop.f32.mrf.mxu1  ;;  %v6454_v20 = vshll.u32 %v6346_v26, 16  ;;  %v5745_v9 = vrot.slane %v8368_v10, 5 }
 0x60a   : > { %v4647_v24 = vpop.f32.mrf.mxu0  ;;  %8097 = vmatmul.msk.bf16.gmra.mxu2 %vm437_vm2, %v7201_v37  ;;  %v7075_v17 = vsel %vm10792_vm10, %v7073_v53, %v7074_v45  ;;  %v6804_v48 = vpack.c.b16 %v6774_v41, %v6773_v51 }
 0x60b   : > { %v4702_v0 = vadd.f32 %v4647_v24, %v4296_v7  ;;  %v8082_v7 = vrot.slane %v6993_v49, 9  ;;  %v6450_v24 = vrot.slane %v6448_v22, 4  ;;  %v7173_v45 = vunpack.c.l.b16 %v7075_v17 }
 0x60c   : > { %v4300_v21 = vpop.f32.mrf.mxu3 }
 0x60d   : > { %v4987_v30 = vadd.f32 %v4932_v46, %v4702_v0  ;;  %v5588_v4 = vpop.f32.mrf.mxu2  ;;  %v6446_v46 = vrot.slane %v6444_v28, 5  ;;  %v6437_v0 = vrot.slane %v6435_v57, 4  ;;  %v7072_v63 = vsel %vm10792_vm10, %v8082_v7, %v7071_v36  ;;  %v5658_v28 = vld [vmem:[#allocation2 + $0x30] sm:$0xe] }
 0x60e   : > { %v7172_v13 = vunpack.c.l.b16 %v7072_v63  ;;  %v7955_v36 = vrot.slane %v5658_v28, 9  ;;  %v4301_v17 = vadd.f32 %v4300_v21, %v10938_v3 }
 0x60f   : > { %v11152_v37 = vadd.f32 %v5585_v52, %v4987_v30  ;;  %v8367_v52 = vld [vmem:[#allocation2 + $0x34] sm:$0xf]  ;;  %v8152_v30 = vld [vmem:[#allocation2 + $0x24] sm:$0xff]  ;;  %v6451_v57 = vor.u32 %v6450_v24, %v6446_v46 }
 0x610   : > { %v5742_v11 = vrot.slane %v8367_v52, 5  ;;  %v7202_v26 = vpack.c.b16 %v7173_v45, %v7172_v13 }
 0x611   : > { %v4935_v5 = vpop.f32.mrf.mxu1  ;;  %7970 = vmatmul.msk.bf16.gmra.mxu3 %vm437_vm2, %v5866_v27  ;;  %v6441_v27 = vor.u32 %v6440_v59, %v6437_v0 }
 0x612   : > { %v4650_v40 = vpop.f32.mrf.mxu0  ;;  %v5744_v53 = vrot.slane %v5742_v11, 4  ;;  %v5743_v52 = vsel %vm10792_vm10, %v7955_v36, %v5742_v11  ;;  %v6994_v11 = vld [vmem:[#allocation2 + $0x3c] sm:$0xe] }
 0x613   : > { %v4703_v12 = vadd.f32 %v4650_v40, %v4299_v38  ;;  %v6456_v38 = vrot.slane %v6454_v20, 5  ;;  %v6348_v40 = vld [vmem:[#allocation2 + $0x40] sm:$0xf]  ;;  %v6442_v0 = vrot.slane %v6441_v27, 4  ;;  %v6347_v20 = vld [vmem:[#allocation2 + $0x3c] sm:$0xf]  ;;  %v5838_v21 = vunpack.c.l.b16 %v5743_v52 }
 0x614   : > { %8065 = vmatmul.msk.bf16.gmra.mxu1 %vm437_vm2, %v6804_v48  ;;  %v4303_v49 = vpop.f32.mrf.mxu3  ;;  %v5746_v7 = vsel %vm10792_vm10, %v5744_v53, %v5745_v9  ;;  %v7078_v63 = vrot.slane %v6348_v40, 5  ;;  %v6459_v27 = vshrl.u32 %v6347_v20, 16  ;;  %v6462_v53 = vshll.u32 %v6347_v20, 16 }
 0x615   : > { %v4988_v22 = vadd.f32 %v4935_v5, %v4703_v12  ;;  %8049 = vmatmul.msk.bf16.gmra.mxu0 %vm437_vm2, %v8152_v30  ;;  %v5590_v41 = vpop.f32.mrf.mxu2  ;;  %v6452_v5 = vrot.slane %v6451_v57, 4  ;;  %v5839_v30 = vunpack.c.l.b16 %v5746_v7  ;;  %v6447_v3 = vsel %vm10443_vm3, %v6442_v0, %v6446_v46 }
 0x616   : > { %v6472_v57 = vshrl.u32 %v6348_v40, 16  ;;  %v6775_v7 = vunpack.c.l.b16 %v6447_v3  ;;  %v8153_v3 = vld [vmem:[#allocation2 + $0x30] sm:$0xff] }
 0x617   : > { %v11162_v51 = vadd.f32 %v5588_v4, %v4988_v22  ;;  %v6349_v4 = vld [vmem:[#allocation2 + $0x44] sm:$0x1]  ;;  %v6457_v12 = vsel %vm10443_vm3, %v6452_v5, %v6456_v38  ;;  %v6468_v22 = vshll.u32 %v6348_v40, 16  ;;  %v5867_v38 = vpack.c.b16 %v5839_v30, %v5838_v21 }
 0x618   : > { %v7081_v28 = vrot.slane %v6349_v4, 5  ;;  %v6776_v13 = vunpack.c.l.b16 %v6457_v12  ;;  %v4304_v5 = vadd.f32 %v4303_v49, %v10949_v61  ;;  %v6474_v40 = vrot.slane %v6472_v57, 4  ;;  %v8369_v12 = vld [vmem:[#allocation2 + $0x40] sm:$0xf]  ;;  %v8370_v21 = vld [vmem:[#allocation2 + $0x44] sm:$0x1] }
 0x619   : > { %v4937_v48 = vpop.f32.mrf.mxu1  ;;  %v5749_v30 = vrot.slane %v8369_v12, 5  ;;  %v6478_v49 = vshll.u32 %v6349_v4, 16 }
 0x61a   : > { %v4652_v24 = vpop.f32.mrf.mxu0  ;;  %8098 = vmatmul.msk.bf16.gmra.mxu2 %vm437_vm2, %v7202_v26  ;;  %v7080_v26 = vrot.slane %v7078_v63, 4  ;;  %v6805_v0 = vpack.c.b16 %v6776_v13, %v6775_v7  ;;  %v6351_v7 = vld [vmem:[#allocation2 + $0x4c] sm:$0xf] }
 0x61b   : > { %v4704_v59 = vadd.f32 %v4652_v24, %v4301_v17  ;;  %v8083_v17 = vrot.slane %v6994_v11, 9  ;;  %v6480_v4 = vrot.slane %v6478_v49, 5  ;;  %v7085_v12 = vrot.slane %v6351_v7, 5 }
 0x61c   : > { %v4305_v10 = vpop.f32.mrf.mxu3  ;;  %v7082_v46 = vsel %vm10792_vm10, %v7080_v26, %v7081_v28  ;;  %v5751_v26 = vrot.slane %v5749_v30, 4 }
 0x61d   : > { %v4989_v9 = vadd.f32 %v4937_v48, %v4704_v59  ;;  %v5593_v45 = vpop.f32.mrf.mxu2  ;;  %v11180_v48 = vrot.slane %v6468_v22, 5  ;;  %v6461_v59 = vrot.slane %v6459_v27, 4  ;;  %v7079_v61 = vsel %vm10792_vm10, %v8083_v17, %v7078_v63  ;;  %v5659_v27 = vld [vmem:[#allocation2 + $0x3c] sm:$0xe] }
 0x61e   : > { %v7175_v28 = vunpack.c.l.b16 %v7082_v46  ;;  %v7956_v17 = vrot.slane %v5659_v27, 9 }
 0x61f   : > { %v11174_v36 = vadd.f32 %v5590_v41, %v4989_v9  ;;  %v6464_v41 = vrot.slane %v6462_v53, 5  ;;  %v5752_v9 = vrot.slane %v8370_v21, 5  ;;  %v6475_v13 = vor.u32 %v6474_v40, %v11180_v48  ;;  %v6352_v21 = vld [vmem:[#allocation2 + $0x50] sm:$0x1] }
 0x620   : > { %v7174_v53 = vunpack.c.l.b16 %v7079_v61 }
 0x621   : > { %v4940_v24 = vpop.f32.mrf.mxu1  ;;  %7971 = vmatmul.msk.bf16.gmra.mxu3 %vm437_vm2, %v5867_v38  ;;  %v6465_v38 = vor.u32 %v6464_v41, %v6461_v59  ;;  %v6492_v41 = vshll.u32 %v6351_v7, 16 }
 0x622   : > { %v4655_v52 = vpop.f32.mrf.mxu0  ;;  %v7203_v63 = vpack.c.b16 %v7175_v28, %v7174_v53  ;;  %v7087_v53 = vrot.slane %v7085_v12, 4 }
 0x623   : > { %v4705_v20 = vadd.f32 %v4655_v52, %v4304_v5  ;;  %v5753_v52 = vsel %vm10792_vm10, %v5751_v26, %v5752_v9  ;;  %v6466_v59 = vrot.slane %v6465_v38, 4  ;;  %v6496_v9 = vshrl.u32 %v6351_v7, 16 }
 0x624   : > { %8066 = vmatmul.msk.bf16.gmra.mxu1 %vm437_vm2, %v6805_v0  ;;  %v4308_v11 = vpop.f32.mrf.mxu3  ;;  %v6476_v0 = vrot.slane %v6475_v13, 4  ;;  %v5841_v49 = vunpack.c.l.b16 %v5753_v52  ;;  %v7088_v26 = vrot.slane %v6352_v21, 5 }
 0x625   : > { %v4990_v22 = vadd.f32 %v4940_v24, %v4705_v20  ;;  %8050 = vmatmul.msk.bf16.gmra.mxu0 %vm437_vm2, %v8153_v3  ;;  %v5595_v57 = vpop.f32.mrf.mxu2  ;;  %v4306_v24 = vadd.f32 %v4305_v10, %v10964_v6  ;;  %v6350_v20 = vld [vmem:[#allocation2 + $0x48] sm:$0xf]  ;;  %v6471_v13 = vsel %vm10443_vm3, %v6466_v59, %v11180_v48  ;;  %v6498_v7 = vrot.slane %v6496_v9, 4 }
 0x626   : > { %v6481_v61 = vsel %vm10443_vm3, %v6476_v0, %v6480_v4  ;;  %v6483_v10 = vshrl.u32 %v6350_v20, 16  ;;  %v7089_v59 = vsel %vm10792_vm10, %v7087_v53, %v7088_v26 }
 0x627   : > { %v11187_v5 = vadd.f32 %v5593_v45, %v4990_v22  ;;  %v5750_v45 = vsel %vm10792_vm10, %v7956_v17, %v5749_v30  ;;  %v6778_v38 = vunpack.c.l.b16 %v6481_v61  ;;  %v6995_v30 = vld [vmem:[#allocation2 + $0x48] sm:$0xe]  ;;  %v11200_v17 = vrot.slane %v6492_v41, 5 }
 0x628   : > { %v5840_v27 = vunpack.c.l.b16 %v5750_v45  ;;  %v8084_v48 = vrot.slane %v6995_v30, 9  ;;  %v6485_v41 = vrot.slane %v6483_v10, 4  ;;  %v8372_v30 = vld [vmem:[#allocation2 + $0x50] sm:$0x1] }
 0x629   : > { %v4942_v46 = vpop.f32.mrf.mxu1  ;;  %v6499_v9 = vor.u32 %v6498_v7, %v11200_v17 }
 0x62a   : > { %v4657_v40 = vpop.f32.mrf.mxu0  ;;  %8099 = vmatmul.msk.bf16.gmra.mxu2 %vm437_vm2, %v7203_v63  ;;  %v6486_v63 = vshll.u32 %v6350_v20, 16  ;;  %v5868_v52 = vpack.c.b16 %v5841_v49, %v5840_v27  ;;  %v7086_v49 = vsel %vm10792_vm10, %v8084_v48, %v7085_v12  ;;  %v5660_v27 = vld [vmem:[#allocation2 + $0x48] sm:$0xe] }
 0x62b   : > { %v4706_v3 = vadd.f32 %v4657_v40, %v4306_v24  ;;  %v8371_v24 = vld [vmem:[#allocation2 + $0x4c] sm:$0xf]  ;;  %v4309_v40 = vadd.f32 %v4308_v11, %v10826_v62  ;;  %v7177_v11 = vunpack.c.l.b16 %v7089_v59  ;;  %v7176_v26 = vunpack.c.l.b16 %v7086_v49 }
 0x62c   : > { %v4310_v6 = vpop.f32.mrf.mxu3  ;;  %v5756_v0 = vrot.slane %v8371_v24, 5  ;;  %v6488_v61 = vrot.slane %v6486_v63, 5  ;;  %v6354_v24 = vld [vmem:[#allocation2 + $0x58] sm:$0xf]  ;;  %v6500_v12 = vrot.slane %v6499_v9, 4  ;;  %v7957_v7 = vrot.slane %v5660_v27, 9 }
 0x62d   : > { %v4991_v28 = vadd.f32 %v4942_v46, %v4706_v3  ;;  %v5598_v22 = vpop.f32.mrf.mxu2  ;;  %v6777_v46 = vunpack.c.l.b16 %v6471_v13  ;;  %v7204_v48 = vpack.c.b16 %v7177_v11, %v7176_v26  ;;  %v4311_v59 = vadd.f32 %v4310_v6, %v10840_v54  ;;  %v6355_v9 = vld [vmem:[#allocation2 + $0x5c] sm:$0x1] }
 0x62e   : > { %v5758_v13 = vrot.slane %v5756_v0, 4  ;;  %v6489_v63 = vor.u32 %v6488_v61, %v6485_v41  ;;  %v6353_v61 = vld [vmem:[#allocation2 + $0x54] sm:$0xf]  ;;  %v6520_v11 = vshrl.u32 %v6354_v24, 16 }
 0x62f   : > { %v11202_v4 = vadd.f32 %v5595_v57, %v4991_v28  ;;  %v6806_v20 = vpack.c.b16 %v6778_v38, %v6777_v46  ;;  %v8154_v28 = vld [vmem:[#allocation2 + $0x3c] sm:$0xff]  ;;  %v6502_v38 = vshll.u32 %v6352_v21, 16 }
 0x630   : > { %v6490_v41 = vrot.slane %v6489_v63, 4  ;;  %v6996_v63 = vld [vmem:[#allocation2 + $0x54] sm:$0xe] }
 0x631   : > { %v4945_v3 = vpop.f32.mrf.mxu1  ;;  %7972 = vmatmul.msk.bf16.gmra.mxu3 %vm437_vm2, %v5868_v52  ;;  %v5759_v52 = vrot.slane %v8372_v30, 5 }
 0x632   : > { %v4660_v45 = vpop.f32.mrf.mxu0 }
 0x633   : > { %v4707_v57 = vadd.f32 %v4660_v45, %v4309_v40  ;;  %v5760_v40 = vsel %vm10792_vm10, %v5758_v13, %v5759_v52  ;;  %v6516_v13 = vshll.u32 %v6354_v24, 16 }
 0x634   : > { %8067 = vmatmul.msk.bf16.gmra.mxu1 %vm437_vm2, %v6806_v20  ;;  %v4313_v62 = vpop.f32.mrf.mxu3  ;;  %v6504_v20 = vrot.slane %v6502_v38, 5 }
 0x635   : > { %v4992_v53 = vadd.f32 %v4945_v3, %v4707_v57  ;;  %8051 = vmatmul.msk.bf16.gmra.mxu0 %vm437_vm2, %v8154_v28  ;;  %v5600_v10 = vpop.f32.mrf.mxu2  ;;  %v5757_v3 = vsel %vm10792_vm10, %v7957_v7, %v5756_v0  ;;  %v7092_v57 = vrot.slane %v6354_v24, 5  ;;  %v6495_v0 = vsel %vm10443_vm3, %v6490_v41, %v11200_v17 }
 0x636   : > { %v6505_v49 = vsel %vm10443_vm3, %v6500_v12, %v6504_v20  ;;  %v5842_v6 = vunpack.c.l.b16 %v5757_v3  ;;  %v7095_v7 = vrot.slane %v6355_v9, 5  ;;  %v11228_v12 = vrot.slane %v6516_v13, 5  ;;  %v8155_v13 = vld [vmem:[#allocation2 + $0x48] sm:$0xff] }
 0x637   : > { %v11213_v46 = vadd.f32 %v5598_v22, %v4992_v53  ;;  %v5843_v22 = vunpack.c.l.b16 %v5760_v40  ;;  %v7094_v52 = vrot.slane %v7092_v57, 4  ;;  %v6507_v53 = vshrl.u32 %v6353_v61, 16 }
 0x638   : > { %v6780_v38 = vunpack.c.l.b16 %v6505_v49  ;;  %v6510_v40 = vshll.u32 %v6353_v61, 16  ;;  %v6522_v24 = vrot.slane %v6520_v11, 4  ;;  %v4314_v3 = vadd.f32 %v4313_v62, %v10847_v55 }
 0x639   : > { %v4947_v45 = vpop.f32.mrf.mxu1  ;;  %v5869_v26 = vpack.c.b16 %v5843_v22, %v5842_v6  ;;  %v8085_v17 = vrot.slane %v6996_v63, 9  ;;  %v7096_v41 = vsel %vm10792_vm10, %v7094_v52, %v7095_v7  ;;  %v6509_v61 = vrot.slane %v6507_v53, 4 }
 0x63a   : > { %v4662_v21 = vpop.f32.mrf.mxu0  ;;  %8100 = vmatmul.msk.bf16.gmra.mxu2 %vm437_vm2, %v7204_v48  ;;  %v6523_v6 = vor.u32 %v6522_v24, %v11228_v12  ;;  %v7179_v62 = vunpack.c.l.b16 %v7096_v41 }
 0x63b   : > { %v4708_v28 = vadd.f32 %v4662_v21, %v4311_v59  ;;  %v8373_v59 = vld [vmem:[#allocation2 + $0x58] sm:$0xf]  ;;  %v7093_v11 = vsel %vm10792_vm10, %v8085_v17, %v7092_v57 }
 0x63c   : > { %v4315_v54 = vpop.f32.mrf.mxu3  ;;  %v5763_v20 = vrot.slane %v8373_v59, 5  ;;  %v7178_v7 = vunpack.c.l.b16 %v7093_v11  ;;  %v6357_v59 = vld [vmem:[#allocation2 + $0x64] sm:$0xf]  ;;  %v6524_v57 = vrot.slane %v6523_v6, 4  ;;  %v6356_v6 = vld [vmem:[#allocation2 + $0x60] sm:$0xf] }
 0x63d   : > { %v4993_v27 = vadd.f32 %v4947_v45, %v4708_v28  ;;  %v5603_v30 = vpop.f32.mrf.mxu2  ;;  %v6779_v45 = vunpack.c.l.b16 %v6495_v0  ;;  %v5661_v0 = vld [vmem:[#allocation2 + $0x54] sm:$0xe]  ;;  %v4316_v41 = vadd.f32 %v4315_v54, %v10859_v18 }
 0x63e   : > { %v7958_v24 = vrot.slane %v5661_v0, 9  ;;  %v7205_v17 = vpack.c.b16 %v7179_v62, %v7178_v7  ;;  %v6544_v62 = vshrl.u32 %v6357_v59, 16 }
 0x63f   : > { %v11226_v48 = vadd.f32 %v5600_v10, %v4993_v27  ;;  %v6807_v28 = vpack.c.b16 %v6780_v38, %v6779_v45  ;;  %v6512_v10 = vrot.slane %v6510_v40, 5  ;;  %v5765_v27 = vrot.slane %v5763_v20, 4 }
 0x640   : > { %v6526_v38 = vshll.u32 %v6355_v9, 16 }
 0x641   : > { %v4950_v21 = vpop.f32.mrf.mxu1  ;;  %7973 = vmatmul.msk.bf16.gmra.mxu3 %vm437_vm2, %v5869_v26  ;;  %v8374_v26 = vld [vmem:[#allocation2 + $0x5c] sm:$0x1]  ;;  %v6513_v40 = vor.u32 %v6512_v10, %v6509_v61  ;;  %v6358_v10 = vld [vmem:[#allocation2 + $0x68] sm:$0x1] }
 0x642   : > { %v4665_v22 = vpop.f32.mrf.mxu0  ;;  %v5766_v63 = vrot.slane %v8374_v26, 5 }
 0x643   : > { %v4709_v49 = vadd.f32 %v4665_v22, %v4314_v3  ;;  %v6514_v61 = vrot.slane %v6513_v40, 4  ;;  %v6997_v40 = vld [vmem:[#allocation2 + $0x60] sm:$0xe] }
 0x644   : > { %8068 = vmatmul.msk.bf16.gmra.mxu1 %vm437_vm2, %v6807_v28  ;;  %v4318_v55 = vpop.f32.mrf.mxu3  ;;  %v5767_v3 = vsel %vm10792_vm10, %v5765_v27, %v5766_v63  ;;  %v6528_v28 = vrot.slane %v6526_v38, 5  ;;  %v6540_v27 = vshll.u32 %v6357_v59, 16 }
 0x645   : > { %v4994_v52 = vadd.f32 %v4950_v21, %v4709_v49  ;;  %8052 = vmatmul.msk.bf16.gmra.mxu0 %vm437_vm2, %v8155_v13  ;;  %v5605_v53 = vpop.f32.mrf.mxu2  ;;  %v5764_v21 = vsel %vm10792_vm10, %v7958_v24, %v5763_v20  ;;  %v7099_v49 = vrot.slane %v6357_v59, 5  ;;  %v6519_v20 = vsel %vm10443_vm3, %v6514_v61, %v11228_v12 }
 0x646   : > { %v6529_v11 = vsel %vm10443_vm3, %v6524_v57, %v6528_v28  ;;  %v5844_v54 = vunpack.c.l.b16 %v5764_v21  ;;  %v6531_v24 = vshrl.u32 %v6356_v6, 16  ;;  %v11254_v57 = vrot.slane %v6540_v27, 5  ;;  %v8156_v27 = vld [vmem:[#allocation2 + $0x54] sm:$0xff] }
 0x647   : > { %v11239_v45 = vadd.f32 %v5603_v30, %v4994_v52  ;;  %v5845_v30 = vunpack.c.l.b16 %v5767_v3  ;;  %v7101_v63 = vrot.slane %v7099_v49, 4  ;;  %v7102_v52 = vrot.slane %v6358_v10, 5 }
 0x648   : > { %v6782_v38 = vunpack.c.l.b16 %v6529_v11  ;;  %v6534_v3 = vshll.u32 %v6356_v6, 16  ;;  %v6546_v59 = vrot.slane %v6544_v62, 4  ;;  %v4319_v21 = vadd.f32 %v4318_v55, %v10873_v56 }
 0x649   : > { %v4952_v22 = vpop.f32.mrf.mxu1  ;;  %v5870_v7 = vpack.c.b16 %v5845_v30, %v5844_v54  ;;  %v8086_v12 = vrot.slane %v6997_v40, 9  ;;  %v7103_v61 = vsel %vm10792_vm10, %v7101_v63, %v7102_v52  ;;  %v6533_v11 = vrot.slane %v6531_v24, 4 }
 0x64a   : > { %v4667_v9 = vpop.f32.mrf.mxu0  ;;  %8101 = vmatmul.msk.bf16.gmra.mxu2 %vm437_vm2, %v7205_v17  ;;  %v6547_v54 = vor.u32 %v6546_v59, %v11254_v57  ;;  %v7181_v55 = vunpack.c.l.b16 %v7103_v61  ;;  %v6550_v52 = vshll.u32 %v6358_v10, 16 }
 0x64b   : > { %v4710_v13 = vadd.f32 %v4667_v9, %v4316_v41  ;;  %v8375_v41 = vld [vmem:[#allocation2 + $0x64] sm:$0xf]  ;;  %v7100_v62 = vsel %vm10792_vm10, %v8086_v12, %v7099_v49 }
 0x64c   : > { %v4320_v18 = vpop.f32.mrf.mxu3  ;;  %v5770_v28 = vrot.slane %v8375_v41, 5  ;;  %v7180_v24 = vunpack.c.l.b16 %v7100_v62  ;;  %v6360_v41 = vld [vmem:[#allocation2 + $0x70] sm:$0xf]  ;;  %v6548_v49 = vrot.slane %v6547_v54, 4  ;;  %v6361_v54 = vld [vmem:[#allocation2 + $0x74] sm:$0x1] }
 0x64d   : > { %v4995_v0 = vadd.f32 %v4952_v22, %v4710_v13  ;;  %v5608_v26 = vpop.f32.mrf.mxu2  ;;  %v6781_v22 = vunpack.c.l.b16 %v6519_v20  ;;  %v5662_v20 = vld [vmem:[#allocation2 + $0x60] sm:$0xe]  ;;  %v4321_v61 = vadd.f32 %v4320_v18, %v10892_v43 }
 0x64e   : > { %v7959_v59 = vrot.slane %v5662_v20, 9  ;;  %v7206_v12 = vpack.c.b16 %v7181_v55, %v7180_v24  ;;  %v6568_v55 = vshrl.u32 %v6360_v41, 16 }
 0x64f   : > { %v11252_v17 = vadd.f32 %v5605_v53, %v4995_v0  ;;  %v6808_v13 = vpack.c.b16 %v6782_v38, %v6781_v22  ;;  %v6536_v53 = vrot.slane %v6534_v3, 5  ;;  %v5772_v0 = vrot.slane %v5770_v28, 4  ;;  %v8376_v38 = vld [vmem:[#allocation2 + $0x68] sm:$0x1] }
 0x650   : > { %v5773_v40 = vrot.slane %v8376_v38, 5  ;;  %v5771_v10 = vsel %vm10792_vm10, %v7959_v59, %v5770_v28  ;;  %v7109_v59 = vrot.slane %v6361_v54, 5 }
 0x651   : > { %v4955_v9 = vpop.f32.mrf.mxu1  ;;  %7974 = vmatmul.msk.bf16.gmra.mxu3 %vm437_vm2, %v5870_v7  ;;  %v6537_v3 = vor.u32 %v6536_v53, %v6533_v11  ;;  %v6359_v53 = vld [vmem:[#allocation2 + $0x6c] sm:$0xf]  ;;  %v5846_v18 = vunpack.c.l.b16 %v5771_v10 }
 0x652   : > { %v4670_v30 = vpop.f32.mrf.mxu0  ;;  %v6555_v38 = vshrl.u32 %v6359_v53, 16 }
 0x653   : > { %v4711_v6 = vadd.f32 %v4670_v30, %v4319_v21  ;;  %v5774_v21 = vsel %vm10792_vm10, %v5772_v0, %v5773_v40  ;;  %v6552_v30 = vrot.slane %v6550_v52, 5  ;;  %v6538_v11 = vrot.slane %v6537_v3, 4  ;;  %v6998_v3 = vld [vmem:[#allocation2 + $0x6c] sm:$0xe] }
 0x654   : > { %8069 = vmatmul.msk.bf16.gmra.mxu1 %vm437_vm2, %v6808_v13  ;;  %v4323_v56 = vpop.f32.mrf.mxu3  ;;  %v7106_v13 = vrot.slane %v6360_v41, 5  ;;  %v6564_v0 = vshll.u32 %v6360_v41, 16  ;;  %v6570_v41 = vrot.slane %v6568_v55, 4 }
 0x655   : > { %v4996_v7 = vadd.f32 %v4955_v9, %v4711_v6  ;;  %8053 = vmatmul.msk.bf16.gmra.mxu0 %vm437_vm2, %v8156_v27  ;;  %v5610_v63 = vpop.f32.mrf.mxu2  ;;  %v6553_v62 = vsel %vm10443_vm3, %v6548_v49, %v6552_v30  ;;  %v6543_v28 = vsel %vm10443_vm3, %v6538_v11, %v11254_v57  ;;  %v4324_v10 = vadd.f32 %v4323_v56, %v10904_v1 }
 0x656   : > { %v7108_v52 = vrot.slane %v7106_v13, 4  ;;  %v6784_v40 = vunpack.c.l.b16 %v6553_v62  ;;  %v11280_v49 = vrot.slane %v6564_v0, 5  ;;  %v8087_v57 = vrot.slane %v6998_v3, 9  ;;  %v8157_v0 = vld [vmem:[#allocation2 + $0x60] sm:$0xff] }
 0x657   : > { %v11265_v22 = vadd.f32 %v5608_v26, %v4996_v7  ;;  %v5847_v26 = vunpack.c.l.b16 %v5774_v21  ;;  %v6558_v21 = vshll.u32 %v6359_v53, 16  ;;  %v6557_v53 = vrot.slane %v6555_v38, 4  ;;  %v8378_v38 = vld [vmem:[#allocation2 + $0x74] sm:$0x1] }
 0x658   : > { %v7110_v11 = vsel %vm10792_vm10, %v7108_v52, %v7109_v59  ;;  %v7107_v55 = vsel %vm10792_vm10, %v8087_v57, %v7106_v13  ;;  %v5780_v3 = vrot.slane %v8378_v38, 5 }
 0x659   : > { %v4957_v9 = vpop.f32.mrf.mxu1  ;;  %v5871_v24 = vpack.c.b16 %v5847_v26, %v5846_v18  ;;  %v6571_v18 = vor.u32 %v6570_v41, %v11280_v49  ;;  %v7183_v56 = vunpack.c.l.b16 %v7110_v11  ;;  %v7182_v59 = vunpack.c.l.b16 %v7107_v55  ;;  %v6362_v55 = vld [vmem:[#allocation2 + $0x78] sm:$0xf] }
 0x65a   : > { %v4672_v6 = vpop.f32.mrf.mxu0  ;;  %8102 = vmatmul.msk.bf16.gmra.mxu2 %vm437_vm2, %v7206_v12 }
 0x65b   : > { %v4712_v27 = vadd.f32 %v4672_v6, %v4321_v61  ;;  %v8377_v61 = vld [vmem:[#allocation2 + $0x70] sm:$0xf]  ;;  %v6572_v13 = vrot.slane %v6571_v18, 4  ;;  %v7207_v57 = vpack.c.b16 %v7183_v56, %v7182_v59  ;;  %v6999_v59 = vld [vmem:[#allocation2 + $0x78] sm:$0xe] }
 0x65c   : > { %v4325_v43 = vpop.f32.mrf.mxu3  ;;  %v5777_v30 = vrot.slane %v8377_v61, 5  ;;  %v6363_v61 = vld [vmem:[#allocation2 + $0x7c] sm:$0xf] }
 0x65d   : > { %v4997_v20 = vadd.f32 %v4957_v9, %v4712_v27  ;;  %v5613_v7 = vpop.f32.mrf.mxu2  ;;  %v6783_v9 = vunpack.c.l.b16 %v6543_v28  ;;  %v5663_v28 = vld [vmem:[#allocation2 + $0x6c] sm:$0xe]  ;;  %v4326_v11 = vadd.f32 %v4325_v43, %v10917_v58  ;;  %v6588_v18 = vshll.u32 %v6363_v61, 16  ;;  %v6364_v43 = vld [vmem:[#allocation2 + $0x80] sm:$0x1] }
 0x65e   : > { %v7960_v41 = vrot.slane %v5663_v28, 9 }
 0x65f   : > { %v11278_v12 = vadd.f32 %v5610_v63, %v4997_v20  ;;  %v6809_v27 = vpack.c.b16 %v6784_v40, %v6783_v9  ;;  %v6560_v63 = vrot.slane %v6558_v21, 5  ;;  %v5779_v20 = vrot.slane %v5777_v30, 4 }
 0x660   : > { %v6574_v40 = vshll.u32 %v6361_v54, 16  ;;  %v5778_v54 = vsel %vm10792_vm10, %v7960_v41, %v5777_v30  ;;  %v6582_v41 = vshll.u32 %v6362_v55, 16 }
 0x661   : > { %v4960_v6 = vpop.f32.mrf.mxu1  ;;  %7975 = vmatmul.msk.bf16.gmra.mxu3 %vm437_vm2, %v5871_v24  ;;  %v6561_v21 = vor.u32 %v6560_v63, %v6557_v53  ;;  %v5848_v58 = vunpack.c.l.b16 %v5778_v54 }
 0x662   : > { %v4675_v26 = vpop.f32.mrf.mxu0 }
 0x663   : > { %v4713_v62 = vadd.f32 %v4675_v26, %v4324_v10  ;;  %v5781_v10 = vsel %vm10792_vm10, %v5779_v20, %v5780_v3  ;;  %v6576_v26 = vrot.slane %v6574_v40, 5  ;;  %v6562_v53 = vrot.slane %v6561_v21, 4 }
 0x664   : > { %8070 = vmatmul.msk.bf16.gmra.mxu1 %vm437_vm2, %v6809_v27  ;;  %v4328_v1 = vpop.f32.mrf.mxu3  ;;  %v7113_v27 = vrot.slane %v6363_v61, 5  ;;  %v6592_v20 = vshrl.u32 %v6363_v61, 16  ;;  %v6579_v21 = vshrl.u32 %v6362_v55, 16 }
 0x665   : > { %v4998_v24 = vadd.f32 %v4960_v6, %v4713_v62  ;;  %8054 = vmatmul.msk.bf16.gmra.mxu0 %vm437_vm2, %v8157_v0  ;;  %v5615_v52 = vpop.f32.mrf.mxu2  ;;  %v6577_v0 = vsel %vm10443_vm3, %v6572_v13, %v6576_v26  ;;  %v6567_v30 = vsel %vm10443_vm3, %v6562_v53, %v11280_v49  ;;  %v7116_v13 = vrot.slane %v6364_v43, 5  ;;  %v8379_v26 = vld [vmem:[#allocation2 + $0x7c] sm:$0xf] }
 0x666   : > { %v7115_v40 = vrot.slane %v7113_v27, 4  ;;  %v6786_v38 = vunpack.c.l.b16 %v6577_v0  ;;  %v6594_v61 = vrot.slane %v6592_v20, 4  ;;  %v4329_v54 = vadd.f32 %v4328_v1, %v10935_v42 }
 0x667   : > { %v11291_v9 = vadd.f32 %v5613_v7, %v4998_v24  ;;  %v5849_v7 = vunpack.c.l.b16 %v5781_v10  ;;  %v8088_v49 = vrot.slane %v6999_v59, 9  ;;  %v6584_v0 = vrot.slane %v6582_v41, 5  ;;  %v8380_v41 = vld [vmem:[#allocation2 + $0x80] sm:$0x1] }
 0x668   : > { %v7117_v53 = vsel %vm10792_vm10, %v7115_v40, %v7116_v13  ;;  %v5787_v13 = vrot.slane %v8380_v41, 5 }
 0x669   : > { %v4962_v6 = vpop.f32.mrf.mxu1  ;;  %v5872_v3 = vpack.c.b16 %v5849_v7, %v5848_v58  ;;  %v7114_v20 = vsel %vm10792_vm10, %v8088_v49, %v7113_v27  ;;  %v7185_v1 = vunpack.c.l.b16 %v7117_v53 }
 0x66a   : > { %v4677_v62 = vpop.f32.mrf.mxu0  ;;  %8103 = vmatmul.msk.bf16.gmra.mxu2 %vm437_vm2, %v7207_v57  ;;  %v11306_v57 = vrot.slane %v6588_v18, 5  ;;  %v8158_v18 = vld [vmem:[#allocation2 + $0x6c] sm:$0xff]  ;;  %v7184_v59 = vunpack.c.l.b16 %v7114_v20 }
 0x66b   : > { %v4714_v63 = vadd.f32 %v4677_v62, %v4326_v11  ;;  %v6785_v11 = vunpack.c.l.b16 %v6567_v30 }
 0x66c   : > { %v4330_v56 = vpop.f32.mrf.mxu3  ;;  %v6595_v58 = vor.u32 %v6594_v61, %v11306_v57  ;;  %v7208_v61 = vpack.c.b16 %v7185_v1, %v7184_v59  ;;  %v6365_v1 = vld [vmem:[#allocation2 + $0x84] sm:$0xf] }
 0x66d   : > { %v4999_v28 = vadd.f32 %v4962_v6, %v4714_v63  ;;  %v5618_v24 = vpop.f32.mrf.mxu2  ;;  %v5784_v6 = vrot.slane %v8379_v26, 5  ;;  %v6810_v63 = vpack.c.b16 %v6786_v38, %v6785_v11  ;;  %v5664_v38 = vld [vmem:[#allocation2 + $0x78] sm:$0xe]  ;;  %v6366_v11 = vld [vmem:[#allocation2 + $0x88] sm:$0xf] }
 0x66e   : > { %v6596_v27 = vrot.slane %v6595_v58, 4  ;;  %v6367_v58 = vld [vmem:[#allocation2 + $0x8c] sm:$0x1] }
 0x66f   : > { %v11304_v10 = vadd.f32 %v5615_v52, %v4999_v28  ;;  %v6581_v52 = vrot.slane %v6579_v21, 4  ;;  %v5786_v28 = vrot.slane %v5784_v6, 4  ;;  %v7123_v41 = vrot.slane %v6367_v58, 5 }
 0x671   : > { %v4965_v62 = vpop.f32.mrf.mxu1  ;;  %7976 = vmatmul.msk.bf16.gmra.mxu3 %vm437_vm2, %v5872_v3  ;;  %v6598_v3 = vshll.u32 %v6364_v43, 16  ;;  %v6585_v21 = vor.u32 %v6584_v0, %v6581_v52  ;;  %v5788_v49 = vsel %vm10792_vm10, %v5786_v28, %v5787_v13  ;;  %v6616_v28 = vshrl.u32 %v6366_v11, 16 }
 0x672   : > { %v4680_v7 = vpop.f32.mrf.mxu0  ;;  %v5851_v20 = vunpack.c.l.b16 %v5788_v49  ;;  %v6603_v13 = vshrl.u32 %v6365_v1, 16 }
 0x673   : > { %v4715_v55 = vadd.f32 %v4680_v7, %v4329_v54  ;;  %v7961_v54 = vrot.slane %v5664_v38, 9  ;;  %v6600_v7 = vrot.slane %v6598_v3, 5  ;;  %v6586_v52 = vrot.slane %v6585_v21, 4 }
 0x674   : > { %8071 = vmatmul.msk.bf16.gmra.mxu1 %vm437_vm2, %v6810_v63  ;;  %v5940_v42 = vpop.f32.mrf.mxu3  ;;  %v7120_v63 = vrot.slane %v6366_v11, 5 }
 0x675   : > { %v5000_v30 = vadd.f32 %v4965_v62, %v4715_v55  ;;  %8055 = vmatmul.msk.bf16.gmra.mxu0 %vm437_vm2, %v8158_v18  ;;  %v5620_v40 = vpop.f32.mrf.mxu2  ;;  %v4331_v62 = vadd.f32 %v4330_v56, %v10945_v19  ;;  %v5785_v0 = vsel %vm10792_vm10, %v7961_v54, %v5784_v6  ;;  %v6601_v18 = vsel %vm10443_vm3, %v6596_v27, %v6600_v7  ;;  %v7000_v6 = vld [vmem:[#allocation2 + $0x84] sm:$0xe] }
 0x676   : > { %v5850_v38 = vunpack.c.l.b16 %v5785_v0  ;;  %v7122_v59 = vrot.slane %v7120_v63, 4  ;;  %v6788_v21 = vunpack.c.l.b16 %v6601_v18 }
 0x677   : > { %v11317_v26 = vadd.f32 %v5618_v24, %v5000_v30  ;;  %v6612_v24 = vshll.u32 %v6366_v11, 16  ;;  %v6591_v30 = vsel %vm10443_vm3, %v6586_v52, %v11306_v57  ;;  %v6618_v11 = vrot.slane %v6616_v28, 4 }
 0x678   : > { %v5873_v27 = vpack.c.b16 %v5851_v20, %v5850_v38  ;;  %v8089_v52 = vrot.slane %v7000_v6, 9  ;;  %v7124_v0 = vsel %vm10792_vm10, %v7122_v59, %v7123_v41  ;;  %v6368_v6 = vld [vmem:[#allocation2 + $0x90] sm:$0xf]  ;;  %v6622_v41 = vshll.u32 %v6367_v58, 16 }
 0x679   : > { %v4967_v53 = vpop.f32.mrf.mxu1  ;;  %v11332_v49 = vrot.slane %v6612_v24, 5  ;;  %v8159_v24 = vld [vmem:[#allocation2 + $0x78] sm:$0xff] }
 0x67a   : > { %v4682_v43 = vpop.f32.mrf.mxu0  ;;  %8104 = vmatmul.msk.bf16.gmra.mxu2 %vm437_vm2, %v7208_v61  ;;  %v6606_v61 = vshll.u32 %v6365_v1, 16  ;;  %v7121_v20 = vsel %vm10792_vm10, %v8089_v52, %v7120_v63 }
 0x67b   : > { %v4716_v55 = vadd.f32 %v4682_v43, %v4331_v62  ;;  %v6787_v62 = vunpack.c.l.b16 %v6591_v30  ;;  %v6020_v43 = vadd.f32 %v5940_v42, %v10983_v47  ;;  %v5665_v47 = vld [vmem:[#allocation2 + $0x84] sm:$0xe]  ;;  %v7187_v30 = vunpack.c.l.b16 %v7124_v0 }
 0x67c   : > { %v5942_v19 = vpop.f32.mrf.mxu3  ;;  %v6608_v28 = vrot.slane %v6606_v61, 5  ;;  %v7186_v63 = vunpack.c.l.b16 %v7121_v20  ;;  %v7962_v61 = vrot.slane %v5665_v47, 9 }
 0x67d   : > { %v5001_v56 = vadd.f32 %v4967_v53, %v4716_v55  ;;  %v7276_v3 = vpop.f32.mrf.mxu2  ;;  %v8381_v53 = vld [vmem:[#allocation2 + $0x88] sm:$0xf]  ;;  %v6811_v18 = vpack.c.b16 %v6788_v21, %v6787_v62 }
 0x67e   : > { %v5791_v7 = vrot.slane %v8381_v53, 5  ;;  %v7209_v52 = vpack.c.b16 %v7187_v30, %v7186_v63 }
 0x67f   : > { %v11330_v54 = vadd.f32 %v5620_v40, %v5001_v56  ;;  %v6605_v40 = vrot.slane %v6603_v13, 4  ;;  %v6619_v56 = vor.u32 %v6618_v11, %v11332_v49  ;;  %v6369_v13 = vld [vmem:[#allocation2 + $0x94] sm:$0xf] }
 0x680   : > { %v5793_v38 = vrot.slane %v5791_v7, 4  ;;  %v7127_v0 = vrot.slane %v6369_v13, 5 }
 0x681   : > { %v6879_v57 = vpop.f32.mrf.mxu1  ;;  %7977 = vmatmul.msk.bf16.gmra.mxu3 %vm437_vm2, %v5873_v27  ;;  %v8382_v27 = vld [vmem:[#allocation2 + $0x8c] sm:$0x1]  ;;  %v6609_v53 = vor.u32 %v6608_v28, %v6605_v40  ;;  %v6636_v40 = vshll.u32 %v6369_v13, 16  ;;  %v6640_v28 = vshrl.u32 %v6369_v13, 16 }
 0x682   : > { %v6226_v55 = vpop.f32.mrf.mxu0  ;;  %v5794_v11 = vrot.slane %v8382_v27, 5 }
 0x683   : > { %v6306_v1 = vadd.f32 %v6226_v55, %v6020_v43  ;;  %v6620_v43 = vrot.slane %v6619_v56, 4  ;;  %v6630_v55 = vshll.u32 %v6368_v6, 16  ;;  %v6610_v47 = vrot.slane %v6609_v53, 4 }
 0x684   : > { %8072 = vmatmul.msk.bf16.gmra.mxu1 %vm437_vm2, %v6811_v18  ;;  %v5945_v42 = vpop.f32.mrf.mxu3  ;;  %v5795_v58 = vsel %vm10792_vm10, %v5793_v38, %v5794_v11  ;;  %v6021_v18 = vadd.f32 %v5942_v19, %v10991_v60  ;;  %v7129_v19 = vrot.slane %v7127_v0, 4 }
 0x685   : > { %v6959_v59 = vadd.f32 %v6879_v57, %v6306_v1  ;;  %8056 = vmatmul.msk.bf16.gmra.mxu0 %vm437_vm2, %v8159_v24  ;;  %v7278_v21 = vpop.f32.mrf.mxu2  ;;  %v6627_v57 = vshrl.u32 %v6368_v6, 16  ;;  %v6624_v24 = vrot.slane %v6622_v41, 5  ;;  %v5853_v38 = vunpack.c.l.b16 %v5795_v58  ;;  %v6370_v6 = vld [vmem:[#allocation2 + $0x98] sm:$0x1] }
 0x686   : > { %v6632_v63 = vrot.slane %v6630_v55, 5  ;;  %v6615_v27 = vsel %vm10443_vm3, %v6610_v47, %v11332_v49  ;;  %v7130_v53 = vrot.slane %v6370_v6, 5  ;;  %v6022_v47 = vadd.f32 %v5945_v42, %v11003_v50 }
 0x687   : > { %v7356_v62 = vadd.f32 %v7276_v3, %v6959_v59  ;;  %v5792_v3 = vsel %vm10792_vm10, %v7962_v61, %v5791_v7  ;;  %v6625_v30 = vsel %vm10443_vm3, %v6620_v43, %v6624_v24  ;;  %v6629_v59 = vrot.slane %v6627_v57, 4  ;;  %v7001_v61 = vld [vmem:[#allocation2 + $0x90] sm:$0xe] }
 0x688   : > { %v5852_v7 = vunpack.c.l.b16 %v5792_v3  ;;  %v6790_v13 = vunpack.c.l.b16 %v6625_v30  ;;  %v6642_v43 = vrot.slane %v6640_v28, 4  ;;  %v6789_v55 = vunpack.c.l.b16 %v6615_v27 }
 0x689   : > { %7388 = vst.msk [vmem:[%s11348_s20] sm:$0xff] %vm435_vm1, %v7356_v62  ;;  %v6881_v1 = vpop.f32.mrf.mxu1  ;;  %v7491_v58 = vmul.f32 %v7356_v62, %v7356_v62  ;;  %v6633_v49 = vor.u32 %v6632_v63, %v6629_v59  ;;  %v7420_v3 = vsel %vm435_vm1, %v7356_v62, 0.0  ;;  %v8160_v59 = vld [vmem:[#allocation2 + $0x84] sm:$0xff] }
 0x68a   : > { %v6228_v20 = vpop.f32.mrf.mxu0  ;;  %8105 = vmatmul.msk.bf16.gmra.mxu2 %vm437_vm2, %v7209_v52  ;;  %v11363_v52 = vrot.slane %v6636_v40, 5  ;;  %v5874_v24 = vpack.c.b16 %v5853_v38, %v5852_v7 }
 0x68b   : > { %v6307_v56 = vadd.f32 %v6228_v20, %v6021_v18  ;;  %v8383_v20 = vld [vmem:[#allocation2 + $0x94] sm:$0xf]  ;;  %v7523_v62 = vsel %vm435_vm1, %v7491_v58, 0.0  ;;  %v6371_v58 = vld [vmem:[#allocation2 + $0x9c] sm:$0xf] }
 0x68c   : > { %v5947_v60 = vpop.f32.mrf.mxu3  ;;  %v5798_v57 = vrot.slane %v8383_v20, 5 }
 0x68d   : > { %v6960_v41 = vadd.f32 %v6881_v1, %v6307_v56  ;;  %v7281_v11 = vpop.f32.mrf.mxu2  ;;  %v8090_v1 = vrot.slane %v7001_v61, 9  ;;  %v7131_v56 = vsel %vm10792_vm10, %v7129_v19, %v7130_v53  ;;  %v6643_v19 = vor.u32 %v6642_v43, %v11363_v52  ;;  %v8384_v43 = vld [vmem:[#allocation2 + $0x98] sm:$0x1] }
 0x68e   : > { %v5800_v63 = vrot.slane %v5798_v57, 4  ;;  %v7189_v53 = vunpack.c.l.b16 %v7131_v56  ;;  %v5801_v20 = vrot.slane %v8384_v43, 5 }
 0x68f   : > { %v7357_v18 = vadd.f32 %v7278_v21, %v6960_v41  ;;  %v6812_v41 = vpack.c.b16 %v6790_v13, %v6789_v55  ;;  %v7128_v27 = vsel %vm10792_vm10, %v8090_v1, %v7127_v0  ;;  %v6644_v1 = vrot.slane %v6643_v19, 4 }
 0x690   : > { %v7188_v55 = vunpack.c.l.b16 %v7128_v27 }
 0x691   : > { %7389 = vst.msk [vmem:[%s11348_s20 + $0x8] sm:$0xff] %vm435_vm1, %v7357_v18  ;;  %v7421_v40 = vsel %vm435_vm1, %v7357_v18, 0.0  ;;  %v7492_v28 = vmul.f32 %v7357_v18, %v7357_v18  ;;  %v6884_v30 = vpop.f32.mrf.mxu1  ;;  %7978 = vmatmul.msk.bf16.gmra.mxu3 %vm437_vm2, %v5874_v24  ;;  %v6646_v18 = vshll.u32 %v6370_v6, 16  ;;  %v5666_v24 = vld [vmem:[#allocation2 + $0x90] sm:$0xe] }
 0x692   : > { %v7422_v21 = vadd.f32 %v7421_v40, %v7420_v3  ;;  %v6231_v38 = vpop.f32.mrf.mxu0  ;;  %v6372_v3 = vld [vmem:[#allocation2 + $0xa0] sm:$0xf]  ;;  %v6634_v40 = vrot.slane %v6633_v49, 4  ;;  %v7210_v56 = vpack.c.b16 %v7189_v53, %v7188_v55 }
 0x693   : > { %v7524_v50 = vsel %vm435_vm1, %v7492_v28, 0.0  ;;  %v6308_v42 = vadd.f32 %v6231_v38, %v6022_v47  ;;  %v7963_v28 = vrot.slane %v5666_v24, 9  ;;  %v5802_v38 = vsel %vm10792_vm10, %v5800_v63, %v5801_v20 }
 0x694   : > { %v7525_v7 = vadd.f32 %v7524_v50, %v7523_v62  ;;  %8073 = vmatmul.msk.bf16.gmra.mxu1 %vm437_vm2, %v6812_v41  ;;  %v5950_v61 = vpop.f32.mrf.mxu3  ;;  %v6648_v6 = vrot.slane %v6646_v18, 5  ;;  %v6651_v41 = vshrl.u32 %v6371_v58, 16  ;;  %v6023_v62 = vadd.f32 %v5947_v60, %v11013_v8  ;;  %v6373_v18 = vld [vmem:[#allocation2 + $0xa4] sm:$0x1] }
 0x695   : > { %v6961_v13 = vadd.f32 %v6884_v30, %v6308_v42  ;;  %8057 = vmatmul.msk.bf16.gmra.mxu0 %vm437_vm2, %v8160_v59  ;;  %v7283_v0 = vpop.f32.mrf.mxu2  ;;  %v6654_v30 = vshll.u32 %v6371_v58, 16  ;;  %v7134_v19 = vrot.slane %v6372_v3, 5  ;;  %v5799_v63 = vsel %vm10792_vm10, %v7963_v28, %v5798_v57 }
 0x696   : > { %v6649_v49 = vsel %vm10443_vm3, %v6644_v1, %v6648_v6  ;;  %v5855_v53 = vunpack.c.l.b16 %v5802_v38  ;;  %v6660_v24 = vshll.u32 %v6372_v3, 16  ;;  %v7002_v1 = vld [vmem:[#allocation2 + $0x9c] sm:$0xe]  ;;  %v7137_v28 = vrot.slane %v6373_v18, 5 }
 0x697   : > { %v7358_v47 = vadd.f32 %v7281_v11, %v6961_v13  ;;  %v6664_v13 = vshrl.u32 %v6372_v3, 16  ;;  %v6792_v57 = vunpack.c.l.b16 %v6649_v49  ;;  %v6653_v38 = vrot.slane %v6651_v41, 4 }
 0x698   : > { %v6656_v6 = vrot.slane %v6654_v30, 5 }
 0x699   : > { %7390 = vst.msk [vmem:[%s11348_s20 + $0x10] sm:$0xff] %vm435_vm1, %v7358_v47  ;;  %v7423_v50 = vsel %vm435_vm1, %v7358_v47, 0.0  ;;  %v7493_v42 = vmul.f32 %v7358_v47, %v7358_v47  ;;  %v6886_v27 = vpop.f32.mrf.mxu1  ;;  %v5854_v47 = vunpack.c.l.b16 %v5799_v63 }
 0x69a   : > { %v7424_v59 = vadd.f32 %v7423_v50, %v7422_v21  ;;  %v6233_v11 = vpop.f32.mrf.mxu0  ;;  %8106 = vmatmul.msk.bf16.gmra.mxu2 %vm437_vm2, %v7210_v56  ;;  %v6639_v21 = vsel %vm10443_vm3, %v6634_v40, %v11363_v52  ;;  %v7136_v56 = vrot.slane %v7134_v19, 4  ;;  %v6024_v52 = vadd.f32 %v5950_v61, %v11025_v31 }
 0x69b   : > { %v7526_v8 = vsel %vm435_vm1, %v7493_v42, 0.0  ;;  %v6309_v60 = vadd.f32 %v6233_v11, %v6023_v62  ;;  %v5875_v50 = vpack.c.b16 %v5855_v53, %v5854_v47  ;;  %v11395_v42 = vrot.slane %v6660_v24, 5  ;;  %v8385_v11 = vld [vmem:[#allocation2 + $0xa0] sm:$0xf] }
 0x69c   : > { %v7527_v43 = vadd.f32 %v7526_v8, %v7525_v7  ;;  %v5952_v20 = vpop.f32.mrf.mxu3  ;;  %v6666_v7 = vrot.slane %v6664_v13, 4  ;;  %v6791_v3 = vunpack.c.l.b16 %v6639_v21  ;;  %v5805_v8 = vrot.slane %v8385_v11, 5 }
 0x69d   : > { %v6962_v58 = vadd.f32 %v6886_v27, %v6309_v60  ;;  %v7286_v55 = vpop.f32.mrf.mxu2  ;;  %v8091_v27 = vrot.slane %v7002_v1, 9  ;;  %v6657_v60 = vor.u32 %v6656_v6, %v6653_v38  ;;  %v8386_v6 = vld [vmem:[#allocation2 + $0xa4] sm:$0x1] }
 0x69e   : > { %v6813_v53 = vpack.c.b16 %v6792_v57, %v6791_v3  ;;  %v6667_v61 = vor.u32 %v6666_v7, %v11395_v42  ;;  %v11410_v3 = vld [vmem:[#allocation2 + $0xac] sm:$0xf] }
 0x69f   : > { %v7359_v62 = vadd.f32 %v7283_v0, %v6962_v58  ;;  %v7138_v0 = vsel %vm10792_vm10, %v7136_v56, %v7137_v28  ;;  %v8161_v58 = vld [vmem:[#allocation2 + $0x90] sm:$0xff]  ;;  %v7135_v31 = vsel %vm10792_vm10, %v8091_v27, %v7134_v19  ;;  %v5667_v56 = vld [vmem:[#allocation2 + $0x9c] sm:$0xe]  ;;  %v6658_v11 = vrot.slane %v6657_v60, 4 }
 0x6a0   : > { %v7191_v1 = vunpack.c.l.b16 %v7138_v0  ;;  %v7190_v38 = vunpack.c.l.b16 %v7135_v31  ;;  %v6668_v7 = vrot.slane %v6667_v61, 4 }
 0x6a1   : > { %7391 = vst.msk [vmem:[%s11348_s20 + $0x18] sm:$0xff] %vm435_vm1, %v7359_v62  ;;  %v7425_v40 = vsel %vm435_vm1, %v7359_v62, 0.0  ;;  %v7494_v63 = vmul.f32 %v7359_v62, %v7359_v62  ;;  %v6889_v49 = vpop.f32.mrf.mxu1  ;;  %7979 = vmatmul.msk.bf16.gmra.mxu3 %vm437_vm2, %v5875_v50  ;;  %v6670_v62 = vshll.u32 %v6373_v18, 16  ;;  %v5808_v50 = vrot.slane %v8386_v6, 5 }
 0x6a2   : > { %v7426_v41 = vadd.f32 %v7425_v40, %v7424_v59  ;;  %v6236_v30 = vpop.f32.mrf.mxu0  ;;  %v5807_v59 = vrot.slane %v5805_v8, 4  ;;  %v7211_v27 = vpack.c.b16 %v7191_v1, %v7190_v38  ;;  %v6025_v40 = vadd.f32 %v5952_v20, %v11033_v39 }
 0x6a3   : > { %v7528_v24 = vsel %vm435_vm1, %v7494_v63, 0.0  ;;  %v6310_v13 = vadd.f32 %v6236_v30, %v6024_v52  ;;  %v6672_v52 = vrot.slane %v6670_v62, 5  ;;  %v7141_v30 = vrot.slane %v11410_v3, 5 }
 0x6a4   : > { %v7529_v21 = vadd.f32 %v7528_v24, %v7527_v43  ;;  %8074 = vmatmul.msk.bf16.gmra.mxu1 %vm437_vm2, %v6813_v53  ;;  %v5955_v47 = vpop.f32.mrf.mxu3  ;;  %v7964_v43 = vrot.slane %v5667_v56, 9  ;;  %v5809_v18 = vsel %vm10792_vm10, %v5807_v59, %v5808_v50  ;;  %v6374_v53 = vld [vmem:[#allocation2 + $0xa8] sm:$0xf]  ;;  %v6688_v39 = vshrl.u32 %v11410_v3, 16 }
 0x6a5   : > { %v6963_v57 = vadd.f32 %v6889_v49, %v6310_v13  ;;  %8058 = vmatmul.msk.bf16.gmra.mxu0 %vm437_vm2, %v8161_v58  ;;  %v7288_v28 = vpop.f32.mrf.mxu2  ;;  %v6684_v13 = vshll.u32 %v11410_v3, 16  ;;  %v6673_v31 = vsel %vm10443_vm3, %v6668_v7, %v6672_v52  ;;  %v5857_v61 = vunpack.c.l.b16 %v5809_v18  ;;  %v7003_v50 = vld [vmem:[#allocation2 + $0xa8] sm:$0xe]  ;;  %v8387_v18 = vld [vmem:[#allocation2 + $0xac] sm:$0xf] }
 0x6a6   : > { %v5806_v60 = vsel %vm10792_vm10, %v7964_v43, %v5805_v8  ;;  %v6675_v56 = vshrl.u32 %v6374_v53, 16  ;;  %v6678_v59 = vshll.u32 %v6374_v53, 16  ;;  %v6663_v8 = vsel %vm10443_vm3, %v6658_v11, %v11395_v42 }
 0x6a7   : > { %v7360_v19 = vadd.f32 %v7286_v55, %v6963_v57  ;;  %v5856_v6 = vunpack.c.l.b16 %v5806_v60  ;;  %v7143_v3 = vrot.slane %v7141_v30, 4  ;;  %v11430_v43 = vrot.slane %v6684_v13, 5 }
 0x6a8   : > { %v6690_v7 = vrot.slane %v6688_v39, 4  ;;  %v6680_v53 = vrot.slane %v6678_v59, 5  ;;  %v6026_v42 = vadd.f32 %v5955_v47, %v11042_v2  ;;  %v8162_v2 = vld [vmem:[#allocation2 + $0x9c] sm:$0xff] }
 0x6a9   : > { %7392 = vst.msk [vmem:[%s11348_s20 + $0x20] sm:$0xff] %vm435_vm1, %v7360_v19  ;;  %v7427_v63 = vsel %vm435_vm1, %v7360_v19, 0.0  ;;  %v7495_v49 = vmul.f32 %v7360_v19, %v7360_v19  ;;  %v6891_v0 = vpop.f32.mrf.mxu1  ;;  %v6794_v19 = vunpack.c.l.b16 %v6673_v31 }
 0x6aa   : > { %v7428_v55 = vadd.f32 %v7427_v63, %v7426_v41  ;;  %v6238_v24 = vpop.f32.mrf.mxu0  ;;  %8107 = vmatmul.msk.bf16.gmra.mxu2 %vm437_vm2, %v7211_v27  ;;  %v6376_v41 = vld [vmem:[#allocation2 + $0xb0] sm:$0x1]  ;;  %v6793_v63 = vunpack.c.l.b16 %v6663_v8 }
 0x6ab   : > { %v7530_v20 = vsel %vm435_vm1, %v7495_v49, 0.0  ;;  %v6311_v58 = vadd.f32 %v6238_v24, %v6025_v40  ;;  %v7144_v52 = vrot.slane %v6376_v41, 5  ;;  %v5812_v40 = vrot.slane %v8387_v18, 5 }
 0x6ac   : > { %v7531_v1 = vadd.f32 %v7530_v20, %v7529_v21  ;;  %v5957_v62 = vpop.f32.mrf.mxu3  ;;  %v5876_v21 = vpack.c.b16 %v5857_v61, %v5856_v6  ;;  %v8092_v49 = vrot.slane %v7003_v50, 9  ;;  %v6814_v20 = vpack.c.b16 %v6794_v19, %v6793_v63  ;;  %v5668_v19 = vld [vmem:[#allocation2 + $0xa8] sm:$0xe] }
 0x6ad   : > { %v6964_v57 = vadd.f32 %v6891_v0, %v6311_v58  ;;  %v7291_v38 = vpop.f32.mrf.mxu2  ;;  %v6677_v0 = vrot.slane %v6675_v56, 4  ;;  %v6691_v58 = vor.u32 %v6690_v7, %v11430_v43  ;;  %v5814_v56 = vrot.slane %v5812_v40, 4  ;;  %v8388_v7 = vld [vmem:[#allocation2 + $0xb0] sm:$0x1] }
 0x6ae   : > { %v7142_v47 = vsel %vm10792_vm10, %v8092_v49, %v7141_v30  ;;  %v6694_v6 = vshll.u32 %v6376_v41, 16 }
 0x6af   : > { %v7361_v27 = vadd.f32 %v7288_v28, %v6964_v57  ;;  %v7145_v28 = vsel %vm10792_vm10, %v7143_v3, %v7144_v52  ;;  %v6681_v3 = vor.u32 %v6680_v53, %v6677_v0  ;;  %v7192_v52 = vunpack.c.l.b16 %v7142_v47 }
 0x6b0   : > { %v7193_v8 = vunpack.c.l.b16 %v7145_v28  ;;  %v6692_v18 = vrot.slane %v6691_v58, 4  ;;  %v6696_v49 = vrot.slane %v6694_v6, 5 }
 0x6b1   : > { %7393 = vst.msk [vmem:[%s11348_s20 + $0x28] sm:$0xff] %vm435_vm1, %v7361_v27  ;;  %v7429_v11 = vsel %vm435_vm1, %v7361_v27, 0.0  ;;  %v7496_v24 = vmul.f32 %v7361_v27, %v7361_v27  ;;  %v6894_v60 = vpop.f32.mrf.mxu1  ;;  %7980 = vmatmul.msk.bf16.gmra.mxu3 %vm437_vm2, %v5876_v21  ;;  %v5815_v27 = vrot.slane %v8388_v7, 5  ;;  %v6378_v21 = vld [vmem:[#allocation2 + $0xb8] sm:$0xf] }
 0x6b2   : > { %v7430_v13 = vadd.f32 %v7429_v11, %v7428_v55  ;;  %v6241_v39 = vpop.f32.mrf.mxu0  ;;  %v7212_v63 = vpack.c.b16 %v7193_v8, %v7192_v52  ;;  %v7148_v41 = vrot.slane %v6378_v21, 5  ;;  %v6027_v11 = vadd.f32 %v5957_v62, %v11049_v16 }
 0x6b3   : > { %v7532_v31 = vsel %vm435_vm1, %v7496_v24, 0.0  ;;  %v6312_v61 = vadd.f32 %v6241_v39, %v6026_v42  ;;  %v7965_v42 = vrot.slane %v5668_v19, 9  ;;  %v6712_v47 = vshrl.u32 %v6378_v21, 16 }
 0x6b4   : > { %v7533_v59 = vadd.f32 %v7532_v31, %v7531_v1  ;;  %8075 = vmatmul.msk.bf16.gmra.mxu1 %vm437_vm2, %v6814_v20  ;;  %v5960_v57 = vpop.f32.mrf.mxu3  ;;  %v5816_v1 = vsel %vm10792_vm10, %v5814_v56, %v5815_v27  ;;  %v6377_v31 = vld [vmem:[#allocation2 + $0xb4] sm:$0xf]  ;;  %v7150_v8 = vrot.slane %v7148_v41, 4 }
 0x6b5   : > { %v6965_v50 = vadd.f32 %v6894_v60, %v6312_v61  ;;  %8059 = vmatmul.msk.bf16.gmra.mxu0 %vm437_vm2, %v8162_v2  ;;  %v7293_v55 = vpop.f32.mrf.mxu2  ;;  %v6682_v60 = vrot.slane %v6681_v3, 4  ;;  %v5813_v20 = vsel %vm10792_vm10, %v7965_v42, %v5812_v40  ;;  %v5859_v58 = vunpack.c.l.b16 %v5816_v1  ;;  %v11457_v61 = vld [vmem:[#allocation2 + $0xbc] sm:$0x1]  ;;  %v7004_v40 = vld [vmem:[#allocation2 + $0xb4] sm:$0xe] }
 0x6b6   : > { %v6708_v2 = vshll.u32 %v6378_v21, 16  ;;  %v5858_v19 = vunpack.c.l.b16 %v5813_v20  ;;  %v6699_v7 = vshrl.u32 %v6377_v31, 16  ;;  %v7151_v52 = vrot.slane %v11457_v61, 5 }
 0x6b7   : > { %v7362_v30 = vadd.f32 %v7291_v38, %v6965_v50  ;;  %v6697_v38 = vsel %vm10443_vm3, %v6692_v18, %v6696_v49  ;;  %v6687_v50 = vsel %vm10443_vm3, %v6682_v60, %v11430_v43  ;;  %v6702_v18 = vshll.u32 %v6377_v31, 16  ;;  %v8389_v43 = vld [vmem:[#allocation2 + $0xb8] sm:$0xf] }
 0x6b8   : > { %v6796_v27 = vunpack.c.l.b16 %v6697_v38  ;;  %v5877_v1 = vpack.c.b16 %v5859_v58, %v5858_v19  ;;  %v11463_v21 = vrot.slane %v6708_v2, 5  ;;  %v8093_v49 = vrot.slane %v7004_v40, 9 }
 0x6b9   : > { %7394 = vst.msk [vmem:[%s11348_s20 + $0x30] sm:$0xff] %vm435_vm1, %v7362_v30  ;;  %v7431_v0 = vsel %vm435_vm1, %v7362_v30, 0.0  ;;  %v7497_v53 = vmul.f32 %v7362_v30, %v7362_v30  ;;  %v6896_v24 = vpop.f32.mrf.mxu1  ;;  %v7152_v42 = vsel %vm10792_vm10, %v7150_v8, %v7151_v52  ;;  %v6704_v31 = vrot.slane %v6702_v18, 5  ;;  %v6380_v8 = vld [vmem:[#allocation2 + $0xc0] sm:$0xf] }
 0x6ba   : > { %v7432_v28 = vadd.f32 %v7431_v0, %v7430_v13  ;;  %v6243_v39 = vpop.f32.mrf.mxu0  ;;  %8108 = vmatmul.msk.bf16.gmra.mxu2 %vm437_vm2, %v7212_v63  ;;  %v6795_v63 = vunpack.c.l.b16 %v6687_v50  ;;  %v6028_v0 = vadd.f32 %v5960_v57, %v11059_v23  ;;  %v7149_v58 = vsel %vm10792_vm10, %v8093_v49, %v7148_v41  ;;  %v8163_v23 = vld [vmem:[#allocation2 + $0xa8] sm:$0xff] }
 0x6bb   : > { %v7534_v16 = vsel %vm435_vm1, %v7497_v53, 0.0  ;;  %v6313_v62 = vadd.f32 %v6243_v39, %v6027_v11  ;;  %v5819_v11 = vrot.slane %v8389_v43, 5  ;;  %v7195_v57 = vunpack.c.l.b16 %v7152_v42 }
 0x6bc   : > { %v7535_v56 = vadd.f32 %v7534_v16, %v7533_v59  ;;  %v5962_v13 = vpop.f32.mrf.mxu3  ;;  %v6714_v59 = vrot.slane %v6712_v47, 4  ;;  %v6815_v20 = vpack.c.b16 %v6796_v27, %v6795_v63  ;;  %v5669_v47 = vld [vmem:[#allocation2 + $0xb4] sm:$0xe]  ;;  %v7194_v41 = vunpack.c.l.b16 %v7149_v58  ;;  %v11479_v27 = vld [vmem:[#allocation2 + $0xc4] sm:$0xf] }
 0x6bd   : > { %v6966_v6 = vadd.f32 %v6896_v24, %v6313_v62  ;;  %v7296_v3 = vpop.f32.mrf.mxu2  ;;  %v7966_v18 = vrot.slane %v5669_v47, 9  ;;  %v6726_v42 = vshll.u32 %v6380_v8, 16 }
 0x6be   : > { %v6715_v2 = vor.u32 %v6714_v59, %v11463_v21  ;;  %v6723_v59 = vshrl.u32 %v6380_v8, 16  ;;  %v7213_v63 = vpack.c.b16 %v7195_v57, %v7194_v41 }
 0x6bf   : > { %v7363_v30 = vadd.f32 %v7293_v55, %v6966_v6  ;;  %v6701_v55 = vrot.slane %v6699_v7, 4  ;;  %v6718_v7 = vshll.u32 %v11457_v61, 16  ;;  %v6736_v61 = vshrl.u32 %v11479_v27, 16 }
 0x6c0   : > { %v6716_v49 = vrot.slane %v6715_v2, 4  ;;  %v6382_v2 = vld [vmem:[#allocation2 + $0xc8] sm:$0x1] }
 0x6c1   : > { %7395 = vst.msk [vmem:[%s11348_s20 + $0x38] sm:$0xff] %vm435_vm1, %v7363_v30  ;;  %v7433_v53 = vsel %vm435_vm1, %v7363_v30, 0.0  ;;  %v7498_v24 = vmul.f32 %v7363_v30, %v7363_v30  ;;  %v6899_v60 = vpop.f32.mrf.mxu1  ;;  %7981 = vmatmul.msk.bf16.gmra.mxu3 %vm437_vm2, %v5877_v1  ;;  %v6705_v52 = vor.u32 %v6704_v31, %v6701_v55  ;;  %v8390_v30 = vld [vmem:[#allocation2 + $0xbc] sm:$0x1] }
 0x6c2   : > { %v7434_v39 = vadd.f32 %v7433_v53, %v7432_v28  ;;  %v6246_v38 = vpop.f32.mrf.mxu0  ;;  %v5821_v28 = vrot.slane %v5819_v11, 4  ;;  %v5822_v1 = vrot.slane %v8390_v30, 5  ;;  %v6732_v53 = vshll.u32 %v11479_v27, 16 }
 0x6c3   : > { %v7536_v16 = vsel %vm435_vm1, %v7498_v24, 0.0  ;;  %v6314_v62 = vadd.f32 %v6246_v38, %v6028_v0  ;;  %v7155_v0 = vrot.slane %v11479_v27, 5  ;;  %v6029_v24 = vadd.f32 %v5962_v13, %v11067_v14 }
 0x6c4   : > { %v7537_v6 = vadd.f32 %v7536_v16, %v7535_v56  ;;  %8076 = vmatmul.msk.bf16.gmra.mxu1 %vm437_vm2, %v6815_v20  ;;  %v5965_v50 = vpop.f32.mrf.mxu3  ;;  %v5823_v43 = vsel %vm10792_vm10, %v5821_v28, %v5822_v1  ;;  %v6720_v38 = vrot.slane %v6718_v7, 5  ;;  %v6706_v31 = vrot.slane %v6705_v52, 4  ;;  %v7005_v52 = vld [vmem:[#allocation2 + $0xc0] sm:$0xe] }
 0x6c5   : > { %v6967_v19 = vadd.f32 %v6899_v60, %v6314_v62  ;;  %8060 = vmatmul.msk.bf16.gmra.mxu0 %vm437_vm2, %v8163_v23  ;;  %v7298_v40 = vpop.f32.mrf.mxu2  ;;  %v5820_v16 = vsel %vm10792_vm10, %v7966_v18, %v5819_v11  ;;  %v6725_v62 = vrot.slane %v6723_v59, 4  ;;  %v5861_v13 = vunpack.c.l.b16 %v5823_v43 }
 0x6c6   : > { %v6721_v14 = vsel %vm10443_vm3, %v6716_v49, %v6720_v38  ;;  %v11498_v28 = vrot.slane %v6732_v53, 5  ;;  %v6711_v11 = vsel %vm10443_vm3, %v6706_v31, %v11463_v21  ;;  %v5860_v27 = vunpack.c.l.b16 %v5820_v16 }
 0x6c7   : > { %v7364_v56 = vadd.f32 %v7296_v3, %v6967_v19  ;;  %v6738_v19 = vrot.slane %v6736_v61, 4  ;;  %v6728_v18 = vrot.slane %v6726_v42, 5  ;;  %v6798_v30 = vunpack.c.l.b16 %v6721_v14 }
 0x6c8   : > { %v7158_v1 = vrot.slane %v6382_v2, 5  ;;  %v6797_v49 = vunpack.c.l.b16 %v6711_v11  ;;  %v8094_v43 = vrot.slane %v7005_v52, 9  ;;  %v6030_v21 = vadd.f32 %v5965_v50, %v11077_v44  ;;  %v8164_v50 = vld [vmem:[#allocation2 + $0xb4] sm:$0xff] }
 0x6c9   : > { %7396 = vst.msk [vmem:[%s11348_s20 + $0x40] sm:$0xff] %vm435_vm1, %v7364_v56  ;;  %v7435_v60 = vsel %vm435_vm1, %v7364_v56, 0.0  ;;  %v7499_v55 = vmul.f32 %v7364_v56, %v7364_v56  ;;  %v6901_v3 = vpop.f32.mrf.mxu1  ;;  %v8391_v56 = vld [vmem:[#allocation2 + $0xc4] sm:$0xf]  ;;  %v6739_v61 = vor.u32 %v6738_v19, %v11498_v28  ;;  %v6742_v16 = vshll.u32 %v6382_v2, 16 }
 0x6ca   : > { %v7436_v20 = vadd.f32 %v7435_v60, %v7434_v39  ;;  %v6248_v58 = vpop.f32.mrf.mxu0  ;;  %8109 = vmatmul.msk.bf16.gmra.mxu2 %vm437_vm2, %v7213_v63  ;;  %v7157_v39 = vrot.slane %v7155_v0, 4  ;;  %v5826_v63 = vrot.slane %v8391_v56, 5  ;;  %v7156_v31 = vsel %vm10792_vm10, %v8094_v43, %v7155_v0  ;;  %v8392_v0 = vld [vmem:[#allocation2 + $0xc8] sm:$0x1] }
 0x6cb   : > { %v7538_v23 = vsel %vm435_vm1, %v7499_v55, 0.0  ;;  %v6315_v57 = vadd.f32 %v6248_v58, %v6029_v24  ;;  %v5670_v55 = vld [vmem:[#allocation2 + $0xc0] sm:$0xe]  ;;  %v6816_v58 = vpack.c.b16 %v6798_v30, %v6797_v49  ;;  %v6740_v19 = vrot.slane %v6739_v61, 4  ;;  %v6384_v30 = vld [vmem:[#allocation2 + $0xd0] sm:$0xf] }
 0x6cc   : > { %v7539_v47 = vadd.f32 %v7538_v23, %v7537_v6  ;;  %v11496_v8 = vpop.f32.mrf.mxu3  ;;  %v5878_v6 = vpack.c.b16 %v5861_v13, %v5860_v27  ;;  %v7159_v53 = vsel %vm10792_vm10, %v7157_v39, %v7158_v1  ;;  %v5828_v14 = vrot.slane %v5826_v63, 4  ;;  %v2359_v1 = vld [vmem:[#allocation2 + $0xcc] sm:$0x1] }
 0x6cd   : > { %v6968_v41 = vadd.f32 %v6901_v3, %v6315_v57  ;;  %v7301_v7 = vpop.f32.mrf.mxu2  ;;  %v7197_v57 = vunpack.c.l.b16 %v7159_v53  ;;  %v7196_v27 = vunpack.c.l.b16 %v7156_v31  ;;  %v5829_v2 = vrot.slane %v8392_v0, 5 }
 0x6ce   : > { %v2360_v56 = vsel %vm9909_vm7, 0, %v2359_v1 }
 0x6cf   : > { %v7365_v59 = vadd.f32 %v7298_v40, %v6968_v41  ;;  %v6729_v40 = vor.u32 %v6728_v18, %v6725_v62  ;;  %v7967_v62 = vrot.slane %v5670_v55, 9  ;;  %v2415_v41 = vld [vmem:[#allocation2 + $0xd4] sm:$0x1]  ;;  %v7214_v43 = vpack.c.b16 %v7197_v57, %v7196_v27  ;;  %2361 = vst [vmem:[#allocation2 + $0xcc] sm:$0x1] %v2360_v56 }
 0x6d0   : > { %v2416_v18 = vsel %vm10194_vm0, 0, %v2415_v41  ;;  %v5830_v61 = vsel %vm10792_vm10, %v5828_v14, %v5829_v2  ;;  %v6031_v55 = vadd.f32 %v11496_v8, %v11085_v34 }
 0x6d1   : > { %7397 = vst.msk [vmem:[%s11348_s20 + $0x48] sm:$0xff] %vm435_vm1, %v7365_v59  ;;  %v7437_v24 = vsel %vm435_vm1, %v7365_v59, 0.0  ;;  %v7500_v42 = vmul.f32 %v7365_v59, %v7365_v59  ;;  %v6904_v60 = vpop.f32.mrf.mxu1  ;;  %7982 = vmatmul.msk.bf16.gmra.mxu3 %vm437_vm2, %v5878_v6  ;;  %v6744_v59 = vrot.slane %v6742_v16, 5  ;;  %v5827_v53 = vsel %vm10792_vm10, %v7967_v62, %v5826_v63 }
 0x6d2   : > { %v7438_v3 = vadd.f32 %v7437_v24, %v7436_v20  ;;  %v6251_v38 = vpop.f32.mrf.mxu0  ;;  %2417 = vst [vmem:[#allocation2 + $0xd4] sm:$0x1] %v2416_v18  ;;  %v7006_v24 = vld [vmem:[#allocation2 + $0xcc] sm:$0xe] }
 0x6d3   : > { %v7540_v23 = vsel %vm435_vm1, %v7500_v42, 0.0  ;;  %v6316_v44 = vadd.f32 %v6251_v38, %v6030_v21  ;;  %v6745_v21 = vsel %vm10443_vm3, %v6740_v19, %v6744_v59  ;;  %v7162_v42 = vrot.slane %v6384_v30, 5 }
 0x6d4   : > { %v7541_v13 = vadd.f32 %v7540_v23, %v7539_v47  ;;  %8077 = vmatmul.msk.bf16.gmra.mxu1 %vm437_vm2, %v6816_v58  ;;  %v5970_v39 = vpop.f32.mrf.mxu3  ;;  %v6730_v47 = vrot.slane %v6729_v40, 4  ;;  %v6760_v40 = vshrl.u32 %v6384_v30, 16  ;;  %v5862_v23 = vunpack.c.l.b16 %v5827_v53 }
 0x6d5   : > { %v6969_v20 = vadd.f32 %v6904_v60, %v6316_v44  ;;  %8061 = vmatmul.msk.bf16.gmra.mxu0 %vm437_vm2, %v8164_v50  ;;  %v7303_v11 = vpop.f32.mrf.mxu2  ;;  %v6756_v60 = vshll.u32 %v6384_v30, 16  ;;  %v5863_v44 = vunpack.c.l.b16 %v5830_v61  ;;  %v6800_v34 = vunpack.c.l.b16 %v6745_v21 }
 0x6d6   : > { %v6735_v16 = vsel %vm10443_vm3, %v6730_v47, %v11498_v28  ;;  %v8095_v8 = vrot.slane %v7006_v24, 9  ;;  %v7164_v62 = vrot.slane %v7162_v42, 4  ;;  %v6383_v28 = vld [vmem:[#allocation2 + $0xcc] sm:$0xf] }
 0x6d7   : > { %v7366_v49 = vadd.f32 %v7301_v7, %v6969_v20  ;;  %v6758_v41 = vrot.slane %v6756_v60, 5  ;;  %v6762_v20 = vrot.slane %v6760_v40, 4  ;;  %v6799_v2 = vunpack.c.l.b16 %v6735_v16 }
 0x6d8   : > { %v5879_v52 = vpack.c.b16 %v5863_v44, %v5862_v23  ;;  %v7163_v1 = vsel %vm10792_vm10, %v8095_v8, %v7162_v42  ;;  %v6747_v47 = vshrl.u32 %v6383_v28, 16  ;;  %v6750_v59 = vshll.u32 %v6383_v28, 16 }
 0x6d9   : > { %7398 = vst.msk [vmem:[%s11348_s20 + $0x50] sm:$0xff] %vm435_vm1, %v7366_v49  ;;  %v7439_v7 = vsel %vm435_vm1, %v7366_v49, 0.0  ;;  %v7501_v38 = vmul.f32 %v7366_v49, %v7366_v49  ;;  %v6906_v63 = vpop.f32.mrf.mxu1  ;;  %v6385_v0 = vld [vmem:[#allocation2 + $0xd4] sm:$0x1]  ;;  %v6817_v6 = vpack.c.b16 %v6800_v34, %v6799_v2  ;;  %v6763_v49 = vor.u32 %v6762_v20, %v6758_v41 }
 0x6da   : > { %v7440_v58 = vadd.f32 %v7439_v7, %v7438_v3  ;;  %v6253_v31 = vpop.f32.mrf.mxu0  ;;  %8110 = vmatmul.msk.bf16.gmra.mxu2 %vm437_vm2, %v7214_v43  ;;  %v7165_v18 = vrot.slane %v6385_v0, 5  ;;  %v6766_v21 = vshll.u32 %v6385_v0, 16  ;;  %v7198_v60 = vunpack.c.l.b16 %v7163_v1 }
 0x6db   : > { %v7542_v50 = vsel %vm435_vm1, %v7501_v38, 0.0  ;;  %v6317_v57 = vadd.f32 %v6253_v31, %v6031_v55  ;;  %v8165_v55 = vld [vmem:[#allocation2 + $0xc0] sm:$0xff]  ;;  %v6764_v23 = vrot.slane %v6763_v49, 4  ;;  %v8166_v49 = vld [vmem:[#allocation2 + $0xcc] sm:$0xff] }
 0x6dc   : > { %v7543_v14 = vadd.f32 %v7542_v50, %v7541_v13  ;;  %v5972_v19 = vpop.f32.mrf.mxu3  ;;  %v6032_v13 = vadd.f32 %v5970_v39, %v11095_v35  ;;  %v7166_v56 = vsel %vm10792_vm10, %v7164_v62, %v7165_v18  ;;  %v6752_v35 = vrot.slane %v6750_v59, 5 }
 0x6dd   : > { %v6970_v3 = vadd.f32 %v6906_v63, %v6317_v57  ;;  %v7306_v27 = vpop.f32.mrf.mxu2  ;;  %v7199_v40 = vunpack.c.l.b16 %v7166_v56  ;;  %v6033_v34 = vadd.f32 %v5972_v19, %v11103_v29 }
 0x6df   : > { %v7367_v30 = vadd.f32 %v7303_v11, %v6970_v3  ;;  %v6749_v11 = vrot.slane %v6747_v47, 4  ;;  %v7215_v44 = vpack.c.b16 %v7199_v40, %v7198_v60 }
 0x6e1   : > { %7399 = vst.msk [vmem:[%s11348_s20 + $0x58] sm:$0xff] %vm435_vm1, %v7367_v30  ;;  %v7441_v43 = vsel %vm435_vm1, %v7367_v30, 0.0  ;;  %v7502_v53 = vmul.f32 %v7367_v30, %v7367_v30  ;;  %v6909_v61 = vpop.f32.mrf.mxu1  ;;  %7983 = vmatmul.msk.bf16.gmra.mxu3 %vm437_vm2, %v5879_v52  ;;  %v6753_v63 = vor.u32 %v6752_v35, %v6749_v11 }
 0x6e2   : > { %v7442_v24 = vadd.f32 %v7441_v43, %v7440_v58  ;;  %v6256_v42 = vpop.f32.mrf.mxu0  ;;  %v6768_v58 = vrot.slane %v6766_v21, 5 }
 0x6e3   : > { %v7544_v39 = vsel %vm435_vm1, %v7502_v53, 0.0  ;;  %v6318_v32 = vadd.f32 %v6256_v42, %v6032_v13  ;;  %v6754_v50 = vrot.slane %v6753_v63, 4 }
 0x6e4   : > { %v7545_v7 = vadd.f32 %v7544_v39, %v7543_v14  ;;  %8078 = vmatmul.msk.bf16.gmra.mxu1 %vm437_vm2, %v6817_v6  ;;  %v5975_v38 = vpop.f32.mrf.mxu3  ;;  %v6769_v3 = vsel %vm10443_vm3, %v6764_v23, %v6768_v58 }
 0x6e5   : > { %v6971_v31 = vadd.f32 %v6909_v61, %v6318_v32  ;;  %8062 = vmatmul.msk.bf16.gmra.mxu0 %vm437_vm2, %v8165_v55  ;;  %v7308_v16 = vpop.f32.mrf.mxu2  ;;  %v6759_v20 = vsel %vm10443_vm3, %v6754_v50, %v6758_v41  ;;  %v6802_v28 = vunpack.c.l.b16 %v6769_v3  ;;  %v11740_v41 = vld [vmem:[#allocation8_spill] sm:$0xff] }
 0x6e6   : > { %v6801_v18 = vunpack.c.l.b16 %v6759_v20  ;;  %v6034_v13 = vadd.f32 %v5975_v38, %v11740_v41 }
 0x6e7   : > { %v7368_v57 = vadd.f32 %v7306_v27, %v6971_v31 }
 0x6e8   : > { %v6818_v59 = vpack.c.b16 %v6802_v28, %v6801_v18 }
 0x6e9   : > { %7400 = vst.msk [vmem:[%s11348_s20 + $0x60] sm:$0xff] %vm435_vm1, %v7368_v57  ;;  %v7443_v8 = vsel %vm435_vm1, %v7368_v57, 0.0  ;;  %v7503_v14 = vmul.f32 %v7368_v57, %v7368_v57  ;;  %v6911_v62 = vpop.f32.mrf.mxu1 }
 0x6ea   : > { %v7444_v0 = vadd.f32 %v7443_v8, %v7442_v24  ;;  %v6258_v2 = vpop.f32.mrf.mxu0  ;;  %8111 = vmatmul.msk.bf16.gmra.mxu2 %vm437_vm2, %v7215_v44 }
 0x6eb   : > { %v7546_v27 = vsel %vm435_vm1, %v7503_v14, 0.0  ;;  %v6319_v29 = vadd.f32 %v6258_v2, %v6033_v34 }
 0x6ec   : > { %v7547_v19 = vadd.f32 %v7546_v27, %v7545_v7  ;;  %v5977_v52 = vpop.f32.mrf.mxu3 }
 0x6ed   : > { %v6972_v30 = vadd.f32 %v6911_v62, %v6319_v29  ;;  %v7311_v1 = vpop.f32.mrf.mxu2  ;;  %v6035_v35 = vadd.f32 %v5977_v52, %v11130_v25 }
 0x6ef   : > { %v7369_v47 = vadd.f32 %v7308_v16, %v6972_v30 }
 0x6f1   : > { %7401 = vst.msk [vmem:[%s11348_s20 + $0x68] sm:$0xff] %vm435_vm1, %v7369_v47  ;;  %v7445_v33 = vsel %vm435_vm1, %v7369_v47, 0.0  ;;  %v7504_v6 = vmul.f32 %v7369_v47, %v7369_v47  ;;  %v6914_v56 = vpop.f32.mrf.mxu1 }
 0x6f2   : > { %v7446_v43 = vadd.f32 %v7445_v33, %v7444_v0  ;;  %v6261_v53 = vpop.f32.mrf.mxu0 }
 0x6f3   : > { %v7548_v61 = vsel %vm435_vm1, %v7504_v6, 0.0  ;;  %v6320_v11 = vadd.f32 %v6261_v53, %v6034_v13 }
 0x6f4   : > { %v7549_v21 = vadd.f32 %v7548_v61, %v7547_v19  ;;  %8079 = vmatmul.msk.bf16.gmra.mxu1 %vm437_vm2, %v6818_v59  ;;  %v5980_v24 = vpop.f32.mrf.mxu3 }
 0x6f5   : > { %v6973_v42 = vadd.f32 %v6914_v56, %v6320_v11  ;;  %8063 = vmatmul.msk.bf16.gmra.mxu0 %vm437_vm2, %v8166_v49  ;;  %v7313_v60 = vpop.f32.mrf.mxu2  ;;  %v6036_v57 = vadd.f32 %v5980_v24, %v11140_v15 }
 0x6f7   : > { %v7370_v40 = vadd.f32 %v7311_v1, %v6973_v42 }
 0x6f9   : > { %7402 = vst.msk [vmem:[%s11348_s20 + $0x70] sm:$0xff] %vm435_vm1, %v7370_v40  ;;  %v7447_v39 = vsel %vm435_vm1, %v7370_v40, 0.0  ;;  %v7505_v32 = vmul.f32 %v7370_v40, %v7370_v40  ;;  %v6916_v55 = vpop.f32.mrf.mxu1 }
 0x6fa   : > { %v7448_v7 = vadd.f32 %v7447_v39, %v7446_v43  ;;  %v6263_v38 = vpop.f32.mrf.mxu0 }
 0x6fb   : > { %v7550_v63 = vsel %vm435_vm1, %v7505_v32, 0.0  ;;  %v6321_v31 = vadd.f32 %v6263_v38, %v6035_v35 }
 0x6fc   : > { %v7551_v16 = vadd.f32 %v7550_v63, %v7549_v21  ;;  %v5982_v23 = vpop.f32.mrf.mxu3 }
 0x6fd   : > { %v6974_v58 = vadd.f32 %v6916_v55, %v6321_v31  ;;  %v7316_v44 = vpop.f32.mrf.mxu2  ;;  %v6037_v52 = vadd.f32 %v5982_v23, %v11152_v37 }
 0x6ff   : > { %v7371_v50 = vadd.f32 %v7313_v60, %v6974_v58 }
 0x701   : > { %7403 = vst.msk [vmem:[%s11348_s20 + $0x78] sm:$0xff] %vm435_vm1, %v7371_v50  ;;  %v7449_v25 = vsel %vm435_vm1, %v7371_v50, 0.0  ;;  %v7506_v34 = vmul.f32 %v7371_v50, %v7371_v50  ;;  %v6919_v8 = vpop.f32.mrf.mxu1 }
 0x702   : > { %v7450_v14 = vadd.f32 %v7449_v25, %v7448_v7  ;;  %v6266_v62 = vpop.f32.mrf.mxu0 }
 0x703   : > { %v7552_v20 = vsel %vm435_vm1, %v7506_v34, 0.0  ;;  %v6322_v3 = vadd.f32 %v6266_v62, %v6036_v57 }
 0x704   : > { %v7553_v0 = vadd.f32 %v7552_v20, %v7551_v16  ;;  %v5985_v2 = vpop.f32.mrf.mxu3 }
 0x705   : > { %v6975_v27 = vadd.f32 %v6919_v8, %v6322_v3  ;;  %v7318_v29 = vpop.f32.mrf.mxu2  ;;  %v6038_v49 = vadd.f32 %v5985_v2, %v11162_v51 }
 0x707   : > { %v7372_v19 = vadd.f32 %v7316_v44, %v6975_v27 }
 0x709   : > { %7404 = vst.msk [vmem:[%s11348_s20 + $0x80] sm:$0xff] %vm435_vm1, %v7372_v19  ;;  %v7451_v15 = vsel %vm435_vm1, %v7372_v19, 0.0  ;;  %v7507_v18 = vmul.f32 %v7372_v19, %v7372_v19  ;;  %v6921_v28 = vpop.f32.mrf.mxu1 }
 0x70a   : > { %v7452_v30 = vadd.f32 %v7451_v15, %v7450_v14  ;;  %v6268_v1 = vpop.f32.mrf.mxu0 }
 0x70b   : > { %v7554_v47 = vsel %vm435_vm1, %v7507_v18, 0.0  ;;  %v6323_v59 = vadd.f32 %v6268_v1, %v6037_v52 }
 0x70c   : > { %v7555_v41 = vadd.f32 %v7554_v47, %v7553_v0  ;;  %v5987_v13 = vpop.f32.mrf.mxu3 }
 0x70d   : > { %v6976_v33 = vadd.f32 %v6921_v28, %v6323_v59  ;;  %v7321_v6 = vpop.f32.mrf.mxu2  ;;  %v6039_v32 = vadd.f32 %v5987_v13, %v11174_v36 }
 0x70f   : > { %v7373_v56 = vadd.f32 %v7318_v29, %v6976_v33 }
 0x711   : > { %7405 = vst.msk [vmem:[%s11348_s20 + $0x88] sm:$0xff] %vm435_vm1, %v7373_v56  ;;  %v7453_v37 = vsel %vm435_vm1, %v7373_v56, 0.0  ;;  %v7508_v43 = vmul.f32 %v7373_v56, %v7373_v56  ;;  %v6924_v53 = vpop.f32.mrf.mxu1 }
 0x712   : > { %v7454_v61 = vadd.f32 %v7453_v37, %v7452_v30  ;;  %v6271_v11 = vpop.f32.mrf.mxu0 }
 0x713   : > { %v7556_v21 = vsel %vm435_vm1, %v7508_v43, 0.0  ;;  %v6324_v24 = vadd.f32 %v6271_v11, %v6038_v49 }
 0x714   : > { %v7557_v42 = vadd.f32 %v7556_v21, %v7555_v41  ;;  %v5990_v60 = vpop.f32.mrf.mxu3 }
 0x715   : > { %v6977_v40 = vadd.f32 %v6924_v53, %v6324_v24  ;;  %v7323_v35 = vpop.f32.mrf.mxu2  ;;  %v6040_v25 = vadd.f32 %v5990_v60, %v11187_v5 }
 0x717   : > { %v7374_v39 = vadd.f32 %v7321_v6, %v6977_v40 }
 0x719   : > { %7406 = vst.msk [vmem:[%s11348_s20 + $0x90] sm:$0xff] %vm435_vm1, %v7374_v39  ;;  %v7455_v51 = vsel %vm435_vm1, %v7374_v39, 0.0  ;;  %v7509_v55 = vmul.f32 %v7374_v39, %v7374_v39  ;;  %v6926_v7 = vpop.f32.mrf.mxu1 }
 0x71a   : > { %v7456_v38 = vadd.f32 %v7455_v51, %v7454_v61  ;;  %v6273_v63 = vpop.f32.mrf.mxu0 }
 0x71b   : > { %v7558_v31 = vsel %vm435_vm1, %v7509_v55, 0.0  ;;  %v6325_v16 = vadd.f32 %v6273_v63, %v6039_v32 }
 0x71c   : > { %v7559_v23 = vadd.f32 %v7558_v31, %v7557_v42  ;;  %v5992_v58 = vpop.f32.mrf.mxu3 }
 0x71d   : > { %v6978_v44 = vadd.f32 %v6926_v7, %v6325_v16  ;;  %v7326_v50 = vpop.f32.mrf.mxu2  ;;  %v6041_v52 = vadd.f32 %v5992_v58, %v11202_v4 }
 0x71f   : > { %v7375_v57 = vadd.f32 %v7323_v35, %v6978_v44 }
 0x721   : > { %7407 = vst.msk [vmem:[%s11348_s20 + $0x98] sm:$0xff] %vm435_vm1, %v7375_v57  ;;  %v7457_v36 = vsel %vm435_vm1, %v7375_v57, 0.0  ;;  %v7510_v34 = vmul.f32 %v7375_v57, %v7375_v57  ;;  %v6929_v8 = vpop.f32.mrf.mxu1 }
 0x722   : > { %v7458_v14 = vadd.f32 %v7457_v36, %v7456_v38  ;;  %v6276_v62 = vpop.f32.mrf.mxu0 }
 0x723   : > { %v7560_v20 = vsel %vm435_vm1, %v7510_v34, 0.0  ;;  %v6326_v3 = vadd.f32 %v6276_v62, %v6040_v25 }
 0x724   : > { %v7561_v0 = vadd.f32 %v7560_v20, %v7559_v23  ;;  %v5995_v2 = vpop.f32.mrf.mxu3 }
 0x725   : > { %v6979_v27 = vadd.f32 %v6929_v8, %v6326_v3  ;;  %v7328_v29 = vpop.f32.mrf.mxu2  ;;  %v6042_v56 = vadd.f32 %v5995_v2, %v11213_v46 }
 0x727   : > { %v7376_v19 = vadd.f32 %v7326_v50, %v6979_v27 }
 0x729   : > { %7408 = vst.msk [vmem:[%s11348_s20 + $0xa0] sm:$0xff] %vm435_vm1, %v7376_v19  ;;  %v7459_v5 = vsel %vm435_vm1, %v7376_v19, 0.0  ;;  %v7511_v15 = vmul.f32 %v7376_v19, %v7376_v19  ;;  %v6931_v18 = vpop.f32.mrf.mxu1 }
 0x72a   : > { %v7460_v28 = vadd.f32 %v7459_v5, %v7458_v14  ;;  %v6278_v30 = vpop.f32.mrf.mxu0 }
 0x72b   : > { %v7562_v1 = vsel %vm435_vm1, %v7511_v15, 0.0  ;;  %v6327_v47 = vadd.f32 %v6278_v30, %v6041_v52 }
 0x72c   : > { %v7563_v59 = vadd.f32 %v7562_v1, %v7561_v0  ;;  %v5997_v41 = vpop.f32.mrf.mxu3 }
 0x72d   : > { %v6980_v13 = vadd.f32 %v6931_v18, %v6327_v47  ;;  %v7331_v33 = vpop.f32.mrf.mxu2  ;;  %v6043_v35 = vadd.f32 %v5997_v41, %v11226_v48 }
 0x72f   : > { %v7377_v6 = vadd.f32 %v7328_v29, %v6980_v13 }
 0x731   : > { %7409 = vst.msk [vmem:[%s11348_s20 + $0xa8] sm:$0xff] %vm435_vm1, %v7377_v6  ;;  %v7461_v4 = vsel %vm435_vm1, %v7377_v6, 0.0  ;;  %v7512_v49 = vmul.f32 %v7377_v6, %v7377_v6  ;;  %v6934_v37 = vpop.f32.mrf.mxu1 }
 0x732   : > { %v7462_v43 = vadd.f32 %v7461_v4, %v7460_v28  ;;  %v6281_v53 = vpop.f32.mrf.mxu0 }
 0x733   : > { %v7564_v61 = vsel %vm435_vm1, %v7512_v49, 0.0  ;;  %v6328_v11 = vadd.f32 %v6281_v53, %v6042_v56 }
 0x734   : > { %v7565_v21 = vadd.f32 %v7564_v61, %v7563_v59  ;;  %v6000_v24 = vpop.f32.mrf.mxu3 }
 0x735   : > { %v6981_v42 = vadd.f32 %v6934_v37, %v6328_v11  ;;  %v7333_v60 = vpop.f32.mrf.mxu2  ;;  %v6044_v44 = vadd.f32 %v6000_v24, %v11239_v45 }
 0x737   : > { %v7378_v40 = vadd.f32 %v7331_v33, %v6981_v42 }
 0x739   : > { %7410 = vst.msk [vmem:[%s11348_s20 + $0xb0] sm:$0xff] %vm435_vm1, %v7378_v40  ;;  %v7463_v46 = vsel %vm435_vm1, %v7378_v40, 0.0  ;;  %v7513_v39 = vmul.f32 %v7378_v40, %v7378_v40  ;;  %v6936_v32 = vpop.f32.mrf.mxu1 }
 0x73a   : > { %v7464_v51 = vadd.f32 %v7463_v46, %v7462_v43  ;;  %v6283_v55 = vpop.f32.mrf.mxu0 }
 0x73b   : > { %v7566_v7 = vsel %vm435_vm1, %v7513_v39, 0.0  ;;  %v6329_v38 = vadd.f32 %v6283_v55, %v6043_v35 }
 0x73c   : > { %v7567_v63 = vadd.f32 %v7566_v7, %v7565_v21  ;;  %v6002_v31 = vpop.f32.mrf.mxu3 }
 0x73d   : > { %v6982_v16 = vadd.f32 %v6936_v32, %v6329_v38  ;;  %v7336_v23 = vpop.f32.mrf.mxu2  ;;  %v6045_v2 = vadd.f32 %v6002_v31, %v11252_v17 }
 0x73f   : > { %v7379_v58 = vadd.f32 %v7333_v60, %v6982_v16 }
 0x741   : > { %7411 = vst.msk [vmem:[%s11348_s20 + $0xb8] sm:$0xff] %vm435_vm1, %v7379_v58  ;;  %v7465_v48 = vsel %vm435_vm1, %v7379_v58, 0.0  ;;  %v7514_v50 = vmul.f32 %v7379_v58, %v7379_v58  ;;  %v6939_v57 = vpop.f32.mrf.mxu1 }
 0x742   : > { %v7466_v25 = vadd.f32 %v7465_v48, %v7464_v51  ;;  %v6286_v36 = vpop.f32.mrf.mxu0 }
 0x743   : > { %v7568_v34 = vsel %vm435_vm1, %v7514_v50, 0.0  ;;  %v6330_v8 = vadd.f32 %v6286_v36, %v6044_v44 }
 0x744   : > { %v7569_v14 = vadd.f32 %v7568_v34, %v7567_v63  ;;  %v6005_v62 = vpop.f32.mrf.mxu3 }
 0x745   : > { %v6983_v20 = vadd.f32 %v6939_v57, %v6330_v8  ;;  %v7338_v3 = vpop.f32.mrf.mxu2  ;;  %v6046_v59 = vadd.f32 %v6005_v62, %v11265_v22 }
 0x747   : > { %v7380_v0 = vadd.f32 %v7336_v23, %v6983_v20 }
 0x749   : > { %7412 = vst.msk [vmem:[%s11348_s20 + $0xc0] sm:$0xff] %vm435_vm1, %v7380_v0  ;;  %v7467_v45 = vsel %vm435_vm1, %v7380_v0, 0.0  ;;  %v7515_v27 = vmul.f32 %v7380_v0, %v7380_v0  ;;  %v6941_v29 = vpop.f32.mrf.mxu1 }
 0x74a   : > { %v7468_v19 = vadd.f32 %v7467_v45, %v7466_v25  ;;  %v6288_v52 = vpop.f32.mrf.mxu0 }
 0x74b   : > { %v7570_v5 = vsel %vm435_vm1, %v7515_v27, 0.0  ;;  %v6331_v15 = vadd.f32 %v6288_v52, %v6045_v2 }
 0x74c   : > { %v7571_v18 = vadd.f32 %v7570_v5, %v7569_v14  ;;  %v6007_v1 = vpop.f32.mrf.mxu3 }
 0x74d   : > { %v6984_v28 = vadd.f32 %v6941_v29, %v6331_v15  ;;  %v7341_v30 = vpop.f32.mrf.mxu2  ;;  %v6047_v11 = vadd.f32 %v6007_v1, %v11278_v12 }
 0x74f   : > { %v7381_v47 = vadd.f32 %v7338_v3, %v6984_v28 }
 0x751   : > { %7413 = vst.msk [vmem:[%s11348_s20 + $0xc8] sm:$0xff] %vm435_vm1, %v7381_v47  ;;  %v7469_v17 = vsel %vm435_vm1, %v7381_v47, 0.0  ;;  %v7516_v41 = vmul.f32 %v7381_v47, %v7381_v47  ;;  %v6944_v13 = vpop.f32.mrf.mxu1 }
 0x752   : > { %v7470_v33 = vadd.f32 %v7469_v17, %v7468_v19  ;;  %v6291_v6 = vpop.f32.mrf.mxu0 }
 0x753   : > { %v7572_v56 = vsel %vm435_vm1, %v7516_v41, 0.0  ;;  %v6332_v4 = vadd.f32 %v6291_v6, %v6046_v59 }
 0x754   : > { %v7573_v49 = vadd.f32 %v7572_v56, %v7571_v18  ;;  %v6010_v61 = vpop.f32.mrf.mxu3 }
 0x755   : > { %v6985_v37 = vadd.f32 %v6944_v13, %v6332_v4  ;;  %v7343_v43 = vpop.f32.mrf.mxu2  ;;  %v6048_v55 = vadd.f32 %v6010_v61, %v11291_v9 }
 0x757   : > { %v7382_v53 = vadd.f32 %v7341_v30, %v6985_v37 }
 0x759   : > { %7414 = vst.msk [vmem:[%s11348_s20 + $0xd0] sm:$0xff] %vm435_vm1, %v7382_v53  ;;  %v7471_v22 = vsel %vm435_vm1, %v7382_v53, 0.0  ;;  %v7517_v21 = vmul.f32 %v7382_v53, %v7382_v53  ;;  %v6946_v24 = vpop.f32.mrf.mxu1 }
 0x75a   : > { %v7472_v42 = vadd.f32 %v7471_v22, %v7470_v33  ;;  %v6293_v60 = vpop.f32.mrf.mxu0 }
 0x75b   : > { %v7574_v40 = vsel %vm435_vm1, %v7517_v21, 0.0  ;;  %v6333_v35 = vadd.f32 %v6293_v60, %v6047_v11 }
 0x75c   : > { %v7575_v46 = vadd.f32 %v7574_v40, %v7573_v49  ;;  %v6012_v16 = vpop.f32.mrf.mxu3 }
 0x75d   : > { %v6986_v39 = vadd.f32 %v6946_v24, %v6333_v35  ;;  %v7346_v51 = vpop.f32.mrf.mxu2  ;;  %v6049_v57 = vadd.f32 %v6012_v16, %v11304_v10 }
 0x75f   : > { %v7383_v32 = vadd.f32 %v7343_v43, %v6986_v39 }
 0x761   : > { %7415 = vst.msk [vmem:[%s11348_s20 + $0xd8] sm:$0xff] %vm435_vm1, %v7383_v32  ;;  %v7473_v12 = vsel %vm435_vm1, %v7383_v32, 0.0  ;;  %v7518_v7 = vmul.f32 %v7383_v32, %v7383_v32  ;;  %v6949_v38 = vpop.f32.mrf.mxu1 }
 0x762   : > { %v7474_v63 = vadd.f32 %v7473_v12, %v7472_v42  ;;  %v6296_v31 = vpop.f32.mrf.mxu0 }
 0x763   : > { %v7576_v23 = vsel %vm435_vm1, %v7518_v7, 0.0  ;;  %v6334_v58 = vadd.f32 %v6296_v31, %v6048_v55 }
 0x764   : > { %v7577_v44 = vadd.f32 %v7576_v23, %v7575_v46  ;;  %v6015_v0 = vpop.f32.mrf.mxu3 }
 0x765   : > { %v6987_v48 = vadd.f32 %v6949_v38, %v6334_v58  ;;  %v7348_v14 = vpop.f32.mrf.mxu2  ;;  %v6050_v27 = vadd.f32 %v6015_v0, %v11317_v26 }
 0x767   : > { %v7384_v50 = vadd.f32 %v7346_v51, %v6987_v48 }
 0x769   : > { %7416 = vst.msk [vmem:[%s11348_s20 + $0xe0] sm:$0xff] %vm435_vm1, %v7384_v50  ;;  %v7475_v9 = vsel %vm435_vm1, %v7384_v50, 0.0  ;;  %v7519_v25 = vmul.f32 %v7384_v50, %v7384_v50  ;;  %v6951_v36 = vpop.f32.mrf.mxu1 }
 0x76a   : > { %v7476_v34 = vadd.f32 %v7475_v9, %v7474_v63  ;;  %v6298_v8 = vpop.f32.mrf.mxu0 }
 0x76b   : > { %v7578_v62 = vsel %vm435_vm1, %v7519_v25, 0.0  ;;  %v6335_v20 = vadd.f32 %v6298_v8, %v6049_v57 }
 0x76c   : > { %v7579_v3 = vadd.f32 %v7578_v62, %v7577_v44  ;;  %v6017_v47 = vpop.f32.mrf.mxu3 }
 0x76d   : > { %v6988_v2 = vadd.f32 %v6951_v36, %v6335_v20  ;;  %v7351_v30 = vpop.f32.mrf.mxu2  ;;  %v6051_v17 = vadd.f32 %v6017_v47, %v11330_v54 }
 0x76f   : > { %v7385_v45 = vadd.f32 %v7348_v14, %v6988_v2 }
 0x771   : > { %7417 = vst.msk [vmem:[%s11348_s20 + $0xe8] sm:$0xff] %vm435_vm1, %v7385_v45  ;;  %v7477_v10 = vsel %vm435_vm1, %v7385_v45, 0.0  ;;  %v7520_v29 = vmul.f32 %v7385_v45, %v7385_v45  ;;  %v6954_v52 = vpop.f32.mrf.mxu1 }
 0x772   : > { %v7478_v19 = vadd.f32 %v7477_v10, %v7476_v34  ;;  %v6301_v5 = vpop.f32.mrf.mxu0 }
 0x773   : > { %v7580_v15 = vsel %vm435_vm1, %v7520_v29, 0.0  ;;  %v6336_v18 = vadd.f32 %v6301_v5, %v6050_v27 }
 0x774   : > { %v7581_v28 = vadd.f32 %v7580_v15, %v7579_v3 }
 0x775   : > { %v6989_v1 = vadd.f32 %v6954_v52, %v6336_v18  ;;  %v7353_v43 = vpop.f32.mrf.mxu2 }
 0x777   : > { %v7386_v59 = vadd.f32 %v7351_v30, %v6989_v1 }
 0x779   : > { %7418 = vst.msk [vmem:[%s11348_s20 + $0xf0] sm:$0xff] %vm435_vm1, %v7386_v59  ;;  %v7479_v26 = vsel %vm435_vm1, %v7386_v59, 0.0  ;;  %v7521_v41 = vmul.f32 %v7386_v59, %v7386_v59  ;;  %v6956_v49 = vpop.f32.mrf.mxu1 }
 0x77a   : > { %v7480_v13 = vadd.f32 %v7479_v26, %v7478_v19  ;;  %v6303_v33 = vpop.f32.mrf.mxu0 }
 0x77b   : > { %v7582_v6 = vsel %vm435_vm1, %v7521_v41, 0.0  ;;  %v6337_v56 = vadd.f32 %v6303_v33, %v6051_v17 }
 0x77c   : > { %v7583_v4 = vadd.f32 %v7582_v6, %v7581_v28 }
 0x77d   : > { %v6990_v37 = vadd.f32 %v6956_v49, %v6337_v56 }
 0x77f   : > { %v7387_v53 = vadd.f32 %v7353_v43, %v6990_v37 }
 0x781   : > { %7419 = vst.msk [vmem:[%s11348_s20 + $0xf8] sm:$0xff] %vm435_vm1, %v7387_v53  ;;  %v7481_v54 = vsel %vm435_vm1, %v7387_v53, 0.0  ;;  %v7522_v61 = vmul.f32 %v7387_v53, %v7387_v53 }
 0x782   : > { %v7482_v11 = vadd.f32 %v7481_v54, %v7480_v13 }
 0x783   : > { %v7584_v22 = vsel %vm435_vm1, %v7522_v61, 0.0 }
 0x784   : > { %v7483_v21 = vrot.slane %v7482_v11, 4  ;;  %v7585_v24 = vadd.f32 %v7584_v22, %v7583_v4 }
 0x786   : > { %v7484_v42 = vadd.f32 %v7483_v21, %v7482_v11  ;;  %v7586_v60 = vrot.slane %v7585_v24, 4 }
 0x788   : > { %v7485_v40 = vrot.slane %v7484_v42, 2  ;;  %v7587_v35 = vadd.f32 %v7586_v60, %v7585_v24 }
 0x78a   : > { %v7486_v46 = vadd.f32 %v7485_v40, %v7484_v42  ;;  %v7588_v39 = vrot.slane %v7587_v35, 2 }
 0x78c   : > { %v7487_v32 = vrot.slane %v7486_v46, 1  ;;  %v7589_v51 = vadd.f32 %v7588_v39, %v7587_v35 }
 0x78e   : > { %v7488_v55 = vadd.f32 %v7487_v32, %v7486_v46  ;;  %v7590_v12 = vrot.slane %v7589_v51, 1 }
 0x790   : > { %7490 = vst.msk [vmem:[%s267_s26] sm:$0x1] %vm2812_vm13, %v7488_v55  ;;  %v7591_v7 = vadd.f32 %v7590_v12, %v7589_v51 }
 0x792   : > { %7592 = vst.msk [vmem:[%s267_s26 + $0x1] sm:$0x1] %vm2812_vm13, %v7591_v7 }
 0x793   : > { %8420 = shalt.err (!%p8417_p3)
}
 0x794   : > { %8170 = dma.vmem_to_hbm [thread:$0]  (%p8563_p5), %s7615_s28, 32, %s7617_s29, %s7599_s25  }
 0x795 PF: > { %p8176_p4 = scmp.ge.s32.totalorder %s8455_s24, 2  ;;  %s7636_s9 = sand.u32 1, %s8443_s21  }
 0x796   : > { %s7637_s14 = scalar_lea.sflag [#allocation4], %s7636_s9 }
 0x797   : > { %p8173_p7 = pnand %p8176_p4, %p8567_p6 }
 0x799   : > { %p8174_p8 = pneg %p8173_p7 }
 0x79b   : > { %8438 = dma.done.wait (%p8174_p8), %s7637_s14, 32  }
 0x79c   : > { %8440 = vsyncadd (%p8174_p8), %s7637_s14, 4294967264  ;;  %p17_p9 = scmp.ge.s32.totalorder %s8550_s27, 4   ;;  %s11741_s21 = smov %s8447_s22 }
 0x79d   : > { %s11742_s22 = smov %s8451_s23  ;;  %s11743_s23 = smov %s8561_s30 }
 0x79e   : > { %s11744_s24 = smov %s8550_s27  ;;  %19 = sbr.rel (!%p17_p9) target bundleno = 3 (0x3), region = 93 }
 0x7a3   :  { %7643 = vsyncpa [#allocation4], 1 }
 0x7a4   :  { %7645 = vsyncpa [#allocation4 + $0x1], 1 }

</bundles_post_ra>
